<compile_context>
chip_gen: v6e
topology: v6e:2x2x1
jax: 0.10.0
libtpu: 0.0.40
codegen_flags: <defaults>
</compile_context>

<pallas_src>
import functools

import jax
import jax.numpy as jnp
from jax.experimental import pallas as pl
from jax.experimental.pallas import tpu as pltpu


def _round_up(a, m):
    return (a + m - 1) // m * m


def inception_aux_kernel(x_ref, cw_ref, w1_ref, b1_ref, w2_ref, b2_ref, o_ref,
                         *, inv_k):
    # x_ref: (16, K, B, C) bf16 -- 16 pooling cells, K window elems, B samples, C channels
    B = x_ref.shape[2]
    n_hidden = w1_ref.shape[2]                             # 1024

    cw = cw_ref[...]                                       # (C, 128) bf16

    # Fused pool -> 1x1 conv -> fc1 accumulation, one pooling cell at a time.
    h = jnp.zeros((B, n_hidden), jnp.float32)
    for p in range(16):                                    # static unroll, static slices
        # adaptive avg-pool cell p: sum window elems with f32 accumulation, scale 1/K.
        pooled = jnp.sum(x_ref[p].astype(jnp.float32), axis=0) * inv_k   # (B, C) f32
        # 1x1 conv (no bias) == channel matmul, bf16 operands, f32 accumulation.
        y = jnp.dot(pooled.astype(jnp.bfloat16), cw,
                    preferred_element_type=jnp.float32)    # (B, 128)
        y = jnp.maximum(y, 0.0).astype(jnp.bfloat16)       # ReLU in f32
        # fc1 contribution of this cell (torch flatten is channel-major: j = c*16 + p).
        h = h + jnp.dot(y, w1_ref[p], preferred_element_type=jnp.float32)  # (B, 1024)
    h = jnp.maximum(h + b1_ref[...], 0.0)                  # bias + ReLU in f32

    # dropout(p=0.7) is the identity at inference time (module in eval mode).
    # TODO(synk): training-mode dropout would need pltpu.prng_seed / prng_random_bits.

    out = jnp.dot(h.astype(jnp.bfloat16), w2_ref[...],
                  preferred_element_type=jnp.float32) + b2_ref[...]
    o_ref[...] = out.astype(o_ref.dtype)                   # (B, NCpad), lane-dense store


def prepare_inception_aux_params(conv_w, fc1_w, fc1_b, fc2_w, fc2_b):
    """One-time weight preprocessing (hoisted out of the per-forward path)."""
    C = conv_w.shape[1]
    # conv weight: torch (128, C, 1, 1) -> (C, 128).
    cw = conv_w.reshape(128, C).T.astype(jnp.bfloat16)
    # fc1 weight: torch (1024, 2048) with flat index j = c*16 + p (channel-major flatten).
    # Kernel contracts per-cell blocks: w1_r[p, c, o] = fc1_w[o, c*16 + p].
    w1_r = (fc1_w.T.reshape(128, 16, 1024)
                  .transpose(1, 0, 2)).astype(jnp.bfloat16)          # (16, 128, 1024)
    b1 = fc1_b.reshape(1, 1024).astype(jnp.float32)

    num_classes = fc2_w.shape[0]
    nc_pad = _round_up(num_classes, 128)                   # lane-dense output stores
    w2 = fc2_w.T                                           # (1024, num_classes)
    b2 = fc2_b.reshape(1, num_classes)
    if nc_pad != num_classes:
        w2 = jnp.pad(w2, ((0, 0), (0, nc_pad - num_classes)))
        b2 = jnp.pad(b2, ((0, 0), (0, nc_pad - num_classes)))
    return {
        "cw": cw,
        "w1": w1_r,
        "b1": b1,
        "w2": w2.astype(jnp.bfloat16),
        "b2": b2.astype(jnp.float32),
        "num_classes": num_classes,
        "nc_pad": nc_pad,
    }


def _vmem_budgets():
    """Per-generation (input-buffer budget, vmem_limit_bytes)."""
    try:
        vmem_cap = pltpu.get_tpu_info().vmem_capacity_bytes
    except Exception:
        vmem_cap = 64 << 20                                # conservative fallback (v7x-like)
    if vmem_cap >= (100 << 20):                            # v5e / v6e: 128 MiB VMEM
        return 24 << 20, 100 << 20
    return 8 << 20, 48 << 20                               # v7x: 64 MiB VMEM


def inception_aux(x, params, max_block_n=128):
    """x: (N, C, H, W) float32 with H % 4 == 0 and W % 4 == 0 (uniform adaptive pool)."""
    N, C, H, W = x.shape
    # TODO(synk): non-uniform adaptive_avg_pool2d windows (e.g. 14x14 -> 4x4) not supported.
    assert H % 4 == 0 and W % 4 == 0, "uniform adaptive pooling windows only"
    kh, kw = H // 4, W // 4
    K = kh * kw

    input_budget, vmem_limit = _vmem_budgets()

    # ---- choose batch tile B (multiple of 8) from the per-chip VMEM budget ----
    per_sample_bytes = 16 * K * _round_up(C, 128) * 2      # padded bf16 footprint / sample
    b_fit = max(8, (input_budget // per_sample_bytes) // 8 * 8)
    Nr = _round_up(N, 8)
    B = int(min(max_block_n, b_fit, Nr))
    B = max(8, (B // 8) * 8)
    # Ensure >= 2 grid steps when possible so the parallel axis can split across
    # v7x's two TensorCores (harmless on single-TC chips).
    if Nr >= 16:
        B = min(B, max(8, ((Nr // 2) // 8) * 8))
    Npad = _round_up(N, B)

    # ---- rearrange NCHW -> (16, K, N, C) with the bf16 cast fused in:
    #      p = ho*4+wo outer, window elems next, batch on sublanes, channels on lanes. ----
    # TODO(synk): ideally consume the producer's layout directly and skip this pre-pass.
    xw = (x.astype(jnp.bfloat16)
           .reshape(N, C, 4, kh, 4, kw)
           .transpose(2, 4, 3, 5, 0, 1)
           .reshape(16, K, N, C))
    if Npad != N:
        xw = jnp.pad(xw, ((0, 0), (0, 0), (0, Npad - N), (0, 0)))

    cw, w1, b1, w2, b2 = params["cw"], params["w1"], params["b1"], params["w2"], params["b2"]
    num_classes, NCpad = params["num_classes"], params["nc_pad"]

    flops = int(Npad * (16 * K * C                                  # pooling adds
                        + 2 * 16 * C * 128                          # 1x1 conv
                        + 2 * 2048 * 1024 + 2 * 1024 * NCpad))      # fc1 + fc2
    bytes_accessed = int(xw.size * 2 + cw.size * 2 + w1.size * 2 + w2.size * 2
                         + b1.size * 4 + b2.size * 4 + Npad * NCpad * 4)

    kernel = functools.partial(inception_aux_kernel, inv_k=1.0 / K)

    out = pl.pallas_call(
        kernel,
        out_shape=jax.ShapeDtypeStruct((Npad, NCpad), jnp.float32),
        grid_spec=pl.GridSpec(
            grid=(Npad // B,),
            in_specs=[
                pl.BlockSpec((16, K, B, C), lambda b: (0, 0, b, 0)),
                # Grid-invariant operands: single-buffered to reclaim VMEM.
                pl.BlockSpec((C, 128), lambda b: (0, 0),
                             pipeline_mode=pl.Buffered(1)),
                pl.BlockSpec((16, 128, 1024), lambda b: (0, 0, 0),
                             pipeline_mode=pl.Buffered(1)),
                pl.BlockSpec((1, 1024), lambda b: (0, 0),
                             pipeline_mode=pl.Buffered(1)),
                pl.BlockSpec((1024, NCpad), lambda b: (0, 0),
                             pipeline_mode=pl.Buffered(1)),
                pl.BlockSpec((1, NCpad), lambda b: (0, 0),
                             pipeline_mode=pl.Buffered(1)),
            ],
            out_specs=pl.BlockSpec((B, NCpad), lambda b: (b, 0)),
        ),
        compiler_params=pltpu.CompilerParams(
            dimension_semantics=("parallel",),
            vmem_limit_bytes=vmem_limit,
        ),
        cost_estimate=pl.CostEstimate(
            flops=flops, transcendentals=0, bytes_accessed=bytes_accessed),
    )(xw, cw, w1, b1, w2, b2)

    return out[:N, :num_classes]


def reference(x, conv_w, fc1_w, fc1_b, fc2_w, fc2_b):
    """Pure-JAX reference mirroring the PyTorch forward (NCHW)."""
    N, C, H, W = x.shape
    kh, kw = H // 4, W // 4
    pooled = x.reshape(N, C, 4, kh, 4, kw).mean(axis=(3, 5))          # (N, C, 4, 4)
    y = jnp.einsum('nchw,oc->nohw', pooled, conv_w.reshape(128, C))   # 1x1 conv
    y = jnp.maximum(y, 0.0)
    flat = y.reshape(N, 2048)                                         # channel-major
    h = jnp.maximum(flat @ fc1_w.T + fc1_b, 0.0)
    return h @ fc2_w.T + fc2_b


if __name__ == "__main__":
    N, C, H, W = 2, 8, 16, 16
    num_classes = 16

    key = jax.random.PRNGKey(0)
    kx, kc, k1, k1b, k2, k2b = jax.random.split(key, 6)

    x = jax.random.normal(kx, (N, C, H, W), dtype=jnp.float32)
    conv_w = 0.05 * jax.random.normal(kc, (128, C, 1, 1), dtype=jnp.float32)
    fc1_w = 0.02 * jax.random.normal(k1, (1024, 2048), dtype=jnp.float32)
    fc1_b = 0.01 * jax.random.normal(k1b, (1024,), dtype=jnp.float32)
    fc2_w = 0.02 * jax.random.normal(k2, (num_classes, 1024), dtype=jnp.float32)
    fc2_b = 0.01 * jax.random.normal(k2b, (num_classes,), dtype=jnp.float32)

    # Weight preprocessing is done once, outside the per-forward path.
    params = jax.tree_util.tree_map(
        jax.block_until_ready,
        prepare_inception_aux_params(conv_w, fc1_w, fc1_b, fc2_w, fc2_b),
        is_leaf=lambda v: isinstance(v, jax.Array))

    out = inception_aux(x, params)
    out = jax.block_until_ready(out)

    ref = reference(x, conv_w, fc1_w, fc1_b, fc2_w, fc2_b)
    assert out.shape == (N, num_classes)
    assert jnp.allclose(out, ref, rtol=5e-2, atol=1e-2), (
        f"max abs err {jnp.max(jnp.abs(out - ref))}")

    print("KERNEL_OK")
</pallas_src>

<mosaic_0001>
module attributes {stable_mosaic.version = 11 : i64} {
  func.func @inception_aux_kernel(%arg0: i32, %arg1: memref<16x16x8x8xbf16, #tpu.memory_space<vmem>>, %arg2: memref<8x128xbf16, #tpu.memory_space<vmem>>, %arg3: memref<16x128x1024xbf16, #tpu.memory_space<vmem>>, %arg4: memref<1x1024xf32, #tpu.memory_space<vmem>>, %arg5: memref<1024x128xbf16, #tpu.memory_space<vmem>>, %arg6: memref<1x128xf32, #tpu.memory_space<vmem>>, %arg7: memref<8x128xf32, #tpu.memory_space<vmem>>) attributes {dimension_semantics = [#tpu.dimension_semantics<parallel>], iteration_bounds = array<i64: 1>, scalar_prefetch = 0 : i64, scratch_operands = 0 : i64, tpu.core_type = #tpu.core_type<tc>, window_params = [{transform_indices = @transform_0, window_bounds = array<i64: 16, 16, 8, 8>}, {pipeline_mode = #tpu.pipeline_mode<synchronous>, transform_indices = @transform_1, window_bounds = array<i64: 8, 128>}, {pipeline_mode = #tpu.pipeline_mode<synchronous>, transform_indices = @transform_2, window_bounds = array<i64: 16, 128, 1024>}, {pipeline_mode = #tpu.pipeline_mode<synchronous>, transform_indices = @transform_3, window_bounds = array<i64: 1, 1024>}, {pipeline_mode = #tpu.pipeline_mode<synchronous>, transform_indices = @transform_4, window_bounds = array<i64: 1024, 128>}, {pipeline_mode = #tpu.pipeline_mode<synchronous>, transform_indices = @transform_5, window_bounds = array<i64: 1, 128>}, {transform_indices = @transform_6, window_bounds = array<i64: 8, 128>}]} {
    %c0 = arith.constant 0 : index
    %c0_0 = arith.constant 0 : index
    %0 = vector.load %arg2[%c0, %c0_0] : memref<8x128xbf16, #tpu.memory_space<vmem>>, vector<8x128xbf16>
    %cst = arith.constant 0.000000e+00 : f32
    %1 = vector.broadcast %cst : f32 to vector<8x1024xf32>
    %c0_1 = arith.constant 0 : index
    %c0_2 = arith.constant 0 : index
    %c0_3 = arith.constant 0 : index
    %c0_4 = arith.constant 0 : index
    %2 = vector.load %arg1[%c0_1, %c0_2, %c0_3, %c0_4] : memref<16x16x8x8xbf16, #tpu.memory_space<vmem>>, vector<1x16x8x8xbf16>
    %3 = vector.shape_cast %2 : vector<1x16x8x8xbf16> to vector<16x8x8xbf16>
    %4 = arith.extf %3 : vector<16x8x8xbf16> to vector<16x8x8xf32>
    %cst_5 = arith.constant dense<0.000000e+00> : vector<8x8xf32>
    %5 = vector.multi_reduction <add>, %4, %cst_5 [0] : vector<16x8x8xf32> to vector<8x8xf32>
    %cst_6 = arith.constant 6.250000e-02 : f32
    %6 = vector.broadcast %cst_6 : f32 to vector<8x8xf32>
    %7 = arith.mulf %5, %6 : vector<8x8xf32>
    %8 = arith.truncf %7 : vector<8x8xf32> to vector<8x8xbf16>
    %cst_7 = arith.constant dense<0.000000e+00> : vector<8x128xf32>
    %9 = tpu.matmul %8, %0, %cst_7 {dimension_numbers = #tpu.dot_dimension_numbers<[1], [0], [0], [1], [0, 0, 1, 1], [], []>} : vector<8x8xbf16>, vector<8x128xbf16>, vector<8x128xf32> -> vector<8x128xf32>
    %cst_8 = arith.constant 0.000000e+00 : f32
    %10 = vector.broadcast %cst_8 : f32 to vector<8x128xf32>
    %11 = arith.maximumf %9, %10 : vector<8x128xf32>
    %12 = arith.truncf %11 : vector<8x128xf32> to vector<8x128xbf16>
    %c0_9 = arith.constant 0 : index
    %c0_10 = arith.constant 0 : index
    %c0_11 = arith.constant 0 : index
    %13 = vector.load %arg3[%c0_9, %c0_10, %c0_11] : memref<16x128x1024xbf16, #tpu.memory_space<vmem>>, vector<1x128x1024xbf16>
    %14 = vector.shape_cast %13 : vector<1x128x1024xbf16> to vector<128x1024xbf16>
    %cst_12 = arith.constant dense<0.000000e+00> : vector<8x1024xf32>
    %15 = tpu.matmul %12, %14, %cst_12 {dimension_numbers = #tpu.dot_dimension_numbers<[1], [0], [0], [1], [0, 0, 1, 1], [], []>} : vector<8x128xbf16>, vector<128x1024xbf16>, vector<8x1024xf32> -> vector<8x1024xf32>
    %16 = arith.addf %1, %15 : vector<8x1024xf32>
    %c1 = arith.constant 1 : index
    %c0_13 = arith.constant 0 : index
    %c0_14 = arith.constant 0 : index
    %c0_15 = arith.constant 0 : index
    %17 = vector.load %arg1[%c1, %c0_13, %c0_14, %c0_15] : memref<16x16x8x8xbf16, #tpu.memory_space<vmem>>, vector<1x16x8x8xbf16>
    %18 = vector.shape_cast %17 : vector<1x16x8x8xbf16> to vector<16x8x8xbf16>
    %19 = arith.extf %18 : vector<16x8x8xbf16> to vector<16x8x8xf32>
    %cst_16 = arith.constant dense<0.000000e+00> : vector<8x8xf32>
    %20 = vector.multi_reduction <add>, %19, %cst_16 [0] : vector<16x8x8xf32> to vector<8x8xf32>
    %cst_17 = arith.constant 6.250000e-02 : f32
    %21 = vector.broadcast %cst_17 : f32 to vector<8x8xf32>
    %22 = arith.mulf %20, %21 : vector<8x8xf32>
    %23 = arith.truncf %22 : vector<8x8xf32> to vector<8x8xbf16>
    %cst_18 = arith.constant dense<0.000000e+00> : vector<8x128xf32>
    %24 = tpu.matmul %23, %0, %cst_18 {dimension_numbers = #tpu.dot_dimension_numbers<[1], [0], [0], [1], [0, 0, 1, 1], [], []>} : vector<8x8xbf16>, vector<8x128xbf16>, vector<8x128xf32> -> vector<8x128xf32>
    %cst_19 = arith.constant 0.000000e+00 : f32
    %25 = vector.broadcast %cst_19 : f32 to vector<8x128xf32>
    %26 = arith.maximumf %24, %25 : vector<8x128xf32>
    %27 = arith.truncf %26 : vector<8x128xf32> to vector<8x128xbf16>
    %c1_20 = arith.constant 1 : index
    %c0_21 = arith.constant 0 : index
    %c0_22 = arith.constant 0 : index
    %28 = vector.load %arg3[%c1_20, %c0_21, %c0_22] : memref<16x128x1024xbf16, #tpu.memory_space<vmem>>, vector<1x128x1024xbf16>
    %29 = vector.shape_cast %28 : vector<1x128x1024xbf16> to vector<128x1024xbf16>
    %cst_23 = arith.constant dense<0.000000e+00> : vector<8x1024xf32>
    %30 = tpu.matmul %27, %29, %cst_23 {dimension_numbers = #tpu.dot_dimension_numbers<[1], [0], [0], [1], [0, 0, 1, 1], [], []>} : vector<8x128xbf16>, vector<128x1024xbf16>, vector<8x1024xf32> -> vector<8x1024xf32>
    %31 = arith.addf %16, %30 : vector<8x1024xf32>
    %c2 = arith.constant 2 : index
    %c0_24 = arith.constant 0 : index
    %c0_25 = arith.constant 0 : index
    %c0_26 = arith.constant 0 : index
    %32 = vector.load %arg1[%c2, %c0_24, %c0_25, %c0_26] : memref<16x16x8x8xbf16, #tpu.memory_space<vmem>>, vector<1x16x8x8xbf16>
    %33 = vector.shape_cast %32 : vector<1x16x8x8xbf16> to vector<16x8x8xbf16>
    %34 = arith.extf %33 : vector<16x8x8xbf16> to vector<16x8x8xf32>
    %cst_27 = arith.constant dense<0.000000e+00> : vector<8x8xf32>
    %35 = vector.multi_reduction <add>, %34, %cst_27 [0] : vector<16x8x8xf32> to vector<8x8xf32>
    %cst_28 = arith.constant 6.250000e-02 : f32
    %36 = vector.broadcast %cst_28 : f32 to vector<8x8xf32>
    %37 = arith.mulf %35, %36 : vector<8x8xf32>
    %38 = arith.truncf %37 : vector<8x8xf32> to vector<8x8xbf16>
    %cst_29 = arith.constant dense<0.000000e+00> : vector<8x128xf32>
    %39 = tpu.matmul %38, %0, %cst_29 {dimension_numbers = #tpu.dot_dimension_numbers<[1], [0], [0], [1], [0, 0, 1, 1], [], []>} : vector<8x8xbf16>, vector<8x128xbf16>, vector<8x128xf32> -> vector<8x128xf32>
    %cst_30 = arith.constant 0.000000e+00 : f32
    %40 = vector.broadcast %cst_30 : f32 to vector<8x128xf32>
    %41 = arith.maximumf %39, %40 : vector<8x128xf32>
    %42 = arith.truncf %41 : vector<8x128xf32> to vector<8x128xbf16>
    %c2_31 = arith.constant 2 : index
    %c0_32 = arith.constant 0 : index
    %c0_33 = arith.constant 0 : index
    %43 = vector.load %arg3[%c2_31, %c0_32, %c0_33] : memref<16x128x1024xbf16, #tpu.memory_space<vmem>>, vector<1x128x1024xbf16>
    %44 = vector.shape_cast %43 : vector<1x128x1024xbf16> to vector<128x1024xbf16>
    %cst_34 = arith.constant dense<0.000000e+00> : vector<8x1024xf32>
    %45 = tpu.matmul %42, %44, %cst_34 {dimension_numbers = #tpu.dot_dimension_numbers<[1], [0], [0], [1], [0, 0, 1, 1], [], []>} : vector<8x128xbf16>, vector<128x1024xbf16>, vector<8x1024xf32> -> vector<8x1024xf32>
    %46 = arith.addf %31, %45 : vector<8x1024xf32>
    %c3 = arith.constant 3 : index
    %c0_35 = arith.constant 0 : index
    %c0_36 = arith.constant 0 : index
    %c0_37 = arith.constant 0 : index
    %47 = vector.load %arg1[%c3, %c0_35, %c0_36, %c0_37] : memref<16x16x8x8xbf16, #tpu.memory_space<vmem>>, vector<1x16x8x8xbf16>
    %48 = vector.shape_cast %47 : vector<1x16x8x8xbf16> to vector<16x8x8xbf16>
    %49 = arith.extf %48 : vector<16x8x8xbf16> to vector<16x8x8xf32>
    %cst_38 = arith.constant dense<0.000000e+00> : vector<8x8xf32>
    %50 = vector.multi_reduction <add>, %49, %cst_38 [0] : vector<16x8x8xf32> to vector<8x8xf32>
    %cst_39 = arith.constant 6.250000e-02 : f32
    %51 = vector.broadcast %cst_39 : f32 to vector<8x8xf32>
    %52 = arith.mulf %50, %51 : vector<8x8xf32>
    %53 = arith.truncf %52 : vector<8x8xf32> to vector<8x8xbf16>
    %cst_40 = arith.constant dense<0.000000e+00> : vector<8x128xf32>
    %54 = tpu.matmul %53, %0, %cst_40 {dimension_numbers = #tpu.dot_dimension_numbers<[1], [0], [0], [1], [0, 0, 1, 1], [], []>} : vector<8x8xbf16>, vector<8x128xbf16>, vector<8x128xf32> -> vector<8x128xf32>
    %cst_41 = arith.constant 0.000000e+00 : f32
    %55 = vector.broadcast %cst_41 : f32 to vector<8x128xf32>
    %56 = arith.maximumf %54, %55 : vector<8x128xf32>
    %57 = arith.truncf %56 : vector<8x128xf32> to vector<8x128xbf16>
    %c3_42 = arith.constant 3 : index
    %c0_43 = arith.constant 0 : index
    %c0_44 = arith.constant 0 : index
    %58 = vector.load %arg3[%c3_42, %c0_43, %c0_44] : memref<16x128x1024xbf16, #tpu.memory_space<vmem>>, vector<1x128x1024xbf16>
    %59 = vector.shape_cast %58 : vector<1x128x1024xbf16> to vector<128x1024xbf16>
    %cst_45 = arith.constant dense<0.000000e+00> : vector<8x1024xf32>
    %60 = tpu.matmul %57, %59, %cst_45 {dimension_numbers = #tpu.dot_dimension_numbers<[1], [0], [0], [1], [0, 0, 1, 1], [], []>} : vector<8x128xbf16>, vector<128x1024xbf16>, vector<8x1024xf32> -> vector<8x1024xf32>
    %61 = arith.addf %46, %60 : vector<8x1024xf32>
    %c4 = arith.constant 4 : index
    %c0_46 = arith.constant 0 : index
    %c0_47 = arith.constant 0 : index
    %c0_48 = arith.constant 0 : index
    %62 = vector.load %arg1[%c4, %c0_46, %c0_47, %c0_48] : memref<16x16x8x8xbf16, #tpu.memory_space<vmem>>, vector<1x16x8x8xbf16>
    %63 = vector.shape_cast %62 : vector<1x16x8x8xbf16> to vector<16x8x8xbf16>
    %64 = arith.extf %63 : vector<16x8x8xbf16> to vector<16x8x8xf32>
    %cst_49 = arith.constant dense<0.000000e+00> : vector<8x8xf32>
    %65 = vector.multi_reduction <add>, %64, %cst_49 [0] : vector<16x8x8xf32> to vector<8x8xf32>
    %cst_50 = arith.constant 6.250000e-02 : f32
    %66 = vector.broadcast %cst_50 : f32 to vector<8x8xf32>
    %67 = arith.mulf %65, %66 : vector<8x8xf32>
    %68 = arith.truncf %67 : vector<8x8xf32> to vector<8x8xbf16>
    %cst_51 = arith.constant dense<0.000000e+00> : vector<8x128xf32>
    %69 = tpu.matmul %68, %0, %cst_51 {dimension_numbers = #tpu.dot_dimension_numbers<[1], [0], [0], [1], [0, 0, 1, 1], [], []>} : vector<8x8xbf16>, vector<8x128xbf16>, vector<8x128xf32> -> vector<8x128xf32>
    %cst_52 = arith.constant 0.000000e+00 : f32
    %70 = vector.broadcast %cst_52 : f32 to vector<8x128xf32>
    %71 = arith.maximumf %69, %70 : vector<8x128xf32>
    %72 = arith.truncf %71 : vector<8x128xf32> to vector<8x128xbf16>
    %c4_53 = arith.constant 4 : index
    %c0_54 = arith.constant 0 : index
    %c0_55 = arith.constant 0 : index
    %73 = vector.load %arg3[%c4_53, %c0_54, %c0_55] : memref<16x128x1024xbf16, #tpu.memory_space<vmem>>, vector<1x128x1024xbf16>
    %74 = vector.shape_cast %73 : vector<1x128x1024xbf16> to vector<128x1024xbf16>
    %cst_56 = arith.constant dense<0.000000e+00> : vector<8x1024xf32>
    %75 = tpu.matmul %72, %74, %cst_56 {dimension_numbers = #tpu.dot_dimension_numbers<[1], [0], [0], [1], [0, 0, 1, 1], [], []>} : vector<8x128xbf16>, vector<128x1024xbf16>, vector<8x1024xf32> -> vector<8x1024xf32>
    %76 = arith.addf %61, %75 : vector<8x1024xf32>
    %c5 = arith.constant 5 : index
    %c0_57 = arith.constant 0 : index
    %c0_58 = arith.constant 0 : index
    %c0_59 = arith.constant 0 : index
    %77 = vector.load %arg1[%c5, %c0_57, %c0_58, %c0_59] : memref<16x16x8x8xbf16, #tpu.memory_space<vmem>>, vector<1x16x8x8xbf16>
    %78 = vector.shape_cast %77 : vector<1x16x8x8xbf16> to vector<16x8x8xbf16>
    %79 = arith.extf %78 : vector<16x8x8xbf16> to vector<16x8x8xf32>
    %cst_60 = arith.constant dense<0.000000e+00> : vector<8x8xf32>
    %80 = vector.multi_reduction <add>, %79, %cst_60 [0] : vector<16x8x8xf32> to vector<8x8xf32>
    %cst_61 = arith.constant 6.250000e-02 : f32
    %81 = vector.broadcast %cst_61 : f32 to vector<8x8xf32>
    %82 = arith.mulf %80, %81 : vector<8x8xf32>
    %83 = arith.truncf %82 : vector<8x8xf32> to vector<8x8xbf16>
    %cst_62 = arith.constant dense<0.000000e+00> : vector<8x128xf32>
    %84 = tpu.matmul %83, %0, %cst_62 {dimension_numbers = #tpu.dot_dimension_numbers<[1], [0], [0], [1], [0, 0, 1, 1], [], []>} : vector<8x8xbf16>, vector<8x128xbf16>, vector<8x128xf32> -> vector<8x128xf32>
    %cst_63 = arith.constant 0.000000e+00 : f32
    %85 = vector.broadcast %cst_63 : f32 to vector<8x128xf32>
    %86 = arith.maximumf %84, %85 : vector<8x128xf32>
    %87 = arith.truncf %86 : vector<8x128xf32> to vector<8x128xbf16>
    %c5_64 = arith.constant 5 : index
    %c0_65 = arith.constant 0 : index
    %c0_66 = arith.constant 0 : index
    %88 = vector.load %arg3[%c5_64, %c0_65, %c0_66] : memref<16x128x1024xbf16, #tpu.memory_space<vmem>>, vector<1x128x1024xbf16>
    %89 = vector.shape_cast %88 : vector<1x128x1024xbf16> to vector<128x1024xbf16>
    %cst_67 = arith.constant dense<0.000000e+00> : vector<8x1024xf32>
    %90 = tpu.matmul %87, %89, %cst_67 {dimension_numbers = #tpu.dot_dimension_numbers<[1], [0], [0], [1], [0, 0, 1, 1], [], []>} : vector<8x128xbf16>, vector<128x1024xbf16>, vector<8x1024xf32> -> vector<8x1024xf32>
    %91 = arith.addf %76, %90 : vector<8x1024xf32>
    %c6 = arith.constant 6 : index
    %c0_68 = arith.constant 0 : index
    %c0_69 = arith.constant 0 : index
    %c0_70 = arith.constant 0 : index
    %92 = vector.load %arg1[%c6, %c0_68, %c0_69, %c0_70] : memref<16x16x8x8xbf16, #tpu.memory_space<vmem>>, vector<1x16x8x8xbf16>
    %93 = vector.shape_cast %92 : vector<1x16x8x8xbf16> to vector<16x8x8xbf16>
    %94 = arith.extf %93 : vector<16x8x8xbf16> to vector<16x8x8xf32>
    %cst_71 = arith.constant dense<0.000000e+00> : vector<8x8xf32>
    %95 = vector.multi_reduction <add>, %94, %cst_71 [0] : vector<16x8x8xf32> to vector<8x8xf32>
    %cst_72 = arith.constant 6.250000e-02 : f32
    %96 = vector.broadcast %cst_72 : f32 to vector<8x8xf32>
    %97 = arith.mulf %95, %96 : vector<8x8xf32>
    %98 = arith.truncf %97 : vector<8x8xf32> to vector<8x8xbf16>
    %cst_73 = arith.constant dense<0.000000e+00> : vector<8x128xf32>
    %99 = tpu.matmul %98, %0, %cst_73 {dimension_numbers = #tpu.dot_dimension_numbers<[1], [0], [0], [1], [0, 0, 1, 1], [], []>} : vector<8x8xbf16>, vector<8x128xbf16>, vector<8x128xf32> -> vector<8x128xf32>
    %cst_74 = arith.constant 0.000000e+00 : f32
    %100 = vector.broadcast %cst_74 : f32 to vector<8x128xf32>
    %101 = arith.maximumf %99, %100 : vector<8x128xf32>
    %102 = arith.truncf %101 : vector<8x128xf32> to vector<8x128xbf16>
    %c6_75 = arith.constant 6 : index
    %c0_76 = arith.constant 0 : index
    %c0_77 = arith.constant 0 : index
    %103 = vector.load %arg3[%c6_75, %c0_76, %c0_77] : memref<16x128x1024xbf16, #tpu.memory_space<vmem>>, vector<1x128x1024xbf16>
    %104 = vector.shape_cast %103 : vector<1x128x1024xbf16> to vector<128x1024xbf16>
    %cst_78 = arith.constant dense<0.000000e+00> : vector<8x1024xf32>
    %105 = tpu.matmul %102, %104, %cst_78 {dimension_numbers = #tpu.dot_dimension_numbers<[1], [0], [0], [1], [0, 0, 1, 1], [], []>} : vector<8x128xbf16>, vector<128x1024xbf16>, vector<8x1024xf32> -> vector<8x1024xf32>
    %106 = arith.addf %91, %105 : vector<8x1024xf32>
    %c7 = arith.constant 7 : index
    %c0_79 = arith.constant 0 : index
    %c0_80 = arith.constant 0 : index
    %c0_81 = arith.constant 0 : index
    %107 = vector.load %arg1[%c7, %c0_79, %c0_80, %c0_81] : memref<16x16x8x8xbf16, #tpu.memory_space<vmem>>, vector<1x16x8x8xbf16>
    %108 = vector.shape_cast %107 : vector<1x16x8x8xbf16> to vector<16x8x8xbf16>
    %109 = arith.extf %108 : vector<16x8x8xbf16> to vector<16x8x8xf32>
    %cst_82 = arith.constant dense<0.000000e+00> : vector<8x8xf32>
    %110 = vector.multi_reduction <add>, %109, %cst_82 [0] : vector<16x8x8xf32> to vector<8x8xf32>
    %cst_83 = arith.constant 6.250000e-02 : f32
    %111 = vector.broadcast %cst_83 : f32 to vector<8x8xf32>
    %112 = arith.mulf %110, %111 : vector<8x8xf32>
    %113 = arith.truncf %112 : vector<8x8xf32> to vector<8x8xbf16>
    %cst_84 = arith.constant dense<0.000000e+00> : vector<8x128xf32>
    %114 = tpu.matmul %113, %0, %cst_84 {dimension_numbers = #tpu.dot_dimension_numbers<[1], [0], [0], [1], [0, 0, 1, 1], [], []>} : vector<8x8xbf16>, vector<8x128xbf16>, vector<8x128xf32> -> vector<8x128xf32>
    %cst_85 = arith.constant 0.000000e+00 : f32
    %115 = vector.broadcast %cst_85 : f32 to vector<8x128xf32>
    %116 = arith.maximumf %114, %115 : vector<8x128xf32>
    %117 = arith.truncf %116 : vector<8x128xf32> to vector<8x128xbf16>
    %c7_86 = arith.constant 7 : index
    %c0_87 = arith.constant 0 : index
    %c0_88 = arith.constant 0 : index
    %118 = vector.load %arg3[%c7_86, %c0_87, %c0_88] : memref<16x128x1024xbf16, #tpu.memory_space<vmem>>, vector<1x128x1024xbf16>
    %119 = vector.shape_cast %118 : vector<1x128x1024xbf16> to vector<128x1024xbf16>
    %cst_89 = arith.constant dense<0.000000e+00> : vector<8x1024xf32>
    %120 = tpu.matmul %117, %119, %cst_89 {dimension_numbers = #tpu.dot_dimension_numbers<[1], [0], [0], [1], [0, 0, 1, 1], [], []>} : vector<8x128xbf16>, vector<128x1024xbf16>, vector<8x1024xf32> -> vector<8x1024xf32>
    %121 = arith.addf %106, %120 : vector<8x1024xf32>
    %c8 = arith.constant 8 : index
    %c0_90 = arith.constant 0 : index
    %c0_91 = arith.constant 0 : index
    %c0_92 = arith.constant 0 : index
    %122 = vector.load %arg1[%c8, %c0_90, %c0_91, %c0_92] : memref<16x16x8x8xbf16, #tpu.memory_space<vmem>>, vector<1x16x8x8xbf16>
    %123 = vector.shape_cast %122 : vector<1x16x8x8xbf16> to vector<16x8x8xbf16>
    %124 = arith.extf %123 : vector<16x8x8xbf16> to vector<16x8x8xf32>
    %cst_93 = arith.constant dense<0.000000e+00> : vector<8x8xf32>
    %125 = vector.multi_reduction <add>, %124, %cst_93 [0] : vector<16x8x8xf32> to vector<8x8xf32>
    %cst_94 = arith.constant 6.250000e-02 : f32
    %126 = vector.broadcast %cst_94 : f32 to vector<8x8xf32>
    %127 = arith.mulf %125, %126 : vector<8x8xf32>
    %128 = arith.truncf %127 : vector<8x8xf32> to vector<8x8xbf16>
    %cst_95 = arith.constant dense<0.000000e+00> : vector<8x128xf32>
    %129 = tpu.matmul %128, %0, %cst_95 {dimension_numbers = #tpu.dot_dimension_numbers<[1], [0], [0], [1], [0, 0, 1, 1], [], []>} : vector<8x8xbf16>, vector<8x128xbf16>, vector<8x128xf32> -> vector<8x128xf32>
    %cst_96 = arith.constant 0.000000e+00 : f32
    %130 = vector.broadcast %cst_96 : f32 to vector<8x128xf32>
    %131 = arith.maximumf %129, %130 : vector<8x128xf32>
    %132 = arith.truncf %131 : vector<8x128xf32> to vector<8x128xbf16>
    %c8_97 = arith.constant 8 : index
    %c0_98 = arith.constant 0 : index
    %c0_99 = arith.constant 0 : index
    %133 = vector.load %arg3[%c8_97, %c0_98, %c0_99] : memref<16x128x1024xbf16, #tpu.memory_space<vmem>>, vector<1x128x1024xbf16>
    %134 = vector.shape_cast %133 : vector<1x128x1024xbf16> to vector<128x1024xbf16>
    %cst_100 = arith.constant dense<0.000000e+00> : vector<8x1024xf32>
    %135 = tpu.matmul %132, %134, %cst_100 {dimension_numbers = #tpu.dot_dimension_numbers<[1], [0], [0], [1], [0, 0, 1, 1], [], []>} : vector<8x128xbf16>, vector<128x1024xbf16>, vector<8x1024xf32> -> vector<8x1024xf32>
    %136 = arith.addf %121, %135 : vector<8x1024xf32>
    %c9 = arith.constant 9 : index
    %c0_101 = arith.constant 0 : index
    %c0_102 = arith.constant 0 : index
    %c0_103 = arith.constant 0 : index
    %137 = vector.load %arg1[%c9, %c0_101, %c0_102, %c0_103] : memref<16x16x8x8xbf16, #tpu.memory_space<vmem>>, vector<1x16x8x8xbf16>
    %138 = vector.shape_cast %137 : vector<1x16x8x8xbf16> to vector<16x8x8xbf16>
    %139 = arith.extf %138 : vector<16x8x8xbf16> to vector<16x8x8xf32>
    %cst_104 = arith.constant dense<0.000000e+00> : vector<8x8xf32>
    %140 = vector.multi_reduction <add>, %139, %cst_104 [0] : vector<16x8x8xf32> to vector<8x8xf32>
    %cst_105 = arith.constant 6.250000e-02 : f32
    %141 = vector.broadcast %cst_105 : f32 to vector<8x8xf32>
    %142 = arith.mulf %140, %141 : vector<8x8xf32>
    %143 = arith.truncf %142 : vector<8x8xf32> to vector<8x8xbf16>
    %cst_106 = arith.constant dense<0.000000e+00> : vector<8x128xf32>
    %144 = tpu.matmul %143, %0, %cst_106 {dimension_numbers = #tpu.dot_dimension_numbers<[1], [0], [0], [1], [0, 0, 1, 1], [], []>} : vector<8x8xbf16>, vector<8x128xbf16>, vector<8x128xf32> -> vector<8x128xf32>
    %cst_107 = arith.constant 0.000000e+00 : f32
    %145 = vector.broadcast %cst_107 : f32 to vector<8x128xf32>
    %146 = arith.maximumf %144, %145 : vector<8x128xf32>
    %147 = arith.truncf %146 : vector<8x128xf32> to vector<8x128xbf16>
    %c9_108 = arith.constant 9 : index
    %c0_109 = arith.constant 0 : index
    %c0_110 = arith.constant 0 : index
    %148 = vector.load %arg3[%c9_108, %c0_109, %c0_110] : memref<16x128x1024xbf16, #tpu.memory_space<vmem>>, vector<1x128x1024xbf16>
    %149 = vector.shape_cast %148 : vector<1x128x1024xbf16> to vector<128x1024xbf16>
    %cst_111 = arith.constant dense<0.000000e+00> : vector<8x1024xf32>
    %150 = tpu.matmul %147, %149, %cst_111 {dimension_numbers = #tpu.dot_dimension_numbers<[1], [0], [0], [1], [0, 0, 1, 1], [], []>} : vector<8x128xbf16>, vector<128x1024xbf16>, vector<8x1024xf32> -> vector<8x1024xf32>
    %151 = arith.addf %136, %150 : vector<8x1024xf32>
    %c10 = arith.constant 10 : index
    %c0_112 = arith.constant 0 : index
    %c0_113 = arith.constant 0 : index
    %c0_114 = arith.constant 0 : index
    %152 = vector.load %arg1[%c10, %c0_112, %c0_113, %c0_114] : memref<16x16x8x8xbf16, #tpu.memory_space<vmem>>, vector<1x16x8x8xbf16>
    %153 = vector.shape_cast %152 : vector<1x16x8x8xbf16> to vector<16x8x8xbf16>
    %154 = arith.extf %153 : vector<16x8x8xbf16> to vector<16x8x8xf32>
    %cst_115 = arith.constant dense<0.000000e+00> : vector<8x8xf32>
    %155 = vector.multi_reduction <add>, %154, %cst_115 [0] : vector<16x8x8xf32> to vector<8x8xf32>
    %cst_116 = arith.constant 6.250000e-02 : f32
    %156 = vector.broadcast %cst_116 : f32 to vector<8x8xf32>
    %157 = arith.mulf %155, %156 : vector<8x8xf32>
    %158 = arith.truncf %157 : vector<8x8xf32> to vector<8x8xbf16>
    %cst_117 = arith.constant dense<0.000000e+00> : vector<8x128xf32>
    %159 = tpu.matmul %158, %0, %cst_117 {dimension_numbers = #tpu.dot_dimension_numbers<[1], [0], [0], [1], [0, 0, 1, 1], [], []>} : vector<8x8xbf16>, vector<8x128xbf16>, vector<8x128xf32> -> vector<8x128xf32>
    %cst_118 = arith.constant 0.000000e+00 : f32
    %160 = vector.broadcast %cst_118 : f32 to vector<8x128xf32>
    %161 = arith.maximumf %159, %160 : vector<8x128xf32>
    %162 = arith.truncf %161 : vector<8x128xf32> to vector<8x128xbf16>
    %c10_119 = arith.constant 10 : index
    %c0_120 = arith.constant 0 : index
    %c0_121 = arith.constant 0 : index
    %163 = vector.load %arg3[%c10_119, %c0_120, %c0_121] : memref<16x128x1024xbf16, #tpu.memory_space<vmem>>, vector<1x128x1024xbf16>
    %164 = vector.shape_cast %163 : vector<1x128x1024xbf16> to vector<128x1024xbf16>
    %cst_122 = arith.constant dense<0.000000e+00> : vector<8x1024xf32>
    %165 = tpu.matmul %162, %164, %cst_122 {dimension_numbers = #tpu.dot_dimension_numbers<[1], [0], [0], [1], [0, 0, 1, 1], [], []>} : vector<8x128xbf16>, vector<128x1024xbf16>, vector<8x1024xf32> -> vector<8x1024xf32>
    %166 = arith.addf %151, %165 : vector<8x1024xf32>
    %c11 = arith.constant 11 : index
    %c0_123 = arith.constant 0 : index
    %c0_124 = arith.constant 0 : index
    %c0_125 = arith.constant 0 : index
    %167 = vector.load %arg1[%c11, %c0_123, %c0_124, %c0_125] : memref<16x16x8x8xbf16, #tpu.memory_space<vmem>>, vector<1x16x8x8xbf16>
    %168 = vector.shape_cast %167 : vector<1x16x8x8xbf16> to vector<16x8x8xbf16>
    %169 = arith.extf %168 : vector<16x8x8xbf16> to vector<16x8x8xf32>
    %cst_126 = arith.constant dense<0.000000e+00> : vector<8x8xf32>
    %170 = vector.multi_reduction <add>, %169, %cst_126 [0] : vector<16x8x8xf32> to vector<8x8xf32>
    %cst_127 = arith.constant 6.250000e-02 : f32
    %171 = vector.broadcast %cst_127 : f32 to vector<8x8xf32>
    %172 = arith.mulf %170, %171 : vector<8x8xf32>
    %173 = arith.truncf %172 : vector<8x8xf32> to vector<8x8xbf16>
    %cst_128 = arith.constant dense<0.000000e+00> : vector<8x128xf32>
    %174 = tpu.matmul %173, %0, %cst_128 {dimension_numbers = #tpu.dot_dimension_numbers<[1], [0], [0], [1], [0, 0, 1, 1], [], []>} : vector<8x8xbf16>, vector<8x128xbf16>, vector<8x128xf32> -> vector<8x128xf32>
    %cst_129 = arith.constant 0.000000e+00 : f32
    %175 = vector.broadcast %cst_129 : f32 to vector<8x128xf32>
    %176 = arith.maximumf %174, %175 : vector<8x128xf32>
    %177 = arith.truncf %176 : vector<8x128xf32> to vector<8x128xbf16>
    %c11_130 = arith.constant 11 : index
    %c0_131 = arith.constant 0 : index
    %c0_132 = arith.constant 0 : index
    %178 = vector.load %arg3[%c11_130, %c0_131, %c0_132] : memref<16x128x1024xbf16, #tpu.memory_space<vmem>>, vector<1x128x1024xbf16>
    %179 = vector.shape_cast %178 : vector<1x128x1024xbf16> to vector<128x1024xbf16>
    %cst_133 = arith.constant dense<0.000000e+00> : vector<8x1024xf32>
    %180 = tpu.matmul %177, %179, %cst_133 {dimension_numbers = #tpu.dot_dimension_numbers<[1], [0], [0], [1], [0, 0, 1, 1], [], []>} : vector<8x128xbf16>, vector<128x1024xbf16>, vector<8x1024xf32> -> vector<8x1024xf32>
    %181 = arith.addf %166, %180 : vector<8x1024xf32>
    %c12 = arith.constant 12 : index
    %c0_134 = arith.constant 0 : index
    %c0_135 = arith.constant 0 : index
    %c0_136 = arith.constant 0 : index
    %182 = vector.load %arg1[%c12, %c0_134, %c0_135, %c0_136] : memref<16x16x8x8xbf16, #tpu.memory_space<vmem>>, vector<1x16x8x8xbf16>
    %183 = vector.shape_cast %182 : vector<1x16x8x8xbf16> to vector<16x8x8xbf16>
    %184 = arith.extf %183 : vector<16x8x8xbf16> to vector<16x8x8xf32>
    %cst_137 = arith.constant dense<0.000000e+00> : vector<8x8xf32>
    %185 = vector.multi_reduction <add>, %184, %cst_137 [0] : vector<16x8x8xf32> to vector<8x8xf32>
    %cst_138 = arith.constant 6.250000e-02 : f32
    %186 = vector.broadcast %cst_138 : f32 to vector<8x8xf32>
    %187 = arith.mulf %185, %186 : vector<8x8xf32>
    %188 = arith.truncf %187 : vector<8x8xf32> to vector<8x8xbf16>
    %cst_139 = arith.constant dense<0.000000e+00> : vector<8x128xf32>
    %189 = tpu.matmul %188, %0, %cst_139 {dimension_numbers = #tpu.dot_dimension_numbers<[1], [0], [0], [1], [0, 0, 1, 1], [], []>} : vector<8x8xbf16>, vector<8x128xbf16>, vector<8x128xf32> -> vector<8x128xf32>
    %cst_140 = arith.constant 0.000000e+00 : f32
    %190 = vector.broadcast %cst_140 : f32 to vector<8x128xf32>
    %191 = arith.maximumf %189, %190 : vector<8x128xf32>
    %192 = arith.truncf %191 : vector<8x128xf32> to vector<8x128xbf16>
    %c12_141 = arith.constant 12 : index
    %c0_142 = arith.constant 0 : index
    %c0_143 = arith.constant 0 : index
    %193 = vector.load %arg3[%c12_141, %c0_142, %c0_143] : memref<16x128x1024xbf16, #tpu.memory_space<vmem>>, vector<1x128x1024xbf16>
    %194 = vector.shape_cast %193 : vector<1x128x1024xbf16> to vector<128x1024xbf16>
    %cst_144 = arith.constant dense<0.000000e+00> : vector<8x1024xf32>
    %195 = tpu.matmul %192, %194, %cst_144 {dimension_numbers = #tpu.dot_dimension_numbers<[1], [0], [0], [1], [0, 0, 1, 1], [], []>} : vector<8x128xbf16>, vector<128x1024xbf16>, vector<8x1024xf32> -> vector<8x1024xf32>
    %196 = arith.addf %181, %195 : vector<8x1024xf32>
    %c13 = arith.constant 13 : index
    %c0_145 = arith.constant 0 : index
    %c0_146 = arith.constant 0 : index
    %c0_147 = arith.constant 0 : index
    %197 = vector.load %arg1[%c13, %c0_145, %c0_146, %c0_147] : memref<16x16x8x8xbf16, #tpu.memory_space<vmem>>, vector<1x16x8x8xbf16>
    %198 = vector.shape_cast %197 : vector<1x16x8x8xbf16> to vector<16x8x8xbf16>
    %199 = arith.extf %198 : vector<16x8x8xbf16> to vector<16x8x8xf32>
    %cst_148 = arith.constant dense<0.000000e+00> : vector<8x8xf32>
    %200 = vector.multi_reduction <add>, %199, %cst_148 [0] : vector<16x8x8xf32> to vector<8x8xf32>
    %cst_149 = arith.constant 6.250000e-02 : f32
    %201 = vector.broadcast %cst_149 : f32 to vector<8x8xf32>
    %202 = arith.mulf %200, %201 : vector<8x8xf32>
    %203 = arith.truncf %202 : vector<8x8xf32> to vector<8x8xbf16>
    %cst_150 = arith.constant dense<0.000000e+00> : vector<8x128xf32>
    %204 = tpu.matmul %203, %0, %cst_150 {dimension_numbers = #tpu.dot_dimension_numbers<[1], [0], [0], [1], [0, 0, 1, 1], [], []>} : vector<8x8xbf16>, vector<8x128xbf16>, vector<8x128xf32> -> vector<8x128xf32>
    %cst_151 = arith.constant 0.000000e+00 : f32
    %205 = vector.broadcast %cst_151 : f32 to vector<8x128xf32>
    %206 = arith.maximumf %204, %205 : vector<8x128xf32>
    %207 = arith.truncf %206 : vector<8x128xf32> to vector<8x128xbf16>
    %c13_152 = arith.constant 13 : index
    %c0_153 = arith.constant 0 : index
    %c0_154 = arith.constant 0 : index
    %208 = vector.load %arg3[%c13_152, %c0_153, %c0_154] : memref<16x128x1024xbf16, #tpu.memory_space<vmem>>, vector<1x128x1024xbf16>
    %209 = vector.shape_cast %208 : vector<1x128x1024xbf16> to vector<128x1024xbf16>
    %cst_155 = arith.constant dense<0.000000e+00> : vector<8x1024xf32>
    %210 = tpu.matmul %207, %209, %cst_155 {dimension_numbers = #tpu.dot_dimension_numbers<[1], [0], [0], [1], [0, 0, 1, 1], [], []>} : vector<8x128xbf16>, vector<128x1024xbf16>, vector<8x1024xf32> -> vector<8x1024xf32>
    %211 = arith.addf %196, %210 : vector<8x1024xf32>
    %c14 = arith.constant 14 : index
    %c0_156 = arith.constant 0 : index
    %c0_157 = arith.constant 0 : index
    %c0_158 = arith.constant 0 : index
    %212 = vector.load %arg1[%c14, %c0_156, %c0_157, %c0_158] : memref<16x16x8x8xbf16, #tpu.memory_space<vmem>>, vector<1x16x8x8xbf16>
    %213 = vector.shape_cast %212 : vector<1x16x8x8xbf16> to vector<16x8x8xbf16>
    %214 = arith.extf %213 : vector<16x8x8xbf16> to vector<16x8x8xf32>
    %cst_159 = arith.constant dense<0.000000e+00> : vector<8x8xf32>
    %215 = vector.multi_reduction <add>, %214, %cst_159 [0] : vector<16x8x8xf32> to vector<8x8xf32>
    %cst_160 = arith.constant 6.250000e-02 : f32
    %216 = vector.broadcast %cst_160 : f32 to vector<8x8xf32>
    %217 = arith.mulf %215, %216 : vector<8x8xf32>
    %218 = arith.truncf %217 : vector<8x8xf32> to vector<8x8xbf16>
    %cst_161 = arith.constant dense<0.000000e+00> : vector<8x128xf32>
    %219 = tpu.matmul %218, %0, %cst_161 {dimension_numbers = #tpu.dot_dimension_numbers<[1], [0], [0], [1], [0, 0, 1, 1], [], []>} : vector<8x8xbf16>, vector<8x128xbf16>, vector<8x128xf32> -> vector<8x128xf32>
    %cst_162 = arith.constant 0.000000e+00 : f32
    %220 = vector.broadcast %cst_162 : f32 to vector<8x128xf32>
    %221 = arith.maximumf %219, %220 : vector<8x128xf32>
    %222 = arith.truncf %221 : vector<8x128xf32> to vector<8x128xbf16>
    %c14_163 = arith.constant 14 : index
    %c0_164 = arith.constant 0 : index
    %c0_165 = arith.constant 0 : index
    %223 = vector.load %arg3[%c14_163, %c0_164, %c0_165] : memref<16x128x1024xbf16, #tpu.memory_space<vmem>>, vector<1x128x1024xbf16>
    %224 = vector.shape_cast %223 : vector<1x128x1024xbf16> to vector<128x1024xbf16>
    %cst_166 = arith.constant dense<0.000000e+00> : vector<8x1024xf32>
    %225 = tpu.matmul %222, %224, %cst_166 {dimension_numbers = #tpu.dot_dimension_numbers<[1], [0], [0], [1], [0, 0, 1, 1], [], []>} : vector<8x128xbf16>, vector<128x1024xbf16>, vector<8x1024xf32> -> vector<8x1024xf32>
    %226 = arith.addf %211, %225 : vector<8x1024xf32>
    %c15 = arith.constant 15 : index
    %c0_167 = arith.constant 0 : index
    %c0_168 = arith.constant 0 : index
    %c0_169 = arith.constant 0 : index
    %227 = vector.load %arg1[%c15, %c0_167, %c0_168, %c0_169] : memref<16x16x8x8xbf16, #tpu.memory_space<vmem>>, vector<1x16x8x8xbf16>
    %228 = vector.shape_cast %227 : vector<1x16x8x8xbf16> to vector<16x8x8xbf16>
    %229 = arith.extf %228 : vector<16x8x8xbf16> to vector<16x8x8xf32>
    %cst_170 = arith.constant dense<0.000000e+00> : vector<8x8xf32>
    %230 = vector.multi_reduction <add>, %229, %cst_170 [0] : vector<16x8x8xf32> to vector<8x8xf32>
    %cst_171 = arith.constant 6.250000e-02 : f32
    %231 = vector.broadcast %cst_171 : f32 to vector<8x8xf32>
    %232 = arith.mulf %230, %231 : vector<8x8xf32>
    %233 = arith.truncf %232 : vector<8x8xf32> to vector<8x8xbf16>
    %cst_172 = arith.constant dense<0.000000e+00> : vector<8x128xf32>
    %234 = tpu.matmul %233, %0, %cst_172 {dimension_numbers = #tpu.dot_dimension_numbers<[1], [0], [0], [1], [0, 0, 1, 1], [], []>} : vector<8x8xbf16>, vector<8x128xbf16>, vector<8x128xf32> -> vector<8x128xf32>
    %cst_173 = arith.constant 0.000000e+00 : f32
    %235 = vector.broadcast %cst_173 : f32 to vector<8x128xf32>
    %236 = arith.maximumf %234, %235 : vector<8x128xf32>
    %237 = arith.truncf %236 : vector<8x128xf32> to vector<8x128xbf16>
    %c15_174 = arith.constant 15 : index
    %c0_175 = arith.constant 0 : index
    %c0_176 = arith.constant 0 : index
    %238 = vector.load %arg3[%c15_174, %c0_175, %c0_176] : memref<16x128x1024xbf16, #tpu.memory_space<vmem>>, vector<1x128x1024xbf16>
    %239 = vector.shape_cast %238 : vector<1x128x1024xbf16> to vector<128x1024xbf16>
    %cst_177 = arith.constant dense<0.000000e+00> : vector<8x1024xf32>
    %240 = tpu.matmul %237, %239, %cst_177 {dimension_numbers = #tpu.dot_dimension_numbers<[1], [0], [0], [1], [0, 0, 1, 1], [], []>} : vector<8x128xbf16>, vector<128x1024xbf16>, vector<8x1024xf32> -> vector<8x1024xf32>
    %241 = arith.addf %226, %240 : vector<8x1024xf32>
    %c0_178 = arith.constant 0 : index
    %c0_179 = arith.constant 0 : index
    %242 = vector.load %arg4[%c0_178, %c0_179] : memref<1x1024xf32, #tpu.memory_space<vmem>>, vector<1x1024xf32>
    %243 = vector.broadcast %242 : vector<1x1024xf32> to vector<8x1024xf32>
    %244 = arith.addf %241, %243 : vector<8x1024xf32>
    %cst_180 = arith.constant 0.000000e+00 : f32
    %245 = vector.broadcast %cst_180 : f32 to vector<8x1024xf32>
    %246 = arith.maximumf %244, %245 : vector<8x1024xf32>
    %247 = arith.truncf %246 : vector<8x1024xf32> to vector<8x1024xbf16>
    %c0_181 = arith.constant 0 : index
    %c0_182 = arith.constant 0 : index
    %248 = vector.load %arg5[%c0_181, %c0_182] : memref<1024x128xbf16, #tpu.memory_space<vmem>>, vector<1024x128xbf16>
    %cst_183 = arith.constant dense<0.000000e+00> : vector<8x128xf32>
    %249 = tpu.matmul %247, %248, %cst_183 {dimension_numbers = #tpu.dot_dimension_numbers<[1], [0], [0], [1], [0, 0, 1, 1], [], []>} : vector<8x1024xbf16>, vector<1024x128xbf16>, vector<8x128xf32> -> vector<8x128xf32>
    %c0_184 = arith.constant 0 : index
    %c0_185 = arith.constant 0 : index
    %250 = vector.load %arg6[%c0_184, %c0_185] : memref<1x128xf32, #tpu.memory_space<vmem>>, vector<1x128xf32>
    %251 = vector.broadcast %250 : vector<1x128xf32> to vector<8x128xf32>
    %252 = arith.addf %249, %251 : vector<8x128xf32>
    %c0_186 = arith.constant 0 : index
    %c0_187 = arith.constant 0 : index
    %253 = vector.load %arg7[%c0_186, %c0_187] : memref<8x128xf32, #tpu.memory_space<vmem>>, vector<8x128xf32>
    tpu.vector_store %arg7[%c0_186, %c0_187], %252 {strides = array<i32>} : memref<8x128xf32, #tpu.memory_space<vmem>>, vector<8x128xf32>,
    return
  }
  func.func @transform_0(%arg0: i32) -> (i32, i32, i32, i32) {
    %c0_i32 = arith.constant 0 : i32
    %c0_i32_0 = arith.constant 0 : i32
    %c0_i32_1 = arith.constant 0 : i32
    %c0_i32_2 = arith.constant 0 : i32
    return %c0_i32, %c0_i32_0, %arg0, %c0_i32_1 : i32, i32, i32, i32
  }
  func.func @transform_1(%arg0: i32) -> (i32, i32) {
    %c0_i32 = arith.constant 0 : i32
    %c0_i32_0 = arith.constant 0 : i32
    %c0_i32_1 = arith.constant 0 : i32
    return %c0_i32, %c0_i32_0 : i32, i32
  }
  func.func @transform_2(%arg0: i32) -> (i32, i32, i32) {
    %c0_i32 = arith.constant 0 : i32
    %c0_i32_0 = arith.constant 0 : i32
    %c0_i32_1 = arith.constant 0 : i32
    %c0_i32_2 = arith.constant 0 : i32
    return %c0_i32, %c0_i32_0, %c0_i32_1 : i32, i32, i32
  }
  func.func @transform_3(%arg0: i32) -> (i32, i32) {
    %c0_i32 = arith.constant 0 : i32
    %c0_i32_0 = arith.constant 0 : i32
    %c0_i32_1 = arith.constant 0 : i32
    return %c0_i32, %c0_i32_0 : i32, i32
  }
  func.func @transform_4(%arg0: i32) -> (i32, i32) {
    %c0_i32 = arith.constant 0 : i32
    %c0_i32_0 = arith.constant 0 : i32
    %c0_i32_1 = arith.constant 0 : i32
    return %c0_i32, %c0_i32_0 : i32, i32
  }
  func.func @transform_5(%arg0: i32) -> (i32, i32) {
    %c0_i32 = arith.constant 0 : i32
    %c0_i32_0 = arith.constant 0 : i32
    %c0_i32_1 = arith.constant 0 : i32
    return %c0_i32, %c0_i32_0 : i32, i32
  }
  func.func @transform_6(%arg0: i32) -> (i32, i32) {
    %c0_i32 = arith.constant 0 : i32
    %c0_i32_0 = arith.constant 0 : i32
    return %arg0, %c0_i32 : i32, i32
  }
}

</mosaic_0001>

<bundles_post_ra>
// kernel: tpu_custom_call.1
= control target key start
LH: loop header
LB: loop body
LE: loop exit
PB: predicated region body
PF: predicated region fallthrough
CT: control target
= control target key end

     0   :  { %11 = vsyncpa [#allocation3], 0  ;;  %s15547_s0 = inlined_call_operand.vmem [shape: bf16[16,16,8,8], index: 0, kind: input, shape index: {}]   ;;  %s15548_s1 = inlined_call_operand.hbm [shape: bf16[8,128], index: 1, kind: input, shape index: {}]   ;;  %s15549_s2 = inlined_call_operand.hbm [shape: bf16[16,128,1024], index: 2, kind: input, shape index: {}]   ;;  %s15550_s3 = inlined_call_operand.hbm [shape: f32[1,1024], index: 3, kind: input, shape index: {}]   ;;  %s15551_s4 = inlined_call_operand.hbm [shape: bf16[1024,128], index: 4, kind: input, shape index: {}]   ;;  %s15552_s5 = inlined_call_operand.hbm [shape: f32[1,128], index: 5, kind: input, shape index: {}]   ;;  %s15553_s6 = inlined_call_operand.hbm [shape: f32[8,128], index: 6, kind: output, shape index: {}]  }
   0x1   :  { %12 = vsyncpa [#allocation6], 0 }
   0x2   :  { %13 = vsyncpa [#allocation9], 0 }
   0x3   :  { %14 = vsyncpa [#allocation4], 0  ;;  %s13931_s21 = smov [#allocation5]  }
   0x4   :  { %s32_s22 = sshll.u32 %s13931_s21, 4  ;;  %s33_s22 = int_to_ptr.vmem [resolvable:$true] %s32_s22 }
   0x5   :  { %s13811_s23 = scalar_lea.vmem %s33_s22, 131072  ;;  %p13816_p1 = scmp.lt.s32.totalorder %s33_s22, %s33_s22 }
   0x6   :  { %p13812_p0 = scmp.ne.s32.totalorder %s33_s22, %s13811_s23  ;;  %p13817_p2 = scmp.lt.s32.totalorder %s13811_s23, %s13811_s23 }
   0x8   :  { %p13818_p3 = por %p13817_p2, %p13816_p1 }
   0xa   :  { %p13819_p4 = pnand %p13818_p3, %p13812_p0 }
   0xc   :  { %13822 = shalt.err (!%p13819_p4)
}
   0xd   :  { %s13932_s24 = smov 512   ;;  %s13933_s25 = smov 32  }
   0xe   :  { %38 = dma.hbm_to_vmem [thread:$0]  %s15549_s2, 131072, %s33_s22, [#allocation6], %s13932_s24, %s13932_s24, %s13933_s25  }
   0xf   :  { %s13934_s28 = smov [#allocation8]  }
  0x10   :  { %s54_s29 = sshll.u32 %s13934_s28, 4  ;;  %s55_s29 = int_to_ptr.vmem [resolvable:$true] %s54_s29 }
  0x11   :  { %s13831_s30 = scalar_lea.vmem %s55_s29, 8192  ;;  %p13836_p6 = scmp.lt.s32.totalorder %s55_s29, %s55_s29 }
  0x12   :  { %p13832_p5 = scmp.ne.s32.totalorder %s55_s29, %s13831_s30  ;;  %p13837_p7 = scmp.lt.s32.totalorder %s13831_s30, %s13831_s30 }
  0x14   :  { %p13838_p8 = por %p13837_p7, %p13836_p6 }
  0x16   :  { %p13839_p9 = pnand %p13838_p8, %p13832_p5 }
  0x18   :  { %13842 = shalt.err (!%p13839_p9)
}
  0x19   :  { %s13935_s7 = smov 64   ;;  %s13936_s8 = smov 4  }
  0x1a   :  { %60 = dma.hbm_to_vmem [thread:$0]  %s15551_s4, 8192, %s55_s29, [#allocation9], %s13935_s7, %s13935_s7, %s13936_s8  }
  0x1b   :  { %s13937_s11 = smov [#allocation2]   ;;  %s13938_s13 = smov [#allocation7]  }
  0x1c   :  { %s23_s12 = sshll.u32 %s13937_s11, 4  ;;  %s45_s2 = sshll.u32 %s13938_s13, 4  ;;  %s24_s12 = int_to_ptr.vmem [resolvable:$true] %s23_s12  ;;  %s46_s2 = int_to_ptr.vmem [resolvable:$true] %s45_s2 }
  0x1d   :  { %s13851_s14 = scalar_lea.vmem %s24_s12, 64  ;;  %p13856_p11 = scmp.lt.s32.totalorder %s24_s12, %s24_s12 }
  0x1e   :  { %p13852_p10 = scmp.ne.s32.totalorder %s24_s12, %s13851_s14  ;;  %p13857_p12 = scmp.lt.s32.totalorder %s13851_s14, %s13851_s14 }
  0x20   :  { %p13858_p13 = por %p13857_p12, %p13856_p11 }
  0x22   :  { %p13859_p0 = pnand %p13858_p13, %p13852_p10 }
  0x24   :  { %13862 = shalt.err (!%p13859_p0)
}
  0x25   :  { %26 = dma.hbm_to_vmem [thread:$0]  %s15548_s1, 64, %s24_s12, [#allocation3]  }
  0x26   :  { %s13871_s17 = scalar_lea.vmem %s46_s2, 128  ;;  %p13876_p2 = scmp.lt.s32.totalorder %s46_s2, %s46_s2 }
  0x27   :  { %p13872_p1 = scmp.ne.s32.totalorder %s46_s2, %s13871_s17  ;;  %p13877_p3 = scmp.lt.s32.totalorder %s13871_s17, %s13871_s17 }
  0x29   :  { %p13878_p4 = por %p13877_p3, %p13876_p2 }
  0x2b   :  { %p13879_p5 = pnand %p13878_p4, %p13872_p1 }
  0x2d   :  { %13882 = shalt.err (!%p13879_p5)
}
  0x2e   :  { %48 = dma.hbm_to_vmem [thread:$0]  %s15550_s3, 128, %s46_s2, [#allocation6]  }
  0x2f   :  { %s13939_s19 = smov [#allocation10]  }
  0x30   :  { %s67_s20 = sshll.u32 %s13939_s19, 4  ;;  %s68_s20 = int_to_ptr.vmem [resolvable:$true] %s67_s20 }
  0x31   :  { %s13891_s21 = scalar_lea.vmem %s68_s20, 16  ;;  %s13895_s22 = scalar_lea.vmem %s68_s20, 32 }
  0x32   :  { %p13892_p6 = scmp.ne.s32.totalorder %s68_s20, %s13891_s21  ;;  %p13896_p7 = scmp.lt.s32.totalorder %s68_s20, %s68_s20 }
  0x33   :  { %p13897_p8 = scmp.lt.s32.totalorder %s13895_s22, %s13891_s21 }
  0x35   :  { %p13898_p9 = por %p13897_p8, %p13896_p7 }
  0x37   :  { %p13899_p10 = pnand %p13898_p9, %p13892_p6 }
  0x39   :  { %13902 = shalt.err (!%p13899_p10)
}
  0x3a   :  { %70 = dma.hbm_to_vmem [thread:$0]  %s15552_s5, 16, %s68_s20, [#allocation9]  }
  0x3b   :  { %13923 = dma.done.wait [#allocation3], 64  }
  0x3c   :  { %13924 = vsyncadd [#allocation3], 4294967232 }
  0x3d   :  { %13925 = dma.done.wait [#allocation6], 131200  }
  0x3e   :  { %13926 = vsyncadd [#allocation6], 4294836096 }
  0x3f   :  { %13927 = dma.done.wait [#allocation9], 8208  }
  0x40   :  { %13928 = vsyncadd [#allocation9], 4294959088  ;;  %v13940_v0 = vmov 0.0   ;;  %vm13941_vm0 = vmmov 0   ;;  %vm157_vm1 = vcmask 1043456   ;;  %v13390_v2 = vld [vmem:[%s15547_s0 + $0x40] sm:$0xff]  }
  0x41   :  { %13636 = vmatprep.subr.bf16.mxu1 %v13940_v0  ;;  %13638 = vmatprep.mubr.msk.bf16.mxu1 %vm13941_vm0, %v13940_v0  ;;  %v87_v1 = vld [vmem:[#allocation2] sm:$0xf]  ;;  %v13391_v3 = vld [vmem:[%s15547_s0 + $0x48] sm:$0xff]   ;;  %v12905_v5 = vunpack.c.l.bf16 %v13390_v2  ;;  %v12906_v6 = vunpack.c.h.bf16 %v13390_v2  ;;  %v13392_v8 = vld [vmem:[%s15547_s0 + $0x50] sm:$0xff]   ;;  %vm120_vm2 = vcmask 64512  }
  0x42   :  { %13630 = vmatprep.subr.bf16.mxu0 %v13940_v0  ;;  %13632 = vmatprep.mubr.msk.bf16.mxu0 %vm13941_vm0, %v13940_v0  ;;  %v14006_v4 = vsel %vm157_vm1, %v87_v1, 0  ;;  %v12909_v7 = vunpack.c.l.bf16 %v13391_v3  ;;  %v13393_v9 = vld [vmem:[%s15547_s0 + $0x58] sm:$0xff]   ;;  %v13394_v10 = vld [vmem:[%s15547_s0 + $0x60] sm:$0xff]   ;;  %v12910_v11 = vunpack.c.h.bf16 %v13391_v3  ;;  %v12913_v12 = vunpack.c.l.bf16 %v13392_v8  ;;  %v13395_v14 = vld [vmem:[%s15547_s0 + $0x68] sm:$0xff]  }
  0x43   :  { %13637 = vmatpush3.bf16.msra.mxu1 %v14006_v4  ;;  %v12914_v13 = vunpack.c.h.bf16 %v13392_v8  ;;  %v13396_v15 = vld [vmem:[%s15547_s0 + $0x70] sm:$0xff]   ;;  %v13397_v16 = vld [vmem:[%s15547_s0 + $0x78] sm:$0xff]   ;;  %13631 = vmatpush3.bf16.msra.mxu0 %v14006_v4  ;;  %v12917_v17 = vunpack.c.l.bf16 %v13393_v9  ;;  %v12918_v18 = vunpack.c.h.bf16 %v13393_v9  ;;  %v12921_v19 = vunpack.c.l.bf16 %v13394_v10  ;;  %v12872_v36 = vld [vmem:[%s15547_s0] sm:$0xff]  }
  0x44   :  { %v12922_v20 = vunpack.c.h.bf16 %v13394_v10  ;;  %v12925_v21 = vunpack.c.l.bf16 %v13395_v14  ;;  %v12926_v22 = vunpack.c.h.bf16 %v13395_v14  ;;  %v12929_v23 = vunpack.c.l.bf16 %v13396_v15  ;;  %v13383_v41 = vld [vmem:[%s15547_s0 + $0x8] sm:$0xff]   ;;  %v13384_v42 = vld [vmem:[%s15547_s0 + $0x10] sm:$0xff]   ;;  %v13385_v47 = vld [vmem:[%s15547_s0 + $0x18] sm:$0xff]  }
  0x45   :  { %v12930_v24 = vunpack.c.h.bf16 %v13396_v15  ;;  %v12933_v25 = vunpack.c.l.bf16 %v13397_v16  ;;  %v300_v26 = vsel %vm120_vm2, %v12905_v5, 0.0  ;;  %v301_v27 = vsel %vm120_vm2, %v12906_v6, 0.0  ;;  %v13386_v48 = vld [vmem:[%s15547_s0 + $0x20] sm:$0xff]   ;;  %v13387_v53 = vld [vmem:[%s15547_s0 + $0x28] sm:$0xff]   ;;  %v13388_v54 = vld [vmem:[%s15547_s0 + $0x30] sm:$0xff]  }
  0x46   :  { %v303_v28 = vsel %vm120_vm2, %v12909_v7, 0.0  ;;  %v12934_v29 = vunpack.c.h.bf16 %v13397_v16  ;;  %v302_v30 = vadd.f32 %v301_v27, %v300_v26  ;;  %v305_v31 = vsel %vm120_vm2, %v12910_v11, 0.0  ;;  %v13389_v63 = vld [vmem:[%s15547_s0 + $0x38] sm:$0xff]   ;;  %v14082_v14 = vld [vmem:[#allocation5 + $0x3c0] sm:$0xff] }
  0x47   :  { %v307_v32 = vsel %vm120_vm2, %v12913_v12, 0.0  ;;  %v309_v33 = vsel %vm120_vm2, %v12914_v13, 0.0  ;;  %v311_v34 = vsel %vm120_vm2, %v12917_v17, 0.0  ;;  %v313_v35 = vsel %vm120_vm2, %v12918_v18, 0.0  ;;  %v14084_v15 = vld [vmem:[#allocation5 + $0x3e0] sm:$0xff] }
  0x48   :  { %v304_v37 = vadd.f32 %v303_v28, %v302_v30  ;;  %v315_v38 = vsel %vm120_vm2, %v12921_v19, 0.0  ;;  %v317_v39 = vsel %vm120_vm2, %v12922_v20, 0.0  ;;  %v14042_v40 = vsel %vm120_vm2, %v12925_v21, 0.0  ;;  %v436_v20 = vld [vmem:[#allocation5 + $0x3c8] sm:$0xff] }
  0x49   :  { %v321_v43 = vsel %vm120_vm2, %v12926_v22, 0.0  ;;  %v14052_v44 = vsel %vm120_vm2, %v12929_v23, 0.0  ;;  %v14055_v45 = vsel %vm120_vm2, %v12930_v24, 0.0  ;;  %v14058_v46 = vsel %vm120_vm2, %v12933_v25, 0.0  ;;  %v440_v25 = vld [vmem:[#allocation5 + $0x3e8] sm:$0xff] }
  0x4a   :  { %v306_v49 = vadd.f32 %v305_v31, %v304_v37  ;;  %v14067_v50 = vsel %vm120_vm2, %v12934_v29, 0.0  ;;  %v12873_v51 = vunpack.c.l.bf16 %v12872_v36  ;;  %v12874_v52 = vunpack.c.h.bf16 %v12872_v36 }
  0x4b   :  { %v12877_v55 = vunpack.c.l.bf16 %v13383_v41  ;;  %v12878_v56 = vunpack.c.h.bf16 %v13383_v41  ;;  %v12881_v57 = vunpack.c.l.bf16 %v13384_v42  ;;  %v12882_v58 = vunpack.c.h.bf16 %v13384_v42 }
  0x4c   :  { %v308_v59 = vadd.f32 %v307_v32, %v306_v49  ;;  %v12885_v60 = vunpack.c.l.bf16 %v13385_v47  ;;  %v12886_v61 = vunpack.c.h.bf16 %v13385_v47  ;;  %v12889_v62 = vunpack.c.l.bf16 %v13386_v48 }
  0x4d   :  { %v12890_v1 = vunpack.c.h.bf16 %v13386_v48  ;;  %v12893_v2 = vunpack.c.l.bf16 %v13387_v53  ;;  %v12894_v3 = vunpack.c.h.bf16 %v13387_v53  ;;  %v12897_v5 = vunpack.c.l.bf16 %v13388_v54 }
  0x4e   :  { %v310_v6 = vadd.f32 %v309_v33, %v308_v59  ;;  %v12898_v7 = vunpack.c.h.bf16 %v13388_v54  ;;  %v121_v8 = vsel %vm120_vm2, %v12873_v51, 0.0  ;;  %v122_v9 = vsel %vm120_vm2, %v12874_v52, 0.0 }
  0x4f   :  { %v12901_v10 = vunpack.c.l.bf16 %v13389_v63  ;;  %v123_v11 = vadd.f32 %v122_v9, %v121_v8  ;;  %v124_v12 = vsel %vm120_vm2, %v12877_v55, 0.0  ;;  %v126_v13 = vsel %vm120_vm2, %v12878_v56, 0.0 }
  0x50   :  { %v312_v16 = vadd.f32 %v311_v34, %v310_v6  ;;  %v128_v17 = vsel %vm120_vm2, %v12881_v57, 0.0  ;;  %v130_v18 = vsel %vm120_vm2, %v12882_v58, 0.0  ;;  %v132_v19 = vsel %vm120_vm2, %v12885_v60, 0.0  ;;  %v428_v57 = vld [vmem:[#allocation5 + $0x388] sm:$0xff]  ;;  %v427_v6 = vld [vmem:[#allocation5 + $0x380] sm:$0xff] }
  0x51   :  { %v125_v21 = vadd.f32 %v124_v12, %v123_v11  ;;  %v134_v22 = vsel %vm120_vm2, %v12886_v61, 0.0  ;;  %v136_v23 = vsel %vm120_vm2, %v12889_v62, 0.0  ;;  %v138_v24 = vsel %vm120_vm2, %v12890_v1, 0.0  ;;  %v420_v62 = vld [vmem:[#allocation5 + $0x348] sm:$0xff] }
  0x52   :  { %v314_v26 = vadd.f32 %v313_v35, %v312_v16  ;;  %v140_v27 = vsel %vm120_vm2, %v12893_v2, 0.0  ;;  %v142_v28 = vsel %vm120_vm2, %v12894_v3, 0.0  ;;  %v144_v29 = vsel %vm120_vm2, %v12897_v5, 0.0  ;;  %v412_v3 = vld [vmem:[#allocation5 + $0x308] sm:$0xff]  ;;  %v419_v16 = vld [vmem:[#allocation5 + $0x340] sm:$0xff] }
  0x53   :  { %v127_v30 = vadd.f32 %v126_v13, %v125_v21  ;;  %v146_v31 = vsel %vm120_vm2, %v12898_v7, 0.0  ;;  %v148_v32 = vsel %vm120_vm2, %v12901_v10, 0.0  ;;  %v11601_v34 = vcombine.high %v14082_v14, %v14084_v15  ;;  %v416_v5 = vld [vmem:[#allocation5 + $0x328] sm:$0xff] }
  0x54   :  { %v316_v33 = vadd.f32 %v315_v38, %v314_v26  ;;  %v11603_v36 = vcombine.high %v436_v20, %v440_v25  ;;  %v12902_v55 = vunpack.c.h.bf16 %v13389_v63  ;;  %v11602_v61 = vcombine.low %v436_v20, %v440_v25  ;;  %v404_v11 = vld [vmem:[#allocation5 + $0x2c8] sm:$0xff]  ;;  %v411_v25 = vld [vmem:[#allocation5 + $0x300] sm:$0xff] }
  0x55   :  { %v129_v37 = vadd.f32 %v128_v17, %v127_v30  ;;  %763 = vmatprep.subr.bf16.mxu0 %v11601_v34  ;;  %v408_v12 = vld [vmem:[#allocation5 + $0x2e8] sm:$0xff]  ;;  %v11600_v13 = vcombine.low %v14082_v14, %v14084_v15  ;;  %v423_v17 = vld [vmem:[#allocation5 + $0x360] sm:$0xff]  ;;  %v11578_v21 = vcombine.low %v412_v3, %v416_v5 }
  0x56   :  { %v318_v41 = vadd.f32 %v317_v39, %v316_v33  ;;  %804 = vmatprep.subr.bf16.mxu1 %v11603_v36  ;;  %v432_v39 = vld [vmem:[#allocation5 + $0x3a8] sm:$0xff]  ;;  %v415_v26 = vld [vmem:[#allocation5 + $0x320] sm:$0xff]  ;;  %v11585_v14 = vcombine.high %v419_v16, %v423_v17  ;;  %v11570_v15 = vcombine.low %v404_v11, %v408_v12  ;;  %v11584_v30 = vcombine.low %v419_v16, %v423_v17  ;;  %v421_v16 = vld [vmem:[#allocation5 + $0x350] sm:$0xff] }
  0x57   :  { %v131_v35 = vadd.f32 %v130_v18, %v129_v37  ;;  %v11595_v2 = vcombine.high %v428_v57, %v432_v39  ;;  %v11594_v63 = vcombine.low %v428_v57, %v432_v39  ;;  %v11579_v18 = vcombine.high %v412_v3, %v416_v5  ;;  %v383_v57 = vld [vmem:[#allocation5 + $0x220] sm:$0xff]  ;;  %v380_v39 = vld [vmem:[#allocation5 + $0x208] sm:$0xff]  ;;  %v429_v5 = vld [vmem:[#allocation5 + $0x390] sm:$0xff] }
  0x58   :  { %v320_v42 = vadd.f32 %v14042_v40, %v318_v41  ;;  %v150_v40 = vsel %vm120_vm2, %v12902_v55, 0.0  ;;  %v11577_v34 = vcombine.high %v411_v25, %v415_v26  ;;  %v11576_v37 = vcombine.low %v411_v25, %v415_v26  ;;  %v395_v41 = vld [vmem:[#allocation5 + $0x280] sm:$0xff]  ;;  %v413_v26 = vld [vmem:[#allocation5 + $0x310] sm:$0xff] }
  0x59   :  { %v133_v47 = vadd.f32 %v132_v19, %v131_v35  ;;  %v399_v35 = vld [vmem:[#allocation5 + $0x2a0] sm:$0xff]  ;;  %v13942_v3 = vmov 0  }
  0x5a   :  { %v322_v48 = vadd.f32 %v321_v43, %v320_v42 }
  0x5b   :  { %v135_v49 = vadd.f32 %v134_v22, %v133_v47  ;;  %v396_v22 = vld [vmem:[#allocation5 + $0x288] sm:$0xff] }
  0x5c   :  { %v324_v51 = vadd.f32 %v14052_v44, %v322_v48  ;;  %v424_v44 = vld [vmem:[#allocation5 + $0x368] sm:$0xff] }
  0x5d   :  { %v137_v52 = vadd.f32 %v136_v23, %v135_v49  ;;  %v11587_v7 = vcombine.high %v420_v62, %v424_v44  ;;  %v11586_v10 = vcombine.low %v420_v62, %v424_v44  ;;  %v400_v23 = vld [vmem:[#allocation5 + $0x2a8] sm:$0xff]  ;;  %v441_v62 = vld [vmem:[#allocation5 + $0x3f0] sm:$0xff]  ;;  %v438_v44 = vld [vmem:[#allocation5 + $0x3d8] sm:$0xff] }
  0x5e   :  { %v326_v53 = vadd.f32 %v14055_v45, %v324_v51  ;;  %v11563_v33 = vcombine.high %v396_v22, %v400_v23  ;;  %v11562_v36 = vcombine.low %v396_v22, %v400_v23  ;;  %v11561_v51 = vcombine.high %v395_v41, %v399_v35 }
  0x5f   :  { %v139_v38 = vadd.f32 %v138_v24, %v137_v52  ;;  %v387_v52 = vld [vmem:[#allocation5 + $0x240] sm:$0xff] }
  0x60   :  { %v328_v54 = vadd.f32 %v14058_v46, %v326_v53  ;;  %v391_v53 = vld [vmem:[#allocation5 + $0x260] sm:$0xff] }
  0x61   :  { %v141_v56 = vadd.f32 %v140_v27, %v139_v38  ;;  %v11571_v27 = vcombine.high %v404_v11, %v408_v12  ;;  %v11560_v38 = vcombine.low %v395_v41, %v399_v35  ;;  %v11552_v55 = vcombine.low %v387_v52, %v391_v53  ;;  %v410_v41 = vld [vmem:[#allocation5 + $0x2f8] sm:$0xff] }
  0x62   :  { %v330_v58 = vadd.f32 %v14067_v50, %v328_v54  ;;  %v431_v50 = vld [vmem:[#allocation5 + $0x3a0] sm:$0xff]  ;;  %v11553_v54 = vcombine.high %v387_v52, %v391_v53  ;;  %v401_v53 = vld [vmem:[#allocation5 + $0x2b0] sm:$0xff] }
  0x63   :  { %v143_v59 = vadd.f32 %v142_v28, %v141_v56  ;;  %v11593_v20 = vcombine.high %v427_v6, %v431_v50  ;;  %v11592_v24 = vcombine.low %v427_v6, %v431_v50  ;;  %v388_v28 = vld [vmem:[#allocation5 + $0x248] sm:$0xff]  ;;  %v379_v56 = vld [vmem:[#allocation5 + $0x200] sm:$0xff]  ;;  %v433_v50 = vld [vmem:[#allocation5 + $0x3b0] sm:$0xff] }
  0x64   :  { %v331_v60 = vmul.f32 0.0625, %v330_v58  ;;  %v11545_v58 = vcombine.high %v379_v56, %v383_v57  ;;  %v11597_v12 = vcombine.high %v429_v5, %v433_v50  ;;  %v11596_v22 = vcombine.low %v429_v5, %v433_v50 }
  0x65   :  { %v145_v43 = vadd.f32 %v144_v29, %v143_v59  ;;  %v392_v29 = vld [vmem:[#allocation5 + $0x268] sm:$0xff] }
  0x66   :  { %v332_v1 = vpack.c.bf16 %v331_v60, %v331_v60  ;;  %v11555_v42 = vcombine.high %v388_v28, %v392_v29  ;;  %v11554_v48 = vcombine.low %v388_v28, %v392_v29  ;;  %v384_v59 = vld [vmem:[#allocation5 + $0x228] sm:$0xff]  ;;  %v11544_v60 = vcombine.low %v379_v56, %v383_v57 }
  0x67   :  { %v147_v45 = vadd.f32 %v146_v31, %v145_v43  ;;  %v403_v31 = vld [vmem:[#allocation5 + $0x2c0] sm:$0xff]  ;;  %v11547_v43 = vcombine.high %v380_v39, %v384_v59 }
  0x68   :  { %13639 = vmatmul.mubr.msk.bf16.vlgmr.msra.gmra.mxu1 %vm120_vm2, %v332_v1 }
  0x69   :  { %v149_v46 = vadd.f32 %v148_v32, %v147_v45  ;;  %805 = vmatpush1.bf16.msra.mxu1 %v11602_v61  ;;  %v407_v32 = vld [vmem:[#allocation5 + $0x2e0] sm:$0xff]  ;;  %v437_v61 = vld [vmem:[#allocation5 + $0x3d0] sm:$0xff]  ;;  %836 = vmatprep.mubr.bf16.mxu1 %v13942_v3 }
  0x6a   :  { %806 = vmatprep.subr.bf16.mxu1 %v11595_v2  ;;  %v11569_v47 = vcombine.high %v403_v31, %v407_v32  ;;  %v11568_v49 = vcombine.low %v403_v31, %v407_v32  ;;  %v11605_v1 = vcombine.high %v437_v61, %v441_v62  ;;  %v442_v2 = vld [vmem:[#allocation5 + $0x3f8] sm:$0xff]  ;;  %v11604_v45 = vcombine.low %v437_v61, %v441_v62 }
  0x6b   :  { %v151_v8 = vadd.f32 %v150_v40, %v149_v46  ;;  %v11546_v40 = vcombine.low %v380_v39, %v384_v59  ;;  %v11606_v46 = vcombine.low %v438_v44, %v442_v2  ;;  %v393_v59 = vld [vmem:[#allocation5 + $0x270] sm:$0xff] }
  0x6d   :  { %v152_v9 = vmul.f32 0.0625, %v151_v8  ;;  %807 = vmatpush1.bf16.msra.mxu1 %v11594_v63  ;;  %v11607_v63 = vcombine.high %v438_v44, %v442_v2  ;;  %v434_v8 = vld [vmem:[#allocation5 + $0x3b8] sm:$0xff]  ;;  %v385_v2 = vld [vmem:[#allocation5 + $0x230] sm:$0xff] }
  0x6e   :  { %808 = vmatprep.subr.bf16.mxu1 %v11587_v7  ;;  %v430_v7 = vld [vmem:[#allocation5 + $0x398] sm:$0xff] }
  0x6f   :  { %v153_v19 = vpack.c.bf16 %v152_v9, %v152_v9  ;;  %v11598_v23 = vcombine.low %v430_v7, %v434_v8 }
  0x71   :  { %13633 = vmatmul.mubr.msk.bf16.vlgmr.msra.gmra.mxu0 %vm120_vm2, %v153_v19  ;;  %809 = vmatpush1.bf16.msra.mxu1 %v11586_v10  ;;  %v422_v19 = vld [vmem:[#allocation5 + $0x358] sm:$0xff] }
  0x72   :  { %764 = vmatpush1.bf16.msra.mxu0 %v11600_v13  ;;  %810 = vmatprep.subr.bf16.mxu1 %v11579_v18  ;;  %v11599_v13 = vcombine.high %v430_v7, %v434_v8  ;;  %v425_v18 = vld [vmem:[#allocation5 + $0x370] sm:$0xff]  ;;  %v259_v7 = vld [vmem:[#allocation5 + $0x1c0] sm:$0xff] }
  0x73   :  { %765 = vmatprep.subr.bf16.mxu0 %v11593_v20  ;;  %795 = vmatprep.mubr.bf16.mxu0 %v13942_v3  ;;  %v426_v20 = vld [vmem:[#allocation5 + $0x378] sm:$0xff]  ;;  %v11588_v29 = vcombine.low %v421_v16, %v425_v18  ;;  %v263_v8 = vld [vmem:[#allocation5 + $0x1e0] sm:$0xff] }
  0x74   :  { %v11591_v25 = vcombine.high %v422_v19, %v426_v20 }
  0x75   :  { %811 = vmatpush1.bf16.msra.mxu1 %v11578_v21 }
  0x76   :  { %766 = vmatpush1.bf16.msra.mxu0 %v11592_v24  ;;  %812 = vmatprep.subr.bf16.mxu1 %v11571_v27  ;;  %v11589_v24 = vcombine.high %v421_v16, %v425_v18  ;;  %v417_v27 = vld [vmem:[#allocation5 + $0x330] sm:$0xff]  ;;  %v11665_v16 = vcombine.high %v259_v7, %v263_v8  ;;  %v251_v18 = vld [vmem:[#allocation5 + $0x180] sm:$0xff] }
  0x77   :  { %767 = vmatprep.subr.bf16.mxu0 %v11585_v14  ;;  %v414_v14 = vld [vmem:[#allocation5 + $0x318] sm:$0xff]  ;;  %v11581_v31 = vcombine.high %v413_v26, %v417_v27 }
  0x79   :  { %813 = vmatpush1.bf16.msra.mxu1 %v11570_v15  ;;  %v418_v15 = vld [vmem:[#allocation5 + $0x338] sm:$0xff] }
  0x7a   :  { %768 = vmatpush1.bf16.msra.mxu0 %v11584_v30  ;;  %814 = vmatprep.subr.bf16.mxu1 %v11563_v33  ;;  %v11590_v30 = vcombine.low %v422_v19, %v426_v20  ;;  %v11583_v32 = vcombine.high %v414_v14, %v418_v15  ;;  %v405_v33 = vld [vmem:[#allocation5 + $0x2d0] sm:$0xff]  ;;  %v13398_v19 = vld [vmem:[%s15547_s0 + $0x80] sm:$0xff]  }
  0x7b   :  { %769 = vmatprep.subr.bf16.mxu0 %v11577_v34  ;;  %v255_v20 = vld [vmem:[#allocation5 + $0x1a0] sm:$0xff] }
  0x7d   :  { %815 = vmatpush1.bf16.msra.mxu1 %v11562_v36  ;;  %v409_v36 = vld [vmem:[#allocation5 + $0x2f0] sm:$0xff] }
  0x7e   :  { %770 = vmatpush1.bf16.msra.mxu0 %v11576_v37  ;;  %816 = vmatprep.subr.bf16.mxu1 %v11555_v42  ;;  %v406_v37 = vld [vmem:[#allocation5 + $0x2d8] sm:$0xff]  ;;  %v11580_v42 = vcombine.low %v413_v26, %v417_v27  ;;  %v12938_v26 = vunpack.c.h.bf16 %v13398_v19  ;;  %v11657_v27 = vcombine.high %v251_v18, %v255_v20 }
  0x7f   :  { %771 = vmatprep.subr.bf16.mxu0 %v11569_v47  ;;  %v11582_v47 = vcombine.low %v414_v14, %v418_v15  ;;  %v11574_v56 = vcombine.low %v406_v37, %v410_v41  ;;  %v243_v15 = vld [vmem:[#allocation5 + $0x140] sm:$0xff] }
  0x81   :  { %817 = vmatpush1.bf16.msra.mxu1 %v11554_v48  ;;  %v11573_v48 = vcombine.high %v405_v33, %v409_v36 }
  0x82   :  { %772 = vmatpush1.bf16.msra.mxu0 %v11568_v49  ;;  %818 = vmatprep.subr.bf16.mxu1 %v11547_v43  ;;  %v11575_v49 = vcombine.high %v406_v37, %v410_v41  ;;  %v1445_v41 = vsel %vm120_vm2, %v12938_v26, 0.0 }
  0x83   :  { %773 = vmatprep.subr.bf16.mxu0 %v11561_v51  ;;  %v397_v51 = vld [vmem:[#allocation5 + $0x290] sm:$0xff] }
  0x84   :  { %v11565_v57 = vcombine.high %v397_v51, %v401_v53  ;;  %v11564_v43 = vcombine.low %v397_v51, %v401_v53  ;;  %v240_v51 = vld [vmem:[#allocation5 + $0x128] sm:$0xff] }
  0x85   :  { %819 = vmatpush1.bf16.msra.mxu1 %v11546_v40  ;;  %v394_v40 = vld [vmem:[#allocation5 + $0x278] sm:$0xff] }
  0x86   :  { %774 = vmatpush1.bf16.msra.mxu0 %v11560_v38  ;;  %886 = vmatprep.subr.bf16.mxu1 %v11607_v63  ;;  %v398_v38 = vld [vmem:[#allocation5 + $0x298] sm:$0xff] }
  0x87   :  { %775 = vmatprep.subr.bf16.mxu0 %v11553_v54  ;;  %v402_v54 = vld [vmem:[#allocation5 + $0x2b8] sm:$0xff] }
  0x88   :  { %v11567_v39 = vcombine.high %v398_v38, %v402_v54  ;;  %v11566_v61 = vcombine.low %v398_v38, %v402_v54 }
  0x8a   :  { %776 = vmatpush1.bf16.msra.mxu0 %v11552_v55  ;;  %v11572_v55 = vcombine.low %v405_v33, %v409_v36  ;;  %v11656_v33 = vcombine.low %v251_v18, %v255_v20  ;;  %v212_v18 = vld [vmem:[#allocation5 + $0x48] sm:$0xff] }
  0x8b   :  { %777 = vmatprep.subr.bf16.mxu0 %v11545_v58  ;;  %v389_v58 = vld [vmem:[#allocation5 + $0x250] sm:$0xff] }
  0x8c   :  { %v11557_v62 = vcombine.high %v389_v58, %v393_v59  ;;  %v11556_v63 = vcombine.low %v389_v58, %v393_v59  ;;  %v231_v58 = vld [vmem:[#allocation5 + $0xe0] sm:$0xff]  ;;  %v228_v59 = vld [vmem:[#allocation5 + $0xc8] sm:$0xff] }
  0x8e   :  { %778 = vmatpush1.bf16.msra.mxu0 %v11544_v60  ;;  %v390_v60 = vld [vmem:[#allocation5 + $0x258] sm:$0xff] }
  0x8f   :  { %845 = vmatprep.subr.bf16.mxu0 %v11605_v1  ;;  %v11559_v44 = vcombine.high %v390_v60, %v394_v40  ;;  %v381_v1 = vld [vmem:[#allocation5 + $0x210] sm:$0xff]  ;;  %v11558_v5 = vcombine.low %v390_v60, %v394_v40  ;;  %v232_v60 = vld [vmem:[#allocation5 + $0xe8] sm:$0xff] }
 0x128   :  { %v370_v6 = vpop.f32.mrf.mxu1 }
 0x129   :  { %v376_v9 = vmax.f32 %v370_v6, 0.0  ;;  %v11549_v6 = vcombine.high %v381_v1, %v385_v2 }
 0x12a   :  { %v13640_v10 = vpop.f32.mrf.mxu1 }
 0x12b   :  { %v14111_v11 = vpack.c.bf16 %v376_v9, %v376_v9  ;;  %v260_v9 = vld [vmem:[#allocation5 + $0x1c8] sm:$0xff] }
 0x12c   :  { %v373_v17 = vpop.f32.mrf.mxu1  ;;  %v264_v10 = vld [vmem:[#allocation5 + $0x1e8] sm:$0xff] }
 0x12d   :  { %796 = vmatmul.mubr.bf16.vlgmr.msra.gmra.mxu0 %v14111_v11  ;;  %837 = vmatmul.mubr.bf16.vlgmr.msra.gmra.mxu1 %v14111_v11  ;;  %v11667_v17 = vcombine.high %v260_v9, %v264_v10 }
 0x12e   :  { %846 = vmatpush1.bf16.msra.mxu0 %v11604_v45  ;;  %887 = vmatpush1.bf16.msra.mxu1 %v11606_v46  ;;  %v13641_v21 = vpop.f32.mrf.mxu1  ;;  %v382_v45 = vld [vmem:[#allocation5 + $0x218] sm:$0xff] }
 0x12f   :  { %847 = vmatprep.subr.bf16.mxu0 %v11597_v12  ;;  %888 = vmatprep.subr.bf16.mxu1 %v11599_v13  ;;  %v386_v46 = vld [vmem:[#allocation5 + $0x238] sm:$0xff]  ;;  %v11548_v12 = vcombine.low %v381_v1, %v385_v2  ;;  %v252_v21 = vld [vmem:[#allocation5 + $0x188] sm:$0xff]  ;;  %v11635_v2 = vcombine.high %v228_v59, %v232_v60 }
 0x130   :  { %877 = vmatprep.mubr.bf16.mxu0 %v13942_v3  ;;  %918 = vmatprep.mubr.bf16.mxu1 %v13942_v3  ;;  %v11551_v50 = vcombine.high %v382_v45, %v386_v46  ;;  %v11550_v13 = vcombine.low %v382_v45, %v386_v46  ;;  %v219_v45 = vld [vmem:[#allocation5 + $0x80] sm:$0xff] }
 0x131   :  { %v14117_v28 = vpop.f32.mrf.mxu0  ;;  %v223_v46 = vld [vmem:[#allocation5 + $0xa0] sm:$0xff] }
 0x132   :  { %848 = vmatpush1.bf16.msra.mxu0 %v11596_v22  ;;  %889 = vmatpush1.bf16.msra.mxu1 %v11598_v23  ;;  %v256_v22 = vld [vmem:[#allocation5 + $0x1a8] sm:$0xff]  ;;  %v11664_v23 = vcombine.low %v259_v7, %v263_v8  ;;  %v11634_v7 = vcombine.low %v228_v59, %v232_v60 }
 0x133   :  { %849 = vmatprep.subr.bf16.mxu0 %v11589_v24  ;;  %890 = vmatprep.subr.bf16.mxu1 %v11591_v25  ;;  %v13634_v34 = vpop.f32.mrf.mxu0  ;;  %v11666_v24 = vcombine.low %v260_v9, %v264_v10  ;;  %v12937_v25 = vunpack.c.l.bf16 %v13398_v19  ;;  %v11659_v14 = vcombine.high %v252_v21, %v256_v22  ;;  %v11625_v10 = vcombine.high %v219_v45, %v223_v46  ;;  %v216_v19 = vld [vmem:[#allocation5 + $0x68] sm:$0xff] }
 0x134   :  { %v11658_v34 = vcombine.low %v252_v21, %v256_v22  ;;  %v11624_v21 = vcombine.low %v219_v45, %v223_v46  ;;  %v11619_v26 = vcombine.high %v212_v18, %v216_v19  ;;  %v249_v45 = vld [vmem:[#allocation5 + $0x170] sm:$0xff]  ;;  %v246_v46 = vld [vmem:[#allocation5 + $0x158] sm:$0xff] }
 0x135   :  { %v198_v35 = vpop.f32.mrf.mxu0  ;;  %v1444_v37 = vsel %vm120_vm2, %v12937_v25, 0.0 }
 0x136   :  { %850 = vmatpush1.bf16.msra.mxu0 %v11588_v29  ;;  %891 = vmatpush1.bf16.msra.mxu1 %v11590_v30  ;;  %v13399_v29 = vld [vmem:[%s15547_s0 + $0x88] sm:$0xff]  }
 0x137   :  { %851 = vmatprep.subr.bf16.mxu0 %v11581_v31  ;;  %892 = vmatprep.subr.bf16.mxu1 %v11583_v32  ;;  %v13635_v52 = vpop.f32.mrf.mxu0  ;;  %v247_v30 = vld [vmem:[#allocation5 + $0x160] sm:$0xff]  ;;  %v244_v31 = vld [vmem:[#allocation5 + $0x148] sm:$0xff]  ;;  %v12941_v36 = vunpack.c.l.bf16 %v13399_v29  ;;  %v12942_v38 = vunpack.c.h.bf16 %v13399_v29 }
 0x138   :  { %v248_v32 = vld [vmem:[#allocation5 + $0x168] sm:$0xff]  ;;  %v11649_v35 = vcombine.high %v243_v15, %v247_v30  ;;  %v11648_v52 = vcombine.low %v243_v15, %v247_v30 }
 0x139   :  { %v11650_v53 = vcombine.low %v244_v31, %v248_v32  ;;  %v1447_v54 = vsel %vm120_vm2, %v12941_v36, 0.0  ;;  %v204_v15 = vld [vmem:[#allocation5 + $0x8] sm:$0xff] }
 0x13a   :  { %852 = vmatpush1.bf16.msra.mxu0 %v11580_v42  ;;  %893 = vmatpush1.bf16.msra.mxu1 %v11582_v47  ;;  %v11651_v42 = vcombine.high %v244_v31, %v248_v32  ;;  %v235_v47 = vld [vmem:[#allocation5 + $0x100] sm:$0xff]  ;;  %v208_v29 = vld [vmem:[#allocation5 + $0x28] sm:$0xff]  ;;  %v11618_v32 = vcombine.low %v212_v18, %v216_v19 }
 0x13b   :  { %853 = vmatprep.subr.bf16.mxu0 %v11573_v48  ;;  %894 = vmatprep.subr.bf16.mxu1 %v11575_v49  ;;  %v239_v48 = vld [vmem:[#allocation5 + $0x120] sm:$0xff]  ;;  %v236_v49 = vld [vmem:[#allocation5 + $0x108] sm:$0xff] }
 0x13e   :  { %854 = vmatpush1.bf16.msra.mxu0 %v11572_v55  ;;  %895 = vmatpush1.bf16.msra.mxu1 %v11574_v56  ;;  %v11641_v55 = vcombine.high %v235_v47, %v239_v48  ;;  %v11643_v56 = vcombine.high %v236_v49, %v240_v51 }
 0x13f   :  { %855 = vmatprep.subr.bf16.mxu0 %v11565_v57  ;;  %896 = vmatprep.subr.bf16.mxu1 %v11567_v39  ;;  %v227_v57 = vld [vmem:[#allocation5 + $0xc0] sm:$0xff]  ;;  %v13400_v39 = vld [vmem:[%s15547_s0 + $0x90] sm:$0xff]  }
 0x140   :  { %v11633_v1 = vcombine.high %v227_v57, %v231_v58  ;;  %v12946_v8 = vunpack.c.h.bf16 %v13400_v39 }
 0x142   :  { %856 = vmatpush1.bf16.msra.mxu0 %v11564_v43  ;;  %897 = vmatpush1.bf16.msra.mxu1 %v11566_v61  ;;  %v11640_v43 = vcombine.low %v235_v47, %v239_v48  ;;  %v11642_v61 = vcombine.low %v236_v49, %v240_v51  ;;  %v262_v47 = vld [vmem:[#allocation5 + $0x1d8] sm:$0xff]  ;;  %v201_v49 = vmax.f32 %v14117_v28, 0.0 }
 0x143   :  { %857 = vmatprep.subr.bf16.mxu0 %v11557_v62  ;;  %898 = vmatprep.subr.bf16.mxu1 %v11559_v44  ;;  %v12945_v62 = vunpack.c.l.bf16 %v13400_v39  ;;  %v1449_v44 = vsel %vm120_vm2, %v12942_v38, 0.0  ;;  %v266_v48 = vld [vmem:[#allocation5 + $0x1f8] sm:$0xff] }
 0x144   :  { %v254_v39 = vld [vmem:[#allocation5 + $0x198] sm:$0xff]  ;;  %v14147_v59 = vpack.c.bf16 %v201_v49, %v201_v49 }
 0x145   :  { %v1451_v9 = vsel %vm120_vm2, %v12945_v62, 0.0 }
 0x146   :  { %858 = vmatpush1.bf16.msra.mxu0 %v11556_v63  ;;  %899 = vmatpush1.bf16.msra.mxu1 %v11558_v5  ;;  %v220_v63 = vld [vmem:[#allocation5 + $0x88] sm:$0xff] }
 0x147   :  { %859 = vmatprep.subr.bf16.mxu0 %v11549_v6  ;;  %900 = vmatprep.subr.bf16.mxu1 %v11551_v50  ;;  %v224_v5 = vld [vmem:[#allocation5 + $0xa8] sm:$0xff]  ;;  %v11632_v50 = vcombine.low %v227_v57, %v231_v58  ;;  %v257_v57 = vld [vmem:[#allocation5 + $0x1b0] sm:$0xff]  ;;  %v258_v58 = vld [vmem:[#allocation5 + $0x1b8] sm:$0xff] }
 0x148   :  { %v11626_v22 = vcombine.low %v220_v63, %v224_v5 }
 0x14a   :  { %860 = vmatpush1.bf16.msra.mxu0 %v11548_v12  ;;  %901 = vmatpush1.bf16.msra.mxu1 %v11550_v13  ;;  %v11627_v12 = vcombine.high %v220_v63, %v224_v5  ;;  %v211_v13 = vld [vmem:[#allocation5 + $0x40] sm:$0xff]  ;;  %v250_v63 = vld [vmem:[#allocation5 + $0x178] sm:$0xff] }
 0x14b   :  { %1247 = vmatprep.subr.bf16.mxu0 %v11665_v16  ;;  %1288 = vmatprep.subr.bf16.mxu1 %v11667_v17  ;;  %v13401_v16 = vld [vmem:[%s15547_s0 + $0x98] sm:$0xff]   ;;  %v215_v17 = vld [vmem:[#allocation5 + $0x60] sm:$0xff] }
 0x14c   :  { %v11617_v25 = vcombine.high %v211_v13, %v215_v17  ;;  %v11616_v31 = vcombine.low %v211_v13, %v215_v17  ;;  %v241_v13 = vld [vmem:[#allocation5 + $0x130] sm:$0xff]  ;;  %v242_v17 = vld [vmem:[#allocation5 + $0x138] sm:$0xff] }
 0x14d   :  { %878 = vmatmul.mubr.bf16.vlgmr.msra.gmra.mxu0 %v14111_v11  ;;  %919 = vmatmul.mubr.bf16.vlgmr.msra.gmra.mxu1 %v14111_v11  ;;  %v1446_v11 = vadd.f32 %v1445_v41, %v1444_v37  ;;  %v11611_v37 = vcombine.high %v204_v15, %v208_v29  ;;  %v261_v41 = vld [vmem:[#allocation5 + $0x1d0] sm:$0xff] }
 0x14e   :  { %1248 = vmatpush1.bf16.msra.mxu0 %v11664_v23  ;;  %1289 = vmatpush1.bf16.msra.mxu1 %v11666_v24  ;;  %v12949_v23 = vunpack.c.l.bf16 %v13401_v16  ;;  %v1453_v24 = vsel %vm120_vm2, %v12946_v8, 0.0 }
 0x14f   :  { %1249 = vmatprep.subr.bf16.mxu0 %v11657_v27  ;;  %1290 = vmatprep.subr.bf16.mxu1 %v11659_v14  ;;  %v1448_v40 = vadd.f32 %v1447_v54, %v1446_v11  ;;  %v203_v27 = vld [vmem:[#allocation5] sm:$0xff] }
 0x150   :  { %1279 = vmatprep.mubr.bf16.mxu0 %v13942_v3  ;;  %1320 = vmatprep.mubr.bf16.mxu1 %v13942_v3  ;;  %v207_v14 = vld [vmem:[#allocation5 + $0x20] sm:$0xff] }
 0x151   :  { %v1450_v6 = vadd.f32 %v1449_v44, %v1448_v40  ;;  %v11609_v36 = vcombine.high %v203_v27, %v207_v14  ;;  %v11608_v11 = vcombine.low %v203_v27, %v207_v14  ;;  %v11670_v40 = vcombine.low %v262_v47, %v266_v48  ;;  %v233_v27 = vld [vmem:[#allocation5 + $0xf0] sm:$0xff]  ;;  %v230_v14 = vld [vmem:[#allocation5 + $0xd8] sm:$0xff] }
 0x152   :  { %1250 = vmatpush1.bf16.msra.mxu0 %v11656_v33  ;;  %1291 = vmatpush1.bf16.msra.mxu1 %v11658_v34  ;;  %v12950_v33 = vunpack.c.h.bf16 %v13401_v16  ;;  %v1455_v34 = vsel %vm120_vm2, %v12949_v23, 0.0  ;;  %v11663_v44 = vcombine.high %v254_v39, %v258_v58  ;;  %v238_v16 = vld [vmem:[#allocation5 + $0x118] sm:$0xff] }
 0x153   :  { %1251 = vmatprep.subr.bf16.mxu0 %v11649_v35  ;;  %1292 = vmatprep.subr.bf16.mxu1 %v11651_v42  ;;  %v1452_v20 = vadd.f32 %v1451_v9, %v1450_v6  ;;  %v13402_v35 = vld [vmem:[%s15547_s0 + $0xa0] sm:$0xff]   ;;  %v265_v42 = vld [vmem:[#allocation5 + $0x1f0] sm:$0xff] }
 0x154   :  { %v1457_v38 = vsel %vm120_vm2, %v12950_v33, 0.0  ;;  %v11669_v54 = vcombine.high %v261_v41, %v265_v42  ;;  %v11668_v28 = vcombine.low %v261_v41, %v265_v42  ;;  %v225_v41 = vld [vmem:[#allocation5 + $0xb0] sm:$0xff]  ;;  %v226_v42 = vld [vmem:[#allocation5 + $0xb8] sm:$0xff] }
 0x155   :  { %v1454_v30 = vadd.f32 %v1453_v24, %v1452_v20  ;;  %v11654_v20 = vcombine.low %v246_v46, %v250_v63  ;;  %v11647_v24 = vcombine.high %v238_v16, %v242_v17 }
 0x156   :  { %1252 = vmatpush1.bf16.msra.mxu0 %v11648_v52  ;;  %1293 = vmatpush1.bf16.msra.mxu1 %v11650_v53  ;;  %v11610_v52 = vcombine.low %v204_v15, %v208_v29  ;;  %v12953_v53 = vunpack.c.l.bf16 %v13402_v35  ;;  %v234_v15 = vld [vmem:[#allocation5 + $0xf8] sm:$0xff] }
 0x157   :  { %1253 = vmatprep.subr.bf16.mxu0 %v11641_v55  ;;  %1294 = vmatprep.subr.bf16.mxu1 %v11643_v56  ;;  %v1456_v51 = vadd.f32 %v1455_v34, %v1454_v30  ;;  %v11671_v55 = vcombine.high %v262_v47, %v266_v48  ;;  %v253_v56 = vld [vmem:[#allocation5 + $0x190] sm:$0xff]  ;;  %v11638_v49 = vcombine.low %v230_v14, %v234_v15 }
 0x158   :  { %v11661_v62 = vcombine.high %v253_v56, %v257_v57  ;;  %v11660_v6 = vcombine.low %v253_v56, %v257_v57  ;;  %v214_v56 = vld [vmem:[#allocation5 + $0x58] sm:$0xff] }
 0x159   :  { %v1458_v60 = vadd.f32 %v1457_v38, %v1456_v51  ;;  %v213_v38 = vld [vmem:[#allocation5 + $0x50] sm:$0xff]  ;;  %v218_v57 = vld [vmem:[#allocation5 + $0x78] sm:$0xff] }
 0x15a   :  { %1254 = vmatpush1.bf16.msra.mxu0 %v11640_v43  ;;  %1295 = vmatpush1.bf16.msra.mxu1 %v11642_v61  ;;  %v12954_v43 = vunpack.c.h.bf16 %v13402_v35  ;;  %v1459_v61 = vsel %vm120_vm2, %v12953_v53, 0.0  ;;  %v222_v35 = vld [vmem:[#allocation5 + $0x98] sm:$0xff] }
 0x15b   :  { %1255 = vmatprep.subr.bf16.mxu0 %v11633_v1  ;;  %1296 = vmatprep.subr.bf16.mxu1 %v11635_v2  ;;  %v245_v1 = vld [vmem:[#allocation5 + $0x150] sm:$0xff]  ;;  %v13403_v2 = vld [vmem:[%s15547_s0 + $0xa8] sm:$0xff]   ;;  %v1460_v5 = vadd.f32 %v1459_v61, %v1458_v60  ;;  %v11631_v53 = vcombine.high %v222_v35, %v226_v42  ;;  %v11630_v60 = vcombine.low %v222_v35, %v226_v42 }
 0x15c   :  { %v1461_v8 = vsel %vm120_vm2, %v12954_v43, 0.0  ;;  %v11653_v9 = vcombine.high %v245_v1, %v249_v45  ;;  %v11652_v19 = vcombine.low %v245_v1, %v249_v45  ;;  %v11623_v61 = vcombine.high %v214_v56, %v218_v57  ;;  %v206_v1 = vld [vmem:[#allocation5 + $0x18] sm:$0xff]  ;;  %v1555_v35 = vld [vmem:[#allocation5 + $0x500] sm:$0xff] }
 0x15d   :  { %v1462_v18 = vadd.f32 %v1461_v8, %v1460_v5  ;;  %v1559_v42 = vld [vmem:[#allocation5 + $0x520] sm:$0xff] }
 0x15e   :  { %1256 = vmatpush1.bf16.msra.mxu0 %v11632_v50  ;;  %1297 = vmatpush1.bf16.msra.mxu1 %v11634_v7  ;;  %v11662_v50 = vcombine.low %v254_v39, %v258_v58  ;;  %v12957_v7 = vunpack.c.l.bf16 %v13403_v2 }
 0x15f   :  { %1257 = vmatprep.subr.bf16.mxu0 %v11625_v10  ;;  %1298 = vmatprep.subr.bf16.mxu1 %v11627_v12  ;;  %v11655_v10 = vcombine.high %v246_v46, %v250_v63  ;;  %v237_v12 = vld [vmem:[#allocation5 + $0x110] sm:$0xff]  ;;  %v11622_v63 = vcombine.low %v214_v56, %v218_v57  ;;  %v11721_v56 = vcombine.low %v1555_v35, %v1559_v42 }
 0x160   :  { %v11645_v23 = vcombine.high %v237_v12, %v241_v13  ;;  %v11644_v30 = vcombine.low %v237_v12, %v241_v13 }
 0x162   :  { %1258 = vmatpush1.bf16.msra.mxu0 %v11624_v21  ;;  %1299 = vmatpush1.bf16.msra.mxu1 %v11626_v22  ;;  %v12958_v21 = vunpack.c.h.bf16 %v13403_v2  ;;  %v1463_v22 = vsel %vm120_vm2, %v12957_v7, 0.0  ;;  %v210_v2 = vld [vmem:[#allocation5 + $0x38] sm:$0xff] }
 0x163   :  { %1259 = vmatprep.subr.bf16.mxu0 %v11617_v25  ;;  %1300 = vmatprep.subr.bf16.mxu1 %v11619_v26  ;;  %v229_v25 = vld [vmem:[#allocation5 + $0xd0] sm:$0xff]  ;;  %v1464_v29 = vadd.f32 %v1463_v22, %v1462_v18  ;;  %v11615_v7 = vcombine.high %v206_v1, %v210_v2  ;;  %v1579_v18 = vld [vmem:[#allocation5 + $0x5c0] sm:$0xff] }
 0x164   :  { %v13404_v26 = vld [vmem:[%s15547_s0 + $0xb0] sm:$0xff]   ;;  %v1465_v33 = vsel %vm120_vm2, %v12958_v21, 0.0  ;;  %v11637_v34 = vcombine.high %v229_v25, %v233_v27  ;;  %v11636_v48 = vcombine.low %v229_v25, %v233_v27 }
 0x165   :  { %v1466_v47 = vadd.f32 %v1465_v33, %v1464_v29  ;;  %v12962_v51 = vunpack.c.h.bf16 %v13404_v26  ;;  %v1563_v29 = vld [vmem:[#allocation5 + $0x540] sm:$0xff]  ;;  %v1568_v33 = vld [vmem:[#allocation5 + $0x568] sm:$0xff] }
 0x166   :  { %1260 = vmatpush1.bf16.msra.mxu0 %v11616_v31  ;;  %1301 = vmatpush1.bf16.msra.mxu1 %v11618_v32  ;;  %v11646_v31 = vcombine.low %v238_v16, %v242_v17  ;;  %v12961_v32 = vunpack.c.l.bf16 %v13404_v26 }
 0x167   :  { %1261 = vmatprep.subr.bf16.mxu0 %v11609_v36  ;;  %1302 = vmatprep.subr.bf16.mxu1 %v11611_v37  ;;  %v11639_v36 = vcombine.high %v230_v14, %v234_v15  ;;  %v221_v37 = vld [vmem:[#allocation5 + $0x90] sm:$0xff]  ;;  %v1572_v14 = vld [vmem:[#allocation5 + $0x588] sm:$0xff] }
 0x168   :  { %v11628_v58 = vcombine.low %v221_v37, %v225_v41  ;;  %v1576_v15 = vld [vmem:[#allocation5 + $0x5a8] sm:$0xff] }
 0x16a   :  { %1262 = vmatpush1.bf16.msra.mxu0 %v11608_v11  ;;  %1303 = vmatpush1.bf16.msra.mxu1 %v11610_v52  ;;  %v1467_v11 = vsel %vm120_vm2, %v12961_v32, 0.0  ;;  %v11629_v52 = vcombine.high %v221_v37, %v225_v41  ;;  %v1564_v32 = vld [vmem:[#allocation5 + $0x548] sm:$0xff] }
 0x16b   :  { %1329 = vmatprep.subr.bf16.mxu0 %v11669_v54  ;;  %1370 = vmatprep.subr.bf16.mxu1 %v11671_v55  ;;  %v13405_v54 = vld [vmem:[%s15547_s0 + $0xb8] sm:$0xff]   ;;  %v1468_v39 = vadd.f32 %v1467_v11, %v1466_v47  ;;  %v11732_v41 = vcombine.high %v1564_v32, %v1568_v33  ;;  %v1556_v47 = vld [vmem:[#allocation5 + $0x508] sm:$0xff]  ;;  %v11722_v11 = vcombine.high %v1555_v35, %v1559_v42 }
 0x16c   :  { %v217_v55 = vld [vmem:[#allocation5 + $0x70] sm:$0xff]  ;;  %v12966_v5 = vunpack.c.h.bf16 %v13405_v54 }
 0x16d   :  { %1280 = vmatmul.mubr.bf16.vlgmr.msra.gmra.mxu0 %v14147_v59  ;;  %1321 = vmatmul.mubr.bf16.vlgmr.msra.gmra.mxu1 %v14147_v59  ;;  %v11621_v43 = vcombine.high %v213_v38, %v217_v55  ;;  %v11620_v46 = vcombine.low %v213_v38, %v217_v55  ;;  %v1551_v38 = vld [vmem:[#allocation5 + $0x4e0] sm:$0xff]  ;;  %v1552_v55 = vld [vmem:[#allocation5 + $0x4e8] sm:$0xff] }
 0x16e   :  { %1330 = vmatpush1.bf16.msra.mxu0 %v11668_v28  ;;  %1371 = vmatpush1.bf16.msra.mxu1 %v11670_v40  ;;  %v12965_v28 = vunpack.c.l.bf16 %v13405_v54  ;;  %v1469_v40 = vsel %vm120_vm2, %v12962_v51, 0.0  ;;  %v1473_v12 = vsel %vm120_vm2, %v12966_v5, 0.0  ;;  %v11731_v51 = vcombine.low %v1564_v32, %v1568_v33  ;;  %v1548_v54 = vld [vmem:[#allocation5 + $0x4c8] sm:$0xff] }
 0x16f   :  { %1331 = vmatprep.subr.bf16.mxu0 %v11661_v62  ;;  %1372 = vmatprep.subr.bf16.mxu1 %v11663_v44  ;;  %v205_v62 = vld [vmem:[#allocation5 + $0x10] sm:$0xff]  ;;  %v1470_v45 = vadd.f32 %v1469_v40, %v1468_v39  ;;  %v1539_v40 = vld [vmem:[#allocation5 + $0x480] sm:$0xff]  ;;  %v1532_v5 = vld [vmem:[#allocation5 + $0x448] sm:$0xff] }
 0x170   :  { %1361 = vmatprep.mubr.bf16.mxu0 %v13942_v3  ;;  %1402 = vmatprep.mubr.bf16.mxu1 %v13942_v3  ;;  %v209_v44 = vld [vmem:[#allocation5 + $0x30] sm:$0xff] }
 0x172   :  { %1332 = vmatpush1.bf16.msra.mxu0 %v11660_v6  ;;  %1373 = vmatpush1.bf16.msra.mxu1 %v11662_v50  ;;  %v1471_v6 = vsel %vm120_vm2, %v12965_v28, 0.0  ;;  %v11613_v50 = vcombine.high %v205_v62, %v209_v44  ;;  %v11715_v28 = vcombine.low %v1548_v54, %v1552_v55 }
 0x173   :  { %1333 = vmatprep.subr.bf16.mxu0 %v11653_v9  ;;  %1374 = vmatprep.subr.bf16.mxu1 %v11655_v10  ;;  %v1472_v8 = vadd.f32 %v1471_v6, %v1470_v45  ;;  %v11612_v9 = vcombine.low %v205_v62, %v209_v44  ;;  %v11614_v10 = vcombine.low %v206_v1, %v210_v2  ;;  %v1544_v44 = vld [vmem:[#allocation5 + $0x4a8] sm:$0xff] }
 0x175   :  { %v1474_v13 = vadd.f32 %v1473_v12, %v1472_v8  ;;  %v1527_v12 = vld [vmem:[#allocation5 + $0x420] sm:$0xff] }
 0x176   :  { %1334 = vmatpush1.bf16.msra.mxu0 %v11652_v19  ;;  %1375 = vmatpush1.bf16.msra.mxu1 %v11654_v20  ;;  %v1583_v19 = vld [vmem:[#allocation5 + $0x5e0] sm:$0xff]  ;;  %v1580_v20 = vld [vmem:[#allocation5 + $0x5c8] sm:$0xff] }
 0x177   :  { %1335 = vmatprep.subr.bf16.mxu0 %v11645_v23  ;;  %1376 = vmatprep.subr.bf16.mxu1 %v11647_v24  ;;  %v1475_v16 = vmul.f32 0.0625, %v1474_v13  ;;  %v11745_v21 = vcombine.low %v1579_v18, %v1583_v19  ;;  %v11746_v22 = vcombine.high %v1579_v18, %v1583_v19  ;;  %v1584_v23 = vld [vmem:[#allocation5 + $0x5e8] sm:$0xff]  ;;  %v1575_v24 = vld [vmem:[#allocation5 + $0x5a0] sm:$0xff] }
 0x178   :  { %v11747_v25 = vcombine.low %v1580_v20, %v1584_v23  ;;  %v11748_v26 = vcombine.high %v1580_v20, %v1584_v23  ;;  %v1524_v13 = vld [vmem:[#allocation5 + $0x408] sm:$0xff]  ;;  %v14183_v23 = vld [vmem:[#allocation5 + $0x5d8] sm:$0xff] }
 0x179   :  { %v1476_v17 = vpack.c.bf16 %v1475_v16, %v1475_v16 }
 0x17a   :  { %1336 = vmatpush1.bf16.msra.mxu0 %v11644_v30  ;;  %1377 = vmatpush1.bf16.msra.mxu1 %v11646_v31  ;;  %v11740_v30 = vcombine.high %v1572_v14, %v1576_v15  ;;  %v1567_v31 = vld [vmem:[#allocation5 + $0x560] sm:$0xff] }
 0x17b   :  { %1337 = vmatprep.subr.bf16.mxu0 %v11637_v34  ;;  %1378 = vmatprep.subr.bf16.mxu1 %v11639_v36  ;;  %v11739_v36 = vcombine.low %v1572_v14, %v1576_v15  ;;  %v11730_v37 = vcombine.high %v1563_v29, %v1567_v31 }
 0x17e   :  { %1338 = vmatpush1.bf16.msra.mxu0 %v11636_v48  ;;  %1379 = vmatpush1.bf16.msra.mxu1 %v11638_v49  ;;  %v1560_v48 = vld [vmem:[#allocation5 + $0x528] sm:$0xff]  ;;  %v11729_v49 = vcombine.low %v1563_v29, %v1567_v31 }
 0x17f   :  { %1339 = vmatprep.subr.bf16.mxu0 %v11629_v52  ;;  %1380 = vmatprep.subr.bf16.mxu1 %v11631_v53  ;;  %v11724_v52 = vcombine.high %v1556_v47, %v1560_v48  ;;  %v1547_v53 = vld [vmem:[#allocation5 + $0x4c0] sm:$0xff]  ;;  %v11723_v57 = vcombine.low %v1556_v47, %v1560_v48 }
 0x180   :  { %v11714_v39 = vcombine.high %v1547_v53, %v1551_v38 }
 0x182   :  { %1340 = vmatpush1.bf16.msra.mxu0 %v11628_v58  ;;  %1381 = vmatpush1.bf16.msra.mxu1 %v11630_v60  ;;  %v11716_v58 = vcombine.high %v1548_v54, %v1552_v55  ;;  %v11713_v60 = vcombine.low %v1547_v53, %v1551_v38 }
 0x183   :  { %1341 = vmatprep.subr.bf16.mxu0 %v11621_v43  ;;  %1382 = vmatprep.subr.bf16.mxu1 %v11623_v61  ;;  %v1543_v43 = vld [vmem:[#allocation5 + $0x4a0] sm:$0xff]  ;;  %v1540_v61 = vld [vmem:[#allocation5 + $0x488] sm:$0xff] }
 0x184   :  { %v11706_v62 = vcombine.high %v1539_v40, %v1543_v43  ;;  %v11705_v1 = vcombine.low %v1539_v40, %v1543_v43  ;;  %v11707_v2 = vcombine.low %v1540_v61, %v1544_v44  ;;  %v11708_v45 = vcombine.high %v1540_v61, %v1544_v44  ;;  %v13407_v61 = vld [vmem:[%s15547_s0 + $0xc8] sm:$0xff]  }
 0x186   :  { %1342 = vmatpush1.bf16.msra.mxu0 %v11620_v46  ;;  %1383 = vmatpush1.bf16.msra.mxu1 %v11622_v63  ;;  %v1531_v46 = vld [vmem:[#allocation5 + $0x440] sm:$0xff] }
 0x187   :  { %1343 = vmatprep.subr.bf16.mxu0 %v11613_v50  ;;  %1384 = vmatprep.subr.bf16.mxu1 %v11615_v7  ;;  %v1535_v63 = vld [vmem:[#allocation5 + $0x460] sm:$0xff]  ;;  %v1536_v50 = vld [vmem:[#allocation5 + $0x468] sm:$0xff] }
 0x188   :  { %v11698_v6 = vcombine.high %v1531_v46, %v1535_v63  ;;  %v11697_v7 = vcombine.low %v1531_v46, %v1535_v63  ;;  %v11699_v8 = vcombine.low %v1532_v5, %v1536_v50  ;;  %v13408_v63 = vld [vmem:[%s15547_s0 + $0xd0] sm:$0xff]  }
 0x18a   :  { %1344 = vmatpush1.bf16.msra.mxu0 %v11612_v9  ;;  %1385 = vmatpush1.bf16.msra.mxu1 %v11614_v10  ;;  %v11700_v9 = vcombine.high %v1532_v5, %v1536_v50  ;;  %v1523_v10 = vld [vmem:[#allocation5 + $0x400] sm:$0xff] }
 0x18b   :  { %13642 = vmatprep.subr.bf16.mxu0 %v13940_v0  ;;  %1907 = vmatprep.subr.bf16.mxu1 %v11746_v22  ;;  %v11690_v16 = vcombine.high %v1523_v10, %v1527_v12  ;;  %v11689_v18 = vcombine.low %v1523_v10, %v1527_v12  ;;  %v14181_v22 = vld [vmem:[#allocation5 + $0x5f0] sm:$0xff] }
 0x18c   :  { %v13409_v10 = vld [vmem:[%s15547_s0 + $0xd8] sm:$0xff]  }
 0x18d   :  { %1362 = vmatmul.mubr.bf16.vlgmr.msra.gmra.mxu0 %v14147_v59  ;;  %1403 = vmatmul.mubr.bf16.vlgmr.msra.gmra.mxu1 %v14147_v59  ;;  %v1571_v59 = vld [vmem:[#allocation5 + $0x580] sm:$0xff] }
 0x18e   :  { %13643 = vmatpush3.bf16.msra.mxu0 %v14006_v4  ;;  %13644 = vmatprep.mubr.msk.bf16.mxu0 %vm13941_vm0, %v13940_v0  ;;  %v11738_v27 = vcombine.high %v1571_v59, %v1575_v24  ;;  %v11737_v34 = vcombine.low %v1571_v59, %v1575_v24  ;;  %v14187_v24 = vld [vmem:[#allocation5 + $0x5f8] sm:$0xff] }
 0x18f   :  { %1939 = vmatprep.mubr.bf16.mxu1 %v13942_v3  ;;  %1948 = vmatprep.subr.bf16.mxu0 %v11748_v26  ;;  %v11751_v26 = vcombine.low %v14183_v23, %v14187_v24 }
 0x190   :  { %1908 = vmatpush1.bf16.msra.mxu1 %v11745_v21  ;;  %v14179_v21 = vld [vmem:[#allocation5 + $0x5d0] sm:$0xff] }
 0x191   :  { %1909 = vmatprep.subr.bf16.mxu1 %v11738_v27  ;;  %v11750_v59 = vcombine.high %v14179_v21, %v14181_v22  ;;  %v11752_v27 = vcombine.high %v14183_v23, %v14187_v24 }
 0x194   :  { %1910 = vmatpush1.bf16.msra.mxu1 %v11737_v34 }
 0x195   :  { %13645 = vmatmul.mubr.msk.bf16.vlgmr.msra.gmra.mxu0 %vm120_vm2, %v1476_v17  ;;  %1911 = vmatprep.subr.bf16.mxu1 %v11730_v37  ;;  %v1528_v17 = vld [vmem:[#allocation5 + $0x428] sm:$0xff] }
 0x196   :  { %1980 = vmatprep.mubr.bf16.mxu0 %v13942_v3  ;;  %1949 = vmatpush1.bf16.msra.mxu0 %v11747_v25  ;;  %v11691_v19 = vcombine.low %v1524_v13, %v1528_v17  ;;  %v11692_v20 = vcombine.high %v1524_v13, %v1528_v17  ;;  %v11749_v25 = vcombine.low %v14179_v21, %v14181_v22  ;;  %v12981_v13 = vunpack.c.l.bf16 %v13409_v10 }
 0x197   :  { %1950 = vmatprep.subr.bf16.mxu0 %v11740_v30 }
 0x198   :  { %1912 = vmatpush1.bf16.msra.mxu1 %v11729_v49 }
 0x199   :  { %1913 = vmatprep.subr.bf16.mxu1 %v11722_v11 }
 0x19a   :  { %1951 = vmatpush1.bf16.msra.mxu0 %v11739_v36 }
 0x19b   :  { %1952 = vmatprep.subr.bf16.mxu0 %v11732_v41 }
 0x19c   :  { %1914 = vmatpush1.bf16.msra.mxu1 %v11721_v56 }
 0x19d   :  { %1915 = vmatprep.subr.bf16.mxu1 %v11714_v39 }
 0x19e   :  { %1953 = vmatpush1.bf16.msra.mxu0 %v11731_v51 }
 0x19f   :  { %1954 = vmatprep.subr.bf16.mxu0 %v11724_v52 }
 0x1a0   :  { %1916 = vmatpush1.bf16.msra.mxu1 %v11713_v60 }
 0x1a1   :  { %1917 = vmatprep.subr.bf16.mxu1 %v11706_v62  ;;  %v12973_v62 = vunpack.c.l.bf16 %v13407_v61 }
 0x1a2   :  { %1955 = vmatpush1.bf16.msra.mxu0 %v11723_v57 }
 0x1a3   :  { %1956 = vmatprep.subr.bf16.mxu0 %v11716_v58  ;;  %v2115_v46 = vsel %vm120_vm2, %v12973_v62, 0.0 }
 0x1a4   :  { %1918 = vmatpush1.bf16.msra.mxu1 %v11705_v1 }
 0x1a5   :  { %1919 = vmatprep.subr.bf16.mxu1 %v11698_v6  ;;  %v12977_v6 = vunpack.c.l.bf16 %v13408_v63 }
 0x1a6   :  { %1957 = vmatpush1.bf16.msra.mxu0 %v11715_v28  ;;  %v13406_v28 = vld [vmem:[%s15547_s0 + $0xc0] sm:$0xff]  }
 0x1a7   :  { %1958 = vmatprep.subr.bf16.mxu0 %v11708_v45  ;;  %v12969_v40 = vunpack.c.l.bf16 %v13406_v28  ;;  %v12970_v43 = vunpack.c.h.bf16 %v13406_v28  ;;  %v12974_v45 = vunpack.c.h.bf16 %v13407_v61  ;;  %v13411_v61 = vld [vmem:[%s15547_s0 + $0xe8] sm:$0xff]  }
 0x1a8   :  { %1920 = vmatpush1.bf16.msra.mxu1 %v11697_v7  ;;  %v12990_v24 = vunpack.c.h.bf16 %v13411_v61 }
 0x1a9   :  { %1921 = vmatprep.subr.bf16.mxu1 %v11690_v16  ;;  %v2112_v44 = vsel %vm120_vm2, %v12969_v40, 0.0  ;;  %v2113_v1 = vsel %vm120_vm2, %v12970_v43, 0.0  ;;  %v2117_v50 = vsel %vm120_vm2, %v12974_v45, 0.0  ;;  %v1565_v43 = vld [vmem:[#allocation5 + $0x550] sm:$0xff] }
 0x1aa   :  { %1959 = vmatpush1.bf16.msra.mxu0 %v11707_v2  ;;  %v2114_v2 = vadd.f32 %v2113_v1, %v2112_v44  ;;  %v1569_v44 = vld [vmem:[#allocation5 + $0x570] sm:$0xff]  ;;  %v1566_v1 = vld [vmem:[#allocation5 + $0x558] sm:$0xff] }
 0x1ab   :  { %1960 = vmatprep.subr.bf16.mxu0 %v11700_v9  ;;  %v2119_v9 = vsel %vm120_vm2, %v12977_v6, 0.0  ;;  %v12989_v6 = vunpack.c.l.bf16 %v13411_v61  ;;  %v11733_v22 = vcombine.low %v1565_v43, %v1569_v44 }
 0x1ac   :  { %1922 = vmatpush1.bf16.msra.mxu1 %v11689_v18  ;;  %v2116_v5 = vadd.f32 %v2115_v46, %v2114_v2  ;;  %v1570_v2 = vld [vmem:[#allocation5 + $0x578] sm:$0xff] }
 0x1ad   :  { %1989 = vmatprep.subr.bf16.mxu1 %v11750_v59  ;;  %v11735_v23 = vcombine.low %v1566_v1, %v1570_v2 }
 0x1ae   :  { %1961 = vmatpush1.bf16.msra.mxu0 %v11699_v8  ;;  %v2118_v7 = vadd.f32 %v2117_v50, %v2116_v5  ;;  %v12978_v8 = vunpack.c.h.bf16 %v13408_v63 }
 0x1af   :  { %1962 = vmatprep.subr.bf16.mxu0 %v11692_v20 }
 0x1b0   :  { %v2120_v12 = vadd.f32 %v2119_v9, %v2118_v7  ;;  %v2121_v16 = vsel %vm120_vm2, %v12978_v8, 0.0  ;;  %v11734_v7 = vcombine.high %v1565_v43, %v1569_v44  ;;  %v11736_v8 = vcombine.high %v1566_v1, %v1570_v2  ;;  %v1557_v9 = vld [vmem:[#allocation5 + $0x510] sm:$0xff]  ;;  %v1538_v43 = vld [vmem:[#allocation5 + $0x478] sm:$0xff] }
 0x1b2   :  { %1963 = vmatpush1.bf16.msra.mxu0 %v11691_v19  ;;  %v2122_v59 = vadd.f32 %v2121_v16, %v2120_v12  ;;  %v1558_v12 = vld [vmem:[#allocation5 + $0x518] sm:$0xff] }
 0x1b3   :  { %2030 = vmatprep.subr.bf16.mxu0 %v11752_v27 }
 0x1ed   :  { %v797_v14 = vpop.f32.mrf.mxu0  ;;  %v838_v15 = vpop.f32.mrf.mxu1 }
 0x1ef   :  { %v799_v29 = vpop.f32.mrf.mxu0  ;;  %v840_v30 = vpop.f32.mrf.mxu1 }
 0x1f1   :  { %v801_v31 = vpop.f32.mrf.mxu0  ;;  %v842_v32 = vpop.f32.mrf.mxu1 }
 0x1f2   :  { %v13410_v32 = vld [vmem:[%s15547_s0 + $0xe0] sm:$0xff]  }
 0x1f3   :  { %v802_v33 = vpop.f32.mrf.mxu0  ;;  %v843_v34 = vpop.f32.mrf.mxu1 }
 0x20d   :  { %v879_v36 = vpop.f32.mrf.mxu0  ;;  %v920_v37 = vpop.f32.mrf.mxu1 }
 0x20f   :  { %v881_v41 = vpop.f32.mrf.mxu0  ;;  %v922_v35 = vpop.f32.mrf.mxu1 }
 0x211   :  { %v883_v42 = vpop.f32.mrf.mxu0  ;;  %v924_v47 = vpop.f32.mrf.mxu1 }
 0x212   :  { %v12985_v47 = vunpack.c.l.bf16 %v13410_v32 }
 0x213   :  { %v884_v48 = vpop.f32.mrf.mxu0  ;;  %v925_v49 = vpop.f32.mrf.mxu1 }
 0x214   :  { %v1573_v49 = vld [vmem:[#allocation5 + $0x590] sm:$0xff] }
 0x22d   :  { %v1281_v51 = vpop.f32.mrf.mxu0  ;;  %v1322_v11 = vpop.f32.mrf.mxu1 }
 0x22e   :  { %v14195_v52 = vadd.f32 %v1281_v51, %v797_v14  ;;  %v14197_v53 = vadd.f32 %v1322_v11, %v838_v15  ;;  %v12982_v15 = vunpack.c.h.bf16 %v13409_v10  ;;  %v1577_v11 = vld [vmem:[#allocation5 + $0x5b0] sm:$0xff] }
 0x22f   :  { %v1283_v38 = vpop.f32.mrf.mxu0  ;;  %v1324_v54 = vpop.f32.mrf.mxu1  ;;  %v11742_v28 = vcombine.high %v1573_v49, %v1577_v11  ;;  %v11741_v63 = vcombine.low %v1573_v49, %v1577_v11  ;;  %v1561_v10 = vld [vmem:[#allocation5 + $0x530] sm:$0xff]  ;;  %v1546_v49 = vld [vmem:[#allocation5 + $0x4b8] sm:$0xff] }
 0x230   :  { %v14199_v55 = vadd.f32 %v1283_v38, %v799_v29  ;;  %v14201_v56 = vadd.f32 %v1324_v54, %v840_v30  ;;  %v2123_v29 = vsel %vm120_vm2, %v12981_v13, 0.0  ;;  %v2125_v48 = vsel %vm120_vm2, %v12982_v15, 0.0  ;;  %v1574_v38 = vld [vmem:[#allocation5 + $0x598] sm:$0xff] }
 0x231   :  { %v1285_v57 = vpop.f32.mrf.mxu0  ;;  %v1326_v39 = vpop.f32.mrf.mxu1  ;;  %v1562_v13 = vld [vmem:[#allocation5 + $0x538] sm:$0xff] }
 0x232   :  { %v12986_v39 = vunpack.c.h.bf16 %v13410_v32  ;;  %v11728_v16 = vcombine.high %v1558_v12, %v1562_v13  ;;  %v11727_v32 = vcombine.low %v1558_v12, %v1562_v13 }
 0x233   :  { %v1286_v58 = vpop.f32.mrf.mxu0  ;;  %v1327_v60 = vpop.f32.mrf.mxu1 }
 0x234   :  { %v2127_v58 = vsel %vm120_vm2, %v12985_v47, 0.0  ;;  %v2129_v50 = vsel %vm120_vm2, %v12986_v39, 0.0  ;;  %v1545_v47 = vld [vmem:[#allocation5 + $0x4b0] sm:$0xff] }
 0x235   :  { %v1533_v39 = vld [vmem:[#allocation5 + $0x450] sm:$0xff] }
 0x24d   :  { %v1363_v17 = vpop.f32.mrf.mxu0  ;;  %v1404_v18 = vpop.f32.mrf.mxu1 }
 0x24e   :  { %v14221_v19 = vadd.f32 %v1363_v17, %v879_v36  ;;  %v14223_v20 = vadd.f32 %v1404_v18, %v920_v37  ;;  %v2124_v36 = vadd.f32 %v2123_v29, %v2122_v59  ;;  %v1549_v17 = vld [vmem:[#allocation5 + $0x4d0] sm:$0xff]  ;;  %v11725_v29 = vcombine.low %v1557_v9, %v1561_v10 }
 0x24f   :  { %v1365_v27 = vpop.f32.mrf.mxu0  ;;  %v1406_v14 = vpop.f32.mrf.mxu1  ;;  %v13412_v18 = vld [vmem:[%s15547_s0 + $0xf0] sm:$0xff]  }
 0x250   :  { %v14226_v30 = vadd.f32 %v1365_v27, %v881_v41  ;;  %v14228_v31 = vadd.f32 %v1406_v14, %v922_v35  ;;  %v1578_v41 = vld [vmem:[#allocation5 + $0x5b8] sm:$0xff]  ;;  %v2126_v35 = vadd.f32 %v2125_v48, %v2124_v36  ;;  %v1553_v59 = vld [vmem:[#allocation5 + $0x4f0] sm:$0xff] }
 0x251   :  { %v1367_v33 = vpop.f32.mrf.mxu0  ;;  %v1408_v34 = vpop.f32.mrf.mxu1  ;;  %v11744_v40 = vcombine.high %v1574_v38, %v1578_v41  ;;  %v11743_v5 = vcombine.low %v1574_v38, %v1578_v41  ;;  %v1550_v27 = vld [vmem:[#allocation5 + $0x4d8] sm:$0xff]  ;;  %v11718_v36 = vcombine.high %v1549_v17, %v1553_v59  ;;  %v11717_v11 = vcombine.low %v1549_v17, %v1553_v59  ;;  %v2251_v59 = vld [vmem:[#allocation5 + $0x7e0] sm:$0xff] }
 0x252   :  { %v2128_v45 = vadd.f32 %v2127_v58, %v2126_v35  ;;  %v1554_v14 = vld [vmem:[#allocation5 + $0x4f8] sm:$0xff]  ;;  %v12993_v33 = vunpack.c.l.bf16 %v13412_v18  ;;  %v2133_v34 = vsel %vm120_vm2, %v12990_v24, 0.0  ;;  %v12994_v41 = vunpack.c.h.bf16 %v13412_v18  ;;  %v2247_v18 = vld [vmem:[#allocation5 + $0x7c0] sm:$0xff] }
 0x253   :  { %v1368_v42 = vpop.f32.mrf.mxu0  ;;  %v1409_v37 = vpop.f32.mrf.mxu1  ;;  %v1542_v48 = vld [vmem:[#allocation5 + $0x498] sm:$0xff]  ;;  %v11719_v38 = vcombine.low %v1550_v27, %v1554_v14 }
 0x254   :  { %v2130_v21 = vadd.f32 %v2129_v50, %v2128_v45  ;;  %v11720_v42 = vcombine.high %v1550_v27, %v1554_v14  ;;  %v1541_v37 = vld [vmem:[#allocation5 + $0x490] sm:$0xff]  ;;  %v11711_v44 = vcombine.low %v1542_v48, %v1546_v49  ;;  %v2137_v2 = vsel %vm120_vm2, %v12994_v41, 0.0  ;;  %v1530_v50 = vld [vmem:[#allocation5 + $0x438] sm:$0xff]  ;;  %v2248_v27 = vld [vmem:[#allocation5 + $0x7c8] sm:$0xff] }
 0x255   :  { %v1514_v51 = vpop.f32.mrf.mxu0  ;;  %v11710_v35 = vcombine.high %v1541_v37, %v1545_v47  ;;  %v13413_v58 = vld [vmem:[%s15547_s0 + $0xf8] sm:$0xff]   ;;  %v11826_v14 = vcombine.low %v2247_v18, %v2251_v59 }
 0x256   :  { %v1520_v54 = vmax.f32 %v1514_v51, 0.0  ;;  %v12997_v1 = vunpack.c.l.bf16 %v13413_v58 }
 0x257   :  { %v13646_v57 = vpop.f32.mrf.mxu0 }
 0x258   :  { %v14235_v60 = vpack.c.bf16 %v1520_v54, %v1520_v54  ;;  %v2135_v54 = vsel %vm120_vm2, %v12993_v33, 0.0  ;;  %v11712_v57 = vcombine.high %v1542_v48, %v1546_v49  ;;  %v2139_v12 = vsel %vm120_vm2, %v12997_v1, 0.0  ;;  %v2235_v49 = vld [vmem:[#allocation5 + $0x760] sm:$0xff] }
 0x259   :  { %v1517_v62 = vpop.f32.mrf.mxu0  ;;  %v2219_v1 = vld [vmem:[#allocation5 + $0x6e0] sm:$0xff] }
 0x25a   :  { %1940 = vmatmul.mubr.bf16.vlgmr.msra.gmra.mxu1 %v14235_v60  ;;  %1981 = vmatmul.mubr.bf16.vlgmr.msra.gmra.mxu0 %v14235_v60  ;;  %v11709_v62 = vcombine.low %v1541_v37, %v1545_v47  ;;  %v2244_v37 = vld [vmem:[#allocation5 + $0x7a8] sm:$0xff]  ;;  %v2231_v47 = vld [vmem:[#allocation5 + $0x740] sm:$0xff] }
 0x25b   :  { %1990 = vmatpush1.bf16.msra.mxu1 %v11749_v25  ;;  %2031 = vmatpush1.bf16.msra.mxu0 %v11751_v26  ;;  %v13647_v46 = vpop.f32.mrf.mxu0  ;;  %v2131_v25 = vsel %vm120_vm2, %v12989_v6, 0.0  ;;  %v11726_v26 = vcombine.high %v1557_v9, %v1561_v10  ;;  %v1526_v6 = vld [vmem:[#allocation5 + $0x418] sm:$0xff]  ;;  %v12998_v10 = vunpack.c.h.bf16 %v13413_v58  ;;  %v2224_v58 = vld [vmem:[#allocation5 + $0x708] sm:$0xff] }
 0x25c   :  { %1991 = vmatprep.subr.bf16.mxu1 %v11742_v28  ;;  %2032 = vmatprep.subr.bf16.mxu0 %v11744_v40  ;;  %v2132_v15 = vadd.f32 %v2131_v25, %v2130_v21  ;;  %v1537_v28 = vld [vmem:[#allocation5 + $0x470] sm:$0xff]  ;;  %v1534_v40 = vld [vmem:[#allocation5 + $0x458] sm:$0xff]  ;;  %v11696_v21 = vcombine.high %v1526_v6, %v1530_v50  ;;  %v11695_v24 = vcombine.low %v1526_v6, %v1530_v50 }
 0x25d   :  { %2021 = vmatprep.mubr.bf16.mxu1 %v13942_v3  ;;  %2062 = vmatprep.mubr.bf16.mxu0 %v13942_v3  ;;  %v11702_v45 = vcombine.high %v1533_v39, %v1537_v28  ;;  %v11704_v46 = vcombine.high %v1534_v40, %v1538_v43  ;;  %v11703_v9 = vcombine.low %v1534_v40, %v1538_v43  ;;  %v2141_v25 = vsel %vm120_vm2, %v12998_v10, 0.0  ;;  %v2208_v10 = vld [vmem:[#allocation5 + $0x688] sm:$0xff] }
 0x25e   :  { %v2134_v51 = vadd.f32 %v2133_v34, %v2132_v15  ;;  %v11827_v15 = vcombine.high %v2247_v18, %v2251_v59  ;;  %v11810_v40 = vcombine.low %v2231_v47, %v2235_v49 }
 0x25f   :  { %1992 = vmatpush1.bf16.msra.mxu1 %v11741_v63  ;;  %2033 = vmatpush1.bf16.msra.mxu0 %v11743_v5  ;;  %v1525_v63 = vld [vmem:[#allocation5 + $0x410] sm:$0xff] }
 0x260   :  { %1993 = vmatprep.subr.bf16.mxu1 %v11734_v7  ;;  %2034 = vmatprep.subr.bf16.mxu0 %v11736_v8  ;;  %v2136_v61 = vadd.f32 %v2135_v54, %v2134_v51  ;;  %v1529_v5 = vld [vmem:[#allocation5 + $0x430] sm:$0xff]  ;;  %v11701_v8 = vcombine.low %v1533_v39, %v1537_v28  ;;  %v2232_v51 = vld [vmem:[#allocation5 + $0x748] sm:$0xff]  ;;  %v11811_v54 = vcombine.high %v2231_v47, %v2235_v49  ;;  %v2227_v39 = vld [vmem:[#allocation5 + $0x720] sm:$0xff] }
 0x261   :  { %v11694_v13 = vcombine.high %v1525_v63, %v1529_v5  ;;  %v2228_v28 = vld [vmem:[#allocation5 + $0x728] sm:$0xff]  ;;  %v14276_v47 = vld [vmem:[#allocation5 + $0x7d8] sm:$0xff] }
 0x262   :  { %v2138_v7 = vadd.f32 %v2137_v2, %v2136_v61  ;;  %v2216_v2 = vld [vmem:[#allocation5 + $0x6c8] sm:$0xff]  ;;  %v14280_v49 = vld [vmem:[#allocation5 + $0x7f8] sm:$0xff] }
 0x263   :  { %1994 = vmatpush1.bf16.msra.mxu1 %v11733_v22  ;;  %2035 = vmatpush1.bf16.msra.mxu0 %v11735_v23  ;;  %v11693_v23 = vcombine.low %v1525_v63, %v1529_v5  ;;  %v11804_v63 = vcombine.low %v2224_v58, %v2228_v28 }
 0x264   :  { %1995 = vmatprep.subr.bf16.mxu1 %v11726_v26  ;;  %2036 = vmatprep.subr.bf16.mxu0 %v11728_v16  ;;  %v2140_v22 = vadd.f32 %v2139_v12, %v2138_v7 }
 0x266   :  { %v2142_v26 = vadd.f32 %v2141_v25, %v2140_v22  ;;  %v2203_v25 = vld [vmem:[#allocation5 + $0x660] sm:$0xff] }
 0x267   :  { %1996 = vmatpush1.bf16.msra.mxu1 %v11725_v29  ;;  %2037 = vmatpush1.bf16.msra.mxu0 %v11727_v32  ;;  %v2252_v29 = vld [vmem:[#allocation5 + $0x7e8] sm:$0xff]  ;;  %v2243_v32 = vld [vmem:[#allocation5 + $0x7a0] sm:$0xff] }
 0x268   :  { %1997 = vmatprep.subr.bf16.mxu1 %v11718_v36  ;;  %2038 = vmatprep.subr.bf16.mxu0 %v11720_v42  ;;  %v2143_v16 = vmul.f32 0.0625, %v2142_v26  ;;  %v11828_v33 = vcombine.low %v2248_v27, %v2252_v29  ;;  %v11829_v34 = vcombine.high %v2248_v27, %v2252_v29  ;;  %v2240_v42 = vld [vmem:[#allocation5 + $0x788] sm:$0xff] }
 0x269   :  { %v11821_v48 = vcombine.high %v2240_v42, %v2244_v37  ;;  %v11820_v41 = vcombine.low %v2240_v42, %v2244_v37  ;;  %v2200_v26 = vld [vmem:[#allocation5 + $0x648] sm:$0xff]  ;;  %v14272_v42 = vld [vmem:[#allocation5 + $0x7d0] sm:$0xff] }
 0x26a   :  { %v2144_v17 = vpack.c.bf16 %v2143_v16, %v2143_v16  ;;  %v2192_v29 = vld [vmem:[#allocation5 + $0x608] sm:$0xff]  ;;  %v14274_v37 = vld [vmem:[#allocation5 + $0x7f0] sm:$0xff] }
 0x26b   :  { %1998 = vmatpush1.bf16.msra.mxu1 %v11717_v11  ;;  %2039 = vmatpush1.bf16.msra.mxu0 %v11719_v38  ;;  %v2236_v11 = vld [vmem:[#allocation5 + $0x768] sm:$0xff] }
 0x26c   :  { %1999 = vmatprep.subr.bf16.mxu1 %v11710_v35  ;;  %2040 = vmatprep.subr.bf16.mxu0 %v11712_v57  ;;  %v11813_v35 = vcombine.high %v2232_v51, %v2236_v11  ;;  %v2223_v57 = vld [vmem:[#allocation5 + $0x700] sm:$0xff]  ;;  %v11812_v43 = vcombine.low %v2232_v51, %v2236_v11  ;;  %v11830_v51 = vcombine.low %v14272_v42, %v14274_v37 }
 0x26d   :  { %v11803_v61 = vcombine.high %v2223_v57, %v2227_v39  ;;  %v11832_v11 = vcombine.low %v14276_v47, %v14280_v49 }
 0x26f   :  { %2000 = vmatpush1.bf16.msra.mxu1 %v11709_v62  ;;  %2041 = vmatpush1.bf16.msra.mxu0 %v11711_v44  ;;  %v11805_v62 = vcombine.high %v2224_v58, %v2228_v28  ;;  %v2215_v44 = vld [vmem:[#allocation5 + $0x6c0] sm:$0xff] }
 0x270   :  { %2001 = vmatprep.subr.bf16.mxu1 %v11702_v45  ;;  %2042 = vmatprep.subr.bf16.mxu0 %v11704_v46  ;;  %v2220_v45 = vld [vmem:[#allocation5 + $0x6e8] sm:$0xff]  ;;  %v11802_v46 = vcombine.low %v2223_v57, %v2227_v39  ;;  %v11795_v5 = vcombine.high %v2215_v44, %v2219_v1  ;;  %v11794_v50 = vcombine.low %v2215_v44, %v2219_v1 }
 0x271   :  { %v11797_v6 = vcombine.high %v2216_v2, %v2220_v45  ;;  %v11796_v7 = vcombine.low %v2216_v2, %v2220_v45 }
 0x273   :  { %2002 = vmatpush1.bf16.msra.mxu1 %v11701_v8  ;;  %2043 = vmatpush1.bf16.msra.mxu0 %v11703_v9  ;;  %v2207_v8 = vld [vmem:[#allocation5 + $0x680] sm:$0xff] }
 0x274   :  { %2003 = vmatprep.subr.bf16.mxu1 %v11694_v13  ;;  %2044 = vmatprep.subr.bf16.mxu0 %v11696_v21  ;;  %v2211_v9 = vld [vmem:[#allocation5 + $0x6a0] sm:$0xff]  ;;  %v2212_v13 = vld [vmem:[#allocation5 + $0x6a8] sm:$0xff] }
 0x275   :  { %v11787_v12 = vcombine.high %v2207_v8, %v2211_v9  ;;  %v11786_v21 = vcombine.low %v2207_v8, %v2211_v9  ;;  %v11788_v22 = vcombine.low %v2208_v10, %v2212_v13 }
 0x277   :  { %2004 = vmatpush1.bf16.msra.mxu1 %v11693_v23  ;;  %2045 = vmatpush1.bf16.msra.mxu0 %v11695_v24  ;;  %v11789_v23 = vcombine.high %v2208_v10, %v2212_v13  ;;  %v2199_v24 = vld [vmem:[#allocation5 + $0x640] sm:$0xff]  ;;  %v13417_v13 = vld [vmem:[%s15547_s0 + $0x118] sm:$0xff]  }
 0x278   :  { %13648 = vmatprep.subr.bf16.mxu1 %v13940_v0  ;;  %2575 = vmatprep.subr.bf16.mxu0 %v11827_v15  ;;  %v11779_v16 = vcombine.high %v2199_v24, %v2203_v25  ;;  %v11778_v18 = vcombine.low %v2199_v24, %v2203_v25  ;;  %v2195_v15 = vld [vmem:[#allocation5 + $0x620] sm:$0xff] }
 0x27a   :  { %2022 = vmatmul.mubr.bf16.vlgmr.msra.gmra.mxu1 %v14235_v60  ;;  %2063 = vmatmul.mubr.bf16.vlgmr.msra.gmra.mxu0 %v14235_v60  ;;  %v2239_v60 = vld [vmem:[#allocation5 + $0x780] sm:$0xff] }
 0x27b   :  { %13649 = vmatpush3.bf16.msra.mxu1 %v14006_v4  ;;  %13650 = vmatprep.mubr.msk.bf16.mxu1 %vm13941_vm0, %v13940_v0  ;;  %v11819_v36 = vcombine.high %v2239_v60, %v2243_v32  ;;  %v11818_v38 = vcombine.low %v2239_v60, %v2243_v32  ;;  %v2196_v32 = vld [vmem:[#allocation5 + $0x628] sm:$0xff] }
 0x27c   :  { %2607 = vmatprep.mubr.bf16.mxu0 %v13942_v3  ;;  %2616 = vmatprep.subr.bf16.mxu1 %v11829_v34  ;;  %v11772_v34 = vcombine.low %v2192_v29, %v2196_v32 }
 0x27d   :  { %2576 = vmatpush1.bf16.msra.mxu0 %v11826_v14  ;;  %v2191_v14 = vld [vmem:[#allocation5 + $0x600] sm:$0xff] }
 0x27e   :  { %2577 = vmatprep.subr.bf16.mxu0 %v11819_v36  ;;  %v11771_v60 = vcombine.high %v2191_v14, %v2195_v15  ;;  %v11773_v36 = vcombine.high %v2192_v29, %v2196_v32 }
 0x281   :  { %2578 = vmatpush1.bf16.msra.mxu0 %v11818_v38  ;;  %v11833_v38 = vcombine.high %v14276_v47, %v14280_v49 }
 0x282   :  { %13651 = vmatmul.mubr.msk.bf16.vlgmr.msra.gmra.mxu1 %vm120_vm2, %v2144_v17  ;;  %2579 = vmatprep.subr.bf16.mxu0 %v11811_v54  ;;  %v2204_v17 = vld [vmem:[#allocation5 + $0x668] sm:$0xff] }
 0x283   :  { %2648 = vmatprep.mubr.bf16.mxu1 %v13942_v3  ;;  %2617 = vmatpush1.bf16.msra.mxu1 %v11828_v33  ;;  %v11780_v59 = vcombine.low %v2200_v26, %v2204_v17  ;;  %v11781_v27 = vcombine.high %v2200_v26, %v2204_v17  ;;  %v11770_v33 = vcombine.low %v2191_v14, %v2195_v15 }
 0x284   :  { %2618 = vmatprep.subr.bf16.mxu1 %v11821_v48  ;;  %v11831_v48 = vcombine.high %v14272_v42, %v14274_v37 }
 0x285   :  { %2580 = vmatpush1.bf16.msra.mxu0 %v11810_v40 }
 0x286   :  { %2581 = vmatprep.subr.bf16.mxu0 %v11803_v61 }
 0x287   :  { %2619 = vmatpush1.bf16.msra.mxu1 %v11820_v41 }
 0x288   :  { %2620 = vmatprep.subr.bf16.mxu1 %v11813_v35 }
 0x289   :  { %2582 = vmatpush1.bf16.msra.mxu0 %v11802_v46 }
 0x28a   :  { %2583 = vmatprep.subr.bf16.mxu0 %v11795_v5 }
 0x28b   :  { %2621 = vmatpush1.bf16.msra.mxu1 %v11812_v43 }
 0x28c   :  { %2622 = vmatprep.subr.bf16.mxu1 %v11805_v62 }
 0x28d   :  { %2584 = vmatpush1.bf16.msra.mxu0 %v11794_v50 }
 0x28e   :  { %2585 = vmatprep.subr.bf16.mxu0 %v11787_v12 }
 0x28f   :  { %2623 = vmatpush1.bf16.msra.mxu1 %v11804_v63 }
 0x290   :  { %2624 = vmatprep.subr.bf16.mxu1 %v11797_v6  ;;  %v13416_v6 = vld [vmem:[%s15547_s0 + $0x110] sm:$0xff]  }
 0x291   :  { %2586 = vmatpush1.bf16.msra.mxu0 %v11786_v21  ;;  %v13010_v10 = vunpack.c.h.bf16 %v13416_v6 }
 0x292   :  { %2587 = vmatprep.subr.bf16.mxu0 %v11779_v16 }
 0x293   :  { %2625 = vmatpush1.bf16.msra.mxu1 %v11796_v7  ;;  %v13009_v7 = vunpack.c.l.bf16 %v13416_v6 }
 0x294   :  { %2626 = vmatprep.subr.bf16.mxu1 %v11789_v23  ;;  %v2789_v23 = vsel %vm120_vm2, %v13010_v10, 0.0 }
 0x295   :  { %2588 = vmatpush1.bf16.msra.mxu0 %v11778_v18  ;;  %v2787_v12 = vsel %vm120_vm2, %v13009_v7, 0.0 }
 0x296   :  { %2589 = vmatprep.subr.bf16.mxu0 %v11771_v60 }
 0x297   :  { %2627 = vmatpush1.bf16.msra.mxu1 %v11788_v22  ;;  %v13013_v22 = vunpack.c.l.bf16 %v13417_v13 }
 0x298   :  { %2628 = vmatprep.subr.bf16.mxu1 %v11781_v27  ;;  %v13014_v27 = vunpack.c.h.bf16 %v13417_v13  ;;  %v2229_v13 = vld [vmem:[#allocation5 + $0x730] sm:$0xff] }
 0x299   :  { %2590 = vmatpush1.bf16.msra.mxu0 %v11770_v33  ;;  %v2791_v14 = vsel %vm120_vm2, %v13013_v22, 0.0  ;;  %v2230_v22 = vld [vmem:[#allocation5 + $0x738] sm:$0xff] }
 0x29a   :  { %2657 = vmatprep.subr.bf16.mxu0 %v11831_v48  ;;  %v2793_v48 = vsel %vm120_vm2, %v13014_v27, 0.0 }
 0x29b   :  { %2629 = vmatpush1.bf16.msra.mxu1 %v11780_v59 }
 0x29c   :  { %2630 = vmatprep.subr.bf16.mxu1 %v11773_v36 }
 0x29f   :  { %2631 = vmatpush1.bf16.msra.mxu1 %v11772_v34 }
 0x2a0   :  { %2698 = vmatprep.subr.bf16.mxu1 %v11833_v38  ;;  %v2241_v38 = vld [vmem:[#allocation5 + $0x790] sm:$0xff] }
 0x31a   :  { %v1941_v41 = vpop.f32.mrf.mxu1  ;;  %v1982_v54 = vpop.f32.mrf.mxu0 }
 0x31b   :  { %v14289_v35 = vadd.f32 %v1941_v41, %v14195_v52  ;;  %v14292_v57 = vadd.f32 %v1982_v54, %v14197_v53  ;;  %v13414_v52 = vld [vmem:[%s15547_s0 + $0x100] sm:$0xff]   ;;  %v13415_v53 = vld [vmem:[%s15547_s0 + $0x108] sm:$0xff]   ;;  %v2245_v54 = vld [vmem:[#allocation5 + $0x7b0] sm:$0xff] }
 0x31c   :  { %v1943_v39 = vpop.f32.mrf.mxu1  ;;  %v1984_v58 = vpop.f32.mrf.mxu0  ;;  %v13001_v1 = vunpack.c.l.bf16 %v13414_v52  ;;  %v13002_v2 = vunpack.c.h.bf16 %v13414_v52  ;;  %v13005_v45 = vunpack.c.l.bf16 %v13415_v53  ;;  %v13006_v63 = vunpack.c.h.bf16 %v13415_v53  ;;  %v13419_v53 = vld [vmem:[%s15547_s0 + $0x128] sm:$0xff]  }
 0x31d   :  { %v14295_v28 = vadd.f32 %v1943_v39, %v14199_v55  ;;  %v14298_v40 = vadd.f32 %v1984_v58, %v14201_v56  ;;  %v2246_v39 = vld [vmem:[#allocation5 + $0x7b8] sm:$0xff]  ;;  %v11823_v52 = vcombine.high %v2241_v38, %v2245_v54  ;;  %v11822_v6 = vcombine.low %v2241_v38, %v2245_v54 }
 0x31e   :  { %v1945_v43 = vpop.f32.mrf.mxu1  ;;  %v1986_v61 = vpop.f32.mrf.mxu0  ;;  %v2780_v55 = vsel %vm120_vm2, %v13001_v1, 0.0  ;;  %v2781_v56 = vsel %vm120_vm2, %v13002_v2, 0.0  ;;  %v2783_v5 = vsel %vm120_vm2, %v13005_v45, 0.0  ;;  %v2785_v8 = vsel %vm120_vm2, %v13006_v63, 0.0  ;;  %v2233_v2 = vld [vmem:[#allocation5 + $0x750] sm:$0xff]  ;;  %v2214_v38 = vld [vmem:[#allocation5 + $0x6b8] sm:$0xff] }
 0x31f   :  { %v2782_v46 = vadd.f32 %v2781_v56, %v2780_v55  ;;  %v2237_v55 = vld [vmem:[#allocation5 + $0x770] sm:$0xff]  ;;  %v2234_v56 = vld [vmem:[#allocation5 + $0x758] sm:$0xff]  ;;  %v13021_v7 = vunpack.c.l.bf16 %v13419_v53  ;;  %v13022_v49 = vunpack.c.h.bf16 %v13419_v53 }
 0x320   :  { %v1946_v62 = vpop.f32.mrf.mxu1  ;;  %v1987_v44 = vpop.f32.mrf.mxu0  ;;  %v11814_v37 = vcombine.low %v2233_v2, %v2237_v55 }
 0x321   :  { %v2784_v50 = vadd.f32 %v2783_v5, %v2782_v46  ;;  %v2238_v46 = vld [vmem:[#allocation5 + $0x778] sm:$0xff] }
 0x322   :  { %v11817_v10 = vcombine.high %v2234_v56, %v2238_v46  ;;  %v11816_v47 = vcombine.low %v2234_v56, %v2238_v46 }
 0x323   :  { %v2786_v9 = vadd.f32 %v2785_v8, %v2784_v50 }
 0x325   :  { %v2788_v21 = vadd.f32 %v2787_v12, %v2786_v9  ;;  %v11815_v9 = vcombine.high %v2233_v2, %v2237_v55  ;;  %v2225_v12 = vld [vmem:[#allocation5 + $0x710] sm:$0xff]  ;;  %v2206_v2 = vld [vmem:[#allocation5 + $0x678] sm:$0xff] }
 0x327   :  { %v2790_v17 = vadd.f32 %v2789_v23, %v2788_v21  ;;  %v2226_v21 = vld [vmem:[#allocation5 + $0x718] sm:$0xff] }
 0x328   :  { %v11809_v23 = vcombine.high %v2226_v21, %v2230_v22 }
 0x33a   :  { %v2023_v24 = vpop.f32.mrf.mxu1  ;;  %v2064_v25 = vpop.f32.mrf.mxu0 }
 0x33b   :  { %v14319_v26 = vadd.f32 %v2023_v24, %v14221_v19  ;;  %v14322_v16 = vadd.f32 %v2064_v25, %v14223_v20  ;;  %v13418_v19 = vld [vmem:[%s15547_s0 + $0x120] sm:$0xff]   ;;  %v2792_v20 = vadd.f32 %v2791_v14, %v2790_v17  ;;  %v2217_v24 = vld [vmem:[#allocation5 + $0x6d0] sm:$0xff]  ;;  %v11806_v14 = vcombine.low %v2225_v12, %v2229_v13 }
 0x33c   :  { %v2025_v18 = vpop.f32.mrf.mxu1  ;;  %v2066_v59 = vpop.f32.mrf.mxu0  ;;  %v13017_v36 = vunpack.c.l.bf16 %v13418_v19  ;;  %v13018_v61 = vunpack.c.h.bf16 %v13418_v19  ;;  %v13420_v25 = vld [vmem:[%s15547_s0 + $0x130] sm:$0xff]   ;;  %v11808_v19 = vcombine.low %v2226_v21, %v2230_v22 }
 0x33d   :  { %v14326_v15 = vadd.f32 %v2025_v18, %v14226_v30  ;;  %v14329_v29 = vadd.f32 %v2066_v59, %v14228_v31  ;;  %v2242_v30 = vld [vmem:[#allocation5 + $0x798] sm:$0xff]  ;;  %v2794_v31 = vadd.f32 %v2793_v48, %v2792_v20  ;;  %v2221_v17 = vld [vmem:[#allocation5 + $0x6f0] sm:$0xff] }
 0x33e   :  { %v2027_v60 = vpop.f32.mrf.mxu1  ;;  %v2068_v32 = vpop.f32.mrf.mxu0  ;;  %v2795_v62 = vsel %vm120_vm2, %v13017_v36, 0.0  ;;  %v11825_v1 = vcombine.high %v2242_v30, %v2246_v39  ;;  %v11824_v50 = vcombine.low %v2242_v30, %v2246_v39  ;;  %v2797_v8 = vsel %vm120_vm2, %v13018_v61, 0.0  ;;  %v2218_v18 = vld [vmem:[#allocation5 + $0x6d8] sm:$0xff]  ;;  %v2213_v36 = vld [vmem:[#allocation5 + $0x6b0] sm:$0xff] }
 0x33f   :  { %v2796_v63 = vadd.f32 %v2795_v62, %v2794_v31  ;;  %v2222_v59 = vld [vmem:[#allocation5 + $0x6f8] sm:$0xff]  ;;  %v13025_v60 = vunpack.c.l.bf16 %v13420_v25  ;;  %v2801_v32 = vsel %vm120_vm2, %v13022_v49, 0.0  ;;  %v11799_v20 = vcombine.high %v2217_v24, %v2221_v17  ;;  %v2201_v61 = vld [vmem:[#allocation5 + $0x650] sm:$0xff] }
 0x340   :  { %v2028_v33 = vpop.f32.mrf.mxu1  ;;  %v2069_v34 = vpop.f32.mrf.mxu0  ;;  %v2210_v48 = vld [vmem:[#allocation5 + $0x698] sm:$0xff]  ;;  %v11798_v54 = vcombine.low %v2217_v24, %v2221_v17  ;;  %v11800_v30 = vcombine.low %v2218_v18, %v2222_v59  ;;  %v13026_v39 = vunpack.c.h.bf16 %v13420_v25  ;;  %v2915_v25 = vld [vmem:[#allocation5 + $0x9c0] sm:$0xff] }
 0x341   :  { %v2798_v42 = vadd.f32 %v2797_v8, %v2796_v63  ;;  %v11801_v33 = vcombine.high %v2218_v18, %v2222_v59  ;;  %v2209_v34 = vld [vmem:[#allocation5 + $0x690] sm:$0xff]  ;;  %v11792_v55 = vcombine.low %v2210_v48, %v2214_v38  ;;  %v2198_v8 = vld [vmem:[#allocation5 + $0x638] sm:$0xff]  ;;  %v2919_v17 = vld [vmem:[#allocation5 + $0x9e0] sm:$0xff] }
 0x342   :  { %v2182_v41 = vpop.f32.mrf.mxu1  ;;  %v11791_v31 = vcombine.high %v2209_v34, %v2213_v36  ;;  %v13421_v62 = vld [vmem:[%s15547_s0 + $0x138] sm:$0xff]   ;;  %v2805_v46 = vsel %vm120_vm2, %v13026_v39, 0.0  ;;  %v2916_v18 = vld [vmem:[#allocation5 + $0x9c8] sm:$0xff]  ;;  %v11907_v59 = vcombine.low %v2915_v25, %v2919_v17 }
 0x343   :  { %v2188_v58 = vmax.f32 %v2182_v41, 0.0  ;;  %v13029_v56 = vunpack.c.l.bf16 %v13421_v62 }
 0x344   :  { %v13652_v43 = vpop.f32.mrf.mxu1 }
 0x345   :  { %v14336_v44 = vpack.c.bf16 %v2188_v58, %v2188_v58  ;;  %v2803_v58 = vsel %vm120_vm2, %v13025_v60, 0.0  ;;  %v11793_v43 = vcombine.high %v2210_v48, %v2214_v38  ;;  %v2807_v21 = vsel %vm120_vm2, %v13029_v56, 0.0  ;;  %v2903_v38 = vld [vmem:[#allocation5 + $0x960] sm:$0xff] }
 0x346   :  { %v2185_v45 = vpop.f32.mrf.mxu1  ;;  %v2887_v56 = vld [vmem:[#allocation5 + $0x8e0] sm:$0xff] }
 0x347   :  { %2608 = vmatmul.mubr.bf16.vlgmr.msra.gmra.mxu0 %v14336_v44  ;;  %2649 = vmatmul.mubr.bf16.vlgmr.msra.gmra.mxu1 %v14336_v44  ;;  %v11790_v45 = vcombine.low %v2209_v34, %v2213_v36  ;;  %v2912_v34 = vld [vmem:[#allocation5 + $0x9a8] sm:$0xff]  ;;  %v2899_v36 = vld [vmem:[#allocation5 + $0x940] sm:$0xff] }
 0x348   :  { %2658 = vmatpush1.bf16.msra.mxu0 %v11830_v51  ;;  %2699 = vmatpush1.bf16.msra.mxu1 %v11832_v11  ;;  %v13653_v5 = vpop.f32.mrf.mxu1  ;;  %v2799_v51 = vsel %vm120_vm2, %v13021_v7, 0.0  ;;  %v11807_v11 = vcombine.high %v2225_v12, %v2229_v13  ;;  %v2194_v7 = vld [vmem:[#allocation5 + $0x618] sm:$0xff]  ;;  %v13030_v13 = vunpack.c.h.bf16 %v13421_v62  ;;  %v2892_v62 = vld [vmem:[#allocation5 + $0x908] sm:$0xff] }
 0x349   :  { %2659 = vmatprep.subr.bf16.mxu0 %v11823_v52  ;;  %2700 = vmatprep.subr.bf16.mxu1 %v11825_v1  ;;  %v2800_v27 = vadd.f32 %v2799_v51, %v2798_v42  ;;  %v2205_v52 = vld [vmem:[#allocation5 + $0x670] sm:$0xff]  ;;  %v2202_v1 = vld [vmem:[#allocation5 + $0x658] sm:$0xff]  ;;  %v11777_v42 = vcombine.high %v2194_v7, %v2198_v8  ;;  %v11776_v49 = vcombine.low %v2194_v7, %v2198_v8 }
 0x34a   :  { %2689 = vmatprep.mubr.bf16.mxu0 %v13942_v3  ;;  %2730 = vmatprep.mubr.bf16.mxu1 %v13942_v3  ;;  %v11783_v63 = vcombine.high %v2201_v61, %v2205_v52  ;;  %v11785_v5 = vcombine.high %v2202_v1, %v2206_v2  ;;  %v11784_v12 = vcombine.low %v2202_v1, %v2206_v2  ;;  %v2809_v51 = vsel %vm120_vm2, %v13030_v13, 0.0  ;;  %v2876_v13 = vld [vmem:[#allocation5 + $0x888] sm:$0xff] }
 0x34b   :  { %v2802_v41 = vadd.f32 %v2801_v32, %v2800_v27  ;;  %v11908_v27 = vcombine.high %v2915_v25, %v2919_v17  ;;  %v11891_v1 = vcombine.low %v2899_v36, %v2903_v38 }
 0x34c   :  { %2660 = vmatpush1.bf16.msra.mxu0 %v11822_v6  ;;  %2701 = vmatpush1.bf16.msra.mxu1 %v11824_v50  ;;  %v2193_v6 = vld [vmem:[#allocation5 + $0x610] sm:$0xff] }
 0x34d   :  { %2661 = vmatprep.subr.bf16.mxu0 %v11815_v9  ;;  %2702 = vmatprep.subr.bf16.mxu1 %v11817_v10  ;;  %v2804_v53 = vadd.f32 %v2803_v58, %v2802_v41  ;;  %v2197_v50 = vld [vmem:[#allocation5 + $0x630] sm:$0xff]  ;;  %v11782_v10 = vcombine.low %v2201_v61, %v2205_v52  ;;  %v2900_v41 = vld [vmem:[#allocation5 + $0x948] sm:$0xff]  ;;  %v11892_v58 = vcombine.high %v2899_v36, %v2903_v38  ;;  %v2895_v61 = vld [vmem:[#allocation5 + $0x920] sm:$0xff] }
 0x34e   :  { %v11775_v22 = vcombine.high %v2193_v6, %v2197_v50  ;;  %v2896_v52 = vld [vmem:[#allocation5 + $0x928] sm:$0xff]  ;;  %v14377_v36 = vld [vmem:[#allocation5 + $0x9d8] sm:$0xff] }
 0x34f   :  { %v2806_v9 = vadd.f32 %v2805_v46, %v2804_v53  ;;  %v2884_v46 = vld [vmem:[#allocation5 + $0x8c8] sm:$0xff]  ;;  %v14381_v38 = vld [vmem:[#allocation5 + $0x9f8] sm:$0xff] }
 0x350   :  { %2662 = vmatpush1.bf16.msra.mxu0 %v11814_v37  ;;  %2703 = vmatpush1.bf16.msra.mxu1 %v11816_v47  ;;  %v11774_v47 = vcombine.low %v2193_v6, %v2197_v50  ;;  %v11885_v6 = vcombine.low %v2892_v62, %v2896_v52 }
 0x351   :  { %2663 = vmatprep.subr.bf16.mxu0 %v11807_v11  ;;  %2704 = vmatprep.subr.bf16.mxu1 %v11809_v23  ;;  %v2808_v37 = vadd.f32 %v2807_v21, %v2806_v9 }
 0x353   :  { %v2810_v11 = vadd.f32 %v2809_v51, %v2808_v37  ;;  %v2871_v51 = vld [vmem:[#allocation5 + $0x860] sm:$0xff] }
 0x354   :  { %2664 = vmatpush1.bf16.msra.mxu0 %v11806_v14  ;;  %2705 = vmatpush1.bf16.msra.mxu1 %v11808_v19  ;;  %v2920_v14 = vld [vmem:[#allocation5 + $0x9e8] sm:$0xff]  ;;  %v2911_v19 = vld [vmem:[#allocation5 + $0x9a0] sm:$0xff] }
 0x355   :  { %2665 = vmatprep.subr.bf16.mxu0 %v11799_v20  ;;  %2706 = vmatprep.subr.bf16.mxu1 %v11801_v33  ;;  %v2811_v23 = vmul.f32 0.0625, %v2810_v11  ;;  %v11909_v60 = vcombine.low %v2916_v18, %v2920_v14  ;;  %v11910_v32 = vcombine.high %v2916_v18, %v2920_v14  ;;  %v2908_v33 = vld [vmem:[#allocation5 + $0x988] sm:$0xff] }
 0x356   :  { %v11902_v48 = vcombine.high %v2908_v33, %v2912_v34  ;;  %v11901_v39 = vcombine.low %v2908_v33, %v2912_v34  ;;  %v2868_v11 = vld [vmem:[#allocation5 + $0x848] sm:$0xff]  ;;  %v14373_v33 = vld [vmem:[#allocation5 + $0x9d0] sm:$0xff] }
 0x357   :  { %v2812_v24 = vpack.c.bf16 %v2811_v23, %v2811_v23  ;;  %v2860_v14 = vld [vmem:[#allocation5 + $0x808] sm:$0xff]  ;;  %v14375_v34 = vld [vmem:[#allocation5 + $0x9f0] sm:$0xff] }
 0x358   :  { %2666 = vmatpush1.bf16.msra.mxu0 %v11798_v54  ;;  %2707 = vmatpush1.bf16.msra.mxu1 %v11800_v30  ;;  %v2904_v54 = vld [vmem:[#allocation5 + $0x968] sm:$0xff] }
 0x359   :  { %2667 = vmatprep.subr.bf16.mxu0 %v11791_v31  ;;  %2708 = vmatprep.subr.bf16.mxu1 %v11793_v43  ;;  %v11894_v31 = vcombine.high %v2900_v41, %v2904_v54  ;;  %v2891_v43 = vld [vmem:[#allocation5 + $0x900] sm:$0xff]  ;;  %v11893_v2 = vcombine.low %v2900_v41, %v2904_v54  ;;  %v11911_v41 = vcombine.low %v14373_v33, %v14375_v34 }
 0x35a   :  { %v11884_v53 = vcombine.high %v2891_v43, %v2895_v61  ;;  %v11913_v54 = vcombine.low %v14377_v36, %v14381_v38 }
 0x35c   :  { %2668 = vmatpush1.bf16.msra.mxu0 %v11790_v45  ;;  %2709 = vmatpush1.bf16.msra.mxu1 %v11792_v55  ;;  %v11886_v45 = vcombine.high %v2892_v62, %v2896_v52  ;;  %v2883_v55 = vld [vmem:[#allocation5 + $0x8c0] sm:$0xff] }
 0x35d   :  { %2669 = vmatprep.subr.bf16.mxu0 %v11783_v63  ;;  %2710 = vmatprep.subr.bf16.mxu1 %v11785_v5  ;;  %v2888_v63 = vld [vmem:[#allocation5 + $0x8e8] sm:$0xff]  ;;  %v11883_v5 = vcombine.low %v2891_v43, %v2895_v61  ;;  %v11876_v50 = vcombine.high %v2883_v55, %v2887_v56  ;;  %v11875_v8 = vcombine.low %v2883_v55, %v2887_v56 }
 0x35e   :  { %v11878_v7 = vcombine.high %v2884_v46, %v2888_v63  ;;  %v11877_v9 = vcombine.low %v2884_v46, %v2888_v63 }
 0x360   :  { %2670 = vmatpush1.bf16.msra.mxu0 %v11782_v10  ;;  %2711 = vmatpush1.bf16.msra.mxu1 %v11784_v12  ;;  %v2875_v10 = vld [vmem:[#allocation5 + $0x880] sm:$0xff] }
 0x361   :  { %2671 = vmatprep.subr.bf16.mxu0 %v11775_v22  ;;  %2712 = vmatprep.subr.bf16.mxu1 %v11777_v42  ;;  %v2879_v12 = vld [vmem:[#allocation5 + $0x8a0] sm:$0xff]  ;;  %v2880_v22 = vld [vmem:[#allocation5 + $0x8a8] sm:$0xff] }
 0x362   :  { %v11868_v21 = vcombine.high %v2875_v10, %v2879_v12  ;;  %v11867_v42 = vcombine.low %v2875_v10, %v2879_v12  ;;  %v11869_v37 = vcombine.low %v2876_v13, %v2880_v22 }
 0x364   :  { %2672 = vmatpush1.bf16.msra.mxu0 %v11774_v47  ;;  %2713 = vmatpush1.bf16.msra.mxu1 %v11776_v49  ;;  %v11870_v47 = vcombine.high %v2876_v13, %v2880_v22  ;;  %v2867_v49 = vld [vmem:[#allocation5 + $0x840] sm:$0xff]  ;;  %v13425_v22 = vld [vmem:[%s15547_s0 + $0x158] sm:$0xff]  }
 0x365   :  { %13654 = vmatprep.subr.bf16.mxu0 %v13940_v0  ;;  %3243 = vmatprep.subr.bf16.mxu1 %v11908_v27  ;;  %v11860_v23 = vcombine.high %v2867_v49, %v2871_v51  ;;  %v11859_v25 = vcombine.low %v2867_v49, %v2871_v51  ;;  %v2863_v27 = vld [vmem:[#allocation5 + $0x820] sm:$0xff] }
 0x367   :  { %2690 = vmatmul.mubr.bf16.vlgmr.msra.gmra.mxu0 %v14336_v44  ;;  %2731 = vmatmul.mubr.bf16.vlgmr.msra.gmra.mxu1 %v14336_v44  ;;  %v2907_v44 = vld [vmem:[#allocation5 + $0x980] sm:$0xff] }
 0x368   :  { %13655 = vmatpush3.bf16.msra.mxu0 %v14006_v4  ;;  %13656 = vmatprep.mubr.msk.bf16.mxu0 %vm13941_vm0, %v13940_v0  ;;  %v11900_v20 = vcombine.high %v2907_v44, %v2911_v19  ;;  %v11899_v30 = vcombine.low %v2907_v44, %v2911_v19  ;;  %v2864_v19 = vld [vmem:[#allocation5 + $0x828] sm:$0xff] }
 0x369   :  { %3275 = vmatprep.mubr.bf16.mxu1 %v13942_v3  ;;  %3284 = vmatprep.subr.bf16.mxu0 %v11910_v32  ;;  %v11853_v32 = vcombine.low %v2860_v14, %v2864_v19 }
 0x36a   :  { %3244 = vmatpush1.bf16.msra.mxu1 %v11907_v59  ;;  %v2859_v59 = vld [vmem:[#allocation5 + $0x800] sm:$0xff] }
 0x36b   :  { %3245 = vmatprep.subr.bf16.mxu1 %v11900_v20  ;;  %v11852_v44 = vcombine.high %v2859_v59, %v2863_v27  ;;  %v11854_v20 = vcombine.high %v2860_v14, %v2864_v19 }
 0x36e   :  { %3246 = vmatpush1.bf16.msra.mxu1 %v11899_v30  ;;  %v11914_v30 = vcombine.high %v14377_v36, %v14381_v38 }
 0x36f   :  { %13657 = vmatmul.mubr.msk.bf16.vlgmr.msra.gmra.mxu0 %vm120_vm2, %v2812_v24  ;;  %3247 = vmatprep.subr.bf16.mxu1 %v11892_v58  ;;  %v2872_v24 = vld [vmem:[#allocation5 + $0x868] sm:$0xff] }
 0x370   :  { %3316 = vmatprep.mubr.bf16.mxu0 %v13942_v3  ;;  %3285 = vmatpush1.bf16.msra.mxu0 %v11909_v60  ;;  %v11861_v17 = vcombine.low %v2868_v11, %v2872_v24  ;;  %v11862_v18 = vcombine.high %v2868_v11, %v2872_v24  ;;  %v11851_v60 = vcombine.low %v2859_v59, %v2863_v27 }
 0x371   :  { %3286 = vmatprep.subr.bf16.mxu0 %v11902_v48  ;;  %v11912_v48 = vcombine.high %v14373_v33, %v14375_v34 }
 0x372   :  { %3248 = vmatpush1.bf16.msra.mxu1 %v11891_v1 }
 0x373   :  { %3249 = vmatprep.subr.bf16.mxu1 %v11884_v53 }
 0x374   :  { %3287 = vmatpush1.bf16.msra.mxu0 %v11901_v39 }
 0x375   :  { %3288 = vmatprep.subr.bf16.mxu0 %v11894_v31 }
 0x376   :  { %3250 = vmatpush1.bf16.msra.mxu1 %v11883_v5 }
 0x377   :  { %3251 = vmatprep.subr.bf16.mxu1 %v11876_v50 }
 0x378   :  { %3289 = vmatpush1.bf16.msra.mxu0 %v11893_v2 }
 0x379   :  { %3290 = vmatprep.subr.bf16.mxu0 %v11886_v45 }
 0x37a   :  { %3252 = vmatpush1.bf16.msra.mxu1 %v11875_v8 }
 0x37b   :  { %3253 = vmatprep.subr.bf16.mxu1 %v11868_v21 }
 0x37c   :  { %3291 = vmatpush1.bf16.msra.mxu0 %v11885_v6 }
 0x37d   :  { %3292 = vmatprep.subr.bf16.mxu0 %v11878_v7  ;;  %v13424_v7 = vld [vmem:[%s15547_s0 + $0x150] sm:$0xff]  }
 0x37e   :  { %3254 = vmatpush1.bf16.msra.mxu1 %v11867_v42  ;;  %v13042_v13 = vunpack.c.h.bf16 %v13424_v7 }
 0x37f   :  { %3255 = vmatprep.subr.bf16.mxu1 %v11860_v23 }
 0x380   :  { %3293 = vmatpush1.bf16.msra.mxu0 %v11877_v9  ;;  %v13041_v9 = vunpack.c.l.bf16 %v13424_v7 }
 0x381   :  { %3294 = vmatprep.subr.bf16.mxu0 %v11870_v47  ;;  %v3457_v47 = vsel %vm120_vm2, %v13042_v13, 0.0 }
 0x382   :  { %3256 = vmatpush1.bf16.msra.mxu1 %v11859_v25  ;;  %v3455_v21 = vsel %vm120_vm2, %v13041_v9, 0.0 }
 0x383   :  { %3257 = vmatprep.subr.bf16.mxu1 %v11852_v44 }
 0x384   :  { %3295 = vmatpush1.bf16.msra.mxu0 %v11869_v37  ;;  %v13045_v37 = vunpack.c.l.bf16 %v13425_v22 }
 0x385   :  { %3296 = vmatprep.subr.bf16.mxu0 %v11862_v18  ;;  %v13046_v18 = vunpack.c.h.bf16 %v13425_v22  ;;  %v2897_v22 = vld [vmem:[#allocation5 + $0x930] sm:$0xff] }
 0x386   :  { %3258 = vmatpush1.bf16.msra.mxu1 %v11851_v60  ;;  %v3459_v59 = vsel %vm120_vm2, %v13045_v37, 0.0  ;;  %v2898_v37 = vld [vmem:[#allocation5 + $0x938] sm:$0xff] }
 0x387   :  { %3325 = vmatprep.subr.bf16.mxu1 %v11912_v48  ;;  %v3461_v48 = vsel %vm120_vm2, %v13046_v18, 0.0 }
 0x388   :  { %3297 = vmatpush1.bf16.msra.mxu0 %v11861_v17 }
 0x389   :  { %3298 = vmatprep.subr.bf16.mxu0 %v11854_v20 }
 0x38c   :  { %3299 = vmatpush1.bf16.msra.mxu0 %v11853_v32 }
 0x38d   :  { %3366 = vmatprep.subr.bf16.mxu0 %v11914_v30  ;;  %v2909_v30 = vld [vmem:[#allocation5 + $0x990] sm:$0xff] }
 0x407   :  { %v2609_v39 = vpop.f32.mrf.mxu0  ;;  %v2650_v58 = vpop.f32.mrf.mxu1 }
 0x408   :  { %v14390_v31 = vadd.f32 %v2609_v39, %v14289_v35  ;;  %v14393_v43 = vadd.f32 %v2650_v58, %v14292_v57  ;;  %v13422_v35 = vld [vmem:[%s15547_s0 + $0x140] sm:$0xff]   ;;  %v13423_v57 = vld [vmem:[%s15547_s0 + $0x148] sm:$0xff]   ;;  %v2913_v58 = vld [vmem:[#allocation5 + $0x9b0] sm:$0xff] }
 0x409   :  { %v2611_v61 = vpop.f32.mrf.mxu0  ;;  %v2652_v62 = vpop.f32.mrf.mxu1  ;;  %v13033_v56 = vunpack.c.l.bf16 %v13422_v35  ;;  %v13034_v46 = vunpack.c.h.bf16 %v13422_v35  ;;  %v13037_v63 = vunpack.c.l.bf16 %v13423_v57  ;;  %v13038_v6 = vunpack.c.h.bf16 %v13423_v57  ;;  %v13427_v57 = vld [vmem:[%s15547_s0 + $0x168] sm:$0xff]  }
 0x40a   :  { %v14396_v52 = vadd.f32 %v2611_v61, %v14295_v28  ;;  %v14399_v1 = vadd.f32 %v2652_v62, %v14298_v40  ;;  %v2914_v61 = vld [vmem:[#allocation5 + $0x9b8] sm:$0xff]  ;;  %v11904_v35 = vcombine.high %v2909_v30, %v2913_v58  ;;  %v11903_v7 = vcombine.low %v2909_v30, %v2913_v58 }
 0x40b   :  { %v2613_v2 = vpop.f32.mrf.mxu0  ;;  %v2654_v53 = vpop.f32.mrf.mxu1  ;;  %v3448_v28 = vsel %vm120_vm2, %v13033_v56, 0.0  ;;  %v3449_v40 = vsel %vm120_vm2, %v13034_v46, 0.0  ;;  %v3451_v50 = vsel %vm120_vm2, %v13037_v63, 0.0  ;;  %v3453_v10 = vsel %vm120_vm2, %v13038_v6, 0.0  ;;  %v2901_v46 = vld [vmem:[#allocation5 + $0x950] sm:$0xff]  ;;  %v2882_v30 = vld [vmem:[#allocation5 + $0x8b8] sm:$0xff] }
 0x40c   :  { %v3450_v5 = vadd.f32 %v3449_v40, %v3448_v28  ;;  %v2905_v28 = vld [vmem:[#allocation5 + $0x970] sm:$0xff]  ;;  %v2902_v40 = vld [vmem:[#allocation5 + $0x958] sm:$0xff]  ;;  %v13053_v9 = vunpack.c.l.bf16 %v13427_v57  ;;  %v13054_v38 = vunpack.c.h.bf16 %v13427_v57 }
 0x40d   :  { %v2614_v45 = vpop.f32.mrf.mxu0  ;;  %v2655_v55 = vpop.f32.mrf.mxu1  ;;  %v11895_v34 = vcombine.low %v2901_v46, %v2905_v28 }
 0x40e   :  { %v3452_v8 = vadd.f32 %v3451_v50, %v3450_v5  ;;  %v2906_v5 = vld [vmem:[#allocation5 + $0x978] sm:$0xff] }
 0x40f   :  { %v11898_v13 = vcombine.high %v2902_v40, %v2906_v5  ;;  %v11897_v36 = vcombine.low %v2902_v40, %v2906_v5 }
 0x410   :  { %v3454_v12 = vadd.f32 %v3453_v10, %v3452_v8 }
 0x412   :  { %v3456_v42 = vadd.f32 %v3455_v21, %v3454_v12  ;;  %v11896_v12 = vcombine.high %v2901_v46, %v2905_v28  ;;  %v2893_v21 = vld [vmem:[#allocation5 + $0x910] sm:$0xff]  ;;  %v2874_v46 = vld [vmem:[#allocation5 + $0x878] sm:$0xff] }
 0x414   :  { %v3458_v24 = vadd.f32 %v3457_v47, %v3456_v42  ;;  %v2894_v42 = vld [vmem:[#allocation5 + $0x918] sm:$0xff] }
 0x415   :  { %v11890_v47 = vcombine.high %v2894_v42, %v2898_v37 }
 0x427   :  { %v2691_v49 = vpop.f32.mrf.mxu0  ;;  %v2732_v51 = vpop.f32.mrf.mxu1 }
 0x428   :  { %v14420_v11 = vadd.f32 %v2691_v49, %v14319_v26  ;;  %v14423_v23 = vadd.f32 %v2732_v51, %v14322_v16  ;;  %v13426_v26 = vld [vmem:[%s15547_s0 + $0x160] sm:$0xff]   ;;  %v3460_v16 = vadd.f32 %v3459_v59, %v3458_v24  ;;  %v2885_v49 = vld [vmem:[#allocation5 + $0x8d0] sm:$0xff]  ;;  %v11887_v59 = vcombine.low %v2893_v21, %v2897_v22 }
 0x429   :  { %v2693_v25 = vpop.f32.mrf.mxu0  ;;  %v2734_v17 = vpop.f32.mrf.mxu1  ;;  %v13049_v20 = vunpack.c.l.bf16 %v13426_v26  ;;  %v13050_v53 = vunpack.c.h.bf16 %v13426_v26  ;;  %v13428_v51 = vld [vmem:[%s15547_s0 + $0x170] sm:$0xff]   ;;  %v11889_v26 = vcombine.low %v2894_v42, %v2898_v37 }
 0x42a   :  { %v14427_v27 = vadd.f32 %v2693_v25, %v14326_v15  ;;  %v14430_v14 = vadd.f32 %v2734_v17, %v14329_v29  ;;  %v2910_v15 = vld [vmem:[#allocation5 + $0x998] sm:$0xff]  ;;  %v3462_v29 = vadd.f32 %v3461_v48, %v3460_v16  ;;  %v2889_v24 = vld [vmem:[#allocation5 + $0x8f0] sm:$0xff] }
 0x42b   :  { %v2695_v44 = vpop.f32.mrf.mxu0  ;;  %v2736_v19 = vpop.f32.mrf.mxu1  ;;  %v3463_v45 = vsel %vm120_vm2, %v13049_v20, 0.0  ;;  %v11906_v56 = vcombine.high %v2910_v15, %v2914_v61  ;;  %v11905_v8 = vcombine.low %v2910_v15, %v2914_v61  ;;  %v3465_v10 = vsel %vm120_vm2, %v13050_v53, 0.0  ;;  %v2886_v25 = vld [vmem:[#allocation5 + $0x8d8] sm:$0xff]  ;;  %v2881_v20 = vld [vmem:[#allocation5 + $0x8b0] sm:$0xff] }
 0x42c   :  { %v3464_v6 = vadd.f32 %v3463_v45, %v3462_v29  ;;  %v2890_v17 = vld [vmem:[#allocation5 + $0x8f8] sm:$0xff]  ;;  %v13057_v44 = vunpack.c.l.bf16 %v13428_v51  ;;  %v3469_v19 = vsel %vm120_vm2, %v13054_v38, 0.0  ;;  %v11880_v16 = vcombine.high %v2885_v49, %v2889_v24  ;;  %v2869_v53 = vld [vmem:[#allocation5 + $0x850] sm:$0xff] }
 0x42d   :  { %v2696_v60 = vpop.f32.mrf.mxu0  ;;  %v2737_v32 = vpop.f32.mrf.mxu1  ;;  %v2878_v48 = vld [vmem:[#allocation5 + $0x898] sm:$0xff]  ;;  %v11879_v58 = vcombine.low %v2885_v49, %v2889_v24  ;;  %v11881_v15 = vcombine.low %v2886_v25, %v2890_v17  ;;  %v13058_v61 = vunpack.c.h.bf16 %v13428_v51  ;;  %v3583_v51 = vld [vmem:[#allocation5 + $0xbc0] sm:$0xff] }
 0x42e   :  { %v3466_v33 = vadd.f32 %v3465_v10, %v3464_v6  ;;  %v11882_v60 = vcombine.high %v2886_v25, %v2890_v17  ;;  %v2877_v32 = vld [vmem:[#allocation5 + $0x890] sm:$0xff]  ;;  %v11873_v28 = vcombine.low %v2878_v48, %v2882_v30  ;;  %v2866_v10 = vld [vmem:[#allocation5 + $0x838] sm:$0xff]  ;;  %v3587_v24 = vld [vmem:[#allocation5 + $0xbe0] sm:$0xff] }
 0x42f   :  { %v2850_v39 = vpop.f32.mrf.mxu0  ;;  %v11872_v29 = vcombine.high %v2877_v32, %v2881_v20  ;;  %v13429_v45 = vld [vmem:[%s15547_s0 + $0x178] sm:$0xff]   ;;  %v3473_v5 = vsel %vm120_vm2, %v13058_v61, 0.0  ;;  %v3584_v25 = vld [vmem:[#allocation5 + $0xbc8] sm:$0xff]  ;;  %v11988_v17 = vcombine.low %v3583_v51, %v3587_v24 }
 0x430   :  { %v2856_v62 = vmax.f32 %v2850_v39, 0.0  ;;  %v13061_v40 = vunpack.c.l.bf16 %v13429_v45 }
 0x431   :  { %v13658_v2 = vpop.f32.mrf.mxu0 }
 0x432   :  { %v14437_v55 = vpack.c.bf16 %v2856_v62, %v2856_v62  ;;  %v3471_v62 = vsel %vm120_vm2, %v13057_v44, 0.0  ;;  %v11874_v2 = vcombine.high %v2878_v48, %v2882_v30  ;;  %v3475_v42 = vsel %vm120_vm2, %v13061_v40, 0.0  ;;  %v3571_v30 = vld [vmem:[#allocation5 + $0xb60] sm:$0xff] }
 0x433   :  { %v2853_v63 = vpop.f32.mrf.mxu0  ;;  %v3555_v40 = vld [vmem:[#allocation5 + $0xae0] sm:$0xff] }
 0x434   :  { %3276 = vmatmul.mubr.bf16.vlgmr.msra.gmra.mxu1 %v14437_v55  ;;  %3317 = vmatmul.mubr.bf16.vlgmr.msra.gmra.mxu0 %v14437_v55  ;;  %v11871_v63 = vcombine.low %v2877_v32, %v2881_v20  ;;  %v3580_v32 = vld [vmem:[#allocation5 + $0xba8] sm:$0xff]  ;;  %v3567_v20 = vld [vmem:[#allocation5 + $0xb40] sm:$0xff] }
 0x435   :  { %3326 = vmatpush1.bf16.msra.mxu1 %v11911_v41  ;;  %3367 = vmatpush1.bf16.msra.mxu0 %v11913_v54  ;;  %v13659_v50 = vpop.f32.mrf.mxu0  ;;  %v3467_v41 = vsel %vm120_vm2, %v13053_v9, 0.0  ;;  %v11888_v54 = vcombine.high %v2893_v21, %v2897_v22  ;;  %v2862_v9 = vld [vmem:[#allocation5 + $0x818] sm:$0xff]  ;;  %v13062_v22 = vunpack.c.h.bf16 %v13429_v45  ;;  %v3560_v45 = vld [vmem:[#allocation5 + $0xb08] sm:$0xff] }
 0x436   :  { %3327 = vmatprep.subr.bf16.mxu1 %v11904_v35  ;;  %3368 = vmatprep.subr.bf16.mxu0 %v11906_v56  ;;  %v3468_v18 = vadd.f32 %v3467_v41, %v3466_v33  ;;  %v2873_v35 = vld [vmem:[#allocation5 + $0x870] sm:$0xff]  ;;  %v2870_v56 = vld [vmem:[#allocation5 + $0x858] sm:$0xff]  ;;  %v11858_v33 = vcombine.high %v2862_v9, %v2866_v10  ;;  %v11857_v38 = vcombine.low %v2862_v9, %v2866_v10 }
 0x437   :  { %3357 = vmatprep.mubr.bf16.mxu1 %v13942_v3  ;;  %3398 = vmatprep.mubr.bf16.mxu0 %v13942_v3  ;;  %v11864_v6 = vcombine.high %v2869_v53, %v2873_v35  ;;  %v11866_v50 = vcombine.high %v2870_v56, %v2874_v46  ;;  %v11865_v21 = vcombine.low %v2870_v56, %v2874_v46  ;;  %v3477_v41 = vsel %vm120_vm2, %v13062_v22, 0.0  ;;  %v3544_v22 = vld [vmem:[#allocation5 + $0xa88] sm:$0xff] }
 0x438   :  { %v3470_v39 = vadd.f32 %v3469_v19, %v3468_v18  ;;  %v11989_v18 = vcombine.high %v3583_v51, %v3587_v24  ;;  %v11972_v56 = vcombine.low %v3567_v20, %v3571_v30 }
 0x439   :  { %3328 = vmatpush1.bf16.msra.mxu1 %v11903_v7  ;;  %3369 = vmatpush1.bf16.msra.mxu0 %v11905_v8  ;;  %v2861_v7 = vld [vmem:[#allocation5 + $0x810] sm:$0xff] }
 0x43a   :  { %3329 = vmatprep.subr.bf16.mxu1 %v11896_v12  ;;  %3370 = vmatprep.subr.bf16.mxu0 %v11898_v13  ;;  %v3472_v57 = vadd.f32 %v3471_v62, %v3470_v39  ;;  %v2865_v8 = vld [vmem:[#allocation5 + $0x830] sm:$0xff]  ;;  %v11863_v13 = vcombine.low %v2869_v53, %v2873_v35  ;;  %v3568_v39 = vld [vmem:[#allocation5 + $0xb48] sm:$0xff]  ;;  %v11973_v62 = vcombine.high %v3567_v20, %v3571_v30  ;;  %v3563_v53 = vld [vmem:[#allocation5 + $0xb20] sm:$0xff] }
 0x43b   :  { %v11856_v37 = vcombine.high %v2861_v7, %v2865_v8  ;;  %v3564_v35 = vld [vmem:[#allocation5 + $0xb28] sm:$0xff]  ;;  %v14478_v20 = vld [vmem:[#allocation5 + $0xbd8] sm:$0xff] }
 0x43c   :  { %v3474_v12 = vadd.f32 %v3473_v5, %v3472_v57  ;;  %v3552_v5 = vld [vmem:[#allocation5 + $0xac8] sm:$0xff]  ;;  %v14482_v30 = vld [vmem:[#allocation5 + $0xbf8] sm:$0xff] }
 0x43d   :  { %3330 = vmatpush1.bf16.msra.mxu1 %v11895_v34  ;;  %3371 = vmatpush1.bf16.msra.mxu0 %v11897_v36  ;;  %v11855_v36 = vcombine.low %v2861_v7, %v2865_v8  ;;  %v11966_v7 = vcombine.low %v3560_v45, %v3564_v35 }
 0x43e   :  { %3331 = vmatprep.subr.bf16.mxu1 %v11888_v54  ;;  %3372 = vmatprep.subr.bf16.mxu0 %v11890_v47  ;;  %v3476_v34 = vadd.f32 %v3475_v42, %v3474_v12 }
 0x440   :  { %v3478_v54 = vadd.f32 %v3477_v41, %v3476_v34  ;;  %v3539_v41 = vld [vmem:[#allocation5 + $0xa60] sm:$0xff] }
 0x441   :  { %3332 = vmatpush1.bf16.msra.mxu1 %v11887_v59  ;;  %3373 = vmatpush1.bf16.msra.mxu0 %v11889_v26  ;;  %v3588_v59 = vld [vmem:[#allocation5 + $0xbe8] sm:$0xff]  ;;  %v3579_v26 = vld [vmem:[#allocation5 + $0xba0] sm:$0xff] }
 0x442   :  { %3333 = vmatprep.subr.bf16.mxu1 %v11880_v16  ;;  %3374 = vmatprep.subr.bf16.mxu0 %v11882_v60  ;;  %v3479_v47 = vmul.f32 0.0625, %v3478_v54  ;;  %v11990_v44 = vcombine.low %v3584_v25, %v3588_v59  ;;  %v11991_v19 = vcombine.high %v3584_v25, %v3588_v59  ;;  %v3576_v60 = vld [vmem:[#allocation5 + $0xb88] sm:$0xff] }
 0x443   :  { %v11983_v48 = vcombine.high %v3576_v60, %v3580_v32  ;;  %v11982_v61 = vcombine.low %v3576_v60, %v3580_v32  ;;  %v3536_v54 = vld [vmem:[#allocation5 + $0xa48] sm:$0xff]  ;;  %v14474_v60 = vld [vmem:[#allocation5 + $0xbd0] sm:$0xff] }
 0x444   :  { %v3480_v49 = vpack.c.bf16 %v3479_v47, %v3479_v47  ;;  %v3528_v59 = vld [vmem:[#allocation5 + $0xa08] sm:$0xff]  ;;  %v14476_v32 = vld [vmem:[#allocation5 + $0xbf0] sm:$0xff] }
 0x445   :  { %3334 = vmatpush1.bf16.msra.mxu1 %v11879_v58  ;;  %3375 = vmatpush1.bf16.msra.mxu0 %v11881_v15  ;;  %v3572_v58 = vld [vmem:[#allocation5 + $0xb68] sm:$0xff] }
 0x446   :  { %3335 = vmatprep.subr.bf16.mxu1 %v11872_v29  ;;  %3376 = vmatprep.subr.bf16.mxu0 %v11874_v2  ;;  %v11975_v29 = vcombine.high %v3568_v39, %v3572_v58  ;;  %v3559_v2 = vld [vmem:[#allocation5 + $0xb00] sm:$0xff]  ;;  %v11974_v46 = vcombine.low %v3568_v39, %v3572_v58  ;;  %v11992_v39 = vcombine.low %v14474_v60, %v14476_v32 }
 0x447   :  { %v11965_v57 = vcombine.high %v3559_v2, %v3563_v53  ;;  %v11994_v58 = vcombine.low %v14478_v20, %v14482_v30 }
 0x449   :  { %3336 = vmatpush1.bf16.msra.mxu1 %v11871_v63  ;;  %3377 = vmatpush1.bf16.msra.mxu0 %v11873_v28  ;;  %v11967_v63 = vcombine.high %v3560_v45, %v3564_v35  ;;  %v3551_v28 = vld [vmem:[#allocation5 + $0xac0] sm:$0xff] }
 0x44a   :  { %3337 = vmatprep.subr.bf16.mxu1 %v11864_v6  ;;  %3378 = vmatprep.subr.bf16.mxu0 %v11866_v50  ;;  %v3556_v6 = vld [vmem:[#allocation5 + $0xae8] sm:$0xff]  ;;  %v11964_v50 = vcombine.low %v3559_v2, %v3563_v53  ;;  %v11957_v8 = vcombine.high %v3551_v28, %v3555_v40  ;;  %v11956_v10 = vcombine.low %v3551_v28, %v3555_v40 }
 0x44b   :  { %v11959_v9 = vcombine.high %v3552_v5, %v3556_v6  ;;  %v11958_v12 = vcombine.low %v3552_v5, %v3556_v6 }
 0x44d   :  { %3338 = vmatpush1.bf16.msra.mxu1 %v11863_v13  ;;  %3379 = vmatpush1.bf16.msra.mxu0 %v11865_v21  ;;  %v3543_v13 = vld [vmem:[#allocation5 + $0xa80] sm:$0xff] }
 0x44e   :  { %3339 = vmatprep.subr.bf16.mxu1 %v11856_v37  ;;  %3380 = vmatprep.subr.bf16.mxu0 %v11858_v33  ;;  %v3547_v21 = vld [vmem:[#allocation5 + $0xaa0] sm:$0xff]  ;;  %v3548_v37 = vld [vmem:[#allocation5 + $0xaa8] sm:$0xff] }
 0x44f   :  { %v11949_v42 = vcombine.high %v3543_v13, %v3547_v21  ;;  %v11948_v33 = vcombine.low %v3543_v13, %v3547_v21  ;;  %v11950_v34 = vcombine.low %v3544_v22, %v3548_v37 }
 0x451   :  { %3340 = vmatpush1.bf16.msra.mxu1 %v11855_v36  ;;  %3381 = vmatpush1.bf16.msra.mxu0 %v11857_v38  ;;  %v11951_v36 = vcombine.high %v3544_v22, %v3548_v37  ;;  %v3535_v38 = vld [vmem:[#allocation5 + $0xa40] sm:$0xff]  ;;  %v13433_v37 = vld [vmem:[%s15547_s0 + $0x198] sm:$0xff]  }
 0x452   :  { %13660 = vmatprep.subr.bf16.mxu1 %v13940_v0  ;;  %3911 = vmatprep.subr.bf16.mxu0 %v11989_v18  ;;  %v11941_v47 = vcombine.high %v3535_v38, %v3539_v41  ;;  %v11940_v51 = vcombine.low %v3535_v38, %v3539_v41  ;;  %v3531_v18 = vld [vmem:[#allocation5 + $0xa20] sm:$0xff] }
 0x454   :  { %3358 = vmatmul.mubr.bf16.vlgmr.msra.gmra.mxu1 %v14437_v55  ;;  %3399 = vmatmul.mubr.bf16.vlgmr.msra.gmra.mxu0 %v14437_v55  ;;  %v3575_v55 = vld [vmem:[#allocation5 + $0xb80] sm:$0xff] }
 0x455   :  { %13661 = vmatpush3.bf16.msra.mxu1 %v14006_v4  ;;  %13662 = vmatprep.mubr.msk.bf16.mxu1 %vm13941_vm0, %v13940_v0  ;;  %v11981_v16 = vcombine.high %v3575_v55, %v3579_v26  ;;  %v11980_v15 = vcombine.low %v3575_v55, %v3579_v26  ;;  %v3532_v26 = vld [vmem:[#allocation5 + $0xa28] sm:$0xff] }
 0x456   :  { %3943 = vmatprep.mubr.bf16.mxu0 %v13942_v3  ;;  %3952 = vmatprep.subr.bf16.mxu1 %v11991_v19  ;;  %v11934_v19 = vcombine.low %v3528_v59, %v3532_v26 }
 0x457   :  { %3912 = vmatpush1.bf16.msra.mxu0 %v11988_v17  ;;  %v3527_v17 = vld [vmem:[#allocation5 + $0xa00] sm:$0xff] }
 0x458   :  { %3913 = vmatprep.subr.bf16.mxu0 %v11981_v16  ;;  %v11933_v55 = vcombine.high %v3527_v17, %v3531_v18  ;;  %v11935_v16 = vcombine.high %v3528_v59, %v3532_v26 }
 0x45b   :  { %3914 = vmatpush1.bf16.msra.mxu0 %v11980_v15  ;;  %v11995_v15 = vcombine.high %v14478_v20, %v14482_v30 }
 0x45c   :  { %13663 = vmatmul.mubr.msk.bf16.vlgmr.msra.gmra.mxu1 %vm120_vm2, %v3480_v49  ;;  %3915 = vmatprep.subr.bf16.mxu0 %v11973_v62  ;;  %v3540_v49 = vld [vmem:[#allocation5 + $0xa68] sm:$0xff] }
 0x45d   :  { %3984 = vmatprep.mubr.bf16.mxu1 %v13942_v3  ;;  %3953 = vmatpush1.bf16.msra.mxu1 %v11990_v44  ;;  %v11942_v24 = vcombine.low %v3536_v54, %v3540_v49  ;;  %v11943_v25 = vcombine.high %v3536_v54, %v3540_v49  ;;  %v11932_v44 = vcombine.low %v3527_v17, %v3531_v18 }
 0x45e   :  { %3954 = vmatprep.subr.bf16.mxu1 %v11983_v48  ;;  %v11993_v48 = vcombine.high %v14474_v60, %v14476_v32 }
 0x45f   :  { %3916 = vmatpush1.bf16.msra.mxu0 %v11972_v56 }
 0x460   :  { %3917 = vmatprep.subr.bf16.mxu0 %v11965_v57 }
 0x461   :  { %3955 = vmatpush1.bf16.msra.mxu1 %v11982_v61 }
 0x462   :  { %3956 = vmatprep.subr.bf16.mxu1 %v11975_v29 }
 0x463   :  { %3918 = vmatpush1.bf16.msra.mxu0 %v11964_v50 }
 0x464   :  { %3919 = vmatprep.subr.bf16.mxu0 %v11957_v8 }
 0x465   :  { %3957 = vmatpush1.bf16.msra.mxu1 %v11974_v46 }
 0x466   :  { %3958 = vmatprep.subr.bf16.mxu1 %v11967_v63 }
 0x467   :  { %3920 = vmatpush1.bf16.msra.mxu0 %v11956_v10 }
 0x468   :  { %3921 = vmatprep.subr.bf16.mxu0 %v11949_v42 }
 0x469   :  { %3959 = vmatpush1.bf16.msra.mxu1 %v11966_v7 }
 0x46a   :  { %3960 = vmatprep.subr.bf16.mxu1 %v11959_v9  ;;  %v13432_v9 = vld [vmem:[%s15547_s0 + $0x190] sm:$0xff]  }
 0x46b   :  { %3922 = vmatpush1.bf16.msra.mxu0 %v11948_v33  ;;  %v13074_v22 = vunpack.c.h.bf16 %v13432_v9 }
 0x46c   :  { %3923 = vmatprep.subr.bf16.mxu0 %v11941_v47 }
 0x46d   :  { %3961 = vmatpush1.bf16.msra.mxu1 %v11958_v12  ;;  %v13073_v12 = vunpack.c.l.bf16 %v13432_v9 }
 0x46e   :  { %3962 = vmatprep.subr.bf16.mxu1 %v11951_v36  ;;  %v4125_v36 = vsel %vm120_vm2, %v13074_v22, 0.0 }
 0x46f   :  { %3924 = vmatpush1.bf16.msra.mxu0 %v11940_v51  ;;  %v4123_v42 = vsel %vm120_vm2, %v13073_v12, 0.0 }
 0x470   :  { %3925 = vmatprep.subr.bf16.mxu0 %v11933_v55 }
 0x471   :  { %3963 = vmatpush1.bf16.msra.mxu1 %v11950_v34  ;;  %v13077_v34 = vunpack.c.l.bf16 %v13433_v37 }
 0x472   :  { %3964 = vmatprep.subr.bf16.mxu1 %v11943_v25  ;;  %v13078_v25 = vunpack.c.h.bf16 %v13433_v37  ;;  %v3565_v37 = vld [vmem:[#allocation5 + $0xb30] sm:$0xff] }
 0x473   :  { %3926 = vmatpush1.bf16.msra.mxu0 %v11932_v44  ;;  %v4127_v17 = vsel %vm120_vm2, %v13077_v34, 0.0  ;;  %v3566_v34 = vld [vmem:[#allocation5 + $0xb38] sm:$0xff] }
 0x474   :  { %3993 = vmatprep.subr.bf16.mxu0 %v11993_v48  ;;  %v4129_v48 = vsel %vm120_vm2, %v13078_v25, 0.0 }
 0x475   :  { %3965 = vmatpush1.bf16.msra.mxu1 %v11942_v24 }
 0x476   :  { %3966 = vmatprep.subr.bf16.mxu1 %v11935_v16 }
 0x479   :  { %3967 = vmatpush1.bf16.msra.mxu1 %v11934_v19 }
 0x47a   :  { %4034 = vmatprep.subr.bf16.mxu1 %v11995_v15  ;;  %v3577_v15 = vld [vmem:[#allocation5 + $0xb90] sm:$0xff] }
 0x4f4   :  { %v3277_v61 = vpop.f32.mrf.mxu1  ;;  %v3318_v62 = vpop.f32.mrf.mxu0 }
 0x4f5   :  { %v14491_v29 = vadd.f32 %v3277_v61, %v14390_v31  ;;  %v14494_v2 = vadd.f32 %v3318_v62, %v14393_v43  ;;  %v13430_v31 = vld [vmem:[%s15547_s0 + $0x180] sm:$0xff]   ;;  %v13431_v43 = vld [vmem:[%s15547_s0 + $0x188] sm:$0xff]   ;;  %v3581_v62 = vld [vmem:[#allocation5 + $0xbb0] sm:$0xff] }
 0x4f6   :  { %v3279_v53 = vpop.f32.mrf.mxu1  ;;  %v3320_v45 = vpop.f32.mrf.mxu0  ;;  %v13065_v40 = vunpack.c.l.bf16 %v13430_v31  ;;  %v13066_v5 = vunpack.c.h.bf16 %v13430_v31  ;;  %v13069_v6 = vunpack.c.l.bf16 %v13431_v43  ;;  %v13070_v7 = vunpack.c.h.bf16 %v13431_v43  ;;  %v13435_v43 = vld [vmem:[%s15547_s0 + $0x1a8] sm:$0xff]  }
 0x4f7   :  { %v14497_v35 = vadd.f32 %v3279_v53, %v14396_v52  ;;  %v14500_v56 = vadd.f32 %v3320_v45, %v14399_v1  ;;  %v3582_v53 = vld [vmem:[#allocation5 + $0xbb8] sm:$0xff]  ;;  %v11985_v31 = vcombine.high %v3577_v15, %v3581_v62  ;;  %v11984_v9 = vcombine.low %v3577_v15, %v3581_v62 }
 0x4f8   :  { %v3281_v46 = vpop.f32.mrf.mxu1  ;;  %v3322_v57 = vpop.f32.mrf.mxu0  ;;  %v4116_v52 = vsel %vm120_vm2, %v13065_v40, 0.0  ;;  %v4117_v1 = vsel %vm120_vm2, %v13066_v5, 0.0  ;;  %v4119_v8 = vsel %vm120_vm2, %v13069_v6, 0.0  ;;  %v4121_v13 = vsel %vm120_vm2, %v13070_v7, 0.0  ;;  %v3569_v5 = vld [vmem:[#allocation5 + $0xb50] sm:$0xff]  ;;  %v3550_v15 = vld [vmem:[#allocation5 + $0xab8] sm:$0xff] }
 0x4f9   :  { %v4118_v50 = vadd.f32 %v4117_v1, %v4116_v52  ;;  %v3573_v52 = vld [vmem:[#allocation5 + $0xb70] sm:$0xff]  ;;  %v3570_v1 = vld [vmem:[#allocation5 + $0xb58] sm:$0xff]  ;;  %v13085_v12 = vunpack.c.l.bf16 %v13435_v43  ;;  %v13086_v30 = vunpack.c.h.bf16 %v13435_v43 }
 0x4fa   :  { %v3282_v63 = vpop.f32.mrf.mxu1  ;;  %v3323_v28 = vpop.f32.mrf.mxu0  ;;  %v11976_v32 = vcombine.low %v3569_v5, %v3573_v52 }
 0x4fb   :  { %v4120_v10 = vadd.f32 %v4119_v8, %v4118_v50  ;;  %v3574_v50 = vld [vmem:[#allocation5 + $0xb78] sm:$0xff] }
 0x4fc   :  { %v11979_v22 = vcombine.high %v3570_v1, %v3574_v50  ;;  %v11978_v20 = vcombine.low %v3570_v1, %v3574_v50 }
 0x4fd   :  { %v4122_v21 = vadd.f32 %v4121_v13, %v4120_v10 }
 0x4ff   :  { %v4124_v33 = vadd.f32 %v4123_v42, %v4122_v21  ;;  %v11977_v21 = vcombine.high %v3569_v5, %v3573_v52  ;;  %v3561_v42 = vld [vmem:[#allocation5 + $0xb10] sm:$0xff]  ;;  %v3542_v5 = vld [vmem:[#allocation5 + $0xa78] sm:$0xff] }
 0x501   :  { %v4126_v49 = vadd.f32 %v4125_v36, %v4124_v33  ;;  %v3562_v33 = vld [vmem:[#allocation5 + $0xb18] sm:$0xff] }
 0x502   :  { %v11971_v36 = vcombine.high %v3562_v33, %v3566_v34 }
 0x514   :  { %v3359_v38 = vpop.f32.mrf.mxu1  ;;  %v3400_v41 = vpop.f32.mrf.mxu0 }
 0x515   :  { %v14521_v54 = vadd.f32 %v3359_v38, %v14420_v11  ;;  %v14524_v47 = vadd.f32 %v3400_v41, %v14423_v23  ;;  %v13434_v11 = vld [vmem:[%s15547_s0 + $0x1a0] sm:$0xff]   ;;  %v4128_v23 = vadd.f32 %v4127_v17, %v4126_v49  ;;  %v3553_v38 = vld [vmem:[#allocation5 + $0xad0] sm:$0xff]  ;;  %v11968_v17 = vcombine.low %v3561_v42, %v3565_v37 }
 0x516   :  { %v3361_v51 = vpop.f32.mrf.mxu1  ;;  %v3402_v24 = vpop.f32.mrf.mxu0  ;;  %v13081_v16 = vunpack.c.l.bf16 %v13434_v11  ;;  %v13082_v57 = vunpack.c.h.bf16 %v13434_v11  ;;  %v13436_v41 = vld [vmem:[%s15547_s0 + $0x1b0] sm:$0xff]   ;;  %v11970_v11 = vcombine.low %v3562_v33, %v3566_v34 }
 0x517   :  { %v14528_v18 = vadd.f32 %v3361_v51, %v14427_v27  ;;  %v14531_v59 = vadd.f32 %v3402_v24, %v14430_v14  ;;  %v3578_v27 = vld [vmem:[#allocation5 + $0xb98] sm:$0xff]  ;;  %v4130_v14 = vadd.f32 %v4129_v48, %v4128_v23  ;;  %v3557_v49 = vld [vmem:[#allocation5 + $0xaf0] sm:$0xff] }
 0x518   :  { %v3363_v55 = vpop.f32.mrf.mxu1  ;;  %v3404_v26 = vpop.f32.mrf.mxu0  ;;  %v4131_v63 = vsel %vm120_vm2, %v13081_v16, 0.0  ;;  %v11987_v40 = vcombine.high %v3578_v27, %v3582_v53  ;;  %v11986_v10 = vcombine.low %v3578_v27, %v3582_v53  ;;  %v4133_v13 = vsel %vm120_vm2, %v13082_v57, 0.0  ;;  %v3554_v51 = vld [vmem:[#allocation5 + $0xad8] sm:$0xff]  ;;  %v3549_v16 = vld [vmem:[#allocation5 + $0xab0] sm:$0xff] }
 0x519   :  { %v4132_v7 = vadd.f32 %v4131_v63, %v4130_v14  ;;  %v3558_v24 = vld [vmem:[#allocation5 + $0xaf8] sm:$0xff]  ;;  %v13089_v55 = vunpack.c.l.bf16 %v13436_v41  ;;  %v4137_v26 = vsel %vm120_vm2, %v13086_v30, 0.0  ;;  %v11961_v23 = vcombine.high %v3553_v38, %v3557_v49  ;;  %v3537_v57 = vld [vmem:[#allocation5 + $0xa50] sm:$0xff] }
 0x51a   :  { %v3364_v44 = vpop.f32.mrf.mxu1  ;;  %v3405_v19 = vpop.f32.mrf.mxu0  ;;  %v3546_v48 = vld [vmem:[#allocation5 + $0xa98] sm:$0xff]  ;;  %v11960_v62 = vcombine.low %v3553_v38, %v3557_v49  ;;  %v11962_v27 = vcombine.low %v3554_v51, %v3558_v24  ;;  %v13090_v53 = vunpack.c.h.bf16 %v13436_v41  ;;  %v4251_v41 = vld [vmem:[#allocation5 + $0xdc0] sm:$0xff] }
 0x51b   :  { %v4134_v60 = vadd.f32 %v4133_v13, %v4132_v7  ;;  %v11963_v44 = vcombine.high %v3554_v51, %v3558_v24  ;;  %v3545_v19 = vld [vmem:[#allocation5 + $0xa90] sm:$0xff]  ;;  %v11954_v52 = vcombine.low %v3546_v48, %v3550_v15  ;;  %v3534_v13 = vld [vmem:[#allocation5 + $0xa38] sm:$0xff]  ;;  %v4255_v49 = vld [vmem:[#allocation5 + $0xde0] sm:$0xff] }
 0x51c   :  { %v3518_v61 = vpop.f32.mrf.mxu1  ;;  %v11953_v14 = vcombine.high %v3545_v19, %v3549_v16  ;;  %v13437_v63 = vld [vmem:[%s15547_s0 + $0x1b8] sm:$0xff]   ;;  %v4141_v50 = vsel %vm120_vm2, %v13090_v53, 0.0  ;;  %v4252_v51 = vld [vmem:[#allocation5 + $0xdc8] sm:$0xff]  ;;  %v12069_v24 = vcombine.low %v4251_v41, %v4255_v49 }
 0x51d   :  { %v3524_v45 = vmax.f32 %v3518_v61, 0.0  ;;  %v13093_v1 = vunpack.c.l.bf16 %v13437_v63 }
 0x51e   :  { %v13664_v46 = vpop.f32.mrf.mxu1 }
 0x51f   :  { %v14538_v28 = vpack.c.bf16 %v3524_v45, %v3524_v45  ;;  %v4139_v45 = vsel %vm120_vm2, %v13089_v55, 0.0  ;;  %v11955_v46 = vcombine.high %v3546_v48, %v3550_v15  ;;  %v4143_v33 = vsel %vm120_vm2, %v13093_v1, 0.0  ;;  %v4239_v15 = vld [vmem:[#allocation5 + $0xd60] sm:$0xff] }
 0x520   :  { %v3521_v6 = vpop.f32.mrf.mxu1  ;;  %v4223_v1 = vld [vmem:[#allocation5 + $0xce0] sm:$0xff] }
 0x521   :  { %3944 = vmatmul.mubr.bf16.vlgmr.msra.gmra.mxu0 %v14538_v28  ;;  %3985 = vmatmul.mubr.bf16.vlgmr.msra.gmra.mxu1 %v14538_v28  ;;  %v11952_v6 = vcombine.low %v3545_v19, %v3549_v16  ;;  %v4248_v19 = vld [vmem:[#allocation5 + $0xda8] sm:$0xff]  ;;  %v4235_v16 = vld [vmem:[#allocation5 + $0xd40] sm:$0xff] }
 0x522   :  { %3994 = vmatpush1.bf16.msra.mxu0 %v11992_v39  ;;  %4035 = vmatpush1.bf16.msra.mxu1 %v11994_v58  ;;  %v13665_v8 = vpop.f32.mrf.mxu1  ;;  %v4135_v39 = vsel %vm120_vm2, %v13085_v12, 0.0  ;;  %v11969_v58 = vcombine.high %v3561_v42, %v3565_v37  ;;  %v3530_v12 = vld [vmem:[#allocation5 + $0xa18] sm:$0xff]  ;;  %v13094_v37 = vunpack.c.h.bf16 %v13437_v63  ;;  %v4228_v63 = vld [vmem:[#allocation5 + $0xd08] sm:$0xff] }
 0x523   :  { %3995 = vmatprep.subr.bf16.mxu0 %v11985_v31  ;;  %4036 = vmatprep.subr.bf16.mxu1 %v11987_v40  ;;  %v4136_v25 = vadd.f32 %v4135_v39, %v4134_v60  ;;  %v3541_v31 = vld [vmem:[#allocation5 + $0xa70] sm:$0xff]  ;;  %v3538_v40 = vld [vmem:[#allocation5 + $0xa58] sm:$0xff]  ;;  %v11939_v60 = vcombine.high %v3530_v12, %v3534_v13  ;;  %v11938_v30 = vcombine.low %v3530_v12, %v3534_v13 }
 0x524   :  { %4025 = vmatprep.mubr.bf16.mxu0 %v13942_v3  ;;  %4066 = vmatprep.mubr.bf16.mxu1 %v13942_v3  ;;  %v11945_v7 = vcombine.high %v3537_v57, %v3541_v31  ;;  %v11947_v8 = vcombine.high %v3538_v40, %v3542_v5  ;;  %v11946_v42 = vcombine.low %v3538_v40, %v3542_v5  ;;  %v4145_v39 = vsel %vm120_vm2, %v13094_v37, 0.0  ;;  %v4212_v37 = vld [vmem:[#allocation5 + $0xc88] sm:$0xff] }
 0x525   :  { %v4138_v61 = vadd.f32 %v4137_v26, %v4136_v25  ;;  %v12070_v25 = vcombine.high %v4251_v41, %v4255_v49  ;;  %v12053_v40 = vcombine.low %v4235_v16, %v4239_v15 }
 0x526   :  { %3996 = vmatpush1.bf16.msra.mxu0 %v11984_v9  ;;  %4037 = vmatpush1.bf16.msra.mxu1 %v11986_v10  ;;  %v3529_v9 = vld [vmem:[#allocation5 + $0xa10] sm:$0xff] }
 0x527   :  { %3997 = vmatprep.subr.bf16.mxu0 %v11977_v21  ;;  %4038 = vmatprep.subr.bf16.mxu1 %v11979_v22  ;;  %v4140_v43 = vadd.f32 %v4139_v45, %v4138_v61  ;;  %v3533_v10 = vld [vmem:[#allocation5 + $0xa30] sm:$0xff]  ;;  %v11944_v22 = vcombine.low %v3537_v57, %v3541_v31  ;;  %v4236_v61 = vld [vmem:[#allocation5 + $0xd48] sm:$0xff]  ;;  %v12054_v45 = vcombine.high %v4235_v16, %v4239_v15  ;;  %v4231_v57 = vld [vmem:[#allocation5 + $0xd20] sm:$0xff] }
 0x528   :  { %v11937_v34 = vcombine.high %v3529_v9, %v3533_v10  ;;  %v4232_v31 = vld [vmem:[#allocation5 + $0xd28] sm:$0xff]  ;;  %v14579_v16 = vld [vmem:[#allocation5 + $0xdd8] sm:$0xff] }
 0x529   :  { %v4142_v21 = vadd.f32 %v4141_v50, %v4140_v43  ;;  %v4220_v50 = vld [vmem:[#allocation5 + $0xcc8] sm:$0xff]  ;;  %v14583_v15 = vld [vmem:[#allocation5 + $0xdf8] sm:$0xff] }
 0x52a   :  { %3998 = vmatpush1.bf16.msra.mxu0 %v11976_v32  ;;  %4039 = vmatpush1.bf16.msra.mxu1 %v11978_v20  ;;  %v11936_v20 = vcombine.low %v3529_v9, %v3533_v10  ;;  %v12047_v9 = vcombine.low %v4228_v63, %v4232_v31 }
 0x52b   :  { %3999 = vmatprep.subr.bf16.mxu0 %v11969_v58  ;;  %4040 = vmatprep.subr.bf16.mxu1 %v11971_v36  ;;  %v4144_v32 = vadd.f32 %v4143_v33, %v4142_v21 }
 0x52d   :  { %v4146_v58 = vadd.f32 %v4145_v39, %v4144_v32  ;;  %v4207_v39 = vld [vmem:[#allocation5 + $0xc60] sm:$0xff] }
 0x52e   :  { %4000 = vmatpush1.bf16.msra.mxu0 %v11968_v17  ;;  %4041 = vmatpush1.bf16.msra.mxu1 %v11970_v11  ;;  %v4256_v17 = vld [vmem:[#allocation5 + $0xde8] sm:$0xff]  ;;  %v4247_v11 = vld [vmem:[#allocation5 + $0xda0] sm:$0xff] }
 0x52f   :  { %4001 = vmatprep.subr.bf16.mxu0 %v11961_v23  ;;  %4042 = vmatprep.subr.bf16.mxu1 %v11963_v44  ;;  %v4147_v36 = vmul.f32 0.0625, %v4146_v58  ;;  %v12071_v55 = vcombine.low %v4252_v51, %v4256_v17  ;;  %v12072_v26 = vcombine.high %v4252_v51, %v4256_v17  ;;  %v4244_v44 = vld [vmem:[#allocation5 + $0xd88] sm:$0xff] }
 0x530   :  { %v12064_v48 = vcombine.high %v4244_v44, %v4248_v19  ;;  %v12063_v53 = vcombine.low %v4244_v44, %v4248_v19  ;;  %v4204_v58 = vld [vmem:[#allocation5 + $0xc48] sm:$0xff]  ;;  %v14575_v44 = vld [vmem:[#allocation5 + $0xdd0] sm:$0xff] }
 0x531   :  { %v4148_v38 = vpack.c.bf16 %v4147_v36, %v4147_v36  ;;  %v4196_v17 = vld [vmem:[#allocation5 + $0xc08] sm:$0xff]  ;;  %v14577_v19 = vld [vmem:[#allocation5 + $0xdf0] sm:$0xff] }
 0x532   :  { %4002 = vmatpush1.bf16.msra.mxu0 %v11960_v62  ;;  %4043 = vmatpush1.bf16.msra.mxu1 %v11962_v27  ;;  %v4240_v62 = vld [vmem:[#allocation5 + $0xd68] sm:$0xff] }
 0x533   :  { %4003 = vmatprep.subr.bf16.mxu0 %v11953_v14  ;;  %4044 = vmatprep.subr.bf16.mxu1 %v11955_v46  ;;  %v12056_v14 = vcombine.high %v4236_v61, %v4240_v62  ;;  %v4227_v46 = vld [vmem:[#allocation5 + $0xd00] sm:$0xff]  ;;  %v12055_v5 = vcombine.low %v4236_v61, %v4240_v62  ;;  %v12073_v61 = vcombine.low %v14575_v44, %v14577_v19 }
 0x534   :  { %v12046_v43 = vcombine.high %v4227_v46, %v4231_v57  ;;  %v12075_v62 = vcombine.low %v14579_v16, %v14583_v15 }
 0x536   :  { %4004 = vmatpush1.bf16.msra.mxu0 %v11952_v6  ;;  %4045 = vmatpush1.bf16.msra.mxu1 %v11954_v52  ;;  %v12048_v6 = vcombine.high %v4228_v63, %v4232_v31  ;;  %v4219_v52 = vld [vmem:[#allocation5 + $0xcc0] sm:$0xff] }
 0x537   :  { %4005 = vmatprep.subr.bf16.mxu0 %v11945_v7  ;;  %4046 = vmatprep.subr.bf16.mxu1 %v11947_v8  ;;  %v4224_v7 = vld [vmem:[#allocation5 + $0xce8] sm:$0xff]  ;;  %v12045_v8 = vcombine.low %v4227_v46, %v4231_v57  ;;  %v12038_v10 = vcombine.high %v4219_v52, %v4223_v1  ;;  %v12037_v13 = vcombine.low %v4219_v52, %v4223_v1 }
 0x538   :  { %v12040_v12 = vcombine.high %v4220_v50, %v4224_v7  ;;  %v12039_v21 = vcombine.low %v4220_v50, %v4224_v7 }
 0x53a   :  { %4006 = vmatpush1.bf16.msra.mxu0 %v11944_v22  ;;  %4047 = vmatpush1.bf16.msra.mxu1 %v11946_v42  ;;  %v4211_v22 = vld [vmem:[#allocation5 + $0xc80] sm:$0xff] }
 0x53b   :  { %4007 = vmatprep.subr.bf16.mxu0 %v11937_v34  ;;  %4048 = vmatprep.subr.bf16.mxu1 %v11939_v60  ;;  %v4215_v42 = vld [vmem:[#allocation5 + $0xca0] sm:$0xff]  ;;  %v4216_v34 = vld [vmem:[#allocation5 + $0xca8] sm:$0xff] }
 0x53c   :  { %v12030_v33 = vcombine.high %v4211_v22, %v4215_v42  ;;  %v12029_v60 = vcombine.low %v4211_v22, %v4215_v42  ;;  %v12031_v32 = vcombine.low %v4212_v37, %v4216_v34 }
 0x53e   :  { %4008 = vmatpush1.bf16.msra.mxu0 %v11936_v20  ;;  %4049 = vmatpush1.bf16.msra.mxu1 %v11938_v30  ;;  %v12032_v20 = vcombine.high %v4212_v37, %v4216_v34  ;;  %v4203_v30 = vld [vmem:[#allocation5 + $0xc40] sm:$0xff]  ;;  %v13441_v34 = vld [vmem:[%s15547_s0 + $0x1d8] sm:$0xff]  }
 0x53f   :  { %13666 = vmatprep.subr.bf16.mxu0 %v13940_v0  ;;  %4579 = vmatprep.subr.bf16.mxu1 %v12070_v25  ;;  %v12022_v36 = vcombine.high %v4203_v30, %v4207_v39  ;;  %v12021_v41 = vcombine.low %v4203_v30, %v4207_v39  ;;  %v4199_v25 = vld [vmem:[#allocation5 + $0xc20] sm:$0xff] }
 0x541   :  { %4026 = vmatmul.mubr.bf16.vlgmr.msra.gmra.mxu0 %v14538_v28  ;;  %4067 = vmatmul.mubr.bf16.vlgmr.msra.gmra.mxu1 %v14538_v28  ;;  %v4243_v28 = vld [vmem:[#allocation5 + $0xd80] sm:$0xff] }
 0x542   :  { %13667 = vmatpush3.bf16.msra.mxu0 %v14006_v4  ;;  %13668 = vmatprep.mubr.msk.bf16.mxu0 %vm13941_vm0, %v13940_v0  ;;  %v12062_v23 = vcombine.high %v4243_v28, %v4247_v11  ;;  %v12061_v27 = vcombine.low %v4243_v28, %v4247_v11  ;;  %v4200_v11 = vld [vmem:[#allocation5 + $0xc28] sm:$0xff] }
 0x543   :  { %4611 = vmatprep.mubr.bf16.mxu1 %v13942_v3  ;;  %4620 = vmatprep.subr.bf16.mxu0 %v12072_v26  ;;  %v12015_v26 = vcombine.low %v4196_v17, %v4200_v11 }
 0x544   :  { %4580 = vmatpush1.bf16.msra.mxu1 %v12069_v24  ;;  %v4195_v24 = vld [vmem:[#allocation5 + $0xc00] sm:$0xff] }
 0x545   :  { %4581 = vmatprep.subr.bf16.mxu1 %v12062_v23  ;;  %v12014_v28 = vcombine.high %v4195_v24, %v4199_v25  ;;  %v12016_v23 = vcombine.high %v4196_v17, %v4200_v11 }
 0x548   :  { %4582 = vmatpush1.bf16.msra.mxu1 %v12061_v27  ;;  %v12076_v27 = vcombine.high %v14579_v16, %v14583_v15 }
 0x549   :  { %13669 = vmatmul.mubr.msk.bf16.vlgmr.msra.gmra.mxu0 %vm120_vm2, %v4148_v38  ;;  %4583 = vmatprep.subr.bf16.mxu1 %v12054_v45  ;;  %v4208_v38 = vld [vmem:[#allocation5 + $0xc68] sm:$0xff] }
 0x54a   :  { %4652 = vmatprep.mubr.bf16.mxu0 %v13942_v3  ;;  %4621 = vmatpush1.bf16.msra.mxu0 %v12071_v55  ;;  %v12023_v49 = vcombine.low %v4204_v58, %v4208_v38  ;;  %v12024_v51 = vcombine.high %v4204_v58, %v4208_v38  ;;  %v12013_v55 = vcombine.low %v4195_v24, %v4199_v25 }
 0x54b   :  { %4622 = vmatprep.subr.bf16.mxu0 %v12064_v48  ;;  %v12074_v48 = vcombine.high %v14575_v44, %v14577_v19 }
 0x54c   :  { %4584 = vmatpush1.bf16.msra.mxu1 %v12053_v40 }
 0x54d   :  { %4585 = vmatprep.subr.bf16.mxu1 %v12046_v43 }
 0x54e   :  { %4623 = vmatpush1.bf16.msra.mxu0 %v12063_v53 }
 0x54f   :  { %4624 = vmatprep.subr.bf16.mxu0 %v12056_v14 }
 0x550   :  { %4586 = vmatpush1.bf16.msra.mxu1 %v12045_v8 }
 0x551   :  { %4587 = vmatprep.subr.bf16.mxu1 %v12038_v10 }
 0x552   :  { %4625 = vmatpush1.bf16.msra.mxu0 %v12055_v5 }
 0x553   :  { %4626 = vmatprep.subr.bf16.mxu0 %v12048_v6 }
 0x554   :  { %4588 = vmatpush1.bf16.msra.mxu1 %v12037_v13 }
 0x555   :  { %4589 = vmatprep.subr.bf16.mxu1 %v12030_v33 }
 0x556   :  { %4627 = vmatpush1.bf16.msra.mxu0 %v12047_v9 }
 0x557   :  { %4628 = vmatprep.subr.bf16.mxu0 %v12040_v12  ;;  %v13440_v12 = vld [vmem:[%s15547_s0 + $0x1d0] sm:$0xff]  }
 0x558   :  { %4590 = vmatpush1.bf16.msra.mxu1 %v12029_v60  ;;  %v13106_v37 = vunpack.c.h.bf16 %v13440_v12 }
 0x559   :  { %4591 = vmatprep.subr.bf16.mxu1 %v12022_v36 }
 0x55a   :  { %4629 = vmatpush1.bf16.msra.mxu0 %v12039_v21  ;;  %v13105_v21 = vunpack.c.l.bf16 %v13440_v12 }
 0x55b   :  { %4630 = vmatprep.subr.bf16.mxu0 %v12032_v20  ;;  %v4793_v20 = vsel %vm120_vm2, %v13106_v37, 0.0 }
 0x55c   :  { %4592 = vmatpush1.bf16.msra.mxu1 %v12021_v41  ;;  %v4791_v33 = vsel %vm120_vm2, %v13105_v21, 0.0 }
 0x55d   :  { %4593 = vmatprep.subr.bf16.mxu1 %v12014_v28 }
 0x55e   :  { %4631 = vmatpush1.bf16.msra.mxu0 %v12031_v32  ;;  %v13109_v32 = vunpack.c.l.bf16 %v13441_v34 }
 0x55f   :  { %4632 = vmatprep.subr.bf16.mxu0 %v12024_v51  ;;  %v13110_v51 = vunpack.c.h.bf16 %v13441_v34  ;;  %v4233_v34 = vld [vmem:[#allocation5 + $0xd30] sm:$0xff] }
 0x560   :  { %4594 = vmatpush1.bf16.msra.mxu1 %v12013_v55  ;;  %v4795_v24 = vsel %vm120_vm2, %v13109_v32, 0.0  ;;  %v4234_v32 = vld [vmem:[#allocation5 + $0xd38] sm:$0xff] }
 0x561   :  { %4661 = vmatprep.subr.bf16.mxu1 %v12074_v48  ;;  %v4797_v48 = vsel %vm120_vm2, %v13110_v51, 0.0 }
 0x562   :  { %4633 = vmatpush1.bf16.msra.mxu0 %v12023_v49 }
 0x563   :  { %4634 = vmatprep.subr.bf16.mxu0 %v12016_v23 }
 0x566   :  { %4635 = vmatpush1.bf16.msra.mxu0 %v12015_v26 }
 0x567   :  { %4702 = vmatprep.subr.bf16.mxu0 %v12076_v27  ;;  %v4245_v27 = vld [vmem:[#allocation5 + $0xd90] sm:$0xff] }
 0x5e1   :  { %v3945_v53 = vpop.f32.mrf.mxu0  ;;  %v3986_v45 = vpop.f32.mrf.mxu1 }
 0x5e2   :  { %v14592_v14 = vadd.f32 %v3945_v53, %v14491_v29  ;;  %v14595_v46 = vadd.f32 %v3986_v45, %v14494_v2  ;;  %v13438_v29 = vld [vmem:[%s15547_s0 + $0x1c0] sm:$0xff]   ;;  %v13439_v2 = vld [vmem:[%s15547_s0 + $0x1c8] sm:$0xff]   ;;  %v4249_v45 = vld [vmem:[#allocation5 + $0xdb0] sm:$0xff] }
 0x5e3   :  { %v3947_v57 = vpop.f32.mrf.mxu0  ;;  %v3988_v63 = vpop.f32.mrf.mxu1  ;;  %v13097_v1 = vunpack.c.l.bf16 %v13438_v29  ;;  %v13098_v50 = vunpack.c.h.bf16 %v13438_v29  ;;  %v13101_v7 = vunpack.c.l.bf16 %v13439_v2  ;;  %v13102_v9 = vunpack.c.h.bf16 %v13439_v2  ;;  %v13443_v2 = vld [vmem:[%s15547_s0 + $0x1e8] sm:$0xff]  }
 0x5e4   :  { %v14598_v31 = vadd.f32 %v3947_v57, %v14497_v35  ;;  %v14601_v40 = vadd.f32 %v3988_v63, %v14500_v56  ;;  %v4250_v57 = vld [vmem:[#allocation5 + $0xdb8] sm:$0xff]  ;;  %v12066_v29 = vcombine.high %v4245_v27, %v4249_v45  ;;  %v12065_v12 = vcombine.low %v4245_v27, %v4249_v45 }
 0x5e5   :  { %v3949_v5 = vpop.f32.mrf.mxu0  ;;  %v3990_v43 = vpop.f32.mrf.mxu1  ;;  %v4784_v35 = vsel %vm120_vm2, %v13097_v1, 0.0  ;;  %v4785_v56 = vsel %vm120_vm2, %v13098_v50, 0.0  ;;  %v4787_v10 = vsel %vm120_vm2, %v13101_v7, 0.0  ;;  %v4789_v22 = vsel %vm120_vm2, %v13102_v9, 0.0  ;;  %v4237_v50 = vld [vmem:[#allocation5 + $0xd50] sm:$0xff]  ;;  %v4218_v27 = vld [vmem:[#allocation5 + $0xcb8] sm:$0xff] }
 0x5e6   :  { %v4786_v8 = vadd.f32 %v4785_v56, %v4784_v35  ;;  %v4241_v35 = vld [vmem:[#allocation5 + $0xd70] sm:$0xff]  ;;  %v4238_v56 = vld [vmem:[#allocation5 + $0xd58] sm:$0xff]  ;;  %v13117_v21 = vunpack.c.l.bf16 %v13443_v2  ;;  %v13118_v15 = vunpack.c.h.bf16 %v13443_v2 }
 0x5e7   :  { %v3950_v6 = vpop.f32.mrf.mxu0  ;;  %v3991_v52 = vpop.f32.mrf.mxu1  ;;  %v12057_v19 = vcombine.low %v4237_v50, %v4241_v35 }
 0x5e8   :  { %v4788_v13 = vadd.f32 %v4787_v10, %v4786_v8  ;;  %v4242_v8 = vld [vmem:[#allocation5 + $0xd78] sm:$0xff] }
 0x5e9   :  { %v12060_v37 = vcombine.high %v4238_v56, %v4242_v8  ;;  %v12059_v16 = vcombine.low %v4238_v56, %v4242_v8 }
 0x5ea   :  { %v4790_v42 = vadd.f32 %v4789_v22, %v4788_v13 }
 0x5ec   :  { %v4792_v60 = vadd.f32 %v4791_v33, %v4790_v42  ;;  %v12058_v42 = vcombine.high %v4237_v50, %v4241_v35  ;;  %v4229_v33 = vld [vmem:[#allocation5 + $0xd10] sm:$0xff]  ;;  %v4210_v50 = vld [vmem:[#allocation5 + $0xc78] sm:$0xff] }
 0x5ee   :  { %v4794_v38 = vadd.f32 %v4793_v20, %v4792_v60  ;;  %v4230_v60 = vld [vmem:[#allocation5 + $0xd18] sm:$0xff] }
 0x5ef   :  { %v12052_v20 = vcombine.high %v4230_v60, %v4234_v32 }
 0x601   :  { %v4027_v30 = vpop.f32.mrf.mxu0  ;;  %v4068_v39 = vpop.f32.mrf.mxu1 }
 0x602   :  { %v14622_v58 = vadd.f32 %v4027_v30, %v14521_v54  ;;  %v14625_v36 = vadd.f32 %v4068_v39, %v14524_v47  ;;  %v13442_v54 = vld [vmem:[%s15547_s0 + $0x1e0] sm:$0xff]   ;;  %v4796_v47 = vadd.f32 %v4795_v24, %v4794_v38  ;;  %v4221_v30 = vld [vmem:[#allocation5 + $0xcd0] sm:$0xff]  ;;  %v12049_v24 = vcombine.low %v4229_v33, %v4233_v34 }
 0x603   :  { %v4029_v41 = vpop.f32.mrf.mxu0  ;;  %v4070_v49 = vpop.f32.mrf.mxu1  ;;  %v13113_v23 = vunpack.c.l.bf16 %v13442_v54  ;;  %v13114_v43 = vunpack.c.h.bf16 %v13442_v54  ;;  %v13444_v39 = vld [vmem:[%s15547_s0 + $0x1f0] sm:$0xff]   ;;  %v12051_v54 = vcombine.low %v4230_v60, %v4234_v32 }
 0x604   :  { %v14629_v25 = vadd.f32 %v4029_v41, %v14528_v18  ;;  %v14632_v17 = vadd.f32 %v4070_v49, %v14531_v59  ;;  %v4246_v18 = vld [vmem:[#allocation5 + $0xd98] sm:$0xff]  ;;  %v4798_v59 = vadd.f32 %v4797_v48, %v4796_v47  ;;  %v4225_v38 = vld [vmem:[#allocation5 + $0xcf0] sm:$0xff] }
 0x605   :  { %v4031_v28 = vpop.f32.mrf.mxu0  ;;  %v4072_v11 = vpop.f32.mrf.mxu1  ;;  %v4799_v6 = vsel %vm120_vm2, %v13113_v23, 0.0  ;;  %v12068_v1 = vcombine.high %v4246_v18, %v4250_v57  ;;  %v12067_v13 = vcombine.low %v4246_v18, %v4250_v57  ;;  %v4801_v22 = vsel %vm120_vm2, %v13114_v43, 0.0  ;;  %v4222_v41 = vld [vmem:[#allocation5 + $0xcd8] sm:$0xff]  ;;  %v4217_v23 = vld [vmem:[#allocation5 + $0xcb0] sm:$0xff] }
 0x606   :  { %v4800_v9 = vadd.f32 %v4799_v6, %v4798_v59  ;;  %v4226_v49 = vld [vmem:[#allocation5 + $0xcf8] sm:$0xff]  ;;  %v13121_v28 = vunpack.c.l.bf16 %v13444_v39  ;;  %v4805_v11 = vsel %vm120_vm2, %v13118_v15, 0.0  ;;  %v12042_v47 = vcombine.high %v4221_v30, %v4225_v38  ;;  %v4205_v43 = vld [vmem:[#allocation5 + $0xc50] sm:$0xff] }
 0x607   :  { %v4032_v55 = vpop.f32.mrf.mxu0  ;;  %v4073_v26 = vpop.f32.mrf.mxu1  ;;  %v4214_v48 = vld [vmem:[#allocation5 + $0xc98] sm:$0xff]  ;;  %v12041_v45 = vcombine.low %v4221_v30, %v4225_v38  ;;  %v12043_v18 = vcombine.low %v4222_v41, %v4226_v49  ;;  %v13122_v57 = vunpack.c.h.bf16 %v13444_v39  ;;  %v4919_v39 = vld [vmem:[#allocation5 + $0xfc0] sm:$0xff] }
 0x608   :  { %v4802_v44 = vadd.f32 %v4801_v22, %v4800_v9  ;;  %v12044_v55 = vcombine.high %v4222_v41, %v4226_v49  ;;  %v4213_v26 = vld [vmem:[#allocation5 + $0xc90] sm:$0xff]  ;;  %v12035_v35 = vcombine.low %v4214_v48, %v4218_v27  ;;  %v4202_v22 = vld [vmem:[#allocation5 + $0xc38] sm:$0xff]  ;;  %v4923_v38 = vld [vmem:[#allocation5 + $0xfe0] sm:$0xff] }
 0x609   :  { %v4186_v53 = vpop.f32.mrf.mxu0  ;;  %v12034_v59 = vcombine.high %v4213_v26, %v4217_v23  ;;  %v13445_v6 = vld [vmem:[%s15547_s0 + $0x1f8] sm:$0xff]   ;;  %v4809_v8 = vsel %vm120_vm2, %v13122_v57, 0.0  ;;  %v4920_v41 = vld [vmem:[#allocation5 + $0xfc8] sm:$0xff]  ;;  %v12150_v49 = vcombine.low %v4919_v39, %v4923_v38 }
 0x60a   :  { %v4192_v63 = vmax.f32 %v4186_v53, 0.0  ;;  %v13125_v56 = vunpack.c.l.bf16 %v13445_v6 }
 0x60b   :  { %v13670_v5 = vpop.f32.mrf.mxu0 }
 0x60c   :  { %v14639_v52 = vpack.c.bf16 %v4192_v63, %v4192_v63  ;;  %v4807_v63 = vsel %vm120_vm2, %v13121_v28, 0.0  ;;  %v12036_v5 = vcombine.high %v4214_v48, %v4218_v27  ;;  %v4811_v60 = vsel %vm120_vm2, %v13125_v56, 0.0  ;;  %v4907_v27 = vld [vmem:[#allocation5 + $0xf60] sm:$0xff] }
 0x60d   :  { %v4189_v7 = vpop.f32.mrf.mxu0  ;;  %v4891_v56 = vld [vmem:[#allocation5 + $0xee0] sm:$0xff] }
 0x60e   :  { %4612 = vmatmul.mubr.bf16.vlgmr.msra.gmra.mxu1 %v14639_v52  ;;  %4653 = vmatmul.mubr.bf16.vlgmr.msra.gmra.mxu0 %v14639_v52  ;;  %v12033_v7 = vcombine.low %v4213_v26, %v4217_v23  ;;  %v4916_v26 = vld [vmem:[#allocation5 + $0xfa8] sm:$0xff]  ;;  %v4903_v23 = vld [vmem:[#allocation5 + $0xf40] sm:$0xff] }
 0x60f   :  { %4662 = vmatpush1.bf16.msra.mxu1 %v12073_v61  ;;  %4703 = vmatpush1.bf16.msra.mxu0 %v12075_v62  ;;  %v13671_v10 = vpop.f32.mrf.mxu0  ;;  %v4803_v61 = vsel %vm120_vm2, %v13117_v21, 0.0  ;;  %v12050_v62 = vcombine.high %v4229_v33, %v4233_v34  ;;  %v4198_v21 = vld [vmem:[#allocation5 + $0xc18] sm:$0xff]  ;;  %v13126_v34 = vunpack.c.h.bf16 %v13445_v6  ;;  %v4896_v6 = vld [vmem:[#allocation5 + $0xf08] sm:$0xff] }
 0x610   :  { %4663 = vmatprep.subr.bf16.mxu1 %v12066_v29  ;;  %4704 = vmatprep.subr.bf16.mxu0 %v12068_v1  ;;  %v4804_v51 = vadd.f32 %v4803_v61, %v4802_v44  ;;  %v4209_v29 = vld [vmem:[#allocation5 + $0xc70] sm:$0xff]  ;;  %v4206_v1 = vld [vmem:[#allocation5 + $0xc58] sm:$0xff]  ;;  %v12020_v44 = vcombine.high %v4198_v21, %v4202_v22  ;;  %v12019_v15 = vcombine.low %v4198_v21, %v4202_v22 }
 0x611   :  { %4693 = vmatprep.mubr.bf16.mxu1 %v13942_v3  ;;  %4734 = vmatprep.mubr.bf16.mxu0 %v13942_v3  ;;  %v12026_v9 = vcombine.high %v4205_v43, %v4209_v29  ;;  %v12028_v10 = vcombine.high %v4206_v1, %v4210_v50  ;;  %v12027_v33 = vcombine.low %v4206_v1, %v4210_v50  ;;  %v4813_v61 = vsel %vm120_vm2, %v13126_v34, 0.0  ;;  %v4880_v34 = vld [vmem:[#allocation5 + $0xe88] sm:$0xff] }
 0x612   :  { %v4806_v53 = vadd.f32 %v4805_v11, %v4804_v51  ;;  %v12151_v51 = vcombine.high %v4919_v39, %v4923_v38  ;;  %v12134_v1 = vcombine.low %v4903_v23, %v4907_v27 }
 0x613   :  { %4664 = vmatpush1.bf16.msra.mxu1 %v12065_v12  ;;  %4705 = vmatpush1.bf16.msra.mxu0 %v12067_v13  ;;  %v4197_v12 = vld [vmem:[#allocation5 + $0xc10] sm:$0xff] }
 0x614   :  { %4665 = vmatprep.subr.bf16.mxu1 %v12058_v42  ;;  %4706 = vmatprep.subr.bf16.mxu0 %v12060_v37  ;;  %v4808_v2 = vadd.f32 %v4807_v63, %v4806_v53  ;;  %v4201_v13 = vld [vmem:[#allocation5 + $0xc30] sm:$0xff]  ;;  %v12025_v37 = vcombine.low %v4205_v43, %v4209_v29  ;;  %v4904_v53 = vld [vmem:[#allocation5 + $0xf48] sm:$0xff]  ;;  %v12135_v63 = vcombine.high %v4903_v23, %v4907_v27  ;;  %v4899_v43 = vld [vmem:[#allocation5 + $0xf20] sm:$0xff] }
 0x615   :  { %v12018_v32 = vcombine.high %v4197_v12, %v4201_v13  ;;  %v4900_v29 = vld [vmem:[#allocation5 + $0xf28] sm:$0xff]  ;;  %v14680_v23 = vld [vmem:[#allocation5 + $0xfd8] sm:$0xff] }
 0x616   :  { %v4810_v42 = vadd.f32 %v4809_v8, %v4808_v2  ;;  %v4888_v8 = vld [vmem:[#allocation5 + $0xec8] sm:$0xff]  ;;  %v14684_v27 = vld [vmem:[#allocation5 + $0xff8] sm:$0xff] }
 0x617   :  { %4666 = vmatpush1.bf16.msra.mxu1 %v12057_v19  ;;  %4707 = vmatpush1.bf16.msra.mxu0 %v12059_v16  ;;  %v12017_v16 = vcombine.low %v4197_v12, %v4201_v13  ;;  %v12128_v12 = vcombine.low %v4896_v6, %v4900_v29 }
 0x618   :  { %4667 = vmatprep.subr.bf16.mxu1 %v12050_v62  ;;  %4708 = vmatprep.subr.bf16.mxu0 %v12052_v20  ;;  %v4812_v19 = vadd.f32 %v4811_v60, %v4810_v42 }
 0x61a   :  { %v4814_v62 = vadd.f32 %v4813_v61, %v4812_v19  ;;  %v4875_v61 = vld [vmem:[#allocation5 + $0xe60] sm:$0xff] }
 0x61b   :  { %4668 = vmatpush1.bf16.msra.mxu1 %v12049_v24  ;;  %4709 = vmatpush1.bf16.msra.mxu0 %v12051_v54  ;;  %v4924_v24 = vld [vmem:[#allocation5 + $0xfe8] sm:$0xff]  ;;  %v4915_v54 = vld [vmem:[#allocation5 + $0xfa0] sm:$0xff] }
 0x61c   :  { %4669 = vmatprep.subr.bf16.mxu1 %v12042_v47  ;;  %4710 = vmatprep.subr.bf16.mxu0 %v12044_v55  ;;  %v4815_v20 = vmul.f32 0.0625, %v4814_v62  ;;  %v12152_v28 = vcombine.low %v4920_v41, %v4924_v24  ;;  %v12153_v11 = vcombine.high %v4920_v41, %v4924_v24  ;;  %v4912_v55 = vld [vmem:[#allocation5 + $0xf88] sm:$0xff] }
 0x61d   :  { %v12145_v48 = vcombine.high %v4912_v55, %v4916_v26  ;;  %v12144_v57 = vcombine.low %v4912_v55, %v4916_v26  ;;  %v4872_v62 = vld [vmem:[#allocation5 + $0xe48] sm:$0xff]  ;;  %v14676_v55 = vld [vmem:[#allocation5 + $0xfd0] sm:$0xff] }
 0x61e   :  { %v4816_v30 = vpack.c.bf16 %v4815_v20, %v4815_v20  ;;  %v4864_v24 = vld [vmem:[#allocation5 + $0xe08] sm:$0xff]  ;;  %v14678_v26 = vld [vmem:[#allocation5 + $0xff0] sm:$0xff] }
 0x61f   :  { %4670 = vmatpush1.bf16.msra.mxu1 %v12041_v45  ;;  %4711 = vmatpush1.bf16.msra.mxu0 %v12043_v18  ;;  %v4908_v45 = vld [vmem:[#allocation5 + $0xf68] sm:$0xff] }
 0x620   :  { %4671 = vmatprep.subr.bf16.mxu1 %v12034_v59  ;;  %4712 = vmatprep.subr.bf16.mxu0 %v12036_v5  ;;  %v12137_v59 = vcombine.high %v4904_v53, %v4908_v45  ;;  %v4895_v5 = vld [vmem:[#allocation5 + $0xf00] sm:$0xff]  ;;  %v12136_v50 = vcombine.low %v4904_v53, %v4908_v45  ;;  %v12154_v53 = vcombine.low %v14676_v55, %v14678_v26 }
 0x621   :  { %v12127_v2 = vcombine.high %v4895_v5, %v4899_v43  ;;  %v12156_v45 = vcombine.low %v14680_v23, %v14684_v27 }
 0x623   :  { %4672 = vmatpush1.bf16.msra.mxu1 %v12033_v7  ;;  %4713 = vmatpush1.bf16.msra.mxu0 %v12035_v35  ;;  %v12129_v7 = vcombine.high %v4896_v6, %v4900_v29  ;;  %v4887_v35 = vld [vmem:[#allocation5 + $0xec0] sm:$0xff] }
 0x624   :  { %4673 = vmatprep.subr.bf16.mxu1 %v12026_v9  ;;  %4714 = vmatprep.subr.bf16.mxu0 %v12028_v10  ;;  %v4892_v9 = vld [vmem:[#allocation5 + $0xee8] sm:$0xff]  ;;  %v12126_v10 = vcombine.low %v4895_v5, %v4899_v43  ;;  %v12119_v13 = vcombine.high %v4887_v35, %v4891_v56  ;;  %v12118_v22 = vcombine.low %v4887_v35, %v4891_v56 }
 0x625   :  { %v12121_v21 = vcombine.high %v4888_v8, %v4892_v9  ;;  %v12120_v42 = vcombine.low %v4888_v8, %v4892_v9 }
 0x627   :  { %4674 = vmatpush1.bf16.msra.mxu1 %v12025_v37  ;;  %4715 = vmatpush1.bf16.msra.mxu0 %v12027_v33  ;;  %v4879_v37 = vld [vmem:[#allocation5 + $0xe80] sm:$0xff] }
 0x628   :  { %4675 = vmatprep.subr.bf16.mxu1 %v12018_v32  ;;  %4716 = vmatprep.subr.bf16.mxu0 %v12020_v44  ;;  %v4883_v33 = vld [vmem:[#allocation5 + $0xea0] sm:$0xff]  ;;  %v4884_v32 = vld [vmem:[#allocation5 + $0xea8] sm:$0xff] }
 0x629   :  { %v12111_v60 = vcombine.high %v4879_v37, %v4883_v33  ;;  %v12110_v44 = vcombine.low %v4879_v37, %v4883_v33  ;;  %v12112_v19 = vcombine.low %v4880_v34, %v4884_v32 }
 0x62b   :  { %4676 = vmatpush1.bf16.msra.mxu1 %v12017_v16  ;;  %4717 = vmatpush1.bf16.msra.mxu0 %v12019_v15  ;;  %v12113_v16 = vcombine.high %v4880_v34, %v4884_v32  ;;  %v4871_v15 = vld [vmem:[#allocation5 + $0xe40] sm:$0xff]  ;;  %v13449_v32 = vld [vmem:[%s15547_s0 + $0x218] sm:$0xff]  }
 0x62c   :  { %13672 = vmatprep.subr.bf16.mxu1 %v13940_v0  ;;  %5247 = vmatprep.subr.bf16.mxu0 %v12151_v51  ;;  %v12103_v20 = vcombine.high %v4871_v15, %v4875_v61  ;;  %v12102_v39 = vcombine.low %v4871_v15, %v4875_v61  ;;  %v4867_v51 = vld [vmem:[#allocation5 + $0xe20] sm:$0xff] }
 0x62e   :  { %4694 = vmatmul.mubr.bf16.vlgmr.msra.gmra.mxu1 %v14639_v52  ;;  %4735 = vmatmul.mubr.bf16.vlgmr.msra.gmra.mxu0 %v14639_v52  ;;  %v4911_v52 = vld [vmem:[#allocation5 + $0xf80] sm:$0xff] }
 0x62f   :  { %13673 = vmatpush3.bf16.msra.mxu1 %v14006_v4  ;;  %13674 = vmatprep.mubr.msk.bf16.mxu1 %vm13941_vm0, %v13940_v0  ;;  %v12143_v47 = vcombine.high %v4911_v52, %v4915_v54  ;;  %v12142_v18 = vcombine.low %v4911_v52, %v4915_v54  ;;  %v4868_v54 = vld [vmem:[#allocation5 + $0xe28] sm:$0xff] }
 0x630   :  { %5279 = vmatprep.mubr.bf16.mxu0 %v13942_v3  ;;  %5288 = vmatprep.subr.bf16.mxu1 %v12153_v11  ;;  %v12096_v11 = vcombine.low %v4864_v24, %v4868_v54 }
 0x631   :  { %5248 = vmatpush1.bf16.msra.mxu0 %v12150_v49  ;;  %v4863_v49 = vld [vmem:[#allocation5 + $0xe00] sm:$0xff] }
 0x632   :  { %5249 = vmatprep.subr.bf16.mxu0 %v12143_v47  ;;  %v12095_v52 = vcombine.high %v4863_v49, %v4867_v51  ;;  %v12097_v47 = vcombine.high %v4864_v24, %v4868_v54 }
 0x635   :  { %5250 = vmatpush1.bf16.msra.mxu0 %v12142_v18  ;;  %v12157_v18 = vcombine.high %v14680_v23, %v14684_v27 }
 0x636   :  { %13675 = vmatmul.mubr.msk.bf16.vlgmr.msra.gmra.mxu1 %vm120_vm2, %v4816_v30  ;;  %5251 = vmatprep.subr.bf16.mxu0 %v12135_v63  ;;  %v4876_v30 = vld [vmem:[#allocation5 + $0xe68] sm:$0xff] }
 0x637   :  { %5320 = vmatprep.mubr.bf16.mxu1 %v13942_v3  ;;  %5289 = vmatpush1.bf16.msra.mxu1 %v12152_v28  ;;  %v12104_v38 = vcombine.low %v4872_v62, %v4876_v30  ;;  %v12105_v41 = vcombine.high %v4872_v62, %v4876_v30  ;;  %v12094_v28 = vcombine.low %v4863_v49, %v4867_v51 }
 0x638   :  { %5290 = vmatprep.subr.bf16.mxu1 %v12145_v48  ;;  %v12155_v48 = vcombine.high %v14676_v55, %v14678_v26 }
 0x639   :  { %5252 = vmatpush1.bf16.msra.mxu0 %v12134_v1 }
 0x63a   :  { %5253 = vmatprep.subr.bf16.mxu0 %v12127_v2 }
 0x63b   :  { %5291 = vmatpush1.bf16.msra.mxu1 %v12144_v57 }
 0x63c   :  { %5292 = vmatprep.subr.bf16.mxu1 %v12137_v59 }
 0x63d   :  { %5254 = vmatpush1.bf16.msra.mxu0 %v12126_v10 }
 0x63e   :  { %5255 = vmatprep.subr.bf16.mxu0 %v12119_v13 }
 0x63f   :  { %5293 = vmatpush1.bf16.msra.mxu1 %v12136_v50 }
 0x640   :  { %5294 = vmatprep.subr.bf16.mxu1 %v12129_v7 }
 0x641   :  { %5256 = vmatpush1.bf16.msra.mxu0 %v12118_v22 }
 0x642   :  { %5257 = vmatprep.subr.bf16.mxu0 %v12111_v60 }
 0x643   :  { %5295 = vmatpush1.bf16.msra.mxu1 %v12128_v12 }
 0x644   :  { %5296 = vmatprep.subr.bf16.mxu1 %v12121_v21  ;;  %v13448_v21 = vld [vmem:[%s15547_s0 + $0x210] sm:$0xff]  }
 0x645   :  { %5258 = vmatpush1.bf16.msra.mxu0 %v12110_v44  ;;  %v13138_v34 = vunpack.c.h.bf16 %v13448_v21 }
 0x646   :  { %5259 = vmatprep.subr.bf16.mxu0 %v12103_v20 }
 0x647   :  { %5297 = vmatpush1.bf16.msra.mxu1 %v12120_v42  ;;  %v13137_v42 = vunpack.c.l.bf16 %v13448_v21 }
 0x648   :  { %5298 = vmatprep.subr.bf16.mxu1 %v12113_v16  ;;  %v5461_v16 = vsel %vm120_vm2, %v13138_v34, 0.0 }
 0x649   :  { %5260 = vmatpush1.bf16.msra.mxu0 %v12102_v39  ;;  %v5459_v60 = vsel %vm120_vm2, %v13137_v42, 0.0 }
 0x64a   :  { %5261 = vmatprep.subr.bf16.mxu0 %v12095_v52 }
 0x64b   :  { %5299 = vmatpush1.bf16.msra.mxu1 %v12112_v19  ;;  %v13141_v19 = vunpack.c.l.bf16 %v13449_v32 }
 0x64c   :  { %5300 = vmatprep.subr.bf16.mxu1 %v12105_v41  ;;  %v13142_v41 = vunpack.c.h.bf16 %v13449_v32  ;;  %v4901_v32 = vld [vmem:[#allocation5 + $0xf30] sm:$0xff] }
 0x64d   :  { %5262 = vmatpush1.bf16.msra.mxu0 %v12094_v28  ;;  %v5463_v49 = vsel %vm120_vm2, %v13141_v19, 0.0  ;;  %v4902_v19 = vld [vmem:[#allocation5 + $0xf38] sm:$0xff] }
 0x64e   :  { %5329 = vmatprep.subr.bf16.mxu0 %v12155_v48  ;;  %v5465_v48 = vsel %vm120_vm2, %v13142_v41, 0.0 }
 0x64f   :  { %5301 = vmatpush1.bf16.msra.mxu1 %v12104_v38 }
 0x650   :  { %5302 = vmatprep.subr.bf16.mxu1 %v12097_v47 }
 0x653   :  { %5303 = vmatpush1.bf16.msra.mxu1 %v12096_v11 }
 0x654   :  { %5370 = vmatprep.subr.bf16.mxu1 %v12157_v18  ;;  %v4913_v18 = vld [vmem:[#allocation5 + $0xf90] sm:$0xff] }
 0x6ce   :  { %v4613_v57 = vpop.f32.mrf.mxu1  ;;  %v4654_v63 = vpop.f32.mrf.mxu0 }
 0x6cf   :  { %v14693_v59 = vadd.f32 %v4613_v57, %v14592_v14  ;;  %v14696_v5 = vadd.f32 %v4654_v63, %v14595_v46  ;;  %v13446_v14 = vld [vmem:[%s15547_s0 + $0x200] sm:$0xff]   ;;  %v13447_v46 = vld [vmem:[%s15547_s0 + $0x208] sm:$0xff]   ;;  %v4917_v63 = vld [vmem:[#allocation5 + $0xfb0] sm:$0xff] }
 0x6d0   :  { %v4615_v43 = vpop.f32.mrf.mxu1  ;;  %v4656_v6 = vpop.f32.mrf.mxu0  ;;  %v13129_v56 = vunpack.c.l.bf16 %v13446_v14  ;;  %v13130_v8 = vunpack.c.h.bf16 %v13446_v14  ;;  %v13133_v9 = vunpack.c.l.bf16 %v13447_v46  ;;  %v13134_v12 = vunpack.c.h.bf16 %v13447_v46  ;;  %v13451_v46 = vld [vmem:[%s15547_s0 + $0x228] sm:$0xff]  }
 0x6d1   :  { %v14699_v29 = vadd.f32 %v4615_v43, %v14598_v31  ;;  %v14702_v1 = vadd.f32 %v4656_v6, %v14601_v40  ;;  %v4918_v43 = vld [vmem:[#allocation5 + $0xfb8] sm:$0xff]  ;;  %v12147_v14 = vcombine.high %v4913_v18, %v4917_v63  ;;  %v12146_v21 = vcombine.low %v4913_v18, %v4917_v63 }
 0x6d2   :  { %v4617_v50 = vpop.f32.mrf.mxu1  ;;  %v4658_v2 = vpop.f32.mrf.mxu0  ;;  %v5452_v31 = vsel %vm120_vm2, %v13129_v56, 0.0  ;;  %v5453_v40 = vsel %vm120_vm2, %v13130_v8, 0.0  ;;  %v5455_v13 = vsel %vm120_vm2, %v13133_v9, 0.0  ;;  %v5457_v37 = vsel %vm120_vm2, %v13134_v12, 0.0  ;;  %v4905_v8 = vld [vmem:[#allocation5 + $0xf50] sm:$0xff]  ;;  %v4886_v18 = vld [vmem:[#allocation5 + $0xeb8] sm:$0xff] }
 0x6d3   :  { %v5454_v10 = vadd.f32 %v5453_v40, %v5452_v31  ;;  %v4909_v31 = vld [vmem:[#allocation5 + $0xf70] sm:$0xff]  ;;  %v4906_v40 = vld [vmem:[#allocation5 + $0xf58] sm:$0xff]  ;;  %v13149_v42 = vunpack.c.l.bf16 %v13451_v46  ;;  %v13150_v27 = vunpack.c.h.bf16 %v13451_v46 }
 0x6d4   :  { %v4618_v7 = vpop.f32.mrf.mxu1  ;;  %v4659_v35 = vpop.f32.mrf.mxu0  ;;  %v12138_v26 = vcombine.low %v4905_v8, %v4909_v31 }
 0x6d5   :  { %v5456_v22 = vadd.f32 %v5455_v13, %v5454_v10  ;;  %v4910_v10 = vld [vmem:[#allocation5 + $0xf78] sm:$0xff] }
 0x6d6   :  { %v12141_v34 = vcombine.high %v4906_v40, %v4910_v10  ;;  %v12140_v23 = vcombine.low %v4906_v40, %v4910_v10 }
 0x6d7   :  { %v5458_v33 = vadd.f32 %v5457_v37, %v5456_v22 }
 0x6d9   :  { %v5460_v44 = vadd.f32 %v5459_v60, %v5458_v33  ;;  %v12139_v33 = vcombine.high %v4905_v8, %v4909_v31  ;;  %v4897_v60 = vld [vmem:[#allocation5 + $0xf10] sm:$0xff]  ;;  %v4878_v8 = vld [vmem:[#allocation5 + $0xe78] sm:$0xff] }
 0x6db   :  { %v5462_v30 = vadd.f32 %v5461_v16, %v5460_v44  ;;  %v4898_v44 = vld [vmem:[#allocation5 + $0xf18] sm:$0xff] }
 0x6dc   :  { %v12133_v16 = vcombine.high %v4898_v44, %v4902_v19 }
 0x6ee   :  { %v4695_v15 = vpop.f32.mrf.mxu1  ;;  %v4736_v61 = vpop.f32.mrf.mxu0 }
 0x6ef   :  { %v14723_v62 = vadd.f32 %v4695_v15, %v14622_v58  ;;  %v14726_v20 = vadd.f32 %v4736_v61, %v14625_v36  ;;  %v13450_v58 = vld [vmem:[%s15547_s0 + $0x220] sm:$0xff]   ;;  %v5464_v36 = vadd.f32 %v5463_v49, %v5462_v30  ;;  %v4889_v15 = vld [vmem:[#allocation5 + $0xed0] sm:$0xff]  ;;  %v12130_v49 = vcombine.low %v4897_v60, %v4901_v32 }
 0x6f0   :  { %v4697_v39 = vpop.f32.mrf.mxu1  ;;  %v4738_v38 = vpop.f32.mrf.mxu0  ;;  %v13145_v47 = vunpack.c.l.bf16 %v13450_v58  ;;  %v13146_v2 = vunpack.c.h.bf16 %v13450_v58  ;;  %v13452_v61 = vld [vmem:[%s15547_s0 + $0x230] sm:$0xff]   ;;  %v12132_v58 = vcombine.low %v4898_v44, %v4902_v19 }
 0x6f1   :  { %v14730_v51 = vadd.f32 %v4697_v39, %v14629_v25  ;;  %v14733_v24 = vadd.f32 %v4738_v38, %v14632_v17  ;;  %v4914_v25 = vld [vmem:[#allocation5 + $0xf98] sm:$0xff]  ;;  %v5466_v17 = vadd.f32 %v5465_v48, %v5464_v36  ;;  %v4893_v30 = vld [vmem:[#allocation5 + $0xef0] sm:$0xff] }
 0x6f2   :  { %v4699_v52 = vpop.f32.mrf.mxu1  ;;  %v4740_v54 = vpop.f32.mrf.mxu0  ;;  %v5467_v7 = vsel %vm120_vm2, %v13145_v47, 0.0  ;;  %v12149_v56 = vcombine.high %v4914_v25, %v4918_v43  ;;  %v12148_v22 = vcombine.low %v4914_v25, %v4918_v43  ;;  %v5469_v37 = vsel %vm120_vm2, %v13146_v2, 0.0  ;;  %v4890_v39 = vld [vmem:[#allocation5 + $0xed8] sm:$0xff]  ;;  %v4885_v47 = vld [vmem:[#allocation5 + $0xeb0] sm:$0xff] }
 0x6f3   :  { %v5468_v12 = vadd.f32 %v5467_v7, %v5466_v17  ;;  %v4894_v38 = vld [vmem:[#allocation5 + $0xef8] sm:$0xff]  ;;  %v13153_v52 = vunpack.c.l.bf16 %v13452_v61  ;;  %v5473_v54 = vsel %vm120_vm2, %v13150_v27, 0.0  ;;  %v12123_v36 = vcombine.high %v4889_v15, %v4893_v30  ;;  %v4873_v2 = vld [vmem:[#allocation5 + $0xe50] sm:$0xff] }
 0x6f4   :  { %v4700_v28 = vpop.f32.mrf.mxu1  ;;  %v4741_v11 = vpop.f32.mrf.mxu0  ;;  %v4882_v48 = vld [vmem:[#allocation5 + $0xe98] sm:$0xff]  ;;  %v12122_v63 = vcombine.low %v4889_v15, %v4893_v30  ;;  %v12124_v25 = vcombine.low %v4890_v39, %v4894_v38  ;;  %v13154_v43 = vunpack.c.h.bf16 %v13452_v61  ;;  %v5587_v61 = vld [vmem:[#allocation5 + $0x11c0] sm:$0xff] }
 0x6f5   :  { %v5470_v55 = vadd.f32 %v5469_v37, %v5468_v12  ;;  %v12125_v28 = vcombine.high %v4890_v39, %v4894_v38  ;;  %v4881_v11 = vld [vmem:[#allocation5 + $0xe90] sm:$0xff]  ;;  %v12116_v31 = vcombine.low %v4882_v48, %v4886_v18  ;;  %v4870_v37 = vld [vmem:[#allocation5 + $0xe38] sm:$0xff]  ;;  %v5591_v30 = vld [vmem:[#allocation5 + $0x11e0] sm:$0xff] }
 0x6f6   :  { %v4854_v57 = vpop.f32.mrf.mxu1  ;;  %v12115_v17 = vcombine.high %v4881_v11, %v4885_v47  ;;  %v13453_v7 = vld [vmem:[%s15547_s0 + $0x238] sm:$0xff]   ;;  %v5477_v10 = vsel %vm120_vm2, %v13154_v43, 0.0  ;;  %v5588_v39 = vld [vmem:[#allocation5 + $0x11c8] sm:$0xff]  ;;  %v12231_v38 = vcombine.low %v5587_v61, %v5591_v30 }
 0x6f7   :  { %v4860_v6 = vmax.f32 %v4854_v57, 0.0  ;;  %v13157_v40 = vunpack.c.l.bf16 %v13453_v7 }
 0x6f8   :  { %v13676_v50 = vpop.f32.mrf.mxu1 }
 0x6f9   :  { %v14740_v35 = vpack.c.bf16 %v4860_v6, %v4860_v6  ;;  %v5475_v6 = vsel %vm120_vm2, %v13153_v52, 0.0  ;;  %v12117_v50 = vcombine.high %v4882_v48, %v4886_v18  ;;  %v5479_v44 = vsel %vm120_vm2, %v13157_v40, 0.0  ;;  %v5575_v18 = vld [vmem:[#allocation5 + $0x1160] sm:$0xff] }
 0x6fa   :  { %v4857_v9 = vpop.f32.mrf.mxu1  ;;  %v5559_v40 = vld [vmem:[#allocation5 + $0x10e0] sm:$0xff] }
 0x6fb   :  { %5280 = vmatmul.mubr.bf16.vlgmr.msra.gmra.mxu0 %v14740_v35  ;;  %5321 = vmatmul.mubr.bf16.vlgmr.msra.gmra.mxu1 %v14740_v35  ;;  %v12114_v9 = vcombine.low %v4881_v11, %v4885_v47  ;;  %v5584_v11 = vld [vmem:[#allocation5 + $0x11a8] sm:$0xff]  ;;  %v5571_v47 = vld [vmem:[#allocation5 + $0x1140] sm:$0xff] }
 0x6fc   :  { %5330 = vmatpush1.bf16.msra.mxu0 %v12154_v53  ;;  %5371 = vmatpush1.bf16.msra.mxu1 %v12156_v45  ;;  %v13677_v13 = vpop.f32.mrf.mxu1  ;;  %v5471_v53 = vsel %vm120_vm2, %v13149_v42, 0.0  ;;  %v12131_v45 = vcombine.high %v4897_v60, %v4901_v32  ;;  %v4866_v42 = vld [vmem:[#allocation5 + $0xe18] sm:$0xff]  ;;  %v13158_v32 = vunpack.c.h.bf16 %v13453_v7  ;;  %v5564_v7 = vld [vmem:[#allocation5 + $0x1108] sm:$0xff] }
 0x6fd   :  { %5331 = vmatprep.subr.bf16.mxu0 %v12147_v14  ;;  %5372 = vmatprep.subr.bf16.mxu1 %v12149_v56  ;;  %v5472_v41 = vadd.f32 %v5471_v53, %v5470_v55  ;;  %v4877_v14 = vld [vmem:[#allocation5 + $0xe70] sm:$0xff]  ;;  %v4874_v56 = vld [vmem:[#allocation5 + $0xe58] sm:$0xff]  ;;  %v12101_v55 = vcombine.high %v4866_v42, %v4870_v37  ;;  %v12100_v27 = vcombine.low %v4866_v42, %v4870_v37 }
 0x6fe   :  { %5361 = vmatprep.mubr.bf16.mxu0 %v13942_v3  ;;  %5402 = vmatprep.mubr.bf16.mxu1 %v13942_v3  ;;  %v12107_v12 = vcombine.high %v4873_v2, %v4877_v14  ;;  %v12109_v13 = vcombine.high %v4874_v56, %v4878_v8  ;;  %v12108_v60 = vcombine.low %v4874_v56, %v4878_v8  ;;  %v5481_v53 = vsel %vm120_vm2, %v13158_v32, 0.0  ;;  %v5548_v32 = vld [vmem:[#allocation5 + $0x1088] sm:$0xff] }
 0x6ff   :  { %v5474_v57 = vadd.f32 %v5473_v54, %v5472_v41  ;;  %v12232_v41 = vcombine.high %v5587_v61, %v5591_v30  ;;  %v12215_v56 = vcombine.low %v5571_v47, %v5575_v18 }
 0x700   :  { %5332 = vmatpush1.bf16.msra.mxu0 %v12146_v21  ;;  %5373 = vmatpush1.bf16.msra.mxu1 %v12148_v22  ;;  %v4865_v21 = vld [vmem:[#allocation5 + $0xe10] sm:$0xff] }
 0x701   :  { %5333 = vmatprep.subr.bf16.mxu0 %v12139_v33  ;;  %5374 = vmatprep.subr.bf16.mxu1 %v12141_v34  ;;  %v5476_v46 = vadd.f32 %v5475_v6, %v5474_v57  ;;  %v4869_v22 = vld [vmem:[#allocation5 + $0xe30] sm:$0xff]  ;;  %v12106_v34 = vcombine.low %v4873_v2, %v4877_v14  ;;  %v5572_v57 = vld [vmem:[#allocation5 + $0x1148] sm:$0xff]  ;;  %v12216_v6 = vcombine.high %v5571_v47, %v5575_v18  ;;  %v5567_v2 = vld [vmem:[#allocation5 + $0x1120] sm:$0xff] }
 0x702   :  { %v12099_v19 = vcombine.high %v4865_v21, %v4869_v22  ;;  %v5568_v14 = vld [vmem:[#allocation5 + $0x1128] sm:$0xff]  ;;  %v14781_v47 = vld [vmem:[#allocation5 + $0x11d8] sm:$0xff] }
 0x703   :  { %v5478_v33 = vadd.f32 %v5477_v10, %v5476_v46  ;;  %v5556_v10 = vld [vmem:[#allocation5 + $0x10c8] sm:$0xff]  ;;  %v14785_v18 = vld [vmem:[#allocation5 + $0x11f8] sm:$0xff] }
 0x704   :  { %5334 = vmatpush1.bf16.msra.mxu0 %v12138_v26  ;;  %5375 = vmatpush1.bf16.msra.mxu1 %v12140_v23  ;;  %v12098_v23 = vcombine.low %v4865_v21, %v4869_v22  ;;  %v12209_v21 = vcombine.low %v5564_v7, %v5568_v14 }
 0x705   :  { %5335 = vmatprep.subr.bf16.mxu0 %v12131_v45  ;;  %5376 = vmatprep.subr.bf16.mxu1 %v12133_v16  ;;  %v5480_v26 = vadd.f32 %v5479_v44, %v5478_v33 }
 0x707   :  { %v5482_v45 = vadd.f32 %v5481_v53, %v5480_v26  ;;  %v5543_v53 = vld [vmem:[#allocation5 + $0x1060] sm:$0xff] }
 0x708   :  { %5336 = vmatpush1.bf16.msra.mxu0 %v12130_v49  ;;  %5377 = vmatpush1.bf16.msra.mxu1 %v12132_v58  ;;  %v5592_v49 = vld [vmem:[#allocation5 + $0x11e8] sm:$0xff]  ;;  %v5583_v58 = vld [vmem:[#allocation5 + $0x11a0] sm:$0xff] }
 0x709   :  { %5337 = vmatprep.subr.bf16.mxu0 %v12123_v36  ;;  %5378 = vmatprep.subr.bf16.mxu1 %v12125_v28  ;;  %v5483_v16 = vmul.f32 0.0625, %v5482_v45  ;;  %v12233_v52 = vcombine.low %v5588_v39, %v5592_v49  ;;  %v12234_v54 = vcombine.high %v5588_v39, %v5592_v49  ;;  %v5580_v28 = vld [vmem:[#allocation5 + $0x1188] sm:$0xff] }
 0x70a   :  { %v12226_v48 = vcombine.high %v5580_v28, %v5584_v11  ;;  %v12225_v43 = vcombine.low %v5580_v28, %v5584_v11  ;;  %v5540_v45 = vld [vmem:[#allocation5 + $0x1048] sm:$0xff]  ;;  %v14777_v28 = vld [vmem:[#allocation5 + $0x11d0] sm:$0xff] }
 0x70b   :  { %v5484_v15 = vpack.c.bf16 %v5483_v16, %v5483_v16  ;;  %v5532_v49 = vld [vmem:[#allocation5 + $0x1008] sm:$0xff]  ;;  %v14779_v11 = vld [vmem:[#allocation5 + $0x11f0] sm:$0xff] }
 0x70c   :  { %5338 = vmatpush1.bf16.msra.mxu0 %v12122_v63  ;;  %5379 = vmatpush1.bf16.msra.mxu1 %v12124_v25  ;;  %v5576_v63 = vld [vmem:[#allocation5 + $0x1168] sm:$0xff] }
 0x70d   :  { %5339 = vmatprep.subr.bf16.mxu0 %v12115_v17  ;;  %5380 = vmatprep.subr.bf16.mxu1 %v12117_v50  ;;  %v12218_v17 = vcombine.high %v5572_v57, %v5576_v63  ;;  %v5563_v50 = vld [vmem:[#allocation5 + $0x1100] sm:$0xff]  ;;  %v12217_v8 = vcombine.low %v5572_v57, %v5576_v63  ;;  %v12235_v57 = vcombine.low %v14777_v28, %v14779_v11 }
 0x70e   :  { %v12208_v46 = vcombine.high %v5563_v50, %v5567_v2  ;;  %v12237_v63 = vcombine.low %v14781_v47, %v14785_v18 }
 0x710   :  { %5340 = vmatpush1.bf16.msra.mxu0 %v12114_v9  ;;  %5381 = vmatpush1.bf16.msra.mxu1 %v12116_v31  ;;  %v12210_v9 = vcombine.high %v5564_v7, %v5568_v14  ;;  %v5555_v31 = vld [vmem:[#allocation5 + $0x10c0] sm:$0xff] }
 0x711   :  { %5341 = vmatprep.subr.bf16.mxu0 %v12107_v12  ;;  %5382 = vmatprep.subr.bf16.mxu1 %v12109_v13  ;;  %v5560_v12 = vld [vmem:[#allocation5 + $0x10e8] sm:$0xff]  ;;  %v12207_v13 = vcombine.low %v5563_v50, %v5567_v2  ;;  %v12200_v22 = vcombine.high %v5555_v31, %v5559_v40  ;;  %v12199_v37 = vcombine.low %v5555_v31, %v5559_v40 }
 0x712   :  { %v12202_v42 = vcombine.high %v5556_v10, %v5560_v12  ;;  %v12201_v33 = vcombine.low %v5556_v10, %v5560_v12 }
 0x714   :  { %5342 = vmatpush1.bf16.msra.mxu0 %v12106_v34  ;;  %5383 = vmatpush1.bf16.msra.mxu1 %v12108_v60  ;;  %v5547_v34 = vld [vmem:[#allocation5 + $0x1080] sm:$0xff] }
 0x715   :  { %5343 = vmatprep.subr.bf16.mxu0 %v12099_v19  ;;  %5384 = vmatprep.subr.bf16.mxu1 %v12101_v55  ;;  %v5551_v60 = vld [vmem:[#allocation5 + $0x10a0] sm:$0xff]  ;;  %v5552_v19 = vld [vmem:[#allocation5 + $0x10a8] sm:$0xff] }
 0x716   :  { %v12192_v44 = vcombine.high %v5547_v34, %v5551_v60  ;;  %v12191_v55 = vcombine.low %v5547_v34, %v5551_v60  ;;  %v12193_v26 = vcombine.low %v5548_v32, %v5552_v19 }
 0x718   :  { %5344 = vmatpush1.bf16.msra.mxu0 %v12098_v23  ;;  %5385 = vmatpush1.bf16.msra.mxu1 %v12100_v27  ;;  %v12194_v23 = vcombine.high %v5548_v32, %v5552_v19  ;;  %v5539_v27 = vld [vmem:[#allocation5 + $0x1040] sm:$0xff]  ;;  %v13457_v19 = vld [vmem:[%s15547_s0 + $0x258] sm:$0xff]  }
 0x719   :  { %13678 = vmatprep.subr.bf16.mxu0 %v13940_v0  ;;  %5915 = vmatprep.subr.bf16.mxu1 %v12232_v41  ;;  %v12184_v16 = vcombine.high %v5539_v27, %v5543_v53  ;;  %v12183_v61 = vcombine.low %v5539_v27, %v5543_v53  ;;  %v5535_v41 = vld [vmem:[#allocation5 + $0x1020] sm:$0xff] }
 0x71b   :  { %5362 = vmatmul.mubr.bf16.vlgmr.msra.gmra.mxu0 %v14740_v35  ;;  %5403 = vmatmul.mubr.bf16.vlgmr.msra.gmra.mxu1 %v14740_v35  ;;  %v5579_v35 = vld [vmem:[#allocation5 + $0x1180] sm:$0xff] }
 0x71c   :  { %13679 = vmatpush3.bf16.msra.mxu0 %v14006_v4  ;;  %13680 = vmatprep.mubr.msk.bf16.mxu0 %vm13941_vm0, %v13940_v0  ;;  %v12224_v36 = vcombine.high %v5579_v35, %v5583_v58  ;;  %v12223_v25 = vcombine.low %v5579_v35, %v5583_v58  ;;  %v5536_v58 = vld [vmem:[#allocation5 + $0x1028] sm:$0xff] }
 0x71d   :  { %5947 = vmatprep.mubr.bf16.mxu1 %v13942_v3  ;;  %5956 = vmatprep.subr.bf16.mxu0 %v12234_v54  ;;  %v12177_v54 = vcombine.low %v5532_v49, %v5536_v58 }
 0x71e   :  { %5916 = vmatpush1.bf16.msra.mxu1 %v12231_v38  ;;  %v5531_v38 = vld [vmem:[#allocation5 + $0x1000] sm:$0xff] }
 0x71f   :  { %5917 = vmatprep.subr.bf16.mxu1 %v12224_v36  ;;  %v12176_v35 = vcombine.high %v5531_v38, %v5535_v41  ;;  %v12178_v36 = vcombine.high %v5532_v49, %v5536_v58 }
 0x722   :  { %5918 = vmatpush1.bf16.msra.mxu1 %v12223_v25  ;;  %v12238_v25 = vcombine.high %v14781_v47, %v14785_v18 }
 0x723   :  { %13681 = vmatmul.mubr.msk.bf16.vlgmr.msra.gmra.mxu0 %vm120_vm2, %v5484_v15  ;;  %5919 = vmatprep.subr.bf16.mxu1 %v12216_v6  ;;  %v5544_v15 = vld [vmem:[#allocation5 + $0x1068] sm:$0xff] }
 0x724   :  { %5988 = vmatprep.mubr.bf16.mxu0 %v13942_v3  ;;  %5957 = vmatpush1.bf16.msra.mxu0 %v12233_v52  ;;  %v12185_v30 = vcombine.low %v5540_v45, %v5544_v15  ;;  %v12186_v39 = vcombine.high %v5540_v45, %v5544_v15  ;;  %v12175_v52 = vcombine.low %v5531_v38, %v5535_v41 }
 0x725   :  { %5958 = vmatprep.subr.bf16.mxu0 %v12226_v48  ;;  %v12236_v48 = vcombine.high %v14777_v28, %v14779_v11 }
 0x726   :  { %5920 = vmatpush1.bf16.msra.mxu1 %v12215_v56 }
 0x727   :  { %5921 = vmatprep.subr.bf16.mxu1 %v12208_v46 }
 0x728   :  { %5959 = vmatpush1.bf16.msra.mxu0 %v12225_v43 }
 0x729   :  { %5960 = vmatprep.subr.bf16.mxu0 %v12218_v17 }
 0x72a   :  { %5922 = vmatpush1.bf16.msra.mxu1 %v12207_v13 }
 0x72b   :  { %5923 = vmatprep.subr.bf16.mxu1 %v12200_v22 }
 0x72c   :  { %5961 = vmatpush1.bf16.msra.mxu0 %v12217_v8 }
 0x72d   :  { %5962 = vmatprep.subr.bf16.mxu0 %v12210_v9 }
 0x72e   :  { %5924 = vmatpush1.bf16.msra.mxu1 %v12199_v37 }
 0x72f   :  { %5925 = vmatprep.subr.bf16.mxu1 %v12192_v44 }
 0x730   :  { %5963 = vmatpush1.bf16.msra.mxu0 %v12209_v21 }
 0x731   :  { %5964 = vmatprep.subr.bf16.mxu0 %v12202_v42  ;;  %v13456_v42 = vld [vmem:[%s15547_s0 + $0x250] sm:$0xff]  }
 0x732   :  { %5926 = vmatpush1.bf16.msra.mxu1 %v12191_v55  ;;  %v13170_v32 = vunpack.c.h.bf16 %v13456_v42 }
 0x733   :  { %5927 = vmatprep.subr.bf16.mxu1 %v12184_v16 }
 0x734   :  { %5965 = vmatpush1.bf16.msra.mxu0 %v12201_v33  ;;  %v13169_v33 = vunpack.c.l.bf16 %v13456_v42 }
 0x735   :  { %5966 = vmatprep.subr.bf16.mxu0 %v12194_v23  ;;  %v6129_v23 = vsel %vm120_vm2, %v13170_v32, 0.0 }
 0x736   :  { %5928 = vmatpush1.bf16.msra.mxu1 %v12183_v61  ;;  %v6127_v44 = vsel %vm120_vm2, %v13169_v33, 0.0 }
 0x737   :  { %5929 = vmatprep.subr.bf16.mxu1 %v12176_v35 }
 0x738   :  { %5967 = vmatpush1.bf16.msra.mxu0 %v12193_v26  ;;  %v13173_v26 = vunpack.c.l.bf16 %v13457_v19 }
 0x739   :  { %5968 = vmatprep.subr.bf16.mxu0 %v12186_v39  ;;  %v13174_v39 = vunpack.c.h.bf16 %v13457_v19  ;;  %v5569_v19 = vld [vmem:[#allocation5 + $0x1130] sm:$0xff] }
 0x73a   :  { %5930 = vmatpush1.bf16.msra.mxu1 %v12175_v52  ;;  %v6131_v38 = vsel %vm120_vm2, %v13173_v26, 0.0  ;;  %v5570_v26 = vld [vmem:[#allocation5 + $0x1138] sm:$0xff] }
 0x73b   :  { %5997 = vmatprep.subr.bf16.mxu1 %v12236_v48  ;;  %v6133_v48 = vsel %vm120_vm2, %v13174_v39, 0.0 }
 0x73c   :  { %5969 = vmatpush1.bf16.msra.mxu0 %v12185_v30 }
 0x73d   :  { %5970 = vmatprep.subr.bf16.mxu0 %v12178_v36 }
 0x740   :  { %5971 = vmatpush1.bf16.msra.mxu0 %v12177_v54 }
 0x741   :  { %6038 = vmatprep.subr.bf16.mxu0 %v12238_v25  ;;  %v5581_v25 = vld [vmem:[#allocation5 + $0x1190] sm:$0xff] }
 0x7bb   :  { %v5281_v43 = vpop.f32.mrf.mxu0  ;;  %v5322_v6 = vpop.f32.mrf.mxu1 }
 0x7bc   :  { %v14794_v17 = vadd.f32 %v5281_v43, %v14693_v59  ;;  %v14797_v50 = vadd.f32 %v5322_v6, %v14696_v5  ;;  %v13454_v59 = vld [vmem:[%s15547_s0 + $0x240] sm:$0xff]   ;;  %v13455_v5 = vld [vmem:[%s15547_s0 + $0x248] sm:$0xff]   ;;  %v5585_v6 = vld [vmem:[#allocation5 + $0x11b0] sm:$0xff] }
 0x7bd   :  { %v5283_v2 = vpop.f32.mrf.mxu0  ;;  %v5324_v7 = vpop.f32.mrf.mxu1  ;;  %v13161_v40 = vunpack.c.l.bf16 %v13454_v59  ;;  %v13162_v10 = vunpack.c.h.bf16 %v13454_v59  ;;  %v13165_v12 = vunpack.c.l.bf16 %v13455_v5  ;;  %v13166_v21 = vunpack.c.h.bf16 %v13455_v5  ;;  %v13459_v5 = vld [vmem:[%s15547_s0 + $0x268] sm:$0xff]  }
 0x7be   :  { %v14800_v14 = vadd.f32 %v5283_v2, %v14699_v29  ;;  %v14803_v56 = vadd.f32 %v5324_v7, %v14702_v1  ;;  %v5586_v2 = vld [vmem:[#allocation5 + $0x11b8] sm:$0xff]  ;;  %v12228_v59 = vcombine.high %v5581_v25, %v5585_v6  ;;  %v12227_v42 = vcombine.low %v5581_v25, %v5585_v6 }
 0x7bf   :  { %v5285_v8 = vpop.f32.mrf.mxu0  ;;  %v5326_v46 = vpop.f32.mrf.mxu1  ;;  %v6120_v29 = vsel %vm120_vm2, %v13161_v40, 0.0  ;;  %v6121_v1 = vsel %vm120_vm2, %v13162_v10, 0.0  ;;  %v6123_v22 = vsel %vm120_vm2, %v13165_v12, 0.0  ;;  %v6125_v34 = vsel %vm120_vm2, %v13166_v21, 0.0  ;;  %v5573_v10 = vld [vmem:[#allocation5 + $0x1150] sm:$0xff]  ;;  %v5554_v25 = vld [vmem:[#allocation5 + $0x10b8] sm:$0xff] }
 0x7c0   :  { %v6122_v13 = vadd.f32 %v6121_v1, %v6120_v29  ;;  %v5577_v29 = vld [vmem:[#allocation5 + $0x1170] sm:$0xff]  ;;  %v5574_v1 = vld [vmem:[#allocation5 + $0x1158] sm:$0xff]  ;;  %v13181_v33 = vunpack.c.l.bf16 %v13459_v5  ;;  %v13182_v18 = vunpack.c.h.bf16 %v13459_v5 }
 0x7c1   :  { %v5286_v9 = vpop.f32.mrf.mxu0  ;;  %v5327_v31 = vpop.f32.mrf.mxu1  ;;  %v12219_v11 = vcombine.low %v5573_v10, %v5577_v29 }
 0x7c2   :  { %v6124_v37 = vadd.f32 %v6123_v22, %v6122_v13  ;;  %v5578_v13 = vld [vmem:[#allocation5 + $0x1178] sm:$0xff] }
 0x7c3   :  { %v12222_v32 = vcombine.high %v5574_v1, %v5578_v13  ;;  %v12221_v47 = vcombine.low %v5574_v1, %v5578_v13 }
 0x7c4   :  { %v6126_v60 = vadd.f32 %v6125_v34, %v6124_v37 }
 0x7c6   :  { %v6128_v55 = vadd.f32 %v6127_v44, %v6126_v60  ;;  %v12220_v60 = vcombine.high %v5573_v10, %v5577_v29  ;;  %v5565_v44 = vld [vmem:[#allocation5 + $0x1110] sm:$0xff]  ;;  %v5546_v10 = vld [vmem:[#allocation5 + $0x1078] sm:$0xff] }
 0x7c8   :  { %v6130_v15 = vadd.f32 %v6129_v23, %v6128_v55  ;;  %v5566_v55 = vld [vmem:[#allocation5 + $0x1118] sm:$0xff] }
 0x7c9   :  { %v12214_v23 = vcombine.high %v5566_v55, %v5570_v26 }
 0x7db   :  { %v5363_v27 = vpop.f32.mrf.mxu0  ;;  %v5404_v53 = vpop.f32.mrf.mxu1 }
 0x7dc   :  { %v14824_v45 = vadd.f32 %v5363_v27, %v14723_v62  ;;  %v14827_v16 = vadd.f32 %v5404_v53, %v14726_v20  ;;  %v13458_v62 = vld [vmem:[%s15547_s0 + $0x260] sm:$0xff]   ;;  %v6132_v20 = vadd.f32 %v6131_v38, %v6130_v15  ;;  %v5557_v27 = vld [vmem:[#allocation5 + $0x10d0] sm:$0xff]  ;;  %v12211_v38 = vcombine.low %v5565_v44, %v5569_v19 }
 0x7dd   :  { %v5365_v61 = vpop.f32.mrf.mxu0  ;;  %v5406_v30 = vpop.f32.mrf.mxu1  ;;  %v13177_v36 = vunpack.c.l.bf16 %v13458_v62  ;;  %v13178_v46 = vunpack.c.h.bf16 %v13458_v62  ;;  %v13460_v53 = vld [vmem:[%s15547_s0 + $0x270] sm:$0xff]   ;;  %v12213_v62 = vcombine.low %v5566_v55, %v5570_v26 }
 0x7de   :  { %v14831_v41 = vadd.f32 %v5365_v61, %v14730_v51  ;;  %v14834_v49 = vadd.f32 %v5406_v30, %v14733_v24  ;;  %v5582_v51 = vld [vmem:[#allocation5 + $0x1198] sm:$0xff]  ;;  %v6134_v24 = vadd.f32 %v6133_v48, %v6132_v20  ;;  %v5561_v15 = vld [vmem:[#allocation5 + $0x10f0] sm:$0xff] }
 0x7df   :  { %v5367_v35 = vpop.f32.mrf.mxu0  ;;  %v5408_v58 = vpop.f32.mrf.mxu1  ;;  %v6135_v9 = vsel %vm120_vm2, %v13177_v36, 0.0  ;;  %v12230_v40 = vcombine.high %v5582_v51, %v5586_v2  ;;  %v12229_v37 = vcombine.low %v5582_v51, %v5586_v2  ;;  %v6137_v34 = vsel %vm120_vm2, %v13178_v46, 0.0  ;;  %v5558_v61 = vld [vmem:[#allocation5 + $0x10d8] sm:$0xff]  ;;  %v5553_v36 = vld [vmem:[#allocation5 + $0x10b0] sm:$0xff] }
 0x7e0   :  { %v6136_v21 = vadd.f32 %v6135_v9, %v6134_v24  ;;  %v5562_v30 = vld [vmem:[#allocation5 + $0x10f8] sm:$0xff]  ;;  %v13185_v35 = vunpack.c.l.bf16 %v13460_v53  ;;  %v6141_v58 = vsel %vm120_vm2, %v13182_v18, 0.0  ;;  %v12204_v20 = vcombine.high %v5557_v27, %v5561_v15  ;;  %v5541_v46 = vld [vmem:[#allocation5 + $0x1050] sm:$0xff] }
 0x7e1   :  { %v5368_v52 = vpop.f32.mrf.mxu0  ;;  %v5409_v54 = vpop.f32.mrf.mxu1  ;;  %v5550_v48 = vld [vmem:[#allocation5 + $0x1098] sm:$0xff]  ;;  %v12203_v6 = vcombine.low %v5557_v27, %v5561_v15  ;;  %v12205_v51 = vcombine.low %v5558_v61, %v5562_v30  ;;  %v13186_v2 = vunpack.c.h.bf16 %v13460_v53  ;;  %v6255_v53 = vld [vmem:[#allocation5 + $0x13c0] sm:$0xff] }
 0x7e2   :  { %v6138_v28 = vadd.f32 %v6137_v34, %v6136_v21  ;;  %v12206_v52 = vcombine.high %v5558_v61, %v5562_v30  ;;  %v5549_v54 = vld [vmem:[#allocation5 + $0x1090] sm:$0xff]  ;;  %v12197_v29 = vcombine.low %v5550_v48, %v5554_v25  ;;  %v5538_v34 = vld [vmem:[#allocation5 + $0x1038] sm:$0xff]  ;;  %v6259_v15 = vld [vmem:[#allocation5 + $0x13e0] sm:$0xff] }
 0x7e3   :  { %v5522_v43 = vpop.f32.mrf.mxu0  ;;  %v12196_v24 = vcombine.high %v5549_v54, %v5553_v36  ;;  %v13461_v9 = vld [vmem:[%s15547_s0 + $0x278] sm:$0xff]   ;;  %v6145_v13 = vsel %vm120_vm2, %v13186_v2, 0.0  ;;  %v6256_v61 = vld [vmem:[#allocation5 + $0x13c8] sm:$0xff]  ;;  %v12312_v30 = vcombine.low %v6255_v53, %v6259_v15 }
 0x7e4   :  { %v5528_v7 = vmax.f32 %v5522_v43, 0.0  ;;  %v13189_v1 = vunpack.c.l.bf16 %v13461_v9 }
 0x7e5   :  { %v13682_v8 = vpop.f32.mrf.mxu0 }
 0x7e6   :  { %v14841_v31 = vpack.c.bf16 %v5528_v7, %v5528_v7  ;;  %v6143_v7 = vsel %vm120_vm2, %v13185_v35, 0.0  ;;  %v12198_v8 = vcombine.high %v5550_v48, %v5554_v25  ;;  %v6147_v55 = vsel %vm120_vm2, %v13189_v1, 0.0  ;;  %v6243_v25 = vld [vmem:[#allocation5 + $0x1360] sm:$0xff] }
 0x7e7   :  { %v5525_v12 = vpop.f32.mrf.mxu0  ;;  %v6227_v1 = vld [vmem:[#allocation5 + $0x12e0] sm:$0xff] }
 0x7e8   :  { %5948 = vmatmul.mubr.bf16.vlgmr.msra.gmra.mxu1 %v14841_v31  ;;  %5989 = vmatmul.mubr.bf16.vlgmr.msra.gmra.mxu0 %v14841_v31  ;;  %v12195_v12 = vcombine.low %v5549_v54, %v5553_v36  ;;  %v6252_v54 = vld [vmem:[#allocation5 + $0x13a8] sm:$0xff]  ;;  %v6239_v36 = vld [vmem:[#allocation5 + $0x1340] sm:$0xff] }
 0x7e9   :  { %5998 = vmatpush1.bf16.msra.mxu1 %v12235_v57  ;;  %6039 = vmatpush1.bf16.msra.mxu0 %v12237_v63  ;;  %v13683_v22 = vpop.f32.mrf.mxu0  ;;  %v6139_v57 = vsel %vm120_vm2, %v13181_v33, 0.0  ;;  %v12212_v63 = vcombine.high %v5565_v44, %v5569_v19  ;;  %v5534_v33 = vld [vmem:[#allocation5 + $0x1018] sm:$0xff]  ;;  %v13190_v19 = vunpack.c.h.bf16 %v13461_v9  ;;  %v6232_v9 = vld [vmem:[#allocation5 + $0x1308] sm:$0xff] }
 0x7ea   :  { %5999 = vmatprep.subr.bf16.mxu1 %v12228_v59  ;;  %6040 = vmatprep.subr.bf16.mxu0 %v12230_v40  ;;  %v6140_v39 = vadd.f32 %v6139_v57, %v6138_v28  ;;  %v5545_v59 = vld [vmem:[#allocation5 + $0x1070] sm:$0xff]  ;;  %v5542_v40 = vld [vmem:[#allocation5 + $0x1058] sm:$0xff]  ;;  %v12182_v28 = vcombine.high %v5534_v33, %v5538_v34  ;;  %v12181_v18 = vcombine.low %v5534_v33, %v5538_v34 }
 0x7eb   :  { %6029 = vmatprep.mubr.bf16.mxu1 %v13942_v3  ;;  %6070 = vmatprep.mubr.bf16.mxu0 %v13942_v3  ;;  %v12188_v21 = vcombine.high %v5541_v46, %v5545_v59  ;;  %v12190_v22 = vcombine.high %v5542_v40, %v5546_v10  ;;  %v12189_v44 = vcombine.low %v5542_v40, %v5546_v10  ;;  %v6149_v57 = vsel %vm120_vm2, %v13190_v19, 0.0  ;;  %v6216_v19 = vld [vmem:[#allocation5 + $0x1288] sm:$0xff] }
 0x7ec   :  { %v6142_v43 = vadd.f32 %v6141_v58, %v6140_v39  ;;  %v12313_v39 = vcombine.high %v6255_v53, %v6259_v15  ;;  %v12296_v40 = vcombine.low %v6239_v36, %v6243_v25 }
 0x7ed   :  { %6000 = vmatpush1.bf16.msra.mxu1 %v12227_v42  ;;  %6041 = vmatpush1.bf16.msra.mxu0 %v12229_v37  ;;  %v5533_v42 = vld [vmem:[#allocation5 + $0x1010] sm:$0xff] }
 0x7ee   :  { %6001 = vmatprep.subr.bf16.mxu1 %v12220_v60  ;;  %6042 = vmatprep.subr.bf16.mxu0 %v12222_v32  ;;  %v6144_v5 = vadd.f32 %v6143_v7, %v6142_v43  ;;  %v5537_v37 = vld [vmem:[#allocation5 + $0x1030] sm:$0xff]  ;;  %v12187_v32 = vcombine.low %v5541_v46, %v5545_v59  ;;  %v6240_v43 = vld [vmem:[#allocation5 + $0x1348] sm:$0xff]  ;;  %v12297_v7 = vcombine.high %v6239_v36, %v6243_v25  ;;  %v6235_v46 = vld [vmem:[#allocation5 + $0x1320] sm:$0xff] }
 0x7ef   :  { %v12180_v26 = vcombine.high %v5533_v42, %v5537_v37  ;;  %v6236_v59 = vld [vmem:[#allocation5 + $0x1328] sm:$0xff]  ;;  %v14882_v36 = vld [vmem:[#allocation5 + $0x13d8] sm:$0xff] }
 0x7f0   :  { %v6146_v60 = vadd.f32 %v6145_v13, %v6144_v5  ;;  %v6224_v13 = vld [vmem:[#allocation5 + $0x12c8] sm:$0xff]  ;;  %v14886_v25 = vld [vmem:[#allocation5 + $0x13f8] sm:$0xff] }
 0x7f1   :  { %6002 = vmatpush1.bf16.msra.mxu1 %v12219_v11  ;;  %6043 = vmatpush1.bf16.msra.mxu0 %v12221_v47  ;;  %v12179_v47 = vcombine.low %v5533_v42, %v5537_v37  ;;  %v12290_v42 = vcombine.low %v6232_v9, %v6236_v59 }
 0x7f2   :  { %6003 = vmatprep.subr.bf16.mxu1 %v12212_v63  ;;  %6044 = vmatprep.subr.bf16.mxu0 %v12214_v23  ;;  %v6148_v11 = vadd.f32 %v6147_v55, %v6146_v60 }
 0x7f4   :  { %v6150_v63 = vadd.f32 %v6149_v57, %v6148_v11  ;;  %v6211_v57 = vld [vmem:[#allocation5 + $0x1260] sm:$0xff] }
 0x7f5   :  { %6004 = vmatpush1.bf16.msra.mxu1 %v12211_v38  ;;  %6045 = vmatpush1.bf16.msra.mxu0 %v12213_v62  ;;  %v6260_v38 = vld [vmem:[#allocation5 + $0x13e8] sm:$0xff]  ;;  %v6251_v62 = vld [vmem:[#allocation5 + $0x13a0] sm:$0xff] }
 0x7f6   :  { %6005 = vmatprep.subr.bf16.mxu1 %v12204_v20  ;;  %6046 = vmatprep.subr.bf16.mxu0 %v12206_v52  ;;  %v6151_v23 = vmul.f32 0.0625, %v6150_v63  ;;  %v12314_v35 = vcombine.low %v6256_v61, %v6260_v38  ;;  %v12315_v58 = vcombine.high %v6256_v61, %v6260_v38  ;;  %v6248_v52 = vld [vmem:[#allocation5 + $0x1388] sm:$0xff] }
 0x7f7   :  { %v12307_v48 = vcombine.high %v6248_v52, %v6252_v54  ;;  %v12306_v2 = vcombine.low %v6248_v52, %v6252_v54  ;;  %v6208_v63 = vld [vmem:[#allocation5 + $0x1248] sm:$0xff]  ;;  %v14878_v52 = vld [vmem:[#allocation5 + $0x13d0] sm:$0xff] }
 0x7f8   :  { %v6152_v27 = vpack.c.bf16 %v6151_v23, %v6151_v23  ;;  %v6200_v38 = vld [vmem:[#allocation5 + $0x1208] sm:$0xff]  ;;  %v14880_v54 = vld [vmem:[#allocation5 + $0x13f0] sm:$0xff] }
 0x7f9   :  { %6006 = vmatpush1.bf16.msra.mxu1 %v12203_v6  ;;  %6047 = vmatpush1.bf16.msra.mxu0 %v12205_v51  ;;  %v6244_v6 = vld [vmem:[#allocation5 + $0x1368] sm:$0xff] }
 0x7fa   :  { %6007 = vmatprep.subr.bf16.mxu1 %v12196_v24  ;;  %6048 = vmatprep.subr.bf16.mxu0 %v12198_v8  ;;  %v12299_v24 = vcombine.high %v6240_v43, %v6244_v6  ;;  %v6231_v8 = vld [vmem:[#allocation5 + $0x1300] sm:$0xff]  ;;  %v12298_v10 = vcombine.low %v6240_v43, %v6244_v6  ;;  %v12316_v43 = vcombine.low %v14878_v52, %v14880_v54 }
 0x7fb   :  { %v12289_v5 = vcombine.high %v6231_v8, %v6235_v46  ;;  %v12318_v6 = vcombine.low %v14882_v36, %v14886_v25 }
 0x7fd   :  { %6008 = vmatpush1.bf16.msra.mxu1 %v12195_v12  ;;  %6049 = vmatpush1.bf16.msra.mxu0 %v12197_v29  ;;  %v12291_v12 = vcombine.high %v6232_v9, %v6236_v59  ;;  %v6223_v29 = vld [vmem:[#allocation5 + $0x12c0] sm:$0xff] }
 0x7fe   :  { %6009 = vmatprep.subr.bf16.mxu1 %v12188_v21  ;;  %6050 = vmatprep.subr.bf16.mxu0 %v12190_v22  ;;  %v6228_v21 = vld [vmem:[#allocation5 + $0x12e8] sm:$0xff]  ;;  %v12288_v22 = vcombine.low %v6231_v8, %v6235_v46  ;;  %v12281_v37 = vcombine.high %v6223_v29, %v6227_v1  ;;  %v12280_v34 = vcombine.low %v6223_v29, %v6227_v1 }
 0x7ff   :  { %v12283_v33 = vcombine.high %v6224_v13, %v6228_v21  ;;  %v12282_v60 = vcombine.low %v6224_v13, %v6228_v21 }
 0x801   :  { %6010 = vmatpush1.bf16.msra.mxu1 %v12187_v32  ;;  %6051 = vmatpush1.bf16.msra.mxu0 %v12189_v44  ;;  %v6215_v32 = vld [vmem:[#allocation5 + $0x1280] sm:$0xff] }
 0x802   :  { %6011 = vmatprep.subr.bf16.mxu1 %v12180_v26  ;;  %6052 = vmatprep.subr.bf16.mxu0 %v12182_v28  ;;  %v6219_v44 = vld [vmem:[#allocation5 + $0x12a0] sm:$0xff]  ;;  %v6220_v26 = vld [vmem:[#allocation5 + $0x12a8] sm:$0xff] }
 0x803   :  { %v12273_v55 = vcombine.high %v6215_v32, %v6219_v44  ;;  %v12272_v28 = vcombine.low %v6215_v32, %v6219_v44  ;;  %v12274_v11 = vcombine.low %v6216_v19, %v6220_v26 }
 0x805   :  { %6012 = vmatpush1.bf16.msra.mxu1 %v12179_v47  ;;  %6053 = vmatpush1.bf16.msra.mxu0 %v12181_v18  ;;  %v12275_v47 = vcombine.high %v6216_v19, %v6220_v26  ;;  %v6207_v18 = vld [vmem:[#allocation5 + $0x1240] sm:$0xff]  ;;  %v13465_v26 = vld [vmem:[%s15547_s0 + $0x298] sm:$0xff]  }
 0x806   :  { %13684 = vmatprep.subr.bf16.mxu1 %v13940_v0  ;;  %6583 = vmatprep.subr.bf16.mxu0 %v12313_v39  ;;  %v12265_v23 = vcombine.high %v6207_v18, %v6211_v57  ;;  %v12264_v53 = vcombine.low %v6207_v18, %v6211_v57  ;;  %v6203_v39 = vld [vmem:[#allocation5 + $0x1220] sm:$0xff] }
 0x808   :  { %6030 = vmatmul.mubr.bf16.vlgmr.msra.gmra.mxu1 %v14841_v31  ;;  %6071 = vmatmul.mubr.bf16.vlgmr.msra.gmra.mxu0 %v14841_v31  ;;  %v6247_v31 = vld [vmem:[#allocation5 + $0x1380] sm:$0xff] }
 0x809   :  { %13685 = vmatpush3.bf16.msra.mxu1 %v14006_v4  ;;  %13686 = vmatprep.mubr.msk.bf16.mxu1 %vm13941_vm0, %v13940_v0  ;;  %v12305_v20 = vcombine.high %v6247_v31, %v6251_v62  ;;  %v12304_v51 = vcombine.low %v6247_v31, %v6251_v62  ;;  %v6204_v62 = vld [vmem:[#allocation5 + $0x1228] sm:$0xff] }
 0x80a   :  { %6615 = vmatprep.mubr.bf16.mxu0 %v13942_v3  ;;  %6624 = vmatprep.subr.bf16.mxu1 %v12315_v58  ;;  %v12258_v58 = vcombine.low %v6200_v38, %v6204_v62 }
 0x80b   :  { %6584 = vmatpush1.bf16.msra.mxu0 %v12312_v30  ;;  %v6199_v30 = vld [vmem:[#allocation5 + $0x1200] sm:$0xff] }
 0x80c   :  { %6585 = vmatprep.subr.bf16.mxu0 %v12305_v20  ;;  %v12257_v31 = vcombine.high %v6199_v30, %v6203_v39  ;;  %v12259_v20 = vcombine.high %v6200_v38, %v6204_v62 }
 0x80f   :  { %6586 = vmatpush1.bf16.msra.mxu0 %v12304_v51  ;;  %v12319_v51 = vcombine.high %v14882_v36, %v14886_v25 }
 0x810   :  { %13687 = vmatmul.mubr.msk.bf16.vlgmr.msra.gmra.mxu1 %vm120_vm2, %v6152_v27  ;;  %6587 = vmatprep.subr.bf16.mxu0 %v12297_v7  ;;  %v6212_v27 = vld [vmem:[#allocation5 + $0x1268] sm:$0xff] }
 0x811   :  { %6656 = vmatprep.mubr.bf16.mxu1 %v13942_v3  ;;  %6625 = vmatpush1.bf16.msra.mxu1 %v12314_v35  ;;  %v12266_v15 = vcombine.low %v6208_v63, %v6212_v27  ;;  %v12267_v61 = vcombine.high %v6208_v63, %v6212_v27  ;;  %v12256_v35 = vcombine.low %v6199_v30, %v6203_v39 }
 0x812   :  { %6626 = vmatprep.subr.bf16.mxu1 %v12307_v48  ;;  %v12317_v48 = vcombine.high %v14878_v52, %v14880_v54 }
 0x813   :  { %6588 = vmatpush1.bf16.msra.mxu0 %v12296_v40 }
 0x814   :  { %6589 = vmatprep.subr.bf16.mxu0 %v12289_v5 }
 0x815   :  { %6627 = vmatpush1.bf16.msra.mxu1 %v12306_v2 }
 0x816   :  { %6628 = vmatprep.subr.bf16.mxu1 %v12299_v24 }
 0x817   :  { %6590 = vmatpush1.bf16.msra.mxu0 %v12288_v22 }
 0x818   :  { %6591 = vmatprep.subr.bf16.mxu0 %v12281_v37 }
 0x819   :  { %6629 = vmatpush1.bf16.msra.mxu1 %v12298_v10 }
 0x81a   :  { %6630 = vmatprep.subr.bf16.mxu1 %v12291_v12 }
 0x81b   :  { %6592 = vmatpush1.bf16.msra.mxu0 %v12280_v34 }
 0x81c   :  { %6593 = vmatprep.subr.bf16.mxu0 %v12273_v55 }
 0x81d   :  { %6631 = vmatpush1.bf16.msra.mxu1 %v12290_v42 }
 0x81e   :  { %6632 = vmatprep.subr.bf16.mxu1 %v12283_v33  ;;  %v13464_v33 = vld [vmem:[%s15547_s0 + $0x290] sm:$0xff]  }
 0x81f   :  { %6594 = vmatpush1.bf16.msra.mxu0 %v12272_v28  ;;  %v13202_v19 = vunpack.c.h.bf16 %v13464_v33 }
 0x820   :  { %6595 = vmatprep.subr.bf16.mxu0 %v12265_v23 }
 0x821   :  { %6633 = vmatpush1.bf16.msra.mxu1 %v12282_v60  ;;  %v13201_v60 = vunpack.c.l.bf16 %v13464_v33 }
 0x822   :  { %6634 = vmatprep.subr.bf16.mxu1 %v12275_v47  ;;  %v6797_v47 = vsel %vm120_vm2, %v13202_v19, 0.0 }
 0x823   :  { %6596 = vmatpush1.bf16.msra.mxu0 %v12264_v53  ;;  %v6795_v55 = vsel %vm120_vm2, %v13201_v60, 0.0 }
 0x824   :  { %6597 = vmatprep.subr.bf16.mxu0 %v12257_v31 }
 0x825   :  { %6635 = vmatpush1.bf16.msra.mxu1 %v12274_v11  ;;  %v13205_v11 = vunpack.c.l.bf16 %v13465_v26 }
 0x826   :  { %6636 = vmatprep.subr.bf16.mxu1 %v12267_v61  ;;  %v13206_v61 = vunpack.c.h.bf16 %v13465_v26  ;;  %v6237_v26 = vld [vmem:[#allocation5 + $0x1330] sm:$0xff] }
 0x827   :  { %6598 = vmatpush1.bf16.msra.mxu0 %v12256_v35  ;;  %v6799_v30 = vsel %vm120_vm2, %v13205_v11, 0.0  ;;  %v6238_v11 = vld [vmem:[#allocation5 + $0x1338] sm:$0xff] }
 0x828   :  { %6665 = vmatprep.subr.bf16.mxu0 %v12317_v48  ;;  %v6801_v48 = vsel %vm120_vm2, %v13206_v61, 0.0 }
 0x829   :  { %6637 = vmatpush1.bf16.msra.mxu1 %v12266_v15 }
 0x82a   :  { %6638 = vmatprep.subr.bf16.mxu1 %v12259_v20 }
 0x82d   :  { %6639 = vmatpush1.bf16.msra.mxu1 %v12258_v58 }
 0x82e   :  { %6706 = vmatprep.subr.bf16.mxu1 %v12319_v51  ;;  %v6249_v51 = vld [vmem:[#allocation5 + $0x1390] sm:$0xff] }
 0x8a8   :  { %v5949_v2 = vpop.f32.mrf.mxu1  ;;  %v5990_v7 = vpop.f32.mrf.mxu0 }
 0x8a9   :  { %v14895_v24 = vadd.f32 %v5949_v2, %v14794_v17  ;;  %v14898_v8 = vadd.f32 %v5990_v7, %v14797_v50  ;;  %v13462_v17 = vld [vmem:[%s15547_s0 + $0x280] sm:$0xff]   ;;  %v13463_v50 = vld [vmem:[%s15547_s0 + $0x288] sm:$0xff]   ;;  %v6253_v7 = vld [vmem:[#allocation5 + $0x13b0] sm:$0xff] }
 0x8aa   :  { %v5951_v46 = vpop.f32.mrf.mxu1  ;;  %v5992_v9 = vpop.f32.mrf.mxu0  ;;  %v13193_v1 = vunpack.c.l.bf16 %v13462_v17  ;;  %v13194_v13 = vunpack.c.h.bf16 %v13462_v17  ;;  %v13197_v21 = vunpack.c.l.bf16 %v13463_v50  ;;  %v13198_v42 = vunpack.c.h.bf16 %v13463_v50  ;;  %v13467_v50 = vld [vmem:[%s15547_s0 + $0x2a8] sm:$0xff]  }
 0x8ab   :  { %v14901_v59 = vadd.f32 %v5951_v46, %v14800_v14  ;;  %v14904_v40 = vadd.f32 %v5992_v9, %v14803_v56  ;;  %v6254_v46 = vld [vmem:[#allocation5 + $0x13b8] sm:$0xff]  ;;  %v12309_v17 = vcombine.high %v6249_v51, %v6253_v7  ;;  %v12308_v33 = vcombine.low %v6249_v51, %v6253_v7 }
 0x8ac   :  { %v5953_v10 = vpop.f32.mrf.mxu1  ;;  %v5994_v5 = vpop.f32.mrf.mxu0  ;;  %v6788_v14 = vsel %vm120_vm2, %v13193_v1, 0.0  ;;  %v6789_v56 = vsel %vm120_vm2, %v13194_v13, 0.0  ;;  %v6791_v37 = vsel %vm120_vm2, %v13197_v21, 0.0  ;;  %v6793_v32 = vsel %vm120_vm2, %v13198_v42, 0.0  ;;  %v6241_v13 = vld [vmem:[#allocation5 + $0x1350] sm:$0xff]  ;;  %v6222_v51 = vld [vmem:[#allocation5 + $0x12b8] sm:$0xff] }
 0x8ad   :  { %v6790_v22 = vadd.f32 %v6789_v56, %v6788_v14  ;;  %v6245_v14 = vld [vmem:[#allocation5 + $0x1370] sm:$0xff]  ;;  %v6242_v56 = vld [vmem:[#allocation5 + $0x1358] sm:$0xff]  ;;  %v13213_v60 = vunpack.c.l.bf16 %v13467_v50  ;;  %v13214_v25 = vunpack.c.h.bf16 %v13467_v50 }
 0x8ae   :  { %v5954_v12 = vpop.f32.mrf.mxu1  ;;  %v5995_v29 = vpop.f32.mrf.mxu0  ;;  %v12300_v54 = vcombine.low %v6241_v13, %v6245_v14 }
 0x8af   :  { %v6792_v34 = vadd.f32 %v6791_v37, %v6790_v22  ;;  %v6246_v22 = vld [vmem:[#allocation5 + $0x1378] sm:$0xff] }
 0x8b0   :  { %v12303_v19 = vcombine.high %v6242_v56, %v6246_v22  ;;  %v12302_v36 = vcombine.low %v6242_v56, %v6246_v22 }
 0x8b1   :  { %v6794_v44 = vadd.f32 %v6793_v32, %v6792_v34 }
 0x8b3   :  { %v6796_v28 = vadd.f32 %v6795_v55, %v6794_v44  ;;  %v12301_v44 = vcombine.high %v6241_v13, %v6245_v14  ;;  %v6233_v55 = vld [vmem:[#allocation5 + $0x1310] sm:$0xff]  ;;  %v6214_v13 = vld [vmem:[#allocation5 + $0x1278] sm:$0xff] }
 0x8b5   :  { %v6798_v27 = vadd.f32 %v6797_v47, %v6796_v28  ;;  %v6234_v28 = vld [vmem:[#allocation5 + $0x1318] sm:$0xff] }
 0x8b6   :  { %v12295_v47 = vcombine.high %v6234_v28, %v6238_v11 }
 0x8c8   :  { %v6031_v18 = vpop.f32.mrf.mxu1  ;;  %v6072_v57 = vpop.f32.mrf.mxu0 }
 0x8c9   :  { %v14925_v63 = vadd.f32 %v6031_v18, %v14824_v45  ;;  %v14928_v23 = vadd.f32 %v6072_v57, %v14827_v16  ;;  %v13466_v45 = vld [vmem:[%s15547_s0 + $0x2a0] sm:$0xff]   ;;  %v6800_v16 = vadd.f32 %v6799_v30, %v6798_v27  ;;  %v6225_v18 = vld [vmem:[#allocation5 + $0x12d0] sm:$0xff]  ;;  %v12292_v30 = vcombine.low %v6233_v55, %v6237_v26 }
 0x8ca   :  { %v6033_v53 = vpop.f32.mrf.mxu1  ;;  %v6074_v15 = vpop.f32.mrf.mxu0  ;;  %v13209_v20 = vunpack.c.l.bf16 %v13466_v45  ;;  %v13210_v5 = vunpack.c.h.bf16 %v13466_v45  ;;  %v13468_v57 = vld [vmem:[%s15547_s0 + $0x2b0] sm:$0xff]   ;;  %v12294_v45 = vcombine.low %v6234_v28, %v6238_v11 }
 0x8cb   :  { %v14932_v39 = vadd.f32 %v6033_v53, %v14831_v41  ;;  %v14935_v38 = vadd.f32 %v6074_v15, %v14834_v49  ;;  %v6250_v41 = vld [vmem:[#allocation5 + $0x1398] sm:$0xff]  ;;  %v6802_v49 = vadd.f32 %v6801_v48, %v6800_v16  ;;  %v6229_v27 = vld [vmem:[#allocation5 + $0x12f0] sm:$0xff] }
 0x8cc   :  { %v6035_v31 = vpop.f32.mrf.mxu1  ;;  %v6076_v62 = vpop.f32.mrf.mxu0  ;;  %v6803_v12 = vsel %vm120_vm2, %v13209_v20, 0.0  ;;  %v12311_v1 = vcombine.high %v6250_v41, %v6254_v46  ;;  %v12310_v34 = vcombine.low %v6250_v41, %v6254_v46  ;;  %v6805_v32 = vsel %vm120_vm2, %v13210_v5, 0.0  ;;  %v6226_v53 = vld [vmem:[#allocation5 + $0x12d8] sm:$0xff]  ;;  %v6221_v20 = vld [vmem:[#allocation5 + $0x12b0] sm:$0xff] }
 0x8cd   :  { %v6804_v42 = vadd.f32 %v6803_v12, %v6802_v49  ;;  %v6230_v15 = vld [vmem:[#allocation5 + $0x12f8] sm:$0xff]  ;;  %v13217_v31 = vunpack.c.l.bf16 %v13468_v57  ;;  %v6809_v62 = vsel %vm120_vm2, %v13214_v25, 0.0  ;;  %v12285_v16 = vcombine.high %v6225_v18, %v6229_v27  ;;  %v6209_v5 = vld [vmem:[#allocation5 + $0x1250] sm:$0xff] }
 0x8ce   :  { %v6036_v35 = vpop.f32.mrf.mxu1  ;;  %v6077_v58 = vpop.f32.mrf.mxu0  ;;  %v6218_v48 = vld [vmem:[#allocation5 + $0x1298] sm:$0xff]  ;;  %v12284_v7 = vcombine.low %v6225_v18, %v6229_v27  ;;  %v12286_v41 = vcombine.low %v6226_v53, %v6230_v15  ;;  %v13218_v46 = vunpack.c.h.bf16 %v13468_v57  ;;  %v6923_v57 = vld [vmem:[#allocation5 + $0x15c0] sm:$0xff] }
 0x8cf   :  { %v6806_v52 = vadd.f32 %v6805_v32, %v6804_v42  ;;  %v12287_v35 = vcombine.high %v6226_v53, %v6230_v15  ;;  %v6217_v58 = vld [vmem:[#allocation5 + $0x1290] sm:$0xff]  ;;  %v12278_v14 = vcombine.low %v6218_v48, %v6222_v51  ;;  %v6206_v32 = vld [vmem:[#allocation5 + $0x1238] sm:$0xff]  ;;  %v6927_v27 = vld [vmem:[#allocation5 + $0x15e0] sm:$0xff] }
 0x8d0   :  { %v6190_v2 = vpop.f32.mrf.mxu1  ;;  %v12277_v49 = vcombine.high %v6217_v58, %v6221_v20  ;;  %v13469_v12 = vld [vmem:[%s15547_s0 + $0x2b8] sm:$0xff]   ;;  %v6813_v22 = vsel %vm120_vm2, %v13218_v46, 0.0  ;;  %v6924_v53 = vld [vmem:[#allocation5 + $0x15c8] sm:$0xff]  ;;  %v12393_v15 = vcombine.low %v6923_v57, %v6927_v27 }
 0x8d1   :  { %v6196_v9 = vmax.f32 %v6190_v2, 0.0  ;;  %v13221_v56 = vunpack.c.l.bf16 %v13469_v12 }
 0x8d2   :  { %v13688_v10 = vpop.f32.mrf.mxu1 }
 0x8d3   :  { %v14942_v29 = vpack.c.bf16 %v6196_v9, %v6196_v9  ;;  %v6811_v9 = vsel %vm120_vm2, %v13217_v31, 0.0  ;;  %v12279_v10 = vcombine.high %v6218_v48, %v6222_v51  ;;  %v6815_v28 = vsel %vm120_vm2, %v13221_v56, 0.0  ;;  %v6911_v51 = vld [vmem:[#allocation5 + $0x1560] sm:$0xff] }
 0x8d4   :  { %v6193_v21 = vpop.f32.mrf.mxu1  ;;  %v6895_v56 = vld [vmem:[#allocation5 + $0x14e0] sm:$0xff] }
 0x8d5   :  { %6616 = vmatmul.mubr.bf16.vlgmr.msra.gmra.mxu0 %v14942_v29  ;;  %6657 = vmatmul.mubr.bf16.vlgmr.msra.gmra.mxu1 %v14942_v29  ;;  %v12276_v21 = vcombine.low %v6217_v58, %v6221_v20  ;;  %v6920_v58 = vld [vmem:[#allocation5 + $0x15a8] sm:$0xff]  ;;  %v6907_v20 = vld [vmem:[#allocation5 + $0x1540] sm:$0xff] }
 0x8d6   :  { %6666 = vmatpush1.bf16.msra.mxu0 %v12316_v43  ;;  %6707 = vmatpush1.bf16.msra.mxu1 %v12318_v6  ;;  %v13689_v37 = vpop.f32.mrf.mxu1  ;;  %v6807_v43 = vsel %vm120_vm2, %v13213_v60, 0.0  ;;  %v12293_v6 = vcombine.high %v6233_v55, %v6237_v26  ;;  %v6202_v60 = vld [vmem:[#allocation5 + $0x1218] sm:$0xff]  ;;  %v13222_v26 = vunpack.c.h.bf16 %v13469_v12  ;;  %v6900_v12 = vld [vmem:[#allocation5 + $0x1508] sm:$0xff] }
 0x8d7   :  { %6667 = vmatprep.subr.bf16.mxu0 %v12309_v17  ;;  %6708 = vmatprep.subr.bf16.mxu1 %v12311_v1  ;;  %v6808_v61 = vadd.f32 %v6807_v43, %v6806_v52  ;;  %v6213_v17 = vld [vmem:[#allocation5 + $0x1270] sm:$0xff]  ;;  %v6210_v1 = vld [vmem:[#allocation5 + $0x1258] sm:$0xff]  ;;  %v12263_v52 = vcombine.high %v6202_v60, %v6206_v32  ;;  %v12262_v25 = vcombine.low %v6202_v60, %v6206_v32 }
 0x8d8   :  { %6697 = vmatprep.mubr.bf16.mxu0 %v13942_v3  ;;  %6738 = vmatprep.mubr.bf16.mxu1 %v13942_v3  ;;  %v12269_v42 = vcombine.high %v6209_v5, %v6213_v17  ;;  %v12271_v37 = vcombine.high %v6210_v1, %v6214_v13  ;;  %v12270_v55 = vcombine.low %v6210_v1, %v6214_v13  ;;  %v6817_v43 = vsel %vm120_vm2, %v13222_v26, 0.0  ;;  %v6884_v26 = vld [vmem:[#allocation5 + $0x1488] sm:$0xff] }
 0x8d9   :  { %v6810_v2 = vadd.f32 %v6809_v62, %v6808_v61  ;;  %v12394_v61 = vcombine.high %v6923_v57, %v6927_v27  ;;  %v12377_v1 = vcombine.low %v6907_v20, %v6911_v51 }
 0x8da   :  { %6668 = vmatpush1.bf16.msra.mxu0 %v12308_v33  ;;  %6709 = vmatpush1.bf16.msra.mxu1 %v12310_v34  ;;  %v6201_v33 = vld [vmem:[#allocation5 + $0x1210] sm:$0xff] }
 0x8db   :  { %6669 = vmatprep.subr.bf16.mxu0 %v12301_v44  ;;  %6710 = vmatprep.subr.bf16.mxu1 %v12303_v19  ;;  %v6812_v50 = vadd.f32 %v6811_v9, %v6810_v2  ;;  %v6205_v34 = vld [vmem:[#allocation5 + $0x1230] sm:$0xff]  ;;  %v12268_v19 = vcombine.low %v6209_v5, %v6213_v17  ;;  %v6908_v2 = vld [vmem:[#allocation5 + $0x1548] sm:$0xff]  ;;  %v12378_v9 = vcombine.high %v6907_v20, %v6911_v51  ;;  %v6903_v5 = vld [vmem:[#allocation5 + $0x1520] sm:$0xff] }
 0x8dc   :  { %v12261_v11 = vcombine.high %v6201_v33, %v6205_v34  ;;  %v6904_v17 = vld [vmem:[#allocation5 + $0x1528] sm:$0xff]  ;;  %v14983_v20 = vld [vmem:[#allocation5 + $0x15d8] sm:$0xff] }
 0x8dd   :  { %v6814_v44 = vadd.f32 %v6813_v22, %v6812_v50  ;;  %v6892_v22 = vld [vmem:[#allocation5 + $0x14c8] sm:$0xff]  ;;  %v14987_v51 = vld [vmem:[#allocation5 + $0x15f8] sm:$0xff] }
 0x8de   :  { %6670 = vmatpush1.bf16.msra.mxu0 %v12300_v54  ;;  %6711 = vmatpush1.bf16.msra.mxu1 %v12302_v36  ;;  %v12260_v36 = vcombine.low %v6201_v33, %v6205_v34  ;;  %v12371_v33 = vcombine.low %v6900_v12, %v6904_v17 }
 0x8df   :  { %6671 = vmatprep.subr.bf16.mxu0 %v12293_v6  ;;  %6712 = vmatprep.subr.bf16.mxu1 %v12295_v47  ;;  %v6816_v54 = vadd.f32 %v6815_v28, %v6814_v44 }
 0x8e1   :  { %v6818_v6 = vadd.f32 %v6817_v43, %v6816_v54  ;;  %v6879_v43 = vld [vmem:[#allocation5 + $0x1460] sm:$0xff] }
 0x8e2   :  { %6672 = vmatpush1.bf16.msra.mxu0 %v12292_v30  ;;  %6713 = vmatpush1.bf16.msra.mxu1 %v12294_v45  ;;  %v6928_v30 = vld [vmem:[#allocation5 + $0x15e8] sm:$0xff]  ;;  %v6919_v45 = vld [vmem:[#allocation5 + $0x15a0] sm:$0xff] }
 0x8e3   :  { %6673 = vmatprep.subr.bf16.mxu0 %v12285_v16  ;;  %6714 = vmatprep.subr.bf16.mxu1 %v12287_v35  ;;  %v6819_v47 = vmul.f32 0.0625, %v6818_v6  ;;  %v12395_v31 = vcombine.low %v6924_v53, %v6928_v30  ;;  %v12396_v62 = vcombine.high %v6924_v53, %v6928_v30  ;;  %v6916_v35 = vld [vmem:[#allocation5 + $0x1588] sm:$0xff] }
 0x8e4   :  { %v12388_v48 = vcombine.high %v6916_v35, %v6920_v58  ;;  %v12387_v46 = vcombine.low %v6916_v35, %v6920_v58  ;;  %v6876_v6 = vld [vmem:[#allocation5 + $0x1448] sm:$0xff]  ;;  %v14979_v35 = vld [vmem:[#allocation5 + $0x15d0] sm:$0xff] }
 0x8e5   :  { %v6820_v18 = vpack.c.bf16 %v6819_v47, %v6819_v47  ;;  %v6868_v30 = vld [vmem:[#allocation5 + $0x1408] sm:$0xff]  ;;  %v14981_v58 = vld [vmem:[#allocation5 + $0x15f0] sm:$0xff] }
 0x8e6   :  { %6674 = vmatpush1.bf16.msra.mxu0 %v12284_v7  ;;  %6715 = vmatpush1.bf16.msra.mxu1 %v12286_v41  ;;  %v6912_v7 = vld [vmem:[#allocation5 + $0x1568] sm:$0xff] }
 0x8e7   :  { %6675 = vmatprep.subr.bf16.mxu0 %v12277_v49  ;;  %6716 = vmatprep.subr.bf16.mxu1 %v12279_v10  ;;  %v12380_v49 = vcombine.high %v6908_v2, %v6912_v7  ;;  %v6899_v10 = vld [vmem:[#allocation5 + $0x1500] sm:$0xff]  ;;  %v12379_v13 = vcombine.low %v6908_v2, %v6912_v7  ;;  %v12397_v2 = vcombine.low %v14979_v35, %v14981_v58 }
 0x8e8   :  { %v12370_v50 = vcombine.high %v6899_v10, %v6903_v5  ;;  %v12399_v7 = vcombine.low %v14983_v20, %v14987_v51 }
 0x8ea   :  { %6676 = vmatpush1.bf16.msra.mxu0 %v12276_v21  ;;  %6717 = vmatpush1.bf16.msra.mxu1 %v12278_v14  ;;  %v12372_v21 = vcombine.high %v6900_v12, %v6904_v17  ;;  %v6891_v14 = vld [vmem:[#allocation5 + $0x14c0] sm:$0xff] }
 0x8eb   :  { %6677 = vmatprep.subr.bf16.mxu0 %v12269_v42  ;;  %6718 = vmatprep.subr.bf16.mxu1 %v12271_v37  ;;  %v6896_v42 = vld [vmem:[#allocation5 + $0x14e8] sm:$0xff]  ;;  %v12369_v37 = vcombine.low %v6899_v10, %v6903_v5  ;;  %v12362_v34 = vcombine.high %v6891_v14, %v6895_v56  ;;  %v12361_v32 = vcombine.low %v6891_v14, %v6895_v56 }
 0x8ec   :  { %v12364_v60 = vcombine.high %v6892_v22, %v6896_v42  ;;  %v12363_v44 = vcombine.low %v6892_v22, %v6896_v42 }
 0x8ee   :  { %6678 = vmatpush1.bf16.msra.mxu0 %v12268_v19  ;;  %6719 = vmatpush1.bf16.msra.mxu1 %v12270_v55  ;;  %v6883_v19 = vld [vmem:[#allocation5 + $0x1480] sm:$0xff] }
 0x8ef   :  { %6679 = vmatprep.subr.bf16.mxu0 %v12261_v11  ;;  %6720 = vmatprep.subr.bf16.mxu1 %v12263_v52  ;;  %v6887_v55 = vld [vmem:[#allocation5 + $0x14a0] sm:$0xff]  ;;  %v6888_v11 = vld [vmem:[#allocation5 + $0x14a8] sm:$0xff] }
 0x8f0   :  { %v12354_v28 = vcombine.high %v6883_v19, %v6887_v55  ;;  %v12353_v52 = vcombine.low %v6883_v19, %v6887_v55  ;;  %v12355_v54 = vcombine.low %v6884_v26, %v6888_v11 }
 0x8f2   :  { %6680 = vmatpush1.bf16.msra.mxu0 %v12260_v36  ;;  %6721 = vmatpush1.bf16.msra.mxu1 %v12262_v25  ;;  %v12356_v36 = vcombine.high %v6884_v26, %v6888_v11  ;;  %v6875_v25 = vld [vmem:[#allocation5 + $0x1440] sm:$0xff]  ;;  %v13473_v11 = vld [vmem:[%s15547_s0 + $0x2d8] sm:$0xff]  }
 0x8f3   :  { %13690 = vmatprep.subr.bf16.mxu0 %v13940_v0  ;;  %7251 = vmatprep.subr.bf16.mxu1 %v12394_v61  ;;  %v12346_v47 = vcombine.high %v6875_v25, %v6879_v43  ;;  %v12345_v57 = vcombine.low %v6875_v25, %v6879_v43  ;;  %v6871_v61 = vld [vmem:[#allocation5 + $0x1420] sm:$0xff] }
 0x8f5   :  { %6698 = vmatmul.mubr.bf16.vlgmr.msra.gmra.mxu0 %v14942_v29  ;;  %6739 = vmatmul.mubr.bf16.vlgmr.msra.gmra.mxu1 %v14942_v29  ;;  %v6915_v29 = vld [vmem:[#allocation5 + $0x1580] sm:$0xff] }
 0x8f6   :  { %13691 = vmatpush3.bf16.msra.mxu0 %v14006_v4  ;;  %13692 = vmatprep.mubr.msk.bf16.mxu0 %vm13941_vm0, %v13940_v0  ;;  %v12386_v16 = vcombine.high %v6915_v29, %v6919_v45  ;;  %v12385_v41 = vcombine.low %v6915_v29, %v6919_v45  ;;  %v6872_v45 = vld [vmem:[#allocation5 + $0x1428] sm:$0xff] }
 0x8f7   :  { %7283 = vmatprep.mubr.bf16.mxu1 %v13942_v3  ;;  %7292 = vmatprep.subr.bf16.mxu0 %v12396_v62  ;;  %v12339_v62 = vcombine.low %v6868_v30, %v6872_v45 }
 0x8f8   :  { %7252 = vmatpush1.bf16.msra.mxu1 %v12393_v15  ;;  %v6867_v15 = vld [vmem:[#allocation5 + $0x1400] sm:$0xff] }
 0x8f9   :  { %7253 = vmatprep.subr.bf16.mxu1 %v12386_v16  ;;  %v12338_v29 = vcombine.high %v6867_v15, %v6871_v61  ;;  %v12340_v16 = vcombine.high %v6868_v30, %v6872_v45 }
 0x8fc   :  { %7254 = vmatpush1.bf16.msra.mxu1 %v12385_v41  ;;  %v12400_v41 = vcombine.high %v14983_v20, %v14987_v51 }
 0x8fd   :  { %13693 = vmatmul.mubr.msk.bf16.vlgmr.msra.gmra.mxu0 %vm120_vm2, %v6820_v18  ;;  %7255 = vmatprep.subr.bf16.mxu1 %v12378_v9  ;;  %v6880_v18 = vld [vmem:[#allocation5 + $0x1468] sm:$0xff] }
 0x8fe   :  { %7324 = vmatprep.mubr.bf16.mxu0 %v13942_v3  ;;  %7293 = vmatpush1.bf16.msra.mxu0 %v12395_v31  ;;  %v12347_v27 = vcombine.low %v6876_v6, %v6880_v18  ;;  %v12348_v53 = vcombine.high %v6876_v6, %v6880_v18  ;;  %v12337_v31 = vcombine.low %v6867_v15, %v6871_v61 }
 0x8ff   :  { %7294 = vmatprep.subr.bf16.mxu0 %v12388_v48  ;;  %v12398_v48 = vcombine.high %v14979_v35, %v14981_v58 }
 0x900   :  { %7256 = vmatpush1.bf16.msra.mxu1 %v12377_v1 }
 0x901   :  { %7257 = vmatprep.subr.bf16.mxu1 %v12370_v50 }
 0x902   :  { %7295 = vmatpush1.bf16.msra.mxu0 %v12387_v46 }
 0x903   :  { %7296 = vmatprep.subr.bf16.mxu0 %v12380_v49 }
 0x904   :  { %7258 = vmatpush1.bf16.msra.mxu1 %v12369_v37 }
 0x905   :  { %7259 = vmatprep.subr.bf16.mxu1 %v12362_v34 }
 0x906   :  { %7297 = vmatpush1.bf16.msra.mxu0 %v12379_v13 }
 0x907   :  { %7298 = vmatprep.subr.bf16.mxu0 %v12372_v21 }
 0x908   :  { %7260 = vmatpush1.bf16.msra.mxu1 %v12361_v32 }
 0x909   :  { %7261 = vmatprep.subr.bf16.mxu1 %v12354_v28 }
 0x90a   :  { %7299 = vmatpush1.bf16.msra.mxu0 %v12371_v33 }
 0x90b   :  { %7300 = vmatprep.subr.bf16.mxu0 %v12364_v60  ;;  %v13472_v60 = vld [vmem:[%s15547_s0 + $0x2d0] sm:$0xff]  }
 0x90c   :  { %7262 = vmatpush1.bf16.msra.mxu1 %v12353_v52  ;;  %v13234_v26 = vunpack.c.h.bf16 %v13472_v60 }
 0x90d   :  { %7263 = vmatprep.subr.bf16.mxu1 %v12346_v47 }
 0x90e   :  { %7301 = vmatpush1.bf16.msra.mxu0 %v12363_v44  ;;  %v13233_v44 = vunpack.c.l.bf16 %v13472_v60 }
 0x90f   :  { %7302 = vmatprep.subr.bf16.mxu0 %v12356_v36  ;;  %v7465_v36 = vsel %vm120_vm2, %v13234_v26, 0.0 }
 0x910   :  { %7264 = vmatpush1.bf16.msra.mxu1 %v12345_v57  ;;  %v7463_v28 = vsel %vm120_vm2, %v13233_v44, 0.0 }
 0x911   :  { %7265 = vmatprep.subr.bf16.mxu1 %v12338_v29 }
 0x912   :  { %7303 = vmatpush1.bf16.msra.mxu0 %v12355_v54  ;;  %v13237_v54 = vunpack.c.l.bf16 %v13473_v11 }
 0x913   :  { %7304 = vmatprep.subr.bf16.mxu0 %v12348_v53  ;;  %v13238_v53 = vunpack.c.h.bf16 %v13473_v11  ;;  %v6905_v11 = vld [vmem:[#allocation5 + $0x1530] sm:$0xff] }
 0x914   :  { %7266 = vmatpush1.bf16.msra.mxu1 %v12337_v31  ;;  %v7467_v15 = vsel %vm120_vm2, %v13237_v54, 0.0  ;;  %v6906_v54 = vld [vmem:[#allocation5 + $0x1538] sm:$0xff] }
 0x915   :  { %7333 = vmatprep.subr.bf16.mxu1 %v12398_v48  ;;  %v7469_v48 = vsel %vm120_vm2, %v13238_v53, 0.0 }
 0x916   :  { %7305 = vmatpush1.bf16.msra.mxu0 %v12347_v27 }
 0x917   :  { %7306 = vmatprep.subr.bf16.mxu0 %v12340_v16 }
 0x91a   :  { %7307 = vmatpush1.bf16.msra.mxu0 %v12339_v62 }
 0x91b   :  { %7374 = vmatprep.subr.bf16.mxu0 %v12400_v41  ;;  %v6917_v41 = vld [vmem:[#allocation5 + $0x1590] sm:$0xff] }
 0x995   :  { %v6617_v46 = vpop.f32.mrf.mxu0  ;;  %v6658_v9 = vpop.f32.mrf.mxu1 }
 0x996   :  { %v14996_v49 = vadd.f32 %v6617_v46, %v14895_v24  ;;  %v14999_v10 = vadd.f32 %v6658_v9, %v14898_v8  ;;  %v13470_v24 = vld [vmem:[%s15547_s0 + $0x2c0] sm:$0xff]   ;;  %v13471_v8 = vld [vmem:[%s15547_s0 + $0x2c8] sm:$0xff]   ;;  %v6921_v9 = vld [vmem:[#allocation5 + $0x15b0] sm:$0xff] }
 0x997   :  { %v6619_v5 = vpop.f32.mrf.mxu0  ;;  %v6660_v12 = vpop.f32.mrf.mxu1  ;;  %v13225_v56 = vunpack.c.l.bf16 %v13470_v24  ;;  %v13226_v22 = vunpack.c.h.bf16 %v13470_v24  ;;  %v13229_v42 = vunpack.c.l.bf16 %v13471_v8  ;;  %v13230_v33 = vunpack.c.h.bf16 %v13471_v8  ;;  %v13475_v8 = vld [vmem:[%s15547_s0 + $0x2e8] sm:$0xff]  }
 0x998   :  { %v15002_v17 = vadd.f32 %v6619_v5, %v14901_v59  ;;  %v15005_v1 = vadd.f32 %v6660_v12, %v14904_v40  ;;  %v6922_v5 = vld [vmem:[#allocation5 + $0x15b8] sm:$0xff]  ;;  %v12390_v24 = vcombine.high %v6917_v41, %v6921_v9  ;;  %v12389_v60 = vcombine.low %v6917_v41, %v6921_v9 }
 0x999   :  { %v6621_v13 = vpop.f32.mrf.mxu0  ;;  %v6662_v50 = vpop.f32.mrf.mxu1  ;;  %v7456_v59 = vsel %vm120_vm2, %v13225_v56, 0.0  ;;  %v7457_v40 = vsel %vm120_vm2, %v13226_v22, 0.0  ;;  %v7459_v34 = vsel %vm120_vm2, %v13229_v42, 0.0  ;;  %v7461_v19 = vsel %vm120_vm2, %v13230_v33, 0.0  ;;  %v6909_v22 = vld [vmem:[#allocation5 + $0x1550] sm:$0xff]  ;;  %v6890_v41 = vld [vmem:[#allocation5 + $0x14b8] sm:$0xff] }
 0x99a   :  { %v7458_v37 = vadd.f32 %v7457_v40, %v7456_v59  ;;  %v6913_v59 = vld [vmem:[#allocation5 + $0x1570] sm:$0xff]  ;;  %v6910_v40 = vld [vmem:[#allocation5 + $0x1558] sm:$0xff]  ;;  %v13245_v44 = vunpack.c.l.bf16 %v13475_v8  ;;  %v13246_v51 = vunpack.c.h.bf16 %v13475_v8 }
 0x99b   :  { %v6622_v21 = vpop.f32.mrf.mxu0  ;;  %v6663_v14 = vpop.f32.mrf.mxu1  ;;  %v12381_v58 = vcombine.low %v6909_v22, %v6913_v59 }
 0x99c   :  { %v7460_v32 = vadd.f32 %v7459_v34, %v7458_v37  ;;  %v6914_v37 = vld [vmem:[#allocation5 + $0x1578] sm:$0xff] }
 0x99d   :  { %v12384_v26 = vcombine.high %v6910_v40, %v6914_v37  ;;  %v12383_v20 = vcombine.low %v6910_v40, %v6914_v37 }
 0x99e   :  { %v7462_v55 = vadd.f32 %v7461_v19, %v7460_v32 }
 0x9a0   :  { %v7464_v52 = vadd.f32 %v7463_v28, %v7462_v55  ;;  %v12382_v55 = vcombine.high %v6909_v22, %v6913_v59  ;;  %v6901_v28 = vld [vmem:[#allocation5 + $0x1510] sm:$0xff]  ;;  %v6882_v22 = vld [vmem:[#allocation5 + $0x1478] sm:$0xff] }
 0x9a2   :  { %v7466_v18 = vadd.f32 %v7465_v36, %v7464_v52  ;;  %v6902_v52 = vld [vmem:[#allocation5 + $0x1518] sm:$0xff] }
 0x9a3   :  { %v12376_v36 = vcombine.high %v6902_v52, %v6906_v54 }
 0x9b5   :  { %v6699_v25 = vpop.f32.mrf.mxu0  ;;  %v6740_v43 = vpop.f32.mrf.mxu1 }
 0x9b6   :  { %v15026_v6 = vadd.f32 %v6699_v25, %v14925_v63  ;;  %v15029_v47 = vadd.f32 %v6740_v43, %v14928_v23  ;;  %v13474_v63 = vld [vmem:[%s15547_s0 + $0x2e0] sm:$0xff]   ;;  %v7468_v23 = vadd.f32 %v7467_v15, %v7466_v18  ;;  %v6893_v25 = vld [vmem:[#allocation5 + $0x14d0] sm:$0xff]  ;;  %v12373_v15 = vcombine.low %v6901_v28, %v6905_v11 }
 0x9b7   :  { %v6701_v57 = vpop.f32.mrf.mxu0  ;;  %v6742_v27 = vpop.f32.mrf.mxu1  ;;  %v13241_v16 = vunpack.c.l.bf16 %v13474_v63  ;;  %v13242_v50 = vunpack.c.h.bf16 %v13474_v63  ;;  %v13476_v43 = vld [vmem:[%s15547_s0 + $0x2f0] sm:$0xff]   ;;  %v12375_v63 = vcombine.low %v6902_v52, %v6906_v54 }
 0x9b8   :  { %v15033_v61 = vadd.f32 %v6701_v57, %v14932_v39  ;;  %v15036_v30 = vadd.f32 %v6742_v27, %v14935_v38  ;;  %v6918_v39 = vld [vmem:[#allocation5 + $0x1598] sm:$0xff]  ;;  %v7470_v38 = vadd.f32 %v7469_v48, %v7468_v23  ;;  %v6897_v18 = vld [vmem:[#allocation5 + $0x14f0] sm:$0xff] }
 0x9b9   :  { %v6703_v29 = vpop.f32.mrf.mxu0  ;;  %v6744_v45 = vpop.f32.mrf.mxu1  ;;  %v7471_v21 = vsel %vm120_vm2, %v13241_v16, 0.0  ;;  %v12392_v56 = vcombine.high %v6918_v39, %v6922_v5  ;;  %v12391_v32 = vcombine.low %v6918_v39, %v6922_v5  ;;  %v7473_v19 = vsel %vm120_vm2, %v13242_v50, 0.0  ;;  %v6894_v57 = vld [vmem:[#allocation5 + $0x14d8] sm:$0xff]  ;;  %v6889_v16 = vld [vmem:[#allocation5 + $0x14b0] sm:$0xff] }
 0x9ba   :  { %v7472_v33 = vadd.f32 %v7471_v21, %v7470_v38  ;;  %v6898_v27 = vld [vmem:[#allocation5 + $0x14f8] sm:$0xff]  ;;  %v13249_v29 = vunpack.c.l.bf16 %v13476_v43  ;;  %v7477_v45 = vsel %vm120_vm2, %v13246_v51, 0.0  ;;  %v12366_v23 = vcombine.high %v6893_v25, %v6897_v18  ;;  %v6877_v50 = vld [vmem:[#allocation5 + $0x1450] sm:$0xff] }
 0x9bb   :  { %v6704_v31 = vpop.f32.mrf.mxu0  ;;  %v6745_v62 = vpop.f32.mrf.mxu1  ;;  %v6886_v48 = vld [vmem:[#allocation5 + $0x1498] sm:$0xff]  ;;  %v12365_v9 = vcombine.low %v6893_v25, %v6897_v18  ;;  %v12367_v39 = vcombine.low %v6894_v57, %v6898_v27  ;;  %v13250_v5 = vunpack.c.h.bf16 %v13476_v43  ;;  %v7591_v43 = vld [vmem:[#allocation5 + $0x17c0] sm:$0xff] }
 0x9bc   :  { %v7474_v35 = vadd.f32 %v7473_v19, %v7472_v33  ;;  %v12368_v31 = vcombine.high %v6894_v57, %v6898_v27  ;;  %v6885_v62 = vld [vmem:[#allocation5 + $0x1490] sm:$0xff]  ;;  %v12359_v59 = vcombine.low %v6886_v48, %v6890_v41  ;;  %v6874_v19 = vld [vmem:[#allocation5 + $0x1438] sm:$0xff]  ;;  %v7595_v18 = vld [vmem:[#allocation5 + $0x17e0] sm:$0xff] }
 0x9bd   :  { %v6858_v46 = vpop.f32.mrf.mxu0  ;;  %v12358_v38 = vcombine.high %v6885_v62, %v6889_v16  ;;  %v13477_v21 = vld [vmem:[%s15547_s0 + $0x2f8] sm:$0xff]   ;;  %v7481_v37 = vsel %vm120_vm2, %v13250_v5, 0.0  ;;  %v7592_v57 = vld [vmem:[#allocation5 + $0x17c8] sm:$0xff]  ;;  %v12474_v27 = vcombine.low %v7591_v43, %v7595_v18 }
 0x9be   :  { %v6864_v12 = vmax.f32 %v6858_v46, 0.0  ;;  %v13253_v40 = vunpack.c.l.bf16 %v13477_v21 }
 0x9bf   :  { %v13694_v13 = vpop.f32.mrf.mxu0 }
 0x9c0   :  { %v15043_v14 = vpack.c.bf16 %v6864_v12, %v6864_v12  ;;  %v7479_v12 = vsel %vm120_vm2, %v13249_v29, 0.0  ;;  %v12360_v13 = vcombine.high %v6886_v48, %v6890_v41  ;;  %v7483_v52 = vsel %vm120_vm2, %v13253_v40, 0.0  ;;  %v7579_v41 = vld [vmem:[#allocation5 + $0x1760] sm:$0xff] }
 0x9c1   :  { %v6861_v42 = vpop.f32.mrf.mxu0  ;;  %v7563_v40 = vld [vmem:[#allocation5 + $0x16e0] sm:$0xff] }
 0x9c2   :  { %7284 = vmatmul.mubr.bf16.vlgmr.msra.gmra.mxu1 %v15043_v14  ;;  %7325 = vmatmul.mubr.bf16.vlgmr.msra.gmra.mxu0 %v15043_v14  ;;  %v12357_v42 = vcombine.low %v6885_v62, %v6889_v16  ;;  %v7588_v62 = vld [vmem:[#allocation5 + $0x17a8] sm:$0xff]  ;;  %v7575_v16 = vld [vmem:[#allocation5 + $0x1740] sm:$0xff] }
 0x9c3   :  { %7334 = vmatpush1.bf16.msra.mxu1 %v12397_v2  ;;  %7375 = vmatpush1.bf16.msra.mxu0 %v12399_v7  ;;  %v13695_v34 = vpop.f32.mrf.mxu0  ;;  %v7475_v2 = vsel %vm120_vm2, %v13245_v44, 0.0  ;;  %v12374_v7 = vcombine.high %v6901_v28, %v6905_v11  ;;  %v6870_v44 = vld [vmem:[#allocation5 + $0x1418] sm:$0xff]  ;;  %v13254_v11 = vunpack.c.h.bf16 %v13477_v21  ;;  %v7568_v21 = vld [vmem:[#allocation5 + $0x1708] sm:$0xff] }
 0x9c4   :  { %7335 = vmatprep.subr.bf16.mxu1 %v12390_v24  ;;  %7376 = vmatprep.subr.bf16.mxu0 %v12392_v56  ;;  %v7476_v53 = vadd.f32 %v7475_v2, %v7474_v35  ;;  %v6881_v24 = vld [vmem:[#allocation5 + $0x1470] sm:$0xff]  ;;  %v6878_v56 = vld [vmem:[#allocation5 + $0x1458] sm:$0xff]  ;;  %v12344_v35 = vcombine.high %v6870_v44, %v6874_v19  ;;  %v12343_v51 = vcombine.low %v6870_v44, %v6874_v19 }
 0x9c5   :  { %7365 = vmatprep.mubr.bf16.mxu1 %v13942_v3  ;;  %7406 = vmatprep.mubr.bf16.mxu0 %v13942_v3  ;;  %v12350_v33 = vcombine.high %v6877_v50, %v6881_v24  ;;  %v12352_v34 = vcombine.high %v6878_v56, %v6882_v22  ;;  %v12351_v28 = vcombine.low %v6878_v56, %v6882_v22  ;;  %v7485_v2 = vsel %vm120_vm2, %v13254_v11, 0.0  ;;  %v7552_v11 = vld [vmem:[#allocation5 + $0x1688] sm:$0xff] }
 0x9c6   :  { %v7478_v46 = vadd.f32 %v7477_v45, %v7476_v53  ;;  %v12475_v53 = vcombine.high %v7591_v43, %v7595_v18  ;;  %v12458_v56 = vcombine.low %v7575_v16, %v7579_v41 }
 0x9c7   :  { %7336 = vmatpush1.bf16.msra.mxu1 %v12389_v60  ;;  %7377 = vmatpush1.bf16.msra.mxu0 %v12391_v32  ;;  %v6869_v60 = vld [vmem:[#allocation5 + $0x1410] sm:$0xff] }
 0x9c8   :  { %7337 = vmatprep.subr.bf16.mxu1 %v12382_v55  ;;  %7378 = vmatprep.subr.bf16.mxu0 %v12384_v26  ;;  %v7480_v8 = vadd.f32 %v7479_v12, %v7478_v46  ;;  %v6873_v32 = vld [vmem:[#allocation5 + $0x1430] sm:$0xff]  ;;  %v12349_v26 = vcombine.low %v6877_v50, %v6881_v24  ;;  %v7576_v46 = vld [vmem:[#allocation5 + $0x1748] sm:$0xff]  ;;  %v12459_v12 = vcombine.high %v7575_v16, %v7579_v41  ;;  %v7571_v50 = vld [vmem:[#allocation5 + $0x1720] sm:$0xff] }
 0x9c9   :  { %v12342_v54 = vcombine.high %v6869_v60, %v6873_v32  ;;  %v7572_v24 = vld [vmem:[#allocation5 + $0x1728] sm:$0xff]  ;;  %v15084_v16 = vld [vmem:[#allocation5 + $0x17d8] sm:$0xff] }
 0x9ca   :  { %v7482_v55 = vadd.f32 %v7481_v37, %v7480_v8  ;;  %v7560_v37 = vld [vmem:[#allocation5 + $0x16c8] sm:$0xff]  ;;  %v15088_v41 = vld [vmem:[#allocation5 + $0x17f8] sm:$0xff] }
 0x9cb   :  { %7338 = vmatpush1.bf16.msra.mxu1 %v12381_v58  ;;  %7379 = vmatpush1.bf16.msra.mxu0 %v12383_v20  ;;  %v12341_v20 = vcombine.low %v6869_v60, %v6873_v32  ;;  %v12452_v60 = vcombine.low %v7568_v21, %v7572_v24 }
 0x9cc   :  { %7339 = vmatprep.subr.bf16.mxu1 %v12374_v7  ;;  %7380 = vmatprep.subr.bf16.mxu0 %v12376_v36  ;;  %v7484_v58 = vadd.f32 %v7483_v52, %v7482_v55 }
 0x9ce   :  { %v7486_v7 = vadd.f32 %v7485_v2, %v7484_v58  ;;  %v7547_v2 = vld [vmem:[#allocation5 + $0x1660] sm:$0xff] }
 0x9cf   :  { %7340 = vmatpush1.bf16.msra.mxu1 %v12373_v15  ;;  %7381 = vmatpush1.bf16.msra.mxu0 %v12375_v63  ;;  %v7596_v15 = vld [vmem:[#allocation5 + $0x17e8] sm:$0xff]  ;;  %v7587_v63 = vld [vmem:[#allocation5 + $0x17a0] sm:$0xff] }
 0x9d0   :  { %7341 = vmatprep.subr.bf16.mxu1 %v12366_v23  ;;  %7382 = vmatprep.subr.bf16.mxu0 %v12368_v31  ;;  %v7487_v36 = vmul.f32 0.0625, %v7486_v7  ;;  %v12476_v29 = vcombine.low %v7592_v57, %v7596_v15  ;;  %v12477_v45 = vcombine.high %v7592_v57, %v7596_v15  ;;  %v7584_v31 = vld [vmem:[#allocation5 + $0x1788] sm:$0xff] }
 0x9d1   :  { %v12469_v48 = vcombine.high %v7584_v31, %v7588_v62  ;;  %v12468_v5 = vcombine.low %v7584_v31, %v7588_v62  ;;  %v7544_v7 = vld [vmem:[#allocation5 + $0x1648] sm:$0xff]  ;;  %v15080_v31 = vld [vmem:[#allocation5 + $0x17d0] sm:$0xff] }
 0x9d2   :  { %v7488_v25 = vpack.c.bf16 %v7487_v36, %v7487_v36  ;;  %v7536_v15 = vld [vmem:[#allocation5 + $0x1608] sm:$0xff]  ;;  %v15082_v62 = vld [vmem:[#allocation5 + $0x17f0] sm:$0xff] }
 0x9d3   :  { %7342 = vmatpush1.bf16.msra.mxu1 %v12365_v9  ;;  %7383 = vmatpush1.bf16.msra.mxu0 %v12367_v39  ;;  %v7580_v9 = vld [vmem:[#allocation5 + $0x1768] sm:$0xff] }
 0x9d4   :  { %7343 = vmatprep.subr.bf16.mxu1 %v12358_v38  ;;  %7384 = vmatprep.subr.bf16.mxu0 %v12360_v13  ;;  %v12461_v38 = vcombine.high %v7576_v46, %v7580_v9  ;;  %v7567_v13 = vld [vmem:[#allocation5 + $0x1700] sm:$0xff]  ;;  %v12460_v22 = vcombine.low %v7576_v46, %v7580_v9  ;;  %v12478_v46 = vcombine.low %v15080_v31, %v15082_v62 }
 0x9d5   :  { %v12451_v8 = vcombine.high %v7567_v13, %v7571_v50  ;;  %v12480_v9 = vcombine.low %v15084_v16, %v15088_v41 }
 0x9d7   :  { %7344 = vmatpush1.bf16.msra.mxu1 %v12357_v42  ;;  %7385 = vmatpush1.bf16.msra.mxu0 %v12359_v59  ;;  %v12453_v42 = vcombine.high %v7568_v21, %v7572_v24  ;;  %v7559_v59 = vld [vmem:[#allocation5 + $0x16c0] sm:$0xff] }
 0x9d8   :  { %7345 = vmatprep.subr.bf16.mxu1 %v12350_v33  ;;  %7386 = vmatprep.subr.bf16.mxu0 %v12352_v34  ;;  %v7564_v33 = vld [vmem:[#allocation5 + $0x16e8] sm:$0xff]  ;;  %v12450_v34 = vcombine.low %v7567_v13, %v7571_v50  ;;  %v12443_v32 = vcombine.high %v7559_v59, %v7563_v40  ;;  %v12442_v19 = vcombine.low %v7559_v59, %v7563_v40 }
 0x9d9   :  { %v12445_v44 = vcombine.high %v7560_v37, %v7564_v33  ;;  %v12444_v55 = vcombine.low %v7560_v37, %v7564_v33 }
 0x9db   :  { %7346 = vmatpush1.bf16.msra.mxu1 %v12349_v26  ;;  %7387 = vmatpush1.bf16.msra.mxu0 %v12351_v28  ;;  %v7551_v26 = vld [vmem:[#allocation5 + $0x1680] sm:$0xff] }
 0x9dc   :  { %7347 = vmatprep.subr.bf16.mxu1 %v12342_v54  ;;  %7388 = vmatprep.subr.bf16.mxu0 %v12344_v35  ;;  %v7555_v28 = vld [vmem:[#allocation5 + $0x16a0] sm:$0xff]  ;;  %v7556_v54 = vld [vmem:[#allocation5 + $0x16a8] sm:$0xff] }
 0x9dd   :  { %v12435_v52 = vcombine.high %v7551_v26, %v7555_v28  ;;  %v12434_v35 = vcombine.low %v7551_v26, %v7555_v28  ;;  %v12436_v58 = vcombine.low %v7552_v11, %v7556_v54 }
 0x9df   :  { %7348 = vmatpush1.bf16.msra.mxu1 %v12341_v20  ;;  %7389 = vmatpush1.bf16.msra.mxu0 %v12343_v51  ;;  %v12437_v20 = vcombine.high %v7552_v11, %v7556_v54  ;;  %v7543_v51 = vld [vmem:[#allocation5 + $0x1640] sm:$0xff]  ;;  %v13481_v54 = vld [vmem:[%s15547_s0 + $0x318] sm:$0xff]  }
 0x9e0   :  { %13696 = vmatprep.subr.bf16.mxu1 %v13940_v0  ;;  %7919 = vmatprep.subr.bf16.mxu0 %v12475_v53  ;;  %v12427_v36 = vcombine.high %v7543_v51, %v7547_v2  ;;  %v12426_v43 = vcombine.low %v7543_v51, %v7547_v2  ;;  %v7539_v53 = vld [vmem:[#allocation5 + $0x1620] sm:$0xff] }
 0x9e2   :  { %7366 = vmatmul.mubr.bf16.vlgmr.msra.gmra.mxu1 %v15043_v14  ;;  %7407 = vmatmul.mubr.bf16.vlgmr.msra.gmra.mxu0 %v15043_v14  ;;  %v7583_v14 = vld [vmem:[#allocation5 + $0x1780] sm:$0xff] }
 0x9e3   :  { %13697 = vmatpush3.bf16.msra.mxu1 %v14006_v4  ;;  %13698 = vmatprep.mubr.msk.bf16.mxu1 %vm13941_vm0, %v13940_v0  ;;  %v12467_v23 = vcombine.high %v7583_v14, %v7587_v63  ;;  %v12466_v39 = vcombine.low %v7583_v14, %v7587_v63  ;;  %v7540_v63 = vld [vmem:[#allocation5 + $0x1628] sm:$0xff] }
 0x9e4   :  { %7951 = vmatprep.mubr.bf16.mxu0 %v13942_v3  ;;  %7960 = vmatprep.subr.bf16.mxu1 %v12477_v45  ;;  %v12420_v45 = vcombine.low %v7536_v15, %v7540_v63 }
 0x9e5   :  { %7920 = vmatpush1.bf16.msra.mxu0 %v12474_v27  ;;  %v7535_v27 = vld [vmem:[#allocation5 + $0x1600] sm:$0xff] }
 0x9e6   :  { %7921 = vmatprep.subr.bf16.mxu0 %v12467_v23  ;;  %v12419_v14 = vcombine.high %v7535_v27, %v7539_v53  ;;  %v12421_v23 = vcombine.high %v7536_v15, %v7540_v63 }
 0x9e9   :  { %7922 = vmatpush1.bf16.msra.mxu0 %v12466_v39  ;;  %v12481_v39 = vcombine.high %v15084_v16, %v15088_v41 }
 0x9ea   :  { %13699 = vmatmul.mubr.msk.bf16.vlgmr.msra.gmra.mxu1 %vm120_vm2, %v7488_v25  ;;  %7923 = vmatprep.subr.bf16.mxu0 %v12459_v12  ;;  %v7548_v25 = vld [vmem:[#allocation5 + $0x1668] sm:$0xff] }
 0x9eb   :  { %7992 = vmatprep.mubr.bf16.mxu1 %v13942_v3  ;;  %7961 = vmatpush1.bf16.msra.mxu1 %v12476_v29  ;;  %v12428_v18 = vcombine.low %v7544_v7, %v7548_v25  ;;  %v12429_v57 = vcombine.high %v7544_v7, %v7548_v25  ;;  %v12418_v29 = vcombine.low %v7535_v27, %v7539_v53 }
 0x9ec   :  { %7962 = vmatprep.subr.bf16.mxu1 %v12469_v48  ;;  %v12479_v48 = vcombine.high %v15080_v31, %v15082_v62 }
 0x9ed   :  { %7924 = vmatpush1.bf16.msra.mxu0 %v12458_v56 }
 0x9ee   :  { %7925 = vmatprep.subr.bf16.mxu0 %v12451_v8 }
 0x9ef   :  { %7963 = vmatpush1.bf16.msra.mxu1 %v12468_v5 }
 0x9f0   :  { %7964 = vmatprep.subr.bf16.mxu1 %v12461_v38 }
 0x9f1   :  { %7926 = vmatpush1.bf16.msra.mxu0 %v12450_v34 }
 0x9f2   :  { %7927 = vmatprep.subr.bf16.mxu0 %v12443_v32 }
 0x9f3   :  { %7965 = vmatpush1.bf16.msra.mxu1 %v12460_v22 }
 0x9f4   :  { %7966 = vmatprep.subr.bf16.mxu1 %v12453_v42 }
 0x9f5   :  { %7928 = vmatpush1.bf16.msra.mxu0 %v12442_v19 }
 0x9f6   :  { %7929 = vmatprep.subr.bf16.mxu0 %v12435_v52 }
 0x9f7   :  { %7967 = vmatpush1.bf16.msra.mxu1 %v12452_v60 }
 0x9f8   :  { %7968 = vmatprep.subr.bf16.mxu1 %v12445_v44  ;;  %v13480_v44 = vld [vmem:[%s15547_s0 + $0x310] sm:$0xff]  }
 0x9f9   :  { %7930 = vmatpush1.bf16.msra.mxu0 %v12434_v35  ;;  %v13266_v11 = vunpack.c.h.bf16 %v13480_v44 }
 0x9fa   :  { %7931 = vmatprep.subr.bf16.mxu0 %v12427_v36 }
 0x9fb   :  { %7969 = vmatpush1.bf16.msra.mxu1 %v12444_v55  ;;  %v13265_v55 = vunpack.c.l.bf16 %v13480_v44 }
 0x9fc   :  { %7970 = vmatprep.subr.bf16.mxu1 %v12437_v20  ;;  %v8133_v20 = vsel %vm120_vm2, %v13266_v11, 0.0 }
 0x9fd   :  { %7932 = vmatpush1.bf16.msra.mxu0 %v12426_v43  ;;  %v8131_v52 = vsel %vm120_vm2, %v13265_v55, 0.0 }
 0x9fe   :  { %7933 = vmatprep.subr.bf16.mxu0 %v12419_v14 }
 0x9ff   :  { %7971 = vmatpush1.bf16.msra.mxu1 %v12436_v58  ;;  %v13269_v58 = vunpack.c.l.bf16 %v13481_v54 }
 0xa00   :  { %7972 = vmatprep.subr.bf16.mxu1 %v12429_v57  ;;  %v13270_v57 = vunpack.c.h.bf16 %v13481_v54  ;;  %v7573_v54 = vld [vmem:[#allocation5 + $0x1730] sm:$0xff] }
 0xa01   :  { %7934 = vmatpush1.bf16.msra.mxu0 %v12418_v29  ;;  %v8135_v27 = vsel %vm120_vm2, %v13269_v58, 0.0  ;;  %v7574_v58 = vld [vmem:[#allocation5 + $0x1738] sm:$0xff] }
 0xa02   :  { %8001 = vmatprep.subr.bf16.mxu0 %v12479_v48  ;;  %v8137_v48 = vsel %vm120_vm2, %v13270_v57, 0.0 }
 0xa03   :  { %7973 = vmatpush1.bf16.msra.mxu1 %v12428_v18 }
 0xa04   :  { %7974 = vmatprep.subr.bf16.mxu1 %v12421_v23 }
 0xa07   :  { %7975 = vmatpush1.bf16.msra.mxu1 %v12420_v45 }
 0xa08   :  { %8042 = vmatprep.subr.bf16.mxu1 %v12481_v39  ;;  %v7585_v39 = vld [vmem:[#allocation5 + $0x1790] sm:$0xff] }
 0xa82   :  { %v7285_v5 = vpop.f32.mrf.mxu1  ;;  %v7326_v12 = vpop.f32.mrf.mxu0 }
 0xa83   :  { %v15097_v38 = vadd.f32 %v7285_v5, %v14996_v49  ;;  %v15100_v13 = vadd.f32 %v7326_v12, %v14999_v10  ;;  %v13478_v49 = vld [vmem:[%s15547_s0 + $0x300] sm:$0xff]   ;;  %v13479_v10 = vld [vmem:[%s15547_s0 + $0x308] sm:$0xff]   ;;  %v7589_v12 = vld [vmem:[#allocation5 + $0x17b0] sm:$0xff] }
 0xa84   :  { %v7287_v50 = vpop.f32.mrf.mxu1  ;;  %v7328_v21 = vpop.f32.mrf.mxu0  ;;  %v13257_v40 = vunpack.c.l.bf16 %v13478_v49  ;;  %v13258_v37 = vunpack.c.h.bf16 %v13478_v49  ;;  %v13261_v33 = vunpack.c.l.bf16 %v13479_v10  ;;  %v13262_v60 = vunpack.c.h.bf16 %v13479_v10  ;;  %v13483_v10 = vld [vmem:[%s15547_s0 + $0x328] sm:$0xff]  }
 0xa85   :  { %v15103_v24 = vadd.f32 %v7287_v50, %v15002_v17  ;;  %v15106_v56 = vadd.f32 %v7328_v21, %v15005_v1  ;;  %v7590_v50 = vld [vmem:[#allocation5 + $0x17b8] sm:$0xff]  ;;  %v12471_v49 = vcombine.high %v7585_v39, %v7589_v12  ;;  %v12470_v44 = vcombine.low %v7585_v39, %v7589_v12 }
 0xa86   :  { %v7289_v22 = vpop.f32.mrf.mxu1  ;;  %v7330_v8 = vpop.f32.mrf.mxu0  ;;  %v8124_v17 = vsel %vm120_vm2, %v13257_v40, 0.0  ;;  %v8125_v1 = vsel %vm120_vm2, %v13258_v37, 0.0  ;;  %v8127_v32 = vsel %vm120_vm2, %v13261_v33, 0.0  ;;  %v8129_v26 = vsel %vm120_vm2, %v13262_v60, 0.0  ;;  %v7577_v37 = vld [vmem:[#allocation5 + $0x1750] sm:$0xff]  ;;  %v7558_v39 = vld [vmem:[#allocation5 + $0x16b8] sm:$0xff] }
 0xa87   :  { %v8126_v34 = vadd.f32 %v8125_v1, %v8124_v17  ;;  %v7581_v17 = vld [vmem:[#allocation5 + $0x1770] sm:$0xff]  ;;  %v7578_v1 = vld [vmem:[#allocation5 + $0x1758] sm:$0xff]  ;;  %v13277_v55 = vunpack.c.l.bf16 %v13483_v10  ;;  %v13278_v41 = vunpack.c.h.bf16 %v13483_v10 }
 0xa88   :  { %v7290_v42 = vpop.f32.mrf.mxu1  ;;  %v7331_v59 = vpop.f32.mrf.mxu0  ;;  %v12462_v62 = vcombine.low %v7577_v37, %v7581_v17 }
 0xa89   :  { %v8128_v19 = vadd.f32 %v8127_v32, %v8126_v34  ;;  %v7582_v34 = vld [vmem:[#allocation5 + $0x1778] sm:$0xff] }
 0xa8a   :  { %v12465_v11 = vcombine.high %v7578_v1, %v7582_v34  ;;  %v12464_v16 = vcombine.low %v7578_v1, %v7582_v34 }
 0xa8b   :  { %v8130_v28 = vadd.f32 %v8129_v26, %v8128_v19 }
 0xa8d   :  { %v8132_v35 = vadd.f32 %v8131_v52, %v8130_v28  ;;  %v12463_v28 = vcombine.high %v7577_v37, %v7581_v17  ;;  %v7569_v52 = vld [vmem:[#allocation5 + $0x1710] sm:$0xff]  ;;  %v7550_v37 = vld [vmem:[#allocation5 + $0x1678] sm:$0xff] }
 0xa8f   :  { %v8134_v25 = vadd.f32 %v8133_v20, %v8132_v35  ;;  %v7570_v35 = vld [vmem:[#allocation5 + $0x1718] sm:$0xff] }
 0xa90   :  { %v12457_v20 = vcombine.high %v7570_v35, %v7574_v58 }
 0xaa2   :  { %v7367_v51 = vpop.f32.mrf.mxu1  ;;  %v7408_v2 = vpop.f32.mrf.mxu0 }
 0xaa3   :  { %v15127_v7 = vadd.f32 %v7367_v51, %v15026_v6  ;;  %v15130_v36 = vadd.f32 %v7408_v2, %v15029_v47  ;;  %v13482_v6 = vld [vmem:[%s15547_s0 + $0x320] sm:$0xff]   ;;  %v8136_v47 = vadd.f32 %v8135_v27, %v8134_v25  ;;  %v7561_v51 = vld [vmem:[#allocation5 + $0x16d0] sm:$0xff]  ;;  %v12454_v27 = vcombine.low %v7569_v52, %v7573_v54 }
 0xaa4   :  { %v7369_v43 = vpop.f32.mrf.mxu1  ;;  %v7410_v18 = vpop.f32.mrf.mxu0  ;;  %v13273_v23 = vunpack.c.l.bf16 %v13482_v6  ;;  %v13274_v8 = vunpack.c.h.bf16 %v13482_v6  ;;  %v13484_v2 = vld [vmem:[%s15547_s0 + $0x330] sm:$0xff]   ;;  %v12456_v6 = vcombine.low %v7570_v35, %v7574_v58 }
 0xaa5   :  { %v15134_v53 = vadd.f32 %v7369_v43, %v15033_v61  ;;  %v15137_v15 = vadd.f32 %v7410_v18, %v15036_v30  ;;  %v7586_v61 = vld [vmem:[#allocation5 + $0x1798] sm:$0xff]  ;;  %v8138_v30 = vadd.f32 %v8137_v48, %v8136_v47  ;;  %v7565_v25 = vld [vmem:[#allocation5 + $0x16f0] sm:$0xff] }
 0xaa6   :  { %v7371_v14 = vpop.f32.mrf.mxu1  ;;  %v7412_v63 = vpop.f32.mrf.mxu0  ;;  %v8139_v42 = vsel %vm120_vm2, %v13273_v23, 0.0  ;;  %v12473_v40 = vcombine.high %v7586_v61, %v7590_v50  ;;  %v12472_v19 = vcombine.low %v7586_v61, %v7590_v50  ;;  %v8141_v26 = vsel %vm120_vm2, %v13274_v8, 0.0  ;;  %v7562_v43 = vld [vmem:[#allocation5 + $0x16d8] sm:$0xff]  ;;  %v7557_v23 = vld [vmem:[#allocation5 + $0x16b0] sm:$0xff] }
 0xaa7   :  { %v8140_v60 = vadd.f32 %v8139_v42, %v8138_v30  ;;  %v7566_v18 = vld [vmem:[#allocation5 + $0x16f8] sm:$0xff]  ;;  %v13281_v14 = vunpack.c.l.bf16 %v13484_v2  ;;  %v8145_v63 = vsel %vm120_vm2, %v13278_v41, 0.0  ;;  %v12447_v47 = vcombine.high %v7561_v51, %v7565_v25  ;;  %v7545_v8 = vld [vmem:[#allocation5 + $0x1650] sm:$0xff] }
 0xaa8   :  { %v7372_v29 = vpop.f32.mrf.mxu1  ;;  %v7413_v45 = vpop.f32.mrf.mxu0  ;;  %v7554_v48 = vld [vmem:[#allocation5 + $0x1698] sm:$0xff]  ;;  %v12446_v12 = vcombine.low %v7561_v51, %v7565_v25  ;;  %v12448_v61 = vcombine.low %v7562_v43, %v7566_v18  ;;  %v13282_v50 = vunpack.c.h.bf16 %v13484_v2  ;;  %v8259_v2 = vld [vmem:[#allocation5 + $0x19c0] sm:$0xff] }
 0xaa9   :  { %v8142_v31 = vadd.f32 %v8141_v26, %v8140_v60  ;;  %v12449_v29 = vcombine.high %v7562_v43, %v7566_v18  ;;  %v7553_v45 = vld [vmem:[#allocation5 + $0x1690] sm:$0xff]  ;;  %v12440_v17 = vcombine.low %v7554_v48, %v7558_v39  ;;  %v7542_v26 = vld [vmem:[#allocation5 + $0x1638] sm:$0xff]  ;;  %v8263_v25 = vld [vmem:[#allocation5 + $0x19e0] sm:$0xff] }
 0xaaa   :  { %v7526_v5 = vpop.f32.mrf.mxu1  ;;  %v12439_v30 = vcombine.high %v7553_v45, %v7557_v23  ;;  %v13485_v42 = vld [vmem:[%s15547_s0 + $0x338] sm:$0xff]   ;;  %v8149_v34 = vsel %vm120_vm2, %v13282_v50, 0.0  ;;  %v8260_v43 = vld [vmem:[#allocation5 + $0x19c8] sm:$0xff]  ;;  %v12555_v18 = vcombine.low %v8259_v2, %v8263_v25 }
 0xaab   :  { %v7532_v21 = vmax.f32 %v7526_v5, 0.0  ;;  %v13285_v1 = vunpack.c.l.bf16 %v13485_v42 }
 0xaac   :  { %v13700_v22 = vpop.f32.mrf.mxu1 }
 0xaad   :  { %v15144_v59 = vpack.c.bf16 %v7532_v21, %v7532_v21  ;;  %v8147_v21 = vsel %vm120_vm2, %v13281_v14, 0.0  ;;  %v12441_v22 = vcombine.high %v7554_v48, %v7558_v39  ;;  %v8151_v35 = vsel %vm120_vm2, %v13285_v1, 0.0  ;;  %v8247_v39 = vld [vmem:[#allocation5 + $0x1960] sm:$0xff] }
 0xaae   :  { %v7529_v33 = vpop.f32.mrf.mxu1  ;;  %v8231_v1 = vld [vmem:[#allocation5 + $0x18e0] sm:$0xff] }
 0xaaf   :  { %7952 = vmatmul.mubr.bf16.vlgmr.msra.gmra.mxu0 %v15144_v59  ;;  %7993 = vmatmul.mubr.bf16.vlgmr.msra.gmra.mxu1 %v15144_v59  ;;  %v12438_v33 = vcombine.low %v7553_v45, %v7557_v23  ;;  %v8256_v45 = vld [vmem:[#allocation5 + $0x19a8] sm:$0xff]  ;;  %v8243_v23 = vld [vmem:[#allocation5 + $0x1940] sm:$0xff] }
 0xab0   :  { %8002 = vmatpush1.bf16.msra.mxu0 %v12478_v46  ;;  %8043 = vmatpush1.bf16.msra.mxu1 %v12480_v9  ;;  %v13701_v32 = vpop.f32.mrf.mxu1  ;;  %v8143_v46 = vsel %vm120_vm2, %v13277_v55, 0.0  ;;  %v12455_v9 = vcombine.high %v7569_v52, %v7573_v54  ;;  %v7538_v55 = vld [vmem:[#allocation5 + $0x1618] sm:$0xff]  ;;  %v13286_v54 = vunpack.c.h.bf16 %v13485_v42  ;;  %v8236_v42 = vld [vmem:[#allocation5 + $0x1908] sm:$0xff] }
 0xab1   :  { %8003 = vmatprep.subr.bf16.mxu0 %v12471_v49  ;;  %8044 = vmatprep.subr.bf16.mxu1 %v12473_v40  ;;  %v8144_v57 = vadd.f32 %v8143_v46, %v8142_v31  ;;  %v7549_v49 = vld [vmem:[#allocation5 + $0x1670] sm:$0xff]  ;;  %v7546_v40 = vld [vmem:[#allocation5 + $0x1658] sm:$0xff]  ;;  %v12425_v31 = vcombine.high %v7538_v55, %v7542_v26  ;;  %v12424_v41 = vcombine.low %v7538_v55, %v7542_v26 }
 0xab2   :  { %8033 = vmatprep.mubr.bf16.mxu0 %v13942_v3  ;;  %8074 = vmatprep.mubr.bf16.mxu1 %v13942_v3  ;;  %v12431_v60 = vcombine.high %v7545_v8, %v7549_v49  ;;  %v12433_v32 = vcombine.high %v7546_v40, %v7550_v37  ;;  %v12432_v52 = vcombine.low %v7546_v40, %v7550_v37  ;;  %v8153_v46 = vsel %vm120_vm2, %v13286_v54, 0.0  ;;  %v8220_v54 = vld [vmem:[#allocation5 + $0x1888] sm:$0xff] }
 0xab3   :  { %v8146_v5 = vadd.f32 %v8145_v63, %v8144_v57  ;;  %v12556_v57 = vcombine.high %v8259_v2, %v8263_v25  ;;  %v12539_v40 = vcombine.low %v8243_v23, %v8247_v39 }
 0xab4   :  { %8004 = vmatpush1.bf16.msra.mxu0 %v12470_v44  ;;  %8045 = vmatpush1.bf16.msra.mxu1 %v12472_v19  ;;  %v7537_v44 = vld [vmem:[#allocation5 + $0x1610] sm:$0xff] }
 0xab5   :  { %8005 = vmatprep.subr.bf16.mxu0 %v12463_v28  ;;  %8046 = vmatprep.subr.bf16.mxu1 %v12465_v11  ;;  %v8148_v10 = vadd.f32 %v8147_v21, %v8146_v5  ;;  %v7541_v19 = vld [vmem:[#allocation5 + $0x1630] sm:$0xff]  ;;  %v12430_v11 = vcombine.low %v7545_v8, %v7549_v49  ;;  %v8244_v5 = vld [vmem:[#allocation5 + $0x1948] sm:$0xff]  ;;  %v12540_v21 = vcombine.high %v8243_v23, %v8247_v39  ;;  %v8239_v8 = vld [vmem:[#allocation5 + $0x1920] sm:$0xff] }
 0xab6   :  { %v12423_v58 = vcombine.high %v7537_v44, %v7541_v19  ;;  %v8240_v49 = vld [vmem:[#allocation5 + $0x1928] sm:$0xff]  ;;  %v15185_v23 = vld [vmem:[#allocation5 + $0x19d8] sm:$0xff] }
 0xab7   :  { %v8150_v28 = vadd.f32 %v8149_v34, %v8148_v10  ;;  %v8228_v34 = vld [vmem:[#allocation5 + $0x18c8] sm:$0xff]  ;;  %v15189_v39 = vld [vmem:[#allocation5 + $0x19f8] sm:$0xff] }
 0xab8   :  { %8006 = vmatpush1.bf16.msra.mxu0 %v12462_v62  ;;  %8047 = vmatpush1.bf16.msra.mxu1 %v12464_v16  ;;  %v12422_v16 = vcombine.low %v7537_v44, %v7541_v19  ;;  %v12533_v44 = vcombine.low %v8236_v42, %v8240_v49 }
 0xab9   :  { %8007 = vmatprep.subr.bf16.mxu0 %v12455_v9  ;;  %8048 = vmatprep.subr.bf16.mxu1 %v12457_v20  ;;  %v8152_v62 = vadd.f32 %v8151_v35, %v8150_v28 }
 0xabb   :  { %v8154_v9 = vadd.f32 %v8153_v46, %v8152_v62  ;;  %v8215_v46 = vld [vmem:[#allocation5 + $0x1860] sm:$0xff] }
 0xabc   :  { %8008 = vmatpush1.bf16.msra.mxu0 %v12454_v27  ;;  %8049 = vmatpush1.bf16.msra.mxu1 %v12456_v6  ;;  %v8264_v27 = vld [vmem:[#allocation5 + $0x19e8] sm:$0xff]  ;;  %v8255_v6 = vld [vmem:[#allocation5 + $0x19a0] sm:$0xff] }
 0xabd   :  { %8009 = vmatprep.subr.bf16.mxu0 %v12447_v47  ;;  %8050 = vmatprep.subr.bf16.mxu1 %v12449_v29  ;;  %v8155_v20 = vmul.f32 0.0625, %v8154_v9  ;;  %v12557_v14 = vcombine.low %v8260_v43, %v8264_v27  ;;  %v12558_v63 = vcombine.high %v8260_v43, %v8264_v27  ;;  %v8252_v29 = vld [vmem:[#allocation5 + $0x1988] sm:$0xff] }
 0xabe   :  { %v12550_v48 = vcombine.high %v8252_v29, %v8256_v45  ;;  %v12549_v50 = vcombine.low %v8252_v29, %v8256_v45  ;;  %v8212_v9 = vld [vmem:[#allocation5 + $0x1848] sm:$0xff]  ;;  %v15181_v29 = vld [vmem:[#allocation5 + $0x19d0] sm:$0xff] }
 0xabf   :  { %v8156_v51 = vpack.c.bf16 %v8155_v20, %v8155_v20  ;;  %v8204_v27 = vld [vmem:[#allocation5 + $0x1808] sm:$0xff]  ;;  %v15183_v45 = vld [vmem:[#allocation5 + $0x19f0] sm:$0xff] }
 0xac0   :  { %8010 = vmatpush1.bf16.msra.mxu0 %v12446_v12  ;;  %8051 = vmatpush1.bf16.msra.mxu1 %v12448_v61  ;;  %v8248_v12 = vld [vmem:[#allocation5 + $0x1968] sm:$0xff] }
 0xac1   :  { %8011 = vmatprep.subr.bf16.mxu0 %v12439_v30  ;;  %8052 = vmatprep.subr.bf16.mxu1 %v12441_v22  ;;  %v12542_v30 = vcombine.high %v8244_v5, %v8248_v12  ;;  %v8235_v22 = vld [vmem:[#allocation5 + $0x1900] sm:$0xff]  ;;  %v12541_v37 = vcombine.low %v8244_v5, %v8248_v12  ;;  %v12559_v5 = vcombine.low %v15181_v29, %v15183_v45 }
 0xac2   :  { %v12532_v10 = vcombine.high %v8235_v22, %v8239_v8  ;;  %v12561_v12 = vcombine.low %v15185_v23, %v15189_v39 }
 0xac4   :  { %8012 = vmatpush1.bf16.msra.mxu0 %v12438_v33  ;;  %8053 = vmatpush1.bf16.msra.mxu1 %v12440_v17  ;;  %v12534_v33 = vcombine.high %v8236_v42, %v8240_v49  ;;  %v8227_v17 = vld [vmem:[#allocation5 + $0x18c0] sm:$0xff] }
 0xac5   :  { %8013 = vmatprep.subr.bf16.mxu0 %v12431_v60  ;;  %8054 = vmatprep.subr.bf16.mxu1 %v12433_v32  ;;  %v8232_v60 = vld [vmem:[#allocation5 + $0x18e8] sm:$0xff]  ;;  %v12531_v32 = vcombine.low %v8235_v22, %v8239_v8  ;;  %v12524_v19 = vcombine.high %v8227_v17, %v8231_v1  ;;  %v12523_v26 = vcombine.low %v8227_v17, %v8231_v1 }
 0xac6   :  { %v12526_v55 = vcombine.high %v8228_v34, %v8232_v60  ;;  %v12525_v28 = vcombine.low %v8228_v34, %v8232_v60 }
 0xac8   :  { %8014 = vmatpush1.bf16.msra.mxu0 %v12430_v11  ;;  %8055 = vmatpush1.bf16.msra.mxu1 %v12432_v52  ;;  %v8219_v11 = vld [vmem:[#allocation5 + $0x1880] sm:$0xff] }
 0xac9   :  { %8015 = vmatprep.subr.bf16.mxu0 %v12423_v58  ;;  %8056 = vmatprep.subr.bf16.mxu1 %v12425_v31  ;;  %v8223_v52 = vld [vmem:[#allocation5 + $0x18a0] sm:$0xff]  ;;  %v8224_v58 = vld [vmem:[#allocation5 + $0x18a8] sm:$0xff] }
 0xaca   :  { %v12516_v35 = vcombine.high %v8219_v11, %v8223_v52  ;;  %v12515_v31 = vcombine.low %v8219_v11, %v8223_v52  ;;  %v12517_v62 = vcombine.low %v8220_v54, %v8224_v58 }
 0xacc   :  { %8016 = vmatpush1.bf16.msra.mxu0 %v12422_v16  ;;  %8057 = vmatpush1.bf16.msra.mxu1 %v12424_v41  ;;  %v12518_v16 = vcombine.high %v8220_v54, %v8224_v58  ;;  %v8211_v41 = vld [vmem:[#allocation5 + $0x1840] sm:$0xff]  ;;  %v13489_v58 = vld [vmem:[%s15547_s0 + $0x358] sm:$0xff]  }
 0xacd   :  { %13702 = vmatprep.subr.bf16.mxu0 %v13940_v0  ;;  %8587 = vmatprep.subr.bf16.mxu1 %v12556_v57  ;;  %v12508_v20 = vcombine.high %v8211_v41, %v8215_v46  ;;  %v12507_v2 = vcombine.low %v8211_v41, %v8215_v46  ;;  %v8207_v57 = vld [vmem:[#allocation5 + $0x1820] sm:$0xff] }
 0xacf   :  { %8034 = vmatmul.mubr.bf16.vlgmr.msra.gmra.mxu0 %v15144_v59  ;;  %8075 = vmatmul.mubr.bf16.vlgmr.msra.gmra.mxu1 %v15144_v59  ;;  %v8251_v59 = vld [vmem:[#allocation5 + $0x1980] sm:$0xff] }
 0xad0   :  { %13703 = vmatpush3.bf16.msra.mxu0 %v14006_v4  ;;  %13704 = vmatprep.mubr.msk.bf16.mxu0 %vm13941_vm0, %v13940_v0  ;;  %v12548_v47 = vcombine.high %v8251_v59, %v8255_v6  ;;  %v12547_v61 = vcombine.low %v8251_v59, %v8255_v6  ;;  %v8208_v6 = vld [vmem:[#allocation5 + $0x1828] sm:$0xff] }
 0xad1   :  { %8619 = vmatprep.mubr.bf16.mxu1 %v13942_v3  ;;  %8628 = vmatprep.subr.bf16.mxu0 %v12558_v63  ;;  %v12501_v63 = vcombine.low %v8204_v27, %v8208_v6 }
 0xad2   :  { %8588 = vmatpush1.bf16.msra.mxu1 %v12555_v18  ;;  %v8203_v18 = vld [vmem:[#allocation5 + $0x1800] sm:$0xff] }
 0xad3   :  { %8589 = vmatprep.subr.bf16.mxu1 %v12548_v47  ;;  %v12500_v59 = vcombine.high %v8203_v18, %v8207_v57  ;;  %v12502_v47 = vcombine.high %v8204_v27, %v8208_v6 }
 0xad6   :  { %8590 = vmatpush1.bf16.msra.mxu1 %v12547_v61  ;;  %v12562_v61 = vcombine.high %v15185_v23, %v15189_v39 }
 0xad7   :  { %13705 = vmatmul.mubr.msk.bf16.vlgmr.msra.gmra.mxu0 %vm120_vm2, %v8156_v51  ;;  %8591 = vmatprep.subr.bf16.mxu1 %v12540_v21  ;;  %v8216_v51 = vld [vmem:[#allocation5 + $0x1868] sm:$0xff] }
 0xad8   :  { %8660 = vmatprep.mubr.bf16.mxu0 %v13942_v3  ;;  %8629 = vmatpush1.bf16.msra.mxu0 %v12557_v14  ;;  %v12509_v25 = vcombine.low %v8212_v9, %v8216_v51  ;;  %v12510_v43 = vcombine.high %v8212_v9, %v8216_v51  ;;  %v12499_v14 = vcombine.low %v8203_v18, %v8207_v57 }
 0xad9   :  { %8630 = vmatprep.subr.bf16.mxu0 %v12550_v48  ;;  %v12560_v48 = vcombine.high %v15181_v29, %v15183_v45 }
 0xada   :  { %8592 = vmatpush1.bf16.msra.mxu1 %v12539_v40 }
 0xadb   :  { %8593 = vmatprep.subr.bf16.mxu1 %v12532_v10 }
 0xadc   :  { %8631 = vmatpush1.bf16.msra.mxu0 %v12549_v50 }
 0xadd   :  { %8632 = vmatprep.subr.bf16.mxu0 %v12542_v30 }
 0xade   :  { %8594 = vmatpush1.bf16.msra.mxu1 %v12531_v32 }
 0xadf   :  { %8595 = vmatprep.subr.bf16.mxu1 %v12524_v19 }
 0xae0   :  { %8633 = vmatpush1.bf16.msra.mxu0 %v12541_v37 }
 0xae1   :  { %8634 = vmatprep.subr.bf16.mxu0 %v12534_v33 }
 0xae2   :  { %8596 = vmatpush1.bf16.msra.mxu1 %v12523_v26 }
 0xae3   :  { %8597 = vmatprep.subr.bf16.mxu1 %v12516_v35 }
 0xae4   :  { %8635 = vmatpush1.bf16.msra.mxu0 %v12533_v44 }
 0xae5   :  { %8636 = vmatprep.subr.bf16.mxu0 %v12526_v55  ;;  %v13488_v55 = vld [vmem:[%s15547_s0 + $0x350] sm:$0xff]  }
 0xae6   :  { %8598 = vmatpush1.bf16.msra.mxu1 %v12515_v31  ;;  %v13298_v54 = vunpack.c.h.bf16 %v13488_v55 }
 0xae7   :  { %8599 = vmatprep.subr.bf16.mxu1 %v12508_v20 }
 0xae8   :  { %8637 = vmatpush1.bf16.msra.mxu0 %v12525_v28  ;;  %v13297_v28 = vunpack.c.l.bf16 %v13488_v55 }
 0xae9   :  { %8638 = vmatprep.subr.bf16.mxu0 %v12518_v16  ;;  %v8801_v16 = vsel %vm120_vm2, %v13298_v54, 0.0 }
 0xaea   :  { %8600 = vmatpush1.bf16.msra.mxu1 %v12507_v2  ;;  %v8799_v35 = vsel %vm120_vm2, %v13297_v28, 0.0 }
 0xaeb   :  { %8601 = vmatprep.subr.bf16.mxu1 %v12500_v59 }
 0xaec   :  { %8639 = vmatpush1.bf16.msra.mxu0 %v12517_v62  ;;  %v13301_v62 = vunpack.c.l.bf16 %v13489_v58 }
 0xaed   :  { %8640 = vmatprep.subr.bf16.mxu0 %v12510_v43  ;;  %v13302_v43 = vunpack.c.h.bf16 %v13489_v58  ;;  %v8241_v58 = vld [vmem:[#allocation5 + $0x1930] sm:$0xff] }
 0xaee   :  { %8602 = vmatpush1.bf16.msra.mxu1 %v12499_v14  ;;  %v8803_v18 = vsel %vm120_vm2, %v13301_v62, 0.0  ;;  %v8242_v62 = vld [vmem:[#allocation5 + $0x1938] sm:$0xff] }
 0xaef   :  { %8669 = vmatprep.subr.bf16.mxu1 %v12560_v48  ;;  %v8805_v48 = vsel %vm120_vm2, %v13302_v43, 0.0 }
 0xaf0   :  { %8641 = vmatpush1.bf16.msra.mxu0 %v12509_v25 }
 0xaf1   :  { %8642 = vmatprep.subr.bf16.mxu0 %v12502_v47 }
 0xaf4   :  { %8643 = vmatpush1.bf16.msra.mxu0 %v12501_v63 }
 0xaf5   :  { %8710 = vmatprep.subr.bf16.mxu0 %v12562_v61  ;;  %v8253_v61 = vld [vmem:[#allocation5 + $0x1990] sm:$0xff] }
 0xb6f   :  { %v7953_v50 = vpop.f32.mrf.mxu0  ;;  %v7994_v21 = vpop.f32.mrf.mxu1 }
 0xb70   :  { %v15198_v30 = vadd.f32 %v7953_v50, %v15097_v38  ;;  %v15201_v22 = vadd.f32 %v7994_v21, %v15100_v13  ;;  %v13486_v38 = vld [vmem:[%s15547_s0 + $0x340] sm:$0xff]   ;;  %v13487_v13 = vld [vmem:[%s15547_s0 + $0x348] sm:$0xff]   ;;  %v8257_v21 = vld [vmem:[#allocation5 + $0x19b0] sm:$0xff] }
 0xb71   :  { %v7955_v8 = vpop.f32.mrf.mxu0  ;;  %v7996_v42 = vpop.f32.mrf.mxu1  ;;  %v13289_v1 = vunpack.c.l.bf16 %v13486_v38  ;;  %v13290_v34 = vunpack.c.h.bf16 %v13486_v38  ;;  %v13293_v60 = vunpack.c.l.bf16 %v13487_v13  ;;  %v13294_v44 = vunpack.c.h.bf16 %v13487_v13  ;;  %v13491_v13 = vld [vmem:[%s15547_s0 + $0x368] sm:$0xff]  }
 0xb72   :  { %v15204_v49 = vadd.f32 %v7955_v8, %v15103_v24  ;;  %v15207_v40 = vadd.f32 %v7996_v42, %v15106_v56  ;;  %v8258_v8 = vld [vmem:[#allocation5 + $0x19b8] sm:$0xff]  ;;  %v12552_v38 = vcombine.high %v8253_v61, %v8257_v21  ;;  %v12551_v55 = vcombine.low %v8253_v61, %v8257_v21 }
 0xb73   :  { %v7957_v37 = vpop.f32.mrf.mxu0  ;;  %v7998_v10 = vpop.f32.mrf.mxu1  ;;  %v8792_v24 = vsel %vm120_vm2, %v13289_v1, 0.0  ;;  %v8793_v56 = vsel %vm120_vm2, %v13290_v34, 0.0  ;;  %v8795_v19 = vsel %vm120_vm2, %v13293_v60, 0.0  ;;  %v8797_v11 = vsel %vm120_vm2, %v13294_v44, 0.0  ;;  %v8245_v34 = vld [vmem:[#allocation5 + $0x1950] sm:$0xff]  ;;  %v8226_v61 = vld [vmem:[#allocation5 + $0x18b8] sm:$0xff] }
 0xb74   :  { %v8794_v32 = vadd.f32 %v8793_v56, %v8792_v24  ;;  %v8249_v24 = vld [vmem:[#allocation5 + $0x1970] sm:$0xff]  ;;  %v8246_v56 = vld [vmem:[#allocation5 + $0x1958] sm:$0xff]  ;;  %v13309_v28 = vunpack.c.l.bf16 %v13491_v13  ;;  %v13310_v39 = vunpack.c.h.bf16 %v13491_v13 }
 0xb75   :  { %v7958_v33 = vpop.f32.mrf.mxu0  ;;  %v7999_v17 = vpop.f32.mrf.mxu1  ;;  %v12543_v45 = vcombine.low %v8245_v34, %v8249_v24 }
 0xb76   :  { %v8796_v26 = vadd.f32 %v8795_v19, %v8794_v32  ;;  %v8250_v32 = vld [vmem:[#allocation5 + $0x1978] sm:$0xff] }
 0xb77   :  { %v12546_v54 = vcombine.high %v8246_v56, %v8250_v32  ;;  %v12545_v23 = vcombine.low %v8246_v56, %v8250_v32 }
 0xb78   :  { %v8798_v52 = vadd.f32 %v8797_v11, %v8796_v26 }
 0xb7a   :  { %v8800_v31 = vadd.f32 %v8799_v35, %v8798_v52  ;;  %v12544_v52 = vcombine.high %v8245_v34, %v8249_v24  ;;  %v8237_v35 = vld [vmem:[#allocation5 + $0x1910] sm:$0xff]  ;;  %v8218_v34 = vld [vmem:[#allocation5 + $0x1878] sm:$0xff] }
 0xb7c   :  { %v8802_v51 = vadd.f32 %v8801_v16, %v8800_v31  ;;  %v8238_v31 = vld [vmem:[#allocation5 + $0x1918] sm:$0xff] }
 0xb7d   :  { %v12538_v16 = vcombine.high %v8238_v31, %v8242_v62 }
 0xb8f   :  { %v8035_v41 = vpop.f32.mrf.mxu0  ;;  %v8076_v46 = vpop.f32.mrf.mxu1 }
 0xb90   :  { %v15228_v9 = vadd.f32 %v8035_v41, %v15127_v7  ;;  %v15231_v20 = vadd.f32 %v8076_v46, %v15130_v36  ;;  %v13490_v7 = vld [vmem:[%s15547_s0 + $0x360] sm:$0xff]   ;;  %v8804_v36 = vadd.f32 %v8803_v18, %v8802_v51  ;;  %v8229_v41 = vld [vmem:[#allocation5 + $0x18d0] sm:$0xff]  ;;  %v12535_v18 = vcombine.low %v8237_v35, %v8241_v58 }
 0xb91   :  { %v8037_v2 = vpop.f32.mrf.mxu0  ;;  %v8078_v25 = vpop.f32.mrf.mxu1  ;;  %v13305_v47 = vunpack.c.l.bf16 %v13490_v7  ;;  %v13306_v10 = vunpack.c.h.bf16 %v13490_v7  ;;  %v13492_v46 = vld [vmem:[%s15547_s0 + $0x370] sm:$0xff]   ;;  %v12537_v7 = vcombine.low %v8238_v31, %v8242_v62 }
 0xb92   :  { %v15235_v57 = vadd.f32 %v8037_v2, %v15134_v53  ;;  %v15238_v27 = vadd.f32 %v8078_v25, %v15137_v15  ;;  %v8254_v53 = vld [vmem:[#allocation5 + $0x1998] sm:$0xff]  ;;  %v8806_v15 = vadd.f32 %v8805_v48, %v8804_v36  ;;  %v8233_v51 = vld [vmem:[#allocation5 + $0x18f0] sm:$0xff] }
 0xb93   :  { %v8039_v59 = vpop.f32.mrf.mxu0  ;;  %v8080_v6 = vpop.f32.mrf.mxu1  ;;  %v8807_v33 = vsel %vm120_vm2, %v13305_v47, 0.0  ;;  %v12554_v1 = vcombine.high %v8254_v53, %v8258_v8  ;;  %v12553_v26 = vcombine.low %v8254_v53, %v8258_v8  ;;  %v8809_v11 = vsel %vm120_vm2, %v13306_v10, 0.0  ;;  %v8230_v2 = vld [vmem:[#allocation5 + $0x18d8] sm:$0xff]  ;;  %v8225_v47 = vld [vmem:[#allocation5 + $0x18b0] sm:$0xff] }
 0xb94   :  { %v8808_v44 = vadd.f32 %v8807_v33, %v8806_v15  ;;  %v8234_v25 = vld [vmem:[#allocation5 + $0x18f8] sm:$0xff]  ;;  %v13313_v59 = vunpack.c.l.bf16 %v13492_v46  ;;  %v8813_v6 = vsel %vm120_vm2, %v13310_v39, 0.0  ;;  %v12528_v36 = vcombine.high %v8229_v41, %v8233_v51  ;;  %v8213_v10 = vld [vmem:[#allocation5 + $0x1850] sm:$0xff] }
 0xb95   :  { %v8040_v14 = vpop.f32.mrf.mxu0  ;;  %v8081_v63 = vpop.f32.mrf.mxu1  ;;  %v8222_v48 = vld [vmem:[#allocation5 + $0x1898] sm:$0xff]  ;;  %v12527_v21 = vcombine.low %v8229_v41, %v8233_v51  ;;  %v12529_v53 = vcombine.low %v8230_v2, %v8234_v25  ;;  %v13314_v8 = vunpack.c.h.bf16 %v13492_v46  ;;  %v8927_v46 = vld [vmem:[#allocation5 + $0x1bc0] sm:$0xff] }
 0xb96   :  { %v8810_v29 = vadd.f32 %v8809_v11, %v8808_v44  ;;  %v12530_v14 = vcombine.high %v8230_v2, %v8234_v25  ;;  %v8221_v63 = vld [vmem:[#allocation5 + $0x1890] sm:$0xff]  ;;  %v12521_v24 = vcombine.low %v8222_v48, %v8226_v61  ;;  %v8210_v11 = vld [vmem:[#allocation5 + $0x1838] sm:$0xff]  ;;  %v8931_v51 = vld [vmem:[#allocation5 + $0x1be0] sm:$0xff] }
 0xb97   :  { %v8194_v50 = vpop.f32.mrf.mxu0  ;;  %v12520_v15 = vcombine.high %v8221_v63, %v8225_v47  ;;  %v13493_v33 = vld [vmem:[%s15547_s0 + $0x378] sm:$0xff]   ;;  %v8817_v32 = vsel %vm120_vm2, %v13314_v8, 0.0  ;;  %v8928_v2 = vld [vmem:[#allocation5 + $0x1bc8] sm:$0xff]  ;;  %v12636_v25 = vcombine.low %v8927_v46, %v8931_v51 }
 0xb98   :  { %v8200_v42 = vmax.f32 %v8194_v50, 0.0  ;;  %v13317_v56 = vunpack.c.l.bf16 %v13493_v33 }
 0xb99   :  { %v13706_v37 = vpop.f32.mrf.mxu0 }
 0xb9a   :  { %v15245_v17 = vpack.c.bf16 %v8200_v42, %v8200_v42  ;;  %v8815_v42 = vsel %vm120_vm2, %v13313_v59, 0.0  ;;  %v12522_v37 = vcombine.high %v8222_v48, %v8226_v61  ;;  %v8819_v31 = vsel %vm120_vm2, %v13317_v56, 0.0  ;;  %v8915_v61 = vld [vmem:[#allocation5 + $0x1b60] sm:$0xff] }
 0xb9b   :  { %v8197_v60 = vpop.f32.mrf.mxu0  ;;  %v8899_v56 = vld [vmem:[#allocation5 + $0x1ae0] sm:$0xff] }
 0xb9c   :  { %8620 = vmatmul.mubr.bf16.vlgmr.msra.gmra.mxu1 %v15245_v17  ;;  %8661 = vmatmul.mubr.bf16.vlgmr.msra.gmra.mxu0 %v15245_v17  ;;  %v12519_v60 = vcombine.low %v8221_v63, %v8225_v47  ;;  %v8924_v63 = vld [vmem:[#allocation5 + $0x1ba8] sm:$0xff]  ;;  %v8911_v47 = vld [vmem:[#allocation5 + $0x1b40] sm:$0xff] }
 0xb9d   :  { %8670 = vmatpush1.bf16.msra.mxu1 %v12559_v5  ;;  %8711 = vmatpush1.bf16.msra.mxu0 %v12561_v12  ;;  %v13707_v19 = vpop.f32.mrf.mxu0  ;;  %v8811_v5 = vsel %vm120_vm2, %v13309_v28, 0.0  ;;  %v12536_v12 = vcombine.high %v8237_v35, %v8241_v58  ;;  %v8206_v28 = vld [vmem:[#allocation5 + $0x1818] sm:$0xff]  ;;  %v13318_v58 = vunpack.c.h.bf16 %v13493_v33  ;;  %v8904_v33 = vld [vmem:[#allocation5 + $0x1b08] sm:$0xff] }
 0xb9e   :  { %8671 = vmatprep.subr.bf16.mxu1 %v12552_v38  ;;  %8712 = vmatprep.subr.bf16.mxu0 %v12554_v1  ;;  %v8812_v43 = vadd.f32 %v8811_v5, %v8810_v29  ;;  %v8217_v38 = vld [vmem:[#allocation5 + $0x1870] sm:$0xff]  ;;  %v8214_v1 = vld [vmem:[#allocation5 + $0x1858] sm:$0xff]  ;;  %v12506_v29 = vcombine.high %v8206_v28, %v8210_v11  ;;  %v12505_v39 = vcombine.low %v8206_v28, %v8210_v11 }
 0xb9f   :  { %8701 = vmatprep.mubr.bf16.mxu1 %v13942_v3  ;;  %8742 = vmatprep.mubr.bf16.mxu0 %v13942_v3  ;;  %v12512_v44 = vcombine.high %v8213_v10, %v8217_v38  ;;  %v12514_v19 = vcombine.high %v8214_v1, %v8218_v34  ;;  %v12513_v35 = vcombine.low %v8214_v1, %v8218_v34  ;;  %v8821_v5 = vsel %vm120_vm2, %v13318_v58, 0.0  ;;  %v8888_v58 = vld [vmem:[#allocation5 + $0x1a88] sm:$0xff] }
 0xba0   :  { %v8814_v50 = vadd.f32 %v8813_v6, %v8812_v43  ;;  %v12637_v43 = vcombine.high %v8927_v46, %v8931_v51  ;;  %v12620_v1 = vcombine.low %v8911_v47, %v8915_v61 }
 0xba1   :  { %8672 = vmatpush1.bf16.msra.mxu1 %v12551_v55  ;;  %8713 = vmatpush1.bf16.msra.mxu0 %v12553_v26  ;;  %v8205_v55 = vld [vmem:[#allocation5 + $0x1810] sm:$0xff] }
 0xba2   :  { %8673 = vmatprep.subr.bf16.mxu1 %v12544_v52  ;;  %8714 = vmatprep.subr.bf16.mxu0 %v12546_v54  ;;  %v8816_v13 = vadd.f32 %v8815_v42, %v8814_v50  ;;  %v8209_v26 = vld [vmem:[#allocation5 + $0x1830] sm:$0xff]  ;;  %v12511_v54 = vcombine.low %v8213_v10, %v8217_v38  ;;  %v8912_v50 = vld [vmem:[#allocation5 + $0x1b48] sm:$0xff]  ;;  %v12621_v42 = vcombine.high %v8911_v47, %v8915_v61  ;;  %v8907_v10 = vld [vmem:[#allocation5 + $0x1b20] sm:$0xff] }
 0xba3   :  { %v12504_v62 = vcombine.high %v8205_v55, %v8209_v26  ;;  %v8908_v38 = vld [vmem:[#allocation5 + $0x1b28] sm:$0xff]  ;;  %v15286_v47 = vld [vmem:[#allocation5 + $0x1bd8] sm:$0xff] }
 0xba4   :  { %v8818_v52 = vadd.f32 %v8817_v32, %v8816_v13  ;;  %v8896_v32 = vld [vmem:[#allocation5 + $0x1ac8] sm:$0xff]  ;;  %v15290_v61 = vld [vmem:[#allocation5 + $0x1bf8] sm:$0xff] }
 0xba5   :  { %8674 = vmatpush1.bf16.msra.mxu1 %v12543_v45  ;;  %8715 = vmatpush1.bf16.msra.mxu0 %v12545_v23  ;;  %v12503_v23 = vcombine.low %v8205_v55, %v8209_v26  ;;  %v12614_v55 = vcombine.low %v8904_v33, %v8908_v38 }
 0xba6   :  { %8675 = vmatprep.subr.bf16.mxu1 %v12536_v12  ;;  %8716 = vmatprep.subr.bf16.mxu0 %v12538_v16  ;;  %v8820_v45 = vadd.f32 %v8819_v31, %v8818_v52 }
 0xba8   :  { %v8822_v12 = vadd.f32 %v8821_v5, %v8820_v45  ;;  %v8883_v5 = vld [vmem:[#allocation5 + $0x1a60] sm:$0xff] }
 0xba9   :  { %8676 = vmatpush1.bf16.msra.mxu1 %v12535_v18  ;;  %8717 = vmatpush1.bf16.msra.mxu0 %v12537_v7  ;;  %v8932_v18 = vld [vmem:[#allocation5 + $0x1be8] sm:$0xff]  ;;  %v8923_v7 = vld [vmem:[#allocation5 + $0x1ba0] sm:$0xff] }
 0xbaa   :  { %8677 = vmatprep.subr.bf16.mxu1 %v12528_v36  ;;  %8718 = vmatprep.subr.bf16.mxu0 %v12530_v14  ;;  %v8823_v16 = vmul.f32 0.0625, %v8822_v12  ;;  %v12638_v59 = vcombine.low %v8928_v2, %v8932_v18  ;;  %v12639_v6 = vcombine.high %v8928_v2, %v8932_v18  ;;  %v8920_v14 = vld [vmem:[#allocation5 + $0x1b88] sm:$0xff] }
 0xbab   :  { %v12631_v48 = vcombine.high %v8920_v14, %v8924_v63  ;;  %v12630_v8 = vcombine.low %v8920_v14, %v8924_v63  ;;  %v8880_v12 = vld [vmem:[#allocation5 + $0x1a48] sm:$0xff]  ;;  %v15282_v14 = vld [vmem:[#allocation5 + $0x1bd0] sm:$0xff] }
 0xbac   :  { %v8824_v41 = vpack.c.bf16 %v8823_v16, %v8823_v16  ;;  %v8872_v18 = vld [vmem:[#allocation5 + $0x1a08] sm:$0xff]  ;;  %v15284_v63 = vld [vmem:[#allocation5 + $0x1bf0] sm:$0xff] }
 0xbad   :  { %8678 = vmatpush1.bf16.msra.mxu1 %v12527_v21  ;;  %8719 = vmatpush1.bf16.msra.mxu0 %v12529_v53  ;;  %v8916_v21 = vld [vmem:[#allocation5 + $0x1b68] sm:$0xff] }
 0xbae   :  { %8679 = vmatprep.subr.bf16.mxu1 %v12520_v15  ;;  %8720 = vmatprep.subr.bf16.mxu0 %v12522_v37  ;;  %v12623_v15 = vcombine.high %v8912_v50, %v8916_v21  ;;  %v8903_v37 = vld [vmem:[#allocation5 + $0x1b00] sm:$0xff]  ;;  %v12622_v34 = vcombine.low %v8912_v50, %v8916_v21  ;;  %v12640_v50 = vcombine.low %v15282_v14, %v15284_v63 }
 0xbaf   :  { %v12613_v13 = vcombine.high %v8903_v37, %v8907_v10  ;;  %v12642_v21 = vcombine.low %v15286_v47, %v15290_v61 }
 0xbb1   :  { %8680 = vmatpush1.bf16.msra.mxu1 %v12519_v60  ;;  %8721 = vmatpush1.bf16.msra.mxu0 %v12521_v24  ;;  %v12615_v60 = vcombine.high %v8904_v33, %v8908_v38  ;;  %v8895_v24 = vld [vmem:[#allocation5 + $0x1ac0] sm:$0xff] }
 0xbb2   :  { %8681 = vmatprep.subr.bf16.mxu1 %v12512_v44  ;;  %8722 = vmatprep.subr.bf16.mxu0 %v12514_v19  ;;  %v8900_v44 = vld [vmem:[#allocation5 + $0x1ae8] sm:$0xff]  ;;  %v12612_v19 = vcombine.low %v8903_v37, %v8907_v10  ;;  %v12605_v26 = vcombine.high %v8895_v24, %v8899_v56  ;;  %v12604_v11 = vcombine.low %v8895_v24, %v8899_v56 }
 0xbb3   :  { %v12607_v28 = vcombine.high %v8896_v32, %v8900_v44  ;;  %v12606_v52 = vcombine.low %v8896_v32, %v8900_v44 }
 0xbb5   :  { %8682 = vmatpush1.bf16.msra.mxu1 %v12511_v54  ;;  %8723 = vmatpush1.bf16.msra.mxu0 %v12513_v35  ;;  %v8887_v54 = vld [vmem:[#allocation5 + $0x1a80] sm:$0xff] }
 0xbb6   :  { %8683 = vmatprep.subr.bf16.mxu1 %v12504_v62  ;;  %8724 = vmatprep.subr.bf16.mxu0 %v12506_v29  ;;  %v8891_v35 = vld [vmem:[#allocation5 + $0x1aa0] sm:$0xff]  ;;  %v8892_v62 = vld [vmem:[#allocation5 + $0x1aa8] sm:$0xff] }
 0xbb7   :  { %v12597_v31 = vcombine.high %v8887_v54, %v8891_v35  ;;  %v12596_v29 = vcombine.low %v8887_v54, %v8891_v35  ;;  %v12598_v45 = vcombine.low %v8888_v58, %v8892_v62 }
 0xbb9   :  { %8684 = vmatpush1.bf16.msra.mxu1 %v12503_v23  ;;  %8725 = vmatpush1.bf16.msra.mxu0 %v12505_v39  ;;  %v12599_v23 = vcombine.high %v8888_v58, %v8892_v62  ;;  %v8879_v39 = vld [vmem:[#allocation5 + $0x1a40] sm:$0xff]  ;;  %v13497_v62 = vld [vmem:[%s15547_s0 + $0x398] sm:$0xff]  }
 0xbba   :  { %13708 = vmatprep.subr.bf16.mxu1 %v13940_v0  ;;  %9255 = vmatprep.subr.bf16.mxu0 %v12637_v43  ;;  %v12589_v16 = vcombine.high %v8879_v39, %v8883_v5  ;;  %v12588_v46 = vcombine.low %v8879_v39, %v8883_v5  ;;  %v8875_v43 = vld [vmem:[#allocation5 + $0x1a20] sm:$0xff] }
 0xbbc   :  { %8702 = vmatmul.mubr.bf16.vlgmr.msra.gmra.mxu1 %v15245_v17  ;;  %8743 = vmatmul.mubr.bf16.vlgmr.msra.gmra.mxu0 %v15245_v17  ;;  %v8919_v17 = vld [vmem:[#allocation5 + $0x1b80] sm:$0xff] }
 0xbbd   :  { %13709 = vmatpush3.bf16.msra.mxu1 %v14006_v4  ;;  %13710 = vmatprep.mubr.msk.bf16.mxu1 %vm13941_vm0, %v13940_v0  ;;  %v12629_v36 = vcombine.high %v8919_v17, %v8923_v7  ;;  %v12628_v53 = vcombine.low %v8919_v17, %v8923_v7  ;;  %v8876_v7 = vld [vmem:[#allocation5 + $0x1a28] sm:$0xff] }
 0xbbe   :  { %9287 = vmatprep.mubr.bf16.mxu0 %v13942_v3  ;;  %9296 = vmatprep.subr.bf16.mxu1 %v12639_v6  ;;  %v12582_v6 = vcombine.low %v8872_v18, %v8876_v7 }
 0xbbf   :  { %9256 = vmatpush1.bf16.msra.mxu0 %v12636_v25  ;;  %v8871_v25 = vld [vmem:[#allocation5 + $0x1a00] sm:$0xff] }
 0xbc0   :  { %9257 = vmatprep.subr.bf16.mxu0 %v12629_v36  ;;  %v12581_v17 = vcombine.high %v8871_v25, %v8875_v43  ;;  %v12583_v36 = vcombine.high %v8872_v18, %v8876_v7 }
 0xbc3   :  { %9258 = vmatpush1.bf16.msra.mxu0 %v12628_v53  ;;  %v12643_v53 = vcombine.high %v15286_v47, %v15290_v61 }
 0xbc4   :  { %13711 = vmatmul.mubr.msk.bf16.vlgmr.msra.gmra.mxu1 %vm120_vm2, %v8824_v41  ;;  %9259 = vmatprep.subr.bf16.mxu0 %v12621_v42  ;;  %v8884_v41 = vld [vmem:[#allocation5 + $0x1a68] sm:$0xff] }
 0xbc5   :  { %9328 = vmatprep.mubr.bf16.mxu1 %v13942_v3  ;;  %9297 = vmatpush1.bf16.msra.mxu1 %v12638_v59  ;;  %v12590_v51 = vcombine.low %v8880_v12, %v8884_v41  ;;  %v12591_v2 = vcombine.high %v8880_v12, %v8884_v41  ;;  %v12580_v59 = vcombine.low %v8871_v25, %v8875_v43 }
 0xbc6   :  { %9298 = vmatprep.subr.bf16.mxu1 %v12631_v48  ;;  %v12641_v48 = vcombine.high %v15282_v14, %v15284_v63 }
 0xbc7   :  { %9260 = vmatpush1.bf16.msra.mxu0 %v12620_v1 }
 0xbc8   :  { %9261 = vmatprep.subr.bf16.mxu0 %v12613_v13 }
 0xbc9   :  { %9299 = vmatpush1.bf16.msra.mxu1 %v12630_v8 }
 0xbca   :  { %9300 = vmatprep.subr.bf16.mxu1 %v12623_v15 }
 0xbcb   :  { %9262 = vmatpush1.bf16.msra.mxu0 %v12612_v19 }
 0xbcc   :  { %9263 = vmatprep.subr.bf16.mxu0 %v12605_v26 }
 0xbcd   :  { %9301 = vmatpush1.bf16.msra.mxu1 %v12622_v34 }
 0xbce   :  { %9302 = vmatprep.subr.bf16.mxu1 %v12615_v60 }
 0xbcf   :  { %9264 = vmatpush1.bf16.msra.mxu0 %v12604_v11 }
 0xbd0   :  { %9265 = vmatprep.subr.bf16.mxu0 %v12597_v31 }
 0xbd1   :  { %9303 = vmatpush1.bf16.msra.mxu1 %v12614_v55 }
 0xbd2   :  { %9304 = vmatprep.subr.bf16.mxu1 %v12607_v28  ;;  %v13496_v28 = vld [vmem:[%s15547_s0 + $0x390] sm:$0xff]  }
 0xbd3   :  { %9266 = vmatpush1.bf16.msra.mxu0 %v12596_v29  ;;  %v13330_v58 = vunpack.c.h.bf16 %v13496_v28 }
 0xbd4   :  { %9267 = vmatprep.subr.bf16.mxu0 %v12589_v16 }
 0xbd5   :  { %9305 = vmatpush1.bf16.msra.mxu1 %v12606_v52  ;;  %v13329_v52 = vunpack.c.l.bf16 %v13496_v28 }
 0xbd6   :  { %9306 = vmatprep.subr.bf16.mxu1 %v12599_v23  ;;  %v9469_v23 = vsel %vm120_vm2, %v13330_v58, 0.0 }
 0xbd7   :  { %9268 = vmatpush1.bf16.msra.mxu0 %v12588_v46  ;;  %v9467_v31 = vsel %vm120_vm2, %v13329_v52, 0.0 }
 0xbd8   :  { %9269 = vmatprep.subr.bf16.mxu0 %v12581_v17 }
 0xbd9   :  { %9307 = vmatpush1.bf16.msra.mxu1 %v12598_v45  ;;  %v13333_v45 = vunpack.c.l.bf16 %v13497_v62 }
 0xbda   :  { %9308 = vmatprep.subr.bf16.mxu1 %v12591_v2  ;;  %v13334_v2 = vunpack.c.h.bf16 %v13497_v62  ;;  %v8909_v62 = vld [vmem:[#allocation5 + $0x1b30] sm:$0xff] }
 0xbdb   :  { %9270 = vmatpush1.bf16.msra.mxu0 %v12580_v59  ;;  %v9471_v25 = vsel %vm120_vm2, %v13333_v45, 0.0  ;;  %v8910_v45 = vld [vmem:[#allocation5 + $0x1b38] sm:$0xff] }
 0xbdc   :  { %9337 = vmatprep.subr.bf16.mxu0 %v12641_v48  ;;  %v9473_v48 = vsel %vm120_vm2, %v13334_v2, 0.0 }
 0xbdd   :  { %9309 = vmatpush1.bf16.msra.mxu1 %v12590_v51 }
 0xbde   :  { %9310 = vmatprep.subr.bf16.mxu1 %v12583_v36 }
 0xbe1   :  { %9311 = vmatpush1.bf16.msra.mxu1 %v12582_v6 }
 0xbe2   :  { %9378 = vmatprep.subr.bf16.mxu1 %v12643_v53  ;;  %v8921_v53 = vld [vmem:[#allocation5 + $0x1b90] sm:$0xff] }
 0xc5c   :  { %v8621_v8 = vpop.f32.mrf.mxu1  ;;  %v8662_v42 = vpop.f32.mrf.mxu0 }
 0xc5d   :  { %v15299_v15 = vadd.f32 %v8621_v8, %v15198_v30  ;;  %v15302_v37 = vadd.f32 %v8662_v42, %v15201_v22  ;;  %v13494_v30 = vld [vmem:[%s15547_s0 + $0x380] sm:$0xff]   ;;  %v13495_v22 = vld [vmem:[%s15547_s0 + $0x388] sm:$0xff]   ;;  %v8925_v42 = vld [vmem:[#allocation5 + $0x1bb0] sm:$0xff] }
 0xc5e   :  { %v8623_v10 = vpop.f32.mrf.mxu1  ;;  %v8664_v33 = vpop.f32.mrf.mxu0  ;;  %v13321_v56 = vunpack.c.l.bf16 %v13494_v30  ;;  %v13322_v32 = vunpack.c.h.bf16 %v13494_v30  ;;  %v13325_v44 = vunpack.c.l.bf16 %v13495_v22  ;;  %v13326_v55 = vunpack.c.h.bf16 %v13495_v22  ;;  %v13499_v22 = vld [vmem:[%s15547_s0 + $0x3a8] sm:$0xff]  }
 0xc5f   :  { %v15305_v38 = vadd.f32 %v8623_v10, %v15204_v49  ;;  %v15308_v1 = vadd.f32 %v8664_v33, %v15207_v40  ;;  %v8926_v10 = vld [vmem:[#allocation5 + $0x1bb8] sm:$0xff]  ;;  %v12633_v30 = vcombine.high %v8921_v53, %v8925_v42  ;;  %v12632_v28 = vcombine.low %v8921_v53, %v8925_v42 }
 0xc60   :  { %v8625_v34 = vpop.f32.mrf.mxu1  ;;  %v8666_v13 = vpop.f32.mrf.mxu0  ;;  %v9460_v49 = vsel %vm120_vm2, %v13321_v56, 0.0  ;;  %v9461_v40 = vsel %vm120_vm2, %v13322_v32, 0.0  ;;  %v9463_v26 = vsel %vm120_vm2, %v13325_v44, 0.0  ;;  %v9465_v54 = vsel %vm120_vm2, %v13326_v55, 0.0  ;;  %v8913_v32 = vld [vmem:[#allocation5 + $0x1b50] sm:$0xff]  ;;  %v8894_v53 = vld [vmem:[#allocation5 + $0x1ab8] sm:$0xff] }
 0xc61   :  { %v9462_v19 = vadd.f32 %v9461_v40, %v9460_v49  ;;  %v8917_v49 = vld [vmem:[#allocation5 + $0x1b70] sm:$0xff]  ;;  %v8914_v40 = vld [vmem:[#allocation5 + $0x1b58] sm:$0xff]  ;;  %v13341_v52 = vunpack.c.l.bf16 %v13499_v22  ;;  %v13342_v61 = vunpack.c.h.bf16 %v13499_v22 }
 0xc62   :  { %v8626_v60 = vpop.f32.mrf.mxu1  ;;  %v8667_v24 = vpop.f32.mrf.mxu0  ;;  %v12624_v63 = vcombine.low %v8913_v32, %v8917_v49 }
 0xc63   :  { %v9464_v11 = vadd.f32 %v9463_v26, %v9462_v19  ;;  %v8918_v19 = vld [vmem:[#allocation5 + $0x1b78] sm:$0xff] }
 0xc64   :  { %v12627_v58 = vcombine.high %v8914_v40, %v8918_v19  ;;  %v12626_v47 = vcombine.low %v8914_v40, %v8918_v19 }
 0xc65   :  { %v9466_v35 = vadd.f32 %v9465_v54, %v9464_v11 }
 0xc67   :  { %v9468_v29 = vadd.f32 %v9467_v31, %v9466_v35  ;;  %v12625_v35 = vcombine.high %v8913_v32, %v8917_v49  ;;  %v8905_v31 = vld [vmem:[#allocation5 + $0x1b10] sm:$0xff]  ;;  %v8886_v32 = vld [vmem:[#allocation5 + $0x1a78] sm:$0xff] }
 0xc69   :  { %v9470_v41 = vadd.f32 %v9469_v23, %v9468_v29  ;;  %v8906_v29 = vld [vmem:[#allocation5 + $0x1b18] sm:$0xff] }
 0xc6a   :  { %v12619_v23 = vcombine.high %v8906_v29, %v8910_v45 }
 0xc7c   :  { %v8703_v39 = vpop.f32.mrf.mxu1  ;;  %v8744_v5 = vpop.f32.mrf.mxu0 }
 0xc7d   :  { %v15329_v12 = vadd.f32 %v8703_v39, %v15228_v9  ;;  %v15332_v16 = vadd.f32 %v8744_v5, %v15231_v20  ;;  %v13498_v9 = vld [vmem:[%s15547_s0 + $0x3a0] sm:$0xff]   ;;  %v9472_v20 = vadd.f32 %v9471_v25, %v9470_v41  ;;  %v8897_v39 = vld [vmem:[#allocation5 + $0x1ad0] sm:$0xff]  ;;  %v12616_v25 = vcombine.low %v8905_v31, %v8909_v62 }
 0xc7e   :  { %v8705_v46 = vpop.f32.mrf.mxu1  ;;  %v8746_v51 = vpop.f32.mrf.mxu0  ;;  %v13337_v36 = vunpack.c.l.bf16 %v13498_v9  ;;  %v13338_v13 = vunpack.c.h.bf16 %v13498_v9  ;;  %v13500_v5 = vld [vmem:[%s15547_s0 + $0x3b0] sm:$0xff]   ;;  %v12618_v9 = vcombine.low %v8906_v29, %v8910_v45 }
 0xc7f   :  { %v15336_v43 = vadd.f32 %v8705_v46, %v15235_v57  ;;  %v15339_v18 = vadd.f32 %v8746_v51, %v15238_v27  ;;  %v8922_v57 = vld [vmem:[#allocation5 + $0x1b98] sm:$0xff]  ;;  %v9474_v27 = vadd.f32 %v9473_v48, %v9472_v20  ;;  %v8901_v41 = vld [vmem:[#allocation5 + $0x1af0] sm:$0xff] }
 0xc80   :  { %v8707_v17 = vpop.f32.mrf.mxu1  ;;  %v8748_v7 = vpop.f32.mrf.mxu0  ;;  %v9475_v60 = vsel %vm120_vm2, %v13337_v36, 0.0  ;;  %v12635_v56 = vcombine.high %v8922_v57, %v8926_v10  ;;  %v12634_v11 = vcombine.low %v8922_v57, %v8926_v10  ;;  %v9477_v54 = vsel %vm120_vm2, %v13338_v13, 0.0  ;;  %v8898_v46 = vld [vmem:[#allocation5 + $0x1ad8] sm:$0xff]  ;;  %v8893_v36 = vld [vmem:[#allocation5 + $0x1ab0] sm:$0xff] }
 0xc81   :  { %v9476_v55 = vadd.f32 %v9475_v60, %v9474_v27  ;;  %v8902_v51 = vld [vmem:[#allocation5 + $0x1af8] sm:$0xff]  ;;  %v13345_v17 = vunpack.c.l.bf16 %v13500_v5  ;;  %v9481_v7 = vsel %vm120_vm2, %v13342_v61, 0.0  ;;  %v12609_v20 = vcombine.high %v8897_v39, %v8901_v41  ;;  %v8881_v13 = vld [vmem:[#allocation5 + $0x1a50] sm:$0xff] }
 0xc82   :  { %v8708_v59 = vpop.f32.mrf.mxu1  ;;  %v8749_v6 = vpop.f32.mrf.mxu0  ;;  %v8890_v48 = vld [vmem:[#allocation5 + $0x1a98] sm:$0xff]  ;;  %v12608_v42 = vcombine.low %v8897_v39, %v8901_v41  ;;  %v12610_v57 = vcombine.low %v8898_v46, %v8902_v51  ;;  %v13346_v10 = vunpack.c.h.bf16 %v13500_v5  ;;  %v9595_v5 = vld [vmem:[#allocation5 + $0x1dc0] sm:$0xff] }
 0xc83   :  { %v9478_v14 = vadd.f32 %v9477_v54, %v9476_v55  ;;  %v12611_v59 = vcombine.high %v8898_v46, %v8902_v51  ;;  %v8889_v6 = vld [vmem:[#allocation5 + $0x1a90] sm:$0xff]  ;;  %v12602_v49 = vcombine.low %v8890_v48, %v8894_v53  ;;  %v8878_v54 = vld [vmem:[#allocation5 + $0x1a38] sm:$0xff]  ;;  %v9599_v41 = vld [vmem:[#allocation5 + $0x1de0] sm:$0xff] }
 0xc84   :  { %v8862_v8 = vpop.f32.mrf.mxu1  ;;  %v12601_v27 = vcombine.high %v8889_v6, %v8893_v36  ;;  %v13501_v60 = vld [vmem:[%s15547_s0 + $0x3b8] sm:$0xff]   ;;  %v9485_v19 = vsel %vm120_vm2, %v13346_v10, 0.0  ;;  %v9596_v46 = vld [vmem:[#allocation5 + $0x1dc8] sm:$0xff]  ;;  %v12717_v51 = vcombine.low %v9595_v5, %v9599_v41 }
 0xc85   :  { %v8868_v33 = vmax.f32 %v8862_v8, 0.0  ;;  %v13349_v40 = vunpack.c.l.bf16 %v13501_v60 }
 0xc86   :  { %v13712_v34 = vpop.f32.mrf.mxu1 }
 0xc87   :  { %v15346_v24 = vpack.c.bf16 %v8868_v33, %v8868_v33  ;;  %v9483_v33 = vsel %vm120_vm2, %v13345_v17, 0.0  ;;  %v12603_v34 = vcombine.high %v8890_v48, %v8894_v53  ;;  %v9487_v29 = vsel %vm120_vm2, %v13349_v40, 0.0  ;;  %v9583_v53 = vld [vmem:[#allocation5 + $0x1d60] sm:$0xff] }
 0xc88   :  { %v8865_v44 = vpop.f32.mrf.mxu1  ;;  %v9567_v40 = vld [vmem:[#allocation5 + $0x1ce0] sm:$0xff] }
 0xc89   :  { %9288 = vmatmul.mubr.bf16.vlgmr.msra.gmra.mxu0 %v15346_v24  ;;  %9329 = vmatmul.mubr.bf16.vlgmr.msra.gmra.mxu1 %v15346_v24  ;;  %v12600_v44 = vcombine.low %v8889_v6, %v8893_v36  ;;  %v9592_v6 = vld [vmem:[#allocation5 + $0x1da8] sm:$0xff]  ;;  %v9579_v36 = vld [vmem:[#allocation5 + $0x1d40] sm:$0xff] }
 0xc8a   :  { %9338 = vmatpush1.bf16.msra.mxu0 %v12640_v50  ;;  %9379 = vmatpush1.bf16.msra.mxu1 %v12642_v21  ;;  %v13713_v26 = vpop.f32.mrf.mxu1  ;;  %v9479_v50 = vsel %vm120_vm2, %v13341_v52, 0.0  ;;  %v12617_v21 = vcombine.high %v8905_v31, %v8909_v62  ;;  %v8874_v52 = vld [vmem:[#allocation5 + $0x1a18] sm:$0xff]  ;;  %v13350_v62 = vunpack.c.h.bf16 %v13501_v60  ;;  %v9572_v60 = vld [vmem:[#allocation5 + $0x1d08] sm:$0xff] }
 0xc8b   :  { %9339 = vmatprep.subr.bf16.mxu0 %v12633_v30  ;;  %9380 = vmatprep.subr.bf16.mxu1 %v12635_v56  ;;  %v9480_v2 = vadd.f32 %v9479_v50, %v9478_v14  ;;  %v8885_v30 = vld [vmem:[#allocation5 + $0x1a70] sm:$0xff]  ;;  %v8882_v56 = vld [vmem:[#allocation5 + $0x1a58] sm:$0xff]  ;;  %v12587_v14 = vcombine.high %v8874_v52, %v8878_v54  ;;  %v12586_v61 = vcombine.low %v8874_v52, %v8878_v54 }
 0xc8c   :  { %9369 = vmatprep.mubr.bf16.mxu0 %v13942_v3  ;;  %9410 = vmatprep.mubr.bf16.mxu1 %v13942_v3  ;;  %v12593_v55 = vcombine.high %v8881_v13, %v8885_v30  ;;  %v12595_v26 = vcombine.high %v8882_v56, %v8886_v32  ;;  %v12594_v31 = vcombine.low %v8882_v56, %v8886_v32  ;;  %v9489_v50 = vsel %vm120_vm2, %v13350_v62, 0.0  ;;  %v9556_v62 = vld [vmem:[#allocation5 + $0x1c88] sm:$0xff] }
 0xc8d   :  { %v9482_v8 = vadd.f32 %v9481_v7, %v9480_v2  ;;  %v12718_v2 = vcombine.high %v9595_v5, %v9599_v41  ;;  %v12701_v56 = vcombine.low %v9579_v36, %v9583_v53 }
 0xc8e   :  { %9340 = vmatpush1.bf16.msra.mxu0 %v12632_v28  ;;  %9381 = vmatpush1.bf16.msra.mxu1 %v12634_v11  ;;  %v8873_v28 = vld [vmem:[#allocation5 + $0x1a10] sm:$0xff] }
 0xc8f   :  { %9341 = vmatprep.subr.bf16.mxu0 %v12625_v35  ;;  %9382 = vmatprep.subr.bf16.mxu1 %v12627_v58  ;;  %v9484_v22 = vadd.f32 %v9483_v33, %v9482_v8  ;;  %v8877_v11 = vld [vmem:[#allocation5 + $0x1a30] sm:$0xff]  ;;  %v12592_v58 = vcombine.low %v8881_v13, %v8885_v30  ;;  %v9580_v8 = vld [vmem:[#allocation5 + $0x1d48] sm:$0xff]  ;;  %v12702_v33 = vcombine.high %v9579_v36, %v9583_v53  ;;  %v9575_v13 = vld [vmem:[#allocation5 + $0x1d20] sm:$0xff] }
 0xc90   :  { %v12585_v45 = vcombine.high %v8873_v28, %v8877_v11  ;;  %v9576_v30 = vld [vmem:[#allocation5 + $0x1d28] sm:$0xff]  ;;  %v15387_v36 = vld [vmem:[#allocation5 + $0x1dd8] sm:$0xff] }
 0xc91   :  { %v9486_v35 = vadd.f32 %v9485_v19, %v9484_v22  ;;  %v9564_v19 = vld [vmem:[#allocation5 + $0x1cc8] sm:$0xff]  ;;  %v15391_v53 = vld [vmem:[#allocation5 + $0x1df8] sm:$0xff] }
 0xc92   :  { %9342 = vmatpush1.bf16.msra.mxu0 %v12624_v63  ;;  %9383 = vmatpush1.bf16.msra.mxu1 %v12626_v47  ;;  %v12584_v47 = vcombine.low %v8873_v28, %v8877_v11  ;;  %v12695_v28 = vcombine.low %v9572_v60, %v9576_v30 }
 0xc93   :  { %9343 = vmatprep.subr.bf16.mxu0 %v12617_v21  ;;  %9384 = vmatprep.subr.bf16.mxu1 %v12619_v23  ;;  %v9488_v63 = vadd.f32 %v9487_v29, %v9486_v35 }
 0xc95   :  { %v9490_v21 = vadd.f32 %v9489_v50, %v9488_v63  ;;  %v9551_v50 = vld [vmem:[#allocation5 + $0x1c60] sm:$0xff] }
 0xc96   :  { %9344 = vmatpush1.bf16.msra.mxu0 %v12616_v25  ;;  %9385 = vmatpush1.bf16.msra.mxu1 %v12618_v9  ;;  %v9600_v25 = vld [vmem:[#allocation5 + $0x1de8] sm:$0xff]  ;;  %v9591_v9 = vld [vmem:[#allocation5 + $0x1da0] sm:$0xff] }
 0xc97   :  { %9345 = vmatprep.subr.bf16.mxu0 %v12609_v20  ;;  %9386 = vmatprep.subr.bf16.mxu1 %v12611_v59  ;;  %v9491_v23 = vmul.f32 0.0625, %v9490_v21  ;;  %v12719_v17 = vcombine.low %v9596_v46, %v9600_v25  ;;  %v12720_v7 = vcombine.high %v9596_v46, %v9600_v25  ;;  %v9588_v59 = vld [vmem:[#allocation5 + $0x1d88] sm:$0xff] }
 0xc98   :  { %v12712_v48 = vcombine.high %v9588_v59, %v9592_v6  ;;  %v12711_v10 = vcombine.low %v9588_v59, %v9592_v6  ;;  %v9548_v21 = vld [vmem:[#allocation5 + $0x1c48] sm:$0xff]  ;;  %v15383_v59 = vld [vmem:[#allocation5 + $0x1dd0] sm:$0xff] }
 0xc99   :  { %v9492_v39 = vpack.c.bf16 %v9491_v23, %v9491_v23  ;;  %v9540_v25 = vld [vmem:[#allocation5 + $0x1c08] sm:$0xff]  ;;  %v15385_v6 = vld [vmem:[#allocation5 + $0x1df0] sm:$0xff] }
 0xc9a   :  { %9346 = vmatpush1.bf16.msra.mxu0 %v12608_v42  ;;  %9387 = vmatpush1.bf16.msra.mxu1 %v12610_v57  ;;  %v9584_v42 = vld [vmem:[#allocation5 + $0x1d68] sm:$0xff] }
 0xc9b   :  { %9347 = vmatprep.subr.bf16.mxu0 %v12601_v27  ;;  %9388 = vmatprep.subr.bf16.mxu1 %v12603_v34  ;;  %v12704_v27 = vcombine.high %v9580_v8, %v9584_v42  ;;  %v9571_v34 = vld [vmem:[#allocation5 + $0x1d00] sm:$0xff]  ;;  %v12703_v32 = vcombine.low %v9580_v8, %v9584_v42  ;;  %v12721_v8 = vcombine.low %v15383_v59, %v15385_v6 }
 0xc9c   :  { %v12694_v22 = vcombine.high %v9571_v34, %v9575_v13  ;;  %v12723_v42 = vcombine.low %v15387_v36, %v15391_v53 }
 0xc9e   :  { %9348 = vmatpush1.bf16.msra.mxu0 %v12600_v44  ;;  %9389 = vmatpush1.bf16.msra.mxu1 %v12602_v49  ;;  %v12696_v44 = vcombine.high %v9572_v60, %v9576_v30  ;;  %v9563_v49 = vld [vmem:[#allocation5 + $0x1cc0] sm:$0xff] }
 0xc9f   :  { %9349 = vmatprep.subr.bf16.mxu0 %v12593_v55  ;;  %9390 = vmatprep.subr.bf16.mxu1 %v12595_v26  ;;  %v9568_v55 = vld [vmem:[#allocation5 + $0x1ce8] sm:$0xff]  ;;  %v12693_v26 = vcombine.low %v9571_v34, %v9575_v13  ;;  %v12686_v11 = vcombine.high %v9563_v49, %v9567_v40  ;;  %v12685_v54 = vcombine.low %v9563_v49, %v9567_v40 }
 0xca0   :  { %v12688_v52 = vcombine.high %v9564_v19, %v9568_v55  ;;  %v12687_v35 = vcombine.low %v9564_v19, %v9568_v55 }
 0xca2   :  { %9350 = vmatpush1.bf16.msra.mxu0 %v12592_v58  ;;  %9391 = vmatpush1.bf16.msra.mxu1 %v12594_v31  ;;  %v9555_v58 = vld [vmem:[#allocation5 + $0x1c80] sm:$0xff] }
 0xca3   :  { %9351 = vmatprep.subr.bf16.mxu0 %v12585_v45  ;;  %9392 = vmatprep.subr.bf16.mxu1 %v12587_v14  ;;  %v9559_v31 = vld [vmem:[#allocation5 + $0x1ca0] sm:$0xff]  ;;  %v9560_v45 = vld [vmem:[#allocation5 + $0x1ca8] sm:$0xff] }
 0xca4   :  { %v12678_v29 = vcombine.high %v9555_v58, %v9559_v31  ;;  %v12677_v14 = vcombine.low %v9555_v58, %v9559_v31  ;;  %v12679_v63 = vcombine.low %v9556_v62, %v9560_v45 }
 0xca6   :  { %9352 = vmatpush1.bf16.msra.mxu0 %v12584_v47  ;;  %9393 = vmatpush1.bf16.msra.mxu1 %v12586_v61  ;;  %v12680_v47 = vcombine.high %v9556_v62, %v9560_v45  ;;  %v9547_v61 = vld [vmem:[#allocation5 + $0x1c40] sm:$0xff]  ;;  %v13505_v45 = vld [vmem:[%s15547_s0 + $0x3d8] sm:$0xff]  }
 0xca7   :  { %13714 = vmatprep.subr.bf16.mxu0 %v13940_v0  ;;  %9923 = vmatprep.subr.bf16.mxu1 %v12718_v2  ;;  %v12670_v23 = vcombine.high %v9547_v61, %v9551_v50  ;;  %v12669_v5 = vcombine.low %v9547_v61, %v9551_v50  ;;  %v9543_v2 = vld [vmem:[#allocation5 + $0x1c20] sm:$0xff] }
 0xca9   :  { %9370 = vmatmul.mubr.bf16.vlgmr.msra.gmra.mxu0 %v15346_v24  ;;  %9411 = vmatmul.mubr.bf16.vlgmr.msra.gmra.mxu1 %v15346_v24  ;;  %v9587_v24 = vld [vmem:[#allocation5 + $0x1d80] sm:$0xff] }
 0xcaa   :  { %13715 = vmatpush3.bf16.msra.mxu0 %v14006_v4  ;;  %13716 = vmatprep.mubr.msk.bf16.mxu0 %vm13941_vm0, %v13940_v0  ;;  %v12710_v20 = vcombine.high %v9587_v24, %v9591_v9  ;;  %v12709_v57 = vcombine.low %v9587_v24, %v9591_v9  ;;  %v9544_v9 = vld [vmem:[#allocation5 + $0x1c28] sm:$0xff] }
 0xcab   :  { %9955 = vmatprep.mubr.bf16.mxu1 %v13942_v3  ;;  %9964 = vmatprep.subr.bf16.mxu0 %v12720_v7  ;;  %v12663_v7 = vcombine.low %v9540_v25, %v9544_v9 }
 0xcac   :  { %9924 = vmatpush1.bf16.msra.mxu1 %v12717_v51  ;;  %v9539_v51 = vld [vmem:[#allocation5 + $0x1c00] sm:$0xff] }
 0xcad   :  { %9925 = vmatprep.subr.bf16.mxu1 %v12710_v20  ;;  %v12662_v24 = vcombine.high %v9539_v51, %v9543_v2  ;;  %v12664_v20 = vcombine.high %v9540_v25, %v9544_v9 }
 0xcb0   :  { %9926 = vmatpush1.bf16.msra.mxu1 %v12709_v57  ;;  %v12724_v57 = vcombine.high %v15387_v36, %v15391_v53 }
 0xcb1   :  { %13717 = vmatmul.mubr.msk.bf16.vlgmr.msra.gmra.mxu0 %vm120_vm2, %v9492_v39  ;;  %9927 = vmatprep.subr.bf16.mxu1 %v12702_v33  ;;  %v9552_v39 = vld [vmem:[#allocation5 + $0x1c68] sm:$0xff] }
 0xcb2   :  { %9996 = vmatprep.mubr.bf16.mxu0 %v13942_v3  ;;  %9965 = vmatpush1.bf16.msra.mxu0 %v12719_v17  ;;  %v12671_v41 = vcombine.low %v9548_v21, %v9552_v39  ;;  %v12672_v46 = vcombine.high %v9548_v21, %v9552_v39  ;;  %v12661_v17 = vcombine.low %v9539_v51, %v9543_v2 }
 0xcb3   :  { %9966 = vmatprep.subr.bf16.mxu0 %v12712_v48  ;;  %v12722_v48 = vcombine.high %v15383_v59, %v15385_v6 }
 0xcb4   :  { %9928 = vmatpush1.bf16.msra.mxu1 %v12701_v56 }
 0xcb5   :  { %9929 = vmatprep.subr.bf16.mxu1 %v12694_v22 }
 0xcb6   :  { %9967 = vmatpush1.bf16.msra.mxu0 %v12711_v10 }
 0xcb7   :  { %9968 = vmatprep.subr.bf16.mxu0 %v12704_v27 }
 0xcb8   :  { %9930 = vmatpush1.bf16.msra.mxu1 %v12693_v26 }
 0xcb9   :  { %9931 = vmatprep.subr.bf16.mxu1 %v12686_v11 }
 0xcba   :  { %9969 = vmatpush1.bf16.msra.mxu0 %v12703_v32 }
 0xcbb   :  { %9970 = vmatprep.subr.bf16.mxu0 %v12696_v44 }
 0xcbc   :  { %9932 = vmatpush1.bf16.msra.mxu1 %v12685_v54 }
 0xcbd   :  { %9933 = vmatprep.subr.bf16.mxu1 %v12678_v29 }
 0xcbe   :  { %9971 = vmatpush1.bf16.msra.mxu0 %v12695_v28 }
 0xcbf   :  { %9972 = vmatprep.subr.bf16.mxu0 %v12688_v52  ;;  %v13504_v52 = vld [vmem:[%s15547_s0 + $0x3d0] sm:$0xff]  }
 0xcc0   :  { %9934 = vmatpush1.bf16.msra.mxu1 %v12677_v14  ;;  %v13362_v62 = vunpack.c.h.bf16 %v13504_v52 }
 0xcc1   :  { %9935 = vmatprep.subr.bf16.mxu1 %v12670_v23 }
 0xcc2   :  { %9973 = vmatpush1.bf16.msra.mxu0 %v12687_v35  ;;  %v13361_v35 = vunpack.c.l.bf16 %v13504_v52 }
 0xcc3   :  { %9974 = vmatprep.subr.bf16.mxu0 %v12680_v47  ;;  %v10137_v47 = vsel %vm120_vm2, %v13362_v62, 0.0 }
 0xcc4   :  { %9936 = vmatpush1.bf16.msra.mxu1 %v12669_v5  ;;  %v10135_v29 = vsel %vm120_vm2, %v13361_v35, 0.0 }
 0xcc5   :  { %9937 = vmatprep.subr.bf16.mxu1 %v12662_v24 }
 0xcc6   :  { %9975 = vmatpush1.bf16.msra.mxu0 %v12679_v63  ;;  %v13365_v63 = vunpack.c.l.bf16 %v13505_v45 }
 0xcc7   :  { %9976 = vmatprep.subr.bf16.mxu0 %v12672_v46  ;;  %v13366_v46 = vunpack.c.h.bf16 %v13505_v45  ;;  %v9577_v45 = vld [vmem:[#allocation5 + $0x1d30] sm:$0xff] }
 0xcc8   :  { %9938 = vmatpush1.bf16.msra.mxu1 %v12661_v17  ;;  %v10139_v51 = vsel %vm120_vm2, %v13365_v63, 0.0  ;;  %v9578_v63 = vld [vmem:[#allocation5 + $0x1d38] sm:$0xff] }
 0xcc9   :  { %10005 = vmatprep.subr.bf16.mxu1 %v12722_v48  ;;  %v10141_v48 = vsel %vm120_vm2, %v13366_v46, 0.0 }
 0xcca   :  { %9977 = vmatpush1.bf16.msra.mxu0 %v12671_v41 }
 0xccb   :  { %9978 = vmatprep.subr.bf16.mxu0 %v12664_v20 }
 0xcce   :  { %9979 = vmatpush1.bf16.msra.mxu0 %v12663_v7 }
 0xccf   :  { %10046 = vmatprep.subr.bf16.mxu0 %v12724_v57  ;;  %v9589_v57 = vld [vmem:[#allocation5 + $0x1d90] sm:$0xff] }
 0xd49   :  { %v9289_v10 = vpop.f32.mrf.mxu0  ;;  %v9330_v33 = vpop.f32.mrf.mxu1 }
 0xd4a   :  { %v15400_v27 = vadd.f32 %v9289_v10, %v15299_v15  ;;  %v15403_v34 = vadd.f32 %v9330_v33, %v15302_v37  ;;  %v13502_v15 = vld [vmem:[%s15547_s0 + $0x3c0] sm:$0xff]   ;;  %v13503_v37 = vld [vmem:[%s15547_s0 + $0x3c8] sm:$0xff]   ;;  %v9593_v33 = vld [vmem:[#allocation5 + $0x1db0] sm:$0xff] }
 0xd4b   :  { %v9291_v13 = vpop.f32.mrf.mxu0  ;;  %v9332_v60 = vpop.f32.mrf.mxu1  ;;  %v13353_v40 = vunpack.c.l.bf16 %v13502_v15  ;;  %v13354_v19 = vunpack.c.h.bf16 %v13502_v15  ;;  %v13357_v55 = vunpack.c.l.bf16 %v13503_v37  ;;  %v13358_v28 = vunpack.c.h.bf16 %v13503_v37  ;;  %v13507_v37 = vld [vmem:[%s15547_s0 + $0x3e8] sm:$0xff]  }
 0xd4c   :  { %v15406_v30 = vadd.f32 %v9291_v13, %v15305_v38  ;;  %v15409_v56 = vadd.f32 %v9332_v60, %v15308_v1  ;;  %v9594_v13 = vld [vmem:[#allocation5 + $0x1db8] sm:$0xff]  ;;  %v12714_v15 = vcombine.high %v9589_v57, %v9593_v33  ;;  %v12713_v52 = vcombine.low %v9589_v57, %v9593_v33 }
 0xd4d   :  { %v9293_v32 = vpop.f32.mrf.mxu0  ;;  %v9334_v22 = vpop.f32.mrf.mxu1  ;;  %v10128_v38 = vsel %vm120_vm2, %v13353_v40, 0.0  ;;  %v10129_v1 = vsel %vm120_vm2, %v13354_v19, 0.0  ;;  %v10131_v11 = vsel %vm120_vm2, %v13357_v55, 0.0  ;;  %v10133_v58 = vsel %vm120_vm2, %v13358_v28, 0.0  ;;  %v9581_v19 = vld [vmem:[#allocation5 + $0x1d50] sm:$0xff]  ;;  %v9562_v57 = vld [vmem:[#allocation5 + $0x1cb8] sm:$0xff] }
 0xd4e   :  { %v10130_v26 = vadd.f32 %v10129_v1, %v10128_v38  ;;  %v9585_v38 = vld [vmem:[#allocation5 + $0x1d70] sm:$0xff]  ;;  %v9582_v1 = vld [vmem:[#allocation5 + $0x1d58] sm:$0xff]  ;;  %v13373_v35 = vunpack.c.l.bf16 %v13507_v37  ;;  %v13374_v53 = vunpack.c.h.bf16 %v13507_v37 }
 0xd4f   :  { %v9294_v44 = vpop.f32.mrf.mxu0  ;;  %v9335_v49 = vpop.f32.mrf.mxu1  ;;  %v12705_v6 = vcombine.low %v9581_v19, %v9585_v38 }
 0xd50   :  { %v10132_v54 = vadd.f32 %v10131_v11, %v10130_v26  ;;  %v9586_v26 = vld [vmem:[#allocation5 + $0x1d78] sm:$0xff] }
 0xd51   :  { %v12708_v62 = vcombine.high %v9582_v1, %v9586_v26  ;;  %v12707_v36 = vcombine.low %v9582_v1, %v9586_v26 }
 0xd52   :  { %v10134_v31 = vadd.f32 %v10133_v58, %v10132_v54 }
 0xd54   :  { %v10136_v14 = vadd.f32 %v10135_v29, %v10134_v31  ;;  %v12706_v31 = vcombine.high %v9581_v19, %v9585_v38  ;;  %v9573_v29 = vld [vmem:[#allocation5 + $0x1d10] sm:$0xff]  ;;  %v9554_v19 = vld [vmem:[#allocation5 + $0x1c78] sm:$0xff] }
 0xd56   :  { %v10138_v39 = vadd.f32 %v10137_v47, %v10136_v14  ;;  %v9574_v14 = vld [vmem:[#allocation5 + $0x1d18] sm:$0xff] }
 0xd57   :  { %v12700_v47 = vcombine.high %v9574_v14, %v9578_v63 }
 0xd69   :  { %v9371_v61 = vpop.f32.mrf.mxu0  ;;  %v9412_v50 = vpop.f32.mrf.mxu1 }
 0xd6a   :  { %v15430_v21 = vadd.f32 %v9371_v61, %v15329_v12  ;;  %v15433_v23 = vadd.f32 %v9412_v50, %v15332_v16  ;;  %v13506_v12 = vld [vmem:[%s15547_s0 + $0x3e0] sm:$0xff]   ;;  %v10140_v16 = vadd.f32 %v10139_v51, %v10138_v39  ;;  %v9565_v61 = vld [vmem:[#allocation5 + $0x1cd0] sm:$0xff]  ;;  %v12697_v51 = vcombine.low %v9573_v29, %v9577_v45 }
 0xd6b   :  { %v9373_v5 = vpop.f32.mrf.mxu0  ;;  %v9414_v41 = vpop.f32.mrf.mxu1  ;;  %v13369_v20 = vunpack.c.l.bf16 %v13506_v12  ;;  %v13370_v22 = vunpack.c.h.bf16 %v13506_v12  ;;  %v13508_v50 = vld [vmem:[%s15547_s0 + $0x3f0] sm:$0xff]   ;;  %v12699_v12 = vcombine.low %v9574_v14, %v9578_v63 }
 0xd6c   :  { %v15437_v2 = vadd.f32 %v9373_v5, %v15336_v43  ;;  %v15440_v25 = vadd.f32 %v9414_v41, %v15339_v18  ;;  %v9590_v43 = vld [vmem:[#allocation5 + $0x1d98] sm:$0xff]  ;;  %v10142_v18 = vadd.f32 %v10141_v48, %v10140_v16  ;;  %v9569_v39 = vld [vmem:[#allocation5 + $0x1cf0] sm:$0xff] }
 0xd6d   :  { %v9375_v24 = vpop.f32.mrf.mxu0  ;;  %v9416_v9 = vpop.f32.mrf.mxu1  ;;  %v10143_v44 = vsel %vm120_vm2, %v13369_v20, 0.0  ;;  %v12716_v40 = vcombine.high %v9590_v43, %v9594_v13  ;;  %v12715_v54 = vcombine.low %v9590_v43, %v9594_v13  ;;  %v10145_v58 = vsel %vm120_vm2, %v13370_v22, 0.0  ;;  %v9566_v5 = vld [vmem:[#allocation5 + $0x1cd8] sm:$0xff]  ;;  %v9561_v20 = vld [vmem:[#allocation5 + $0x1cb0] sm:$0xff] }
 0xd6e   :  { %v10144_v28 = vadd.f32 %v10143_v44, %v10142_v18  ;;  %v9570_v41 = vld [vmem:[#allocation5 + $0x1cf8] sm:$0xff]  ;;  %v13377_v24 = vunpack.c.l.bf16 %v13508_v50  ;;  %v10149_v9 = vsel %vm120_vm2, %v13374_v53, 0.0  ;;  %v12690_v16 = vcombine.high %v9565_v61, %v9569_v39  ;;  %v9549_v22 = vld [vmem:[#allocation5 + $0x1c50] sm:$0xff] }
 0xd6f   :  { %v9376_v17 = vpop.f32.mrf.mxu0  ;;  %v9417_v7 = vpop.f32.mrf.mxu1  ;;  %v9558_v48 = vld [vmem:[#allocation5 + $0x1c98] sm:$0xff]  ;;  %v12689_v33 = vcombine.low %v9565_v61, %v9569_v39  ;;  %v12691_v43 = vcombine.low %v9566_v5, %v9570_v41  ;;  %v13378_v13 = vunpack.c.h.bf16 %v13508_v50  ;;  %v10263_v50 = vld [vmem:[#allocation5 + $0x1fc0] sm:$0xff] }
 0xd70   :  { %v10146_v59 = vadd.f32 %v10145_v58, %v10144_v28  ;;  %v12692_v17 = vcombine.high %v9566_v5, %v9570_v41  ;;  %v9557_v7 = vld [vmem:[#allocation5 + $0x1c90] sm:$0xff]  ;;  %v12683_v38 = vcombine.low %v9558_v48, %v9562_v57  ;;  %v9546_v58 = vld [vmem:[#allocation5 + $0x1c38] sm:$0xff]  ;;  %v10267_v39 = vld [vmem:[#allocation5 + $0x1fe0] sm:$0xff] }
 0xd71   :  { %v9530_v10 = vpop.f32.mrf.mxu0  ;;  %v12682_v18 = vcombine.high %v9557_v7, %v9561_v20  ;;  %v13509_v44 = vld [vmem:[%s15547_s0 + $0x3f8] sm:$0xff]   ;;  %v10153_v26 = vsel %vm120_vm2, %v13378_v13, 0.0  ;;  %v10264_v5 = vld [vmem:[#allocation5 + $0x1fc8] sm:$0xff]  ;;  %v12798_v41 = vcombine.low %v10263_v50, %v10267_v39  ;;  %s13943_s0 = smov [#allocation11]  }
 0xd72   :  { %v9536_v60 = vmax.f32 %v9530_v10, 0.0  ;;  %v13381_v1 = vunpack.c.l.bf16 %v13509_v44  ;;  %s11515_s20 = sshll.u32 %s13943_s0, 4  ;;  %s11516_s20 = int_to_ptr.vmem [resolvable:$true] %s11515_s20 }
 0xd73   :  { %v13718_v32 = vpop.f32.mrf.mxu0  ;;  %s13903_s21 = scalar_lea.vmem %s11516_s20, 128  ;;  %p13908_p12 = scmp.lt.s32.totalorder %s11516_s20, %s11516_s20 }
 0xd74   :  { %v15447_v49 = vpack.c.bf16 %v9536_v60, %v9536_v60  ;;  %v10151_v60 = vsel %vm120_vm2, %v13377_v24, 0.0  ;;  %v12684_v32 = vcombine.high %v9558_v48, %v9562_v57  ;;  %v10155_v14 = vsel %vm120_vm2, %v13381_v1, 0.0  ;;  %v10248_v48 = vld [vmem:[#allocation5 + $0x1f48] sm:$0xff]  ;;  %p13904_p11 = scmp.ne.s32.totalorder %s11516_s20, %s13903_s21  ;;  %p13909_p13 = scmp.lt.s32.totalorder %s13903_s21, %s13903_s21 }
 0xd75   :  { %v9533_v55 = vpop.f32.mrf.mxu0  ;;  %v10252_v57 = vld [vmem:[#allocation5 + $0x1f68] sm:$0xff] }
 0xd76   :  { %9956 = vmatmul.mubr.bf16.vlgmr.msra.gmra.mxu1 %v15447_v49  ;;  %9997 = vmatmul.mubr.bf16.vlgmr.msra.gmra.mxu0 %v15447_v49  ;;  %v12681_v55 = vcombine.low %v9557_v7, %v9561_v20  ;;  %v10251_v20 = vld [vmem:[#allocation5 + $0x1f60] sm:$0xff]  ;;  %v12785_v13 = vcombine.high %v10248_v48, %v10252_v57  ;;  %v10236_v1 = vld [vmem:[#allocation5 + $0x1ee8] sm:$0xff]  ;;  %p13910_p0 = por %p13909_p13, %p13908_p12 }
 0xd77   :  { %10006 = vmatpush1.bf16.msra.mxu1 %v12721_v8  ;;  %10047 = vmatpush1.bf16.msra.mxu0 %v12723_v42  ;;  %v13719_v11 = vpop.f32.mrf.mxu0  ;;  %v10147_v8 = vsel %vm120_vm2, %v13373_v35, 0.0  ;;  %v12698_v42 = vcombine.high %v9573_v29, %v9577_v45  ;;  %v9542_v35 = vld [vmem:[#allocation5 + $0x1c18] sm:$0xff]  ;;  %v13382_v45 = vunpack.c.h.bf16 %v13509_v44 }
 0xd78   :  { %10007 = vmatprep.subr.bf16.mxu1 %v12714_v15  ;;  %10048 = vmatprep.subr.bf16.mxu0 %v12716_v40  ;;  %v10148_v46 = vadd.f32 %v10147_v8, %v10146_v59  ;;  %v9553_v15 = vld [vmem:[#allocation5 + $0x1c70] sm:$0xff]  ;;  %v9550_v40 = vld [vmem:[#allocation5 + $0x1c58] sm:$0xff]  ;;  %v12668_v59 = vcombine.high %v9542_v35, %v9546_v58  ;;  %v12667_v53 = vcombine.low %v9542_v35, %v9546_v58  ;;  %v10223_v58 = vld [vmem:[#allocation5 + $0x1e80] sm:$0xff]  ;;  %p13911_p1 = pnand %p13910_p0, %p13904_p11 }
 0xd79   :  { %10037 = vmatprep.mubr.bf16.mxu1 %v13942_v3  ;;  %10078 = vmatprep.mubr.bf16.mxu0 %v13942_v3  ;;  %v12674_v28 = vcombine.high %v9549_v22, %v9553_v15  ;;  %v12676_v11 = vcombine.high %v9550_v40, %v9554_v19  ;;  %v12675_v29 = vcombine.low %v9550_v40, %v9554_v19  ;;  %v10157_v8 = vsel %vm120_vm2, %v13382_v45, 0.0  ;;  %v10228_v45 = vld [vmem:[#allocation5 + $0x1ea8] sm:$0xff] }
 0xd7a   :  { %v10150_v10 = vadd.f32 %v10149_v9, %v10148_v46  ;;  %v12799_v46 = vcombine.high %v10263_v50, %v10267_v39  ;;  %v10207_v39 = vld [vmem:[#allocation5 + $0x1e00] sm:$0xff] }
 0xd7b   :  { %10008 = vmatpush1.bf16.msra.mxu1 %v12713_v52  ;;  %10049 = vmatpush1.bf16.msra.mxu0 %v12715_v54  ;;  %v9541_v52 = vld [vmem:[#allocation5 + $0x1c10] sm:$0xff] }
 0xd7c   :  { %10009 = vmatprep.subr.bf16.mxu1 %v12706_v31  ;;  %10050 = vmatprep.subr.bf16.mxu0 %v12708_v62  ;;  %v10152_v37 = vadd.f32 %v10151_v60, %v10150_v10  ;;  %v9545_v54 = vld [vmem:[#allocation5 + $0x1c30] sm:$0xff]  ;;  %v12673_v62 = vcombine.low %v9549_v22, %v9553_v15  ;;  %v10239_v60 = vld [vmem:[#allocation5 + $0x1f00] sm:$0xff]  ;;  %v10244_v22 = vld [vmem:[#allocation5 + $0x1f28] sm:$0xff]  ;;  %v12784_v15 = vcombine.low %v10248_v48, %v10252_v57 }
 0xd7d   :  { %v12666_v63 = vcombine.high %v9541_v52, %v9545_v54 }
 0xd7e   :  { %v10154_v31 = vadd.f32 %v10153_v26, %v10152_v37  ;;  %v10231_v37 = vld [vmem:[#allocation5 + $0x1ec0] sm:$0xff] }
 0xd7f   :  { %10010 = vmatpush1.bf16.msra.mxu1 %v12705_v6  ;;  %10051 = vmatpush1.bf16.msra.mxu0 %v12707_v36  ;;  %v12665_v36 = vcombine.low %v9541_v52, %v9545_v54 }
 0xd80   :  { %10011 = vmatprep.subr.bf16.mxu1 %v12698_v42  ;;  %10052 = vmatprep.subr.bf16.mxu0 %v12700_v47  ;;  %v10156_v6 = vadd.f32 %v10155_v14, %v10154_v31  ;;  %v10227_v31 = vld [vmem:[#allocation5 + $0x1ea0] sm:$0xff] }
 0xd81   :  { %v12758_v14 = vcombine.low %v10223_v58, %v10227_v31 }
 0xd82   :  { %v10158_v42 = vadd.f32 %v10157_v8, %v10156_v6  ;;  %v10215_v6 = vld [vmem:[#allocation5 + $0x1e40] sm:$0xff] }
 0xd83   :  { %10012 = vmatpush1.bf16.msra.mxu1 %v12697_v51  ;;  %10053 = vmatpush1.bf16.msra.mxu0 %v12699_v12  ;;  %v10268_v51 = vld [vmem:[#allocation5 + $0x1fe8] sm:$0xff]  ;;  %v10259_v12 = vld [vmem:[#allocation5 + $0x1fa0] sm:$0xff] }
 0xd84   :  { %10013 = vmatprep.subr.bf16.mxu1 %v12690_v16  ;;  %10054 = vmatprep.subr.bf16.mxu0 %v12692_v17  ;;  %v10159_v47 = vmul.f32 0.0625, %v10158_v42  ;;  %v12800_v24 = vcombine.low %v10264_v5, %v10268_v51  ;;  %v10256_v16 = vld [vmem:[#allocation5 + $0x1f88] sm:$0xff]  ;;  %v10247_v17 = vld [vmem:[#allocation5 + $0x1f40] sm:$0xff] }
 0xd85   :  { %v12782_v44 = vcombine.low %v10247_v17, %v10251_v20  ;;  %v10220_v42 = vld [vmem:[#allocation5 + $0x1e68] sm:$0xff] }
 0xd86   :  { %v10160_v61 = vpack.c.bf16 %v10159_v47, %v10159_v47 }
 0xd87   :  { %10014 = vmatpush1.bf16.msra.mxu1 %v12689_v33  ;;  %10055 = vmatpush1.bf16.msra.mxu0 %v12691_v43  ;;  %v12783_v43 = vcombine.high %v10247_v17, %v10251_v20  ;;  %v10270_v17 = vld [vmem:[#allocation5 + $0x1ff8] sm:$0xff] }
 0xd88   :  { %10015 = vmatprep.subr.bf16.mxu1 %v12682_v18  ;;  %10056 = vmatprep.subr.bf16.mxu0 %v12684_v32  ;;  %v10243_v18 = vld [vmem:[#allocation5 + $0x1f20] sm:$0xff]  ;;  %v10240_v32 = vld [vmem:[#allocation5 + $0x1f08] sm:$0xff] }
 0xd89   :  { %v12775_v40 = vcombine.high %v10239_v60, %v10243_v18  ;;  %v12777_v19 = vcombine.high %v10240_v32, %v10244_v22  ;;  %v12774_v26 = vcombine.low %v10239_v60, %v10243_v18 }
 0xd8b   :  { %10016 = vmatpush1.bf16.msra.mxu1 %v12681_v55  ;;  %10057 = vmatpush1.bf16.msra.mxu0 %v12683_v38  ;;  %v10235_v55 = vld [vmem:[#allocation5 + $0x1ee0] sm:$0xff]  ;;  %v10232_v38 = vld [vmem:[#allocation5 + $0x1ec8] sm:$0xff] }
 0xd8c   :  { %10017 = vmatprep.subr.bf16.mxu1 %v12674_v28  ;;  %10058 = vmatprep.subr.bf16.mxu0 %v12676_v11  ;;  %v12776_v28 = vcombine.low %v10240_v32, %v10244_v22  ;;  %v12767_v11 = vcombine.high %v10231_v37, %v10235_v55  ;;  %v12769_v52 = vcombine.high %v10232_v38, %v10236_v1 }
 0xd8d   :  { %v12766_v54 = vcombine.low %v10231_v37, %v10235_v55  ;;  %v12768_v35 = vcombine.low %v10232_v38, %v10236_v1 }
 0xd8f   :  { %10018 = vmatpush1.bf16.msra.mxu1 %v12673_v62  ;;  %10059 = vmatpush1.bf16.msra.mxu0 %v12675_v29  ;;  %v10224_v62 = vld [vmem:[#allocation5 + $0x1e88] sm:$0xff]  ;;  %v12759_v29 = vcombine.high %v10223_v58, %v10227_v31  ;;  %v10262_v58 = vld [vmem:[#allocation5 + $0x1fb8] sm:$0xff] }
 0xd90   :  { %10019 = vmatprep.subr.bf16.mxu1 %v12666_v63  ;;  %10060 = vmatprep.subr.bf16.mxu0 %v12668_v59  ;;  %v12760_v63 = vcombine.low %v10224_v62, %v10228_v45  ;;  %v12761_v59 = vcombine.high %v10224_v62, %v10228_v45 }
 0xd93   :  { %10020 = vmatpush1.bf16.msra.mxu1 %v12665_v36  ;;  %10061 = vmatpush1.bf16.msra.mxu0 %v12667_v53  ;;  %v10219_v36 = vld [vmem:[#allocation5 + $0x1e60] sm:$0xff]  ;;  %v10216_v53 = vld [vmem:[#allocation5 + $0x1e48] sm:$0xff] }
 0xd94   :  { %13720 = vmatprep.subr.bf16.mxu1 %v13940_v0  ;;  %10591 = vmatprep.subr.bf16.mxu0 %v12799_v46  ;;  %v12751_v8 = vcombine.high %v10215_v6, %v10219_v36  ;;  %v12750_v47 = vcombine.low %v10215_v6, %v10219_v36  ;;  %v12753_v50 = vcombine.high %v10216_v53, %v10220_v42 }
 0xd96   :  { %10038 = vmatmul.mubr.bf16.vlgmr.msra.gmra.mxu1 %v15447_v49  ;;  %10079 = vmatmul.mubr.bf16.vlgmr.msra.gmra.mxu0 %v15447_v49  ;;  %v10255_v49 = vld [vmem:[#allocation5 + $0x1f80] sm:$0xff] }
 0xd97   :  { %13721 = vmatpush3.bf16.msra.mxu1 %v14006_v4  ;;  %13722 = vmatprep.mubr.msk.bf16.mxu1 %vm13941_vm0, %v13940_v0  ;;  %v12801_v4 = vcombine.high %v10264_v5, %v10268_v51  ;;  %v12791_v9 = vcombine.high %v10255_v49, %v10259_v12  ;;  %v10260_v0 = vld [vmem:[#allocation5 + $0x1fa8] sm:$0xff]  ;;  %v12790_v10 = vcombine.low %v10255_v49, %v10259_v12  ;;  %v10211_v5 = vld [vmem:[#allocation5 + $0x1e20] sm:$0xff] }
 0xd98   :  { %10623 = vmatprep.mubr.bf16.mxu0 %v13942_v3  ;;  %v12793_v7 = vcombine.high %v10256_v16, %v10260_v0  ;;  %10592 = vmatpush1.bf16.msra.mxu0 %v12798_v41  ;;  %v12792_v33 = vcombine.low %v10256_v16, %v10260_v0  ;;  %v10208_v41 = vld [vmem:[#allocation5 + $0x1e08] sm:$0xff]  ;;  %v12743_v46 = vcombine.high %v10207_v39, %v10211_v5  ;;  %v10266_v16 = vld [vmem:[#allocation5 + $0x1fd8] sm:$0xff] }
 0xd99   :  { %10632 = vmatprep.subr.bf16.mxu1 %v12801_v4  ;;  %10593 = vmatprep.subr.bf16.mxu0 %v12791_v9  ;;  %v10212_v51 = vld [vmem:[#allocation5 + $0x1e28] sm:$0xff]  ;;  %v12742_v49 = vcombine.low %v10207_v39, %v10211_v5  ;;  %v10265_v4 = vld [vmem:[#allocation5 + $0x1fd0] sm:$0xff]  ;;  %v12804_v20 = vcombine.low %v10266_v16, %v10270_v17  ;;  %v12805_v48 = vcombine.high %v10266_v16, %v10270_v17  ;;  %v10246_v39 = vld [vmem:[#allocation5 + $0x1f38] sm:$0xff] }
 0xd9a   :  { %v12744_v12 = vcombine.low %v10208_v41, %v10212_v51  ;;  %v10269_v9 = vld [vmem:[#allocation5 + $0x1ff0] sm:$0xff] }
 0xd9b   :  { %v12803_v0 = vcombine.high %v10265_v4, %v10269_v9  ;;  %v10225_v17 = vld [vmem:[#allocation5 + $0x1e90] sm:$0xff] }
 0xd9c   :  { %10594 = vmatpush1.bf16.msra.mxu0 %v12790_v10 }
 0xd9d   :  { %10595 = vmatprep.subr.bf16.mxu0 %v12783_v43 }
 0xd9e   :  { %13723 = vmatmul.mubr.msk.bf16.vlgmr.msra.gmra.mxu1 %vm120_vm2, %v10160_v61  ;;  %v12752_v61 = vcombine.low %v10216_v53, %v10220_v42 }
 0xd9f   :  { %10664 = vmatprep.mubr.bf16.mxu1 %v13942_v3  ;;  %10633 = vmatpush1.bf16.msra.mxu1 %v12800_v24  ;;  %v12745_v24 = vcombine.high %v10208_v41, %v10212_v51 }
 0xda0   :  { %10634 = vmatprep.subr.bf16.mxu1 %v12793_v7  ;;  %10596 = vmatpush1.bf16.msra.mxu0 %v12782_v44  ;;  %v12802_v7 = vcombine.low %v10265_v4, %v10269_v9  ;;  %v10238_v4 = vld [vmem:[#allocation5 + $0x1ef8] sm:$0xff] }
 0xda1   :  { %10597 = vmatprep.subr.bf16.mxu0 %v12775_v40 }
 0xda3   :  { %10635 = vmatpush1.bf16.msra.mxu1 %v12792_v33 }
 0xda4   :  { %10636 = vmatprep.subr.bf16.mxu1 %v12785_v13  ;;  %10598 = vmatpush1.bf16.msra.mxu0 %v12774_v26 }
 0xda5   :  { %10599 = vmatprep.subr.bf16.mxu0 %v12767_v11 }
 0xda7   :  { %10637 = vmatpush1.bf16.msra.mxu1 %v12784_v15 }
 0xda8   :  { %10638 = vmatprep.subr.bf16.mxu1 %v12777_v19  ;;  %10600 = vmatpush1.bf16.msra.mxu0 %v12766_v54 }
 0xda9   :  { %10601 = vmatprep.subr.bf16.mxu0 %v12759_v29 }
 0xdab   :  { %10639 = vmatpush1.bf16.msra.mxu1 %v12776_v28 }
 0xdac   :  { %10640 = vmatprep.subr.bf16.mxu1 %v12769_v52  ;;  %10602 = vmatpush1.bf16.msra.mxu0 %v12758_v14  ;;  %v10257_v52 = vld [vmem:[#allocation5 + $0x1f90] sm:$0xff] }
 0xdad   :  { %10603 = vmatprep.subr.bf16.mxu0 %v12751_v8 }
 0xdaf   :  { %10641 = vmatpush1.bf16.msra.mxu1 %v12768_v35  ;;  %v10261_v35 = vld [vmem:[#allocation5 + $0x1fb0] sm:$0xff] }
 0xdb0   :  { %10642 = vmatprep.subr.bf16.mxu1 %v12761_v59  ;;  %10604 = vmatpush1.bf16.msra.mxu0 %v12750_v47  ;;  %v12795_v29 = vcombine.high %v10257_v52, %v10261_v35  ;;  %v10254_v59 = vld [vmem:[#allocation5 + $0x1f78] sm:$0xff]  ;;  %v12794_v36 = vcombine.low %v10257_v52, %v10261_v35  ;;  %v10241_v47 = vld [vmem:[#allocation5 + $0x1f10] sm:$0xff] }
 0xdb1   :  { %10605 = vmatprep.subr.bf16.mxu0 %v12743_v46 }
 0xdb3   :  { %10643 = vmatpush1.bf16.msra.mxu1 %v12760_v63  ;;  %v10253_v63 = vld [vmem:[#allocation5 + $0x1f70] sm:$0xff] }
 0xdb4   :  { %10644 = vmatprep.subr.bf16.mxu1 %v12753_v50  ;;  %10606 = vmatpush1.bf16.msra.mxu0 %v12742_v49  ;;  %v10242_v50 = vld [vmem:[#allocation5 + $0x1f18] sm:$0xff]  ;;  %v10233_v49 = vld [vmem:[#allocation5 + $0x1ed0] sm:$0xff] }
 0xdb5   :  { %10673 = vmatprep.subr.bf16.mxu0 %v12803_v0  ;;  %v12781_v51 = vcombine.high %v10242_v50, %v10246_v39  ;;  %v12780_v16 = vcombine.low %v10242_v50, %v10246_v39  ;;  %v13755_v50 = vld [vmem:[#allocation8 + $0x58] sm:$0xff]  }
 0xdb6   :  { %v13756_v39 = vld [vmem:[#allocation8 + $0xd8] sm:$0xff]  }
 0xdb7   :  { %10645 = vmatpush1.bf16.msra.mxu1 %v12752_v61  ;;  %v10245_v61 = vld [vmem:[#allocation5 + $0x1f30] sm:$0xff] }
 0xdb8   :  { %10646 = vmatprep.subr.bf16.mxu1 %v12745_v24  ;;  %v12779_v46 = vcombine.high %v10241_v47, %v10245_v61  ;;  %v10234_v24 = vld [vmem:[#allocation5 + $0x1ed8] sm:$0xff]  ;;  %v12778_v9 = vcombine.low %v10241_v47, %v10245_v61  ;;  %v13752_v47 = vld [vmem:[#allocation8 + $0xe0] sm:$0xff]  }
 0xdb9   :  { %v13753_v61 = vld [vmem:[#allocation8 + $0x20] sm:$0xff]  }
 0xdbb   :  { %10647 = vmatpush1.bf16.msra.mxu1 %v12744_v12  ;;  %v10237_v12 = vld [vmem:[#allocation5 + $0x1ef0] sm:$0xff] }
 0xdbc   :  { %10714 = vmatprep.subr.bf16.mxu1 %v12805_v48  ;;  %v12771_v0 = vcombine.high %v10233_v49, %v10237_v12  ;;  %v10230_v48 = vld [vmem:[#allocation5 + $0x1eb8] sm:$0xff] }
 0xe36   :  { %v9957_v57 = vpop.f32.mrf.mxu1  ;;  %v9998_v10 = vpop.f32.mrf.mxu0 }
 0xe37   :  { %v15485_v33 = vadd.f32 %v9957_v57, %v15400_v27  ;;  %v15488_v43 = vadd.f32 %v9998_v10, %v15403_v34  ;;  %v12770_v57 = vcombine.low %v10233_v49, %v10237_v12  ;;  %v12772_v10 = vcombine.low %v10234_v24, %v10238_v4  ;;  %v13761_v49 = vld [vmem:[#allocation8 + $0x10] sm:$0xff]  }
 0xe38   :  { %v9959_v13 = vpop.f32.mrf.mxu1  ;;  %v10000_v60 = vpop.f32.mrf.mxu0  ;;  %v13762_v12 = vld [vmem:[#allocation8 + $0x90] sm:$0xff]  }
 0xe39   :  { %v15491_v18 = vadd.f32 %v9959_v13, %v15406_v30  ;;  %v15494_v32 = vadd.f32 %v10000_v60, %v15409_v56 }
 0xe3a   :  { %v9961_v22 = vpop.f32.mrf.mxu1  ;;  %v10002_v44 = vpop.f32.mrf.mxu0 }
 0xe3b   :  { %v10217_v22 = vld [vmem:[#allocation5 + $0x1e50] sm:$0xff] }
 0xe3c   :  { %v9962_v15 = vpop.f32.mrf.mxu1  ;;  %v10003_v40 = vpop.f32.mrf.mxu0  ;;  %v10221_v44 = vld [vmem:[#allocation5 + $0x1e70] sm:$0xff] }
 0xe3d   :  { %v10218_v15 = vld [vmem:[#allocation5 + $0x1e58] sm:$0xff]  ;;  %v12754_v52 = vcombine.low %v10217_v22, %v10221_v44 }
 0xe3e   :  { %v10222_v40 = vld [vmem:[#allocation5 + $0x1e78] sm:$0xff] }
 0xe56   :  { %v10039_v19 = vpop.f32.mrf.mxu1  ;;  %v10080_v37 = vpop.f32.mrf.mxu0 }
 0xe57   :  { %v15497_v27 = vadd.f32 %v10039_v19, %v15430_v21  ;;  %v15500_v34 = vadd.f32 %v10080_v37, %v15433_v23  ;;  %v10258_v21 = vld [vmem:[#allocation5 + $0x1f98] sm:$0xff] }
 0xe58   :  { %v10041_v55 = vpop.f32.mrf.mxu1  ;;  %v10082_v38 = vpop.f32.mrf.mxu0  ;;  %v12797_v45 = vcombine.high %v10258_v21, %v10262_v58  ;;  %v12796_v53 = vcombine.low %v10258_v21, %v10262_v58 }
 0xe59   :  { %v15503_v30 = vadd.f32 %v10041_v55, %v15437_v2  ;;  %v15506_v56 = vadd.f32 %v10082_v38, %v15440_v25  ;;  %v10249_v2 = vld [vmem:[#allocation5 + $0x1f50] sm:$0xff]  ;;  %v10250_v25 = vld [vmem:[#allocation5 + $0x1f58] sm:$0xff]  ;;  %v12755_v55 = vcombine.high %v10217_v22, %v10221_v44  ;;  %v12757_v38 = vcombine.high %v10218_v15, %v10222_v40  ;;  %v15520_v22 = vld [vmem:[#allocation7] sm:$0xff] }
 0xe5a   :  { %v10043_v1 = vpop.f32.mrf.mxu1  ;;  %v10084_v26 = vpop.f32.mrf.mxu0  ;;  %v12787_v8 = vcombine.high %v10249_v2, %v10253_v63  ;;  %v12789_v42 = vcombine.high %v10250_v25, %v10254_v59  ;;  %v12786_v5 = vcombine.low %v10249_v2, %v10253_v63  ;;  %v12788_v41 = vcombine.low %v10250_v25, %v10254_v59  ;;  %v13742_v2 = vld [vmem:[#allocation8 + $0xb8] sm:$0xff]   ;;  %v13744_v63 = vld [vmem:[#allocation8 + $0xf0] sm:$0xff]  }
 0xe5b   :  { %v10209_v1 = vld [vmem:[#allocation5 + $0x1e10] sm:$0xff]  ;;  %v13745_v25 = vld [vmem:[#allocation8 + $0x30] sm:$0xff]  }
 0xe5c   :  { %v10044_v28 = vpop.f32.mrf.mxu1  ;;  %v10085_v11 = vpop.f32.mrf.mxu0  ;;  %v10213_v26 = vld [vmem:[#allocation5 + $0x1e30] sm:$0xff]  ;;  %v13746_v59 = vld [vmem:[#allocation8 + $0xb0] sm:$0xff]  }
 0xe5d   :  { %v10210_v28 = vld [vmem:[#allocation5 + $0x1e18] sm:$0xff]  ;;  %v12747_v35 = vcombine.high %v10209_v1, %v10213_v26  ;;  %v12746_v58 = vcombine.low %v10209_v1, %v10213_v26 }
 0xe5e   :  { %v10198_v54 = vpop.f32.mrf.mxu1  ;;  %v10214_v11 = vld [vmem:[#allocation5 + $0x1e38] sm:$0xff] }
 0xe5f   :  { %v10204_v31 = vmax.f32 %v10198_v54, 0.0  ;;  %v12756_v54 = vcombine.low %v10218_v15, %v10222_v40  ;;  %v12749_v21 = vcombine.high %v10210_v28, %v10214_v11 }
 0xe60   :  { %v13724_v23 = vpop.f32.mrf.mxu1 }
 0xe61   :  { %v15508_v62 = vpack.c.bf16 %v10204_v31, %v10204_v31  ;;  %v12748_v31 = vcombine.low %v10210_v28, %v10214_v11  ;;  %v13739_v23 = vld [vmem:[#allocation8 + $0x78] sm:$0xff]  }
 0xe62   :  { %v10201_v14 = vpop.f32.mrf.mxu1 }
 0xe63   :  { %10624 = vmatmul.mubr.bf16.vlgmr.msra.gmra.mxu0 %v15508_v62  ;;  %10665 = vmatmul.mubr.bf16.vlgmr.msra.gmra.mxu1 %v15508_v62  ;;  %v13743_v14 = vld [vmem:[#allocation8 + $0x70] sm:$0xff]  }
 0xe64   :  { %10674 = vmatpush1.bf16.msra.mxu0 %v12802_v7  ;;  %10715 = vmatpush1.bf16.msra.mxu1 %v12804_v20  ;;  %v13725_v6 = vpop.f32.mrf.mxu1  ;;  %v10229_v7 = vld [vmem:[#allocation5 + $0x1eb0] sm:$0xff]  ;;  %v10226_v20 = vld [vmem:[#allocation5 + $0x1e98] sm:$0xff] }
 0xe65   :  { %10675 = vmatprep.subr.bf16.mxu0 %v12795_v29  ;;  %10716 = vmatprep.subr.bf16.mxu1 %v12797_v45  ;;  %v12763_v13 = vcombine.high %v10225_v17, %v10229_v7  ;;  %v12765_v60 = vcombine.high %v10226_v20, %v10230_v48  ;;  %v12762_v19 = vcombine.low %v10225_v17, %v10229_v7  ;;  %v13740_v29 = vld [vmem:[#allocation8 + $0xf8] sm:$0xff]   ;;  %v13747_v6 = vld [vmem:[#allocation8 + $0x68] sm:$0xff]   ;;  %v13769_v17 = vld [vmem:[#allocation8] sm:$0xff]  }
 0xe66   :  { %10705 = vmatprep.mubr.bf16.mxu0 %v13942_v3  ;;  %10746 = vmatprep.mubr.bf16.mxu1 %v13942_v3  ;;  %v12773_v3 = vcombine.high %v10234_v24, %v10238_v4  ;;  %v12764_v37 = vcombine.low %v10226_v20, %v10230_v48  ;;  %v13741_v45 = vld [vmem:[#allocation8 + $0x38] sm:$0xff]   ;;  %v13763_v24 = vld [vmem:[#allocation8 + $0x48] sm:$0xff]   ;;  %v13770_v7 = vld [vmem:[#allocation8 + $0x80] sm:$0xff]  }
 0xe67   :  { %v13764_v4 = vld [vmem:[#allocation8 + $0xc8] sm:$0xff]   ;;  %v13771_v20 = vld [vmem:[#allocation8 + $0x178] sm:$0xff]  }
 0xe68   :  { %10676 = vmatpush1.bf16.msra.mxu0 %v12794_v36  ;;  %10717 = vmatpush1.bf16.msra.mxu1 %v12796_v53  ;;  %v13748_v36 = vld [vmem:[#allocation8 + $0xe8] sm:$0xff]   ;;  %v13772_v48 = vld [vmem:[#allocation8 + $0x1f8] sm:$0xff]  }
 0xe69   :  { %10677 = vmatprep.subr.bf16.mxu0 %v12787_v8  ;;  %10718 = vmatprep.subr.bf16.mxu1 %v12789_v42  ;;  %v13749_v53 = vld [vmem:[#allocation8 + $0x28] sm:$0xff]   ;;  %v13751_v42 = vld [vmem:[#allocation8 + $0x60] sm:$0xff]  }
 0xe6a   :  { %v13750_v8 = vld [vmem:[#allocation8 + $0xa8] sm:$0xff]  }
 0xe6c   :  { %10678 = vmatpush1.bf16.msra.mxu0 %v12786_v5  ;;  %10719 = vmatpush1.bf16.msra.mxu1 %v12788_v41  ;;  %v13757_v5 = vld [vmem:[#allocation8 + $0x18] sm:$0xff]  }
 0xe6d   :  { %10679 = vmatprep.subr.bf16.mxu0 %v12779_v46  ;;  %10720 = vmatprep.subr.bf16.mxu1 %v12781_v51  ;;  %v13758_v41 = vld [vmem:[#allocation8 + $0x98] sm:$0xff]   ;;  %v13759_v46 = vld [vmem:[#allocation8 + $0x50] sm:$0xff]  }
 0xe6e   :  { %v13760_v51 = vld [vmem:[#allocation8 + $0xd0] sm:$0xff]  }
 0xe70   :  { %10680 = vmatpush1.bf16.msra.mxu0 %v12778_v9  ;;  %10721 = vmatpush1.bf16.msra.mxu1 %v12780_v16  ;;  %v13765_v9 = vld [vmem:[#allocation8 + $0x8] sm:$0xff]  }
 0xe71   :  { %10681 = vmatprep.subr.bf16.mxu0 %v12771_v0  ;;  %10722 = vmatprep.subr.bf16.mxu1 %v12773_v3  ;;  %v13766_v16 = vld [vmem:[#allocation8 + $0x88] sm:$0xff]   ;;  %v13767_v0 = vld [vmem:[#allocation8 + $0x40] sm:$0xff]  }
 0xe72   :  { %v13768_v3 = vld [vmem:[#allocation8 + $0xc0] sm:$0xff]  }
 0xe74   :  { %10682 = vmatpush1.bf16.msra.mxu0 %v12770_v57  ;;  %10723 = vmatpush1.bf16.msra.mxu1 %v12772_v10  ;;  %v10765_v57 = vlaneseq }
 0xe75   :  { %10683 = vmatprep.subr.bf16.mxu0 %v12763_v13  ;;  %10724 = vmatprep.subr.bf16.mxu1 %v12765_v60 }
 0xe76   :  { %v15516_v10 = vshrl.u32 %v10765_v57, 7 }
 0xe78   :  { %10684 = vmatpush1.bf16.msra.mxu0 %v12762_v19  ;;  %10725 = vmatpush1.bf16.msra.mxu1 %v12764_v37  ;;  %v10767_v13 = vsub.s32 0, %v15516_v10  ;;  %v10775_v60 = vsub.s32 2, %v15516_v10  ;;  %v10771_v44 = vsub.s32 1, %v15516_v10  ;;  %v10779_v15 = vsub.s32 3, %v15516_v10 }
 0xe79   :  { %10685 = vmatprep.subr.bf16.mxu0 %v12755_v55  ;;  %10726 = vmatprep.subr.bf16.mxu1 %v12757_v38  ;;  %v10795_v57 = vsub.s32 7, %v15516_v10 }
 0xe7a   :  { %v10768_v40 = vrot.slane %v15520_v22, %v10767_v13  ;;  %v10776_v19 = vrot.slane %v15520_v22, %v10775_v60  ;;  %v10772_v26 = vrot.slane %v15520_v22, %v10771_v44  ;;  %v10780_v28 = vrot.slane %v15520_v22, %v10779_v15  ;;  %v13795_v13 = vld [vmem:[#allocation8 + $0x148] sm:$0xff]  }
 0xe7b   :  { %v13796_v60 = vld [vmem:[#allocation8 + $0x1c8] sm:$0xff]  }
 0xe7c   :  { %10686 = vmatpush1.bf16.msra.mxu0 %v12754_v52  ;;  %10727 = vmatpush1.bf16.msra.mxu1 %v12756_v54 }
 0xe7d   :  { %10687 = vmatprep.subr.bf16.mxu0 %v12747_v35  ;;  %10728 = vmatprep.subr.bf16.mxu1 %v12749_v21 }
 0xe80   :  { %10688 = vmatpush1.bf16.msra.mxu0 %v12746_v58  ;;  %10729 = vmatpush1.bf16.msra.mxu1 %v12748_v31 }
 0xe81   :  { %13542 = vmatprep.subr.bf16.mxu0 %v13739_v23  ;;  %13564 = vmatprep.subr.bf16.mxu1 %v13740_v29 }
 0xe83   :  { %10706 = vmatmul.mubr.bf16.vlgmr.msra.gmra.mxu0 %v15508_v62  ;;  %10747 = vmatmul.mubr.bf16.vlgmr.msra.gmra.mxu1 %v15508_v62  ;;  %v13754_v62 = vld [vmem:[#allocation8 + $0xa0] sm:$0xff]  }
 0xe84   :  { %13543 = vmatpush3.bf16.msra.mxu0 %v13741_v45  ;;  %13565 = vmatpush3.bf16.msra.mxu1 %v13742_v2 }
 0xe85   :  { %13544 = vmatprep.subr.bf16.mxu0 %v13743_v14  ;;  %13566 = vmatprep.subr.bf16.mxu1 %v13744_v63 }
 0xe88   :  { %13545 = vmatpush3.bf16.msra.mxu0 %v13745_v25  ;;  %13567 = vmatpush3.bf16.msra.mxu1 %v13746_v59 }
 0xe89   :  { %13546 = vmatprep.subr.bf16.mxu0 %v13747_v6  ;;  %13568 = vmatprep.subr.bf16.mxu1 %v13748_v36  ;;  %v13773_v36 = vld [vmem:[#allocation8 + $0x138] sm:$0xff]  }
 0xe8c   :  { %13547 = vmatpush3.bf16.msra.mxu0 %v13749_v53  ;;  %13569 = vmatpush3.bf16.msra.mxu1 %v13750_v8  ;;  %v13774_v53 = vld [vmem:[#allocation8 + $0x1b8] sm:$0xff]  }
 0xe8d   :  { %13548 = vmatprep.subr.bf16.mxu0 %v13751_v42  ;;  %13570 = vmatprep.subr.bf16.mxu1 %v13752_v47  ;;  %v13775_v47 = vld [vmem:[#allocation8 + $0x170] sm:$0xff]  }
 0xe90   :  { %13549 = vmatpush3.bf16.msra.mxu0 %v13753_v61  ;;  %13571 = vmatpush3.bf16.msra.mxu1 %v13754_v62  ;;  %v13778_v61 = vld [vmem:[#allocation8 + $0x1b0] sm:$0xff]   ;;  %v13779_v62 = vld [vmem:[#allocation8 + $0x168] sm:$0xff]  }
 0xe91   :  { %13550 = vmatprep.subr.bf16.mxu0 %v13755_v50  ;;  %13572 = vmatprep.subr.bf16.mxu1 %v13756_v39  ;;  %v13780_v50 = vld [vmem:[#allocation8 + $0x1e8] sm:$0xff]  }
 0xe92   :  { %v13781_v39 = vld [vmem:[#allocation8 + $0x128] sm:$0xff]  }
 0xe94   :  { %13551 = vmatpush3.bf16.msra.mxu0 %v13757_v5  ;;  %13573 = vmatpush3.bf16.msra.mxu1 %v13758_v41  ;;  %v13782_v5 = vld [vmem:[#allocation8 + $0x1a8] sm:$0xff]   ;;  %v13783_v41 = vld [vmem:[#allocation8 + $0x160] sm:$0xff]  }
 0xe95   :  { %13552 = vmatprep.subr.bf16.mxu0 %v13759_v46  ;;  %13574 = vmatprep.subr.bf16.mxu1 %v13760_v51  ;;  %v13784_v46 = vld [vmem:[#allocation8 + $0x1e0] sm:$0xff]  }
 0xe96   :  { %v13785_v51 = vld [vmem:[#allocation8 + $0x120] sm:$0xff]  }
 0xe98   :  { %13553 = vmatpush3.bf16.msra.mxu0 %v13761_v49  ;;  %13575 = vmatpush3.bf16.msra.mxu1 %v13762_v12  ;;  %v13786_v49 = vld [vmem:[#allocation8 + $0x1a0] sm:$0xff]   ;;  %v13787_v12 = vld [vmem:[#allocation8 + $0x158] sm:$0xff]  }
 0xe99   :  { %13554 = vmatprep.subr.bf16.mxu0 %v13763_v24  ;;  %13576 = vmatprep.subr.bf16.mxu1 %v13764_v4  ;;  %v13788_v24 = vld [vmem:[#allocation8 + $0x1d8] sm:$0xff]  }
 0xe9a   :  { %v13789_v4 = vld [vmem:[#allocation8 + $0x118] sm:$0xff]  }
 0xe9c   :  { %13555 = vmatpush3.bf16.msra.mxu0 %v13765_v9  ;;  %13577 = vmatpush3.bf16.msra.mxu1 %v13766_v16  ;;  %v13790_v9 = vld [vmem:[#allocation8 + $0x198] sm:$0xff]   ;;  %v13791_v16 = vld [vmem:[#allocation8 + $0x150] sm:$0xff]  }
 0xe9d   :  { %13556 = vmatprep.subr.bf16.mxu0 %v13767_v0  ;;  %13578 = vmatprep.subr.bf16.mxu1 %v13768_v3  ;;  %v13792_v0 = vld [vmem:[#allocation8 + $0x1d0] sm:$0xff]   ;;  %v10783_v3 = vsub.s32 4, %v15516_v10 }
 0xe9f   :  { %v10784_v44 = vrot.slane %v15520_v22, %v10783_v3 }
 0xea0   :  { %13557 = vmatpush3.bf16.msra.mxu0 %v13769_v17  ;;  %13579 = vmatpush3.bf16.msra.mxu1 %v13770_v7  ;;  %v10791_v17 = vsub.s32 6, %v15516_v10  ;;  %v10787_v7 = vsub.s32 5, %v15516_v10  ;;  %v10796_v10 = vrot.slane %v15520_v22, %v10795_v57 }
 0xea1   :  { %13586 = vmatprep.subr.bf16.mxu0 %v13771_v20  ;;  %13608 = vmatprep.subr.bf16.mxu1 %v13772_v48  ;;  %v13793_v20 = vld [vmem:[#allocation8 + $0x110] sm:$0xff]  }
 0xea2   :  { %v13794_v48 = vld [vmem:[#allocation8 + $0x190] sm:$0xff]   ;;  %v10792_v15 = vrot.slane %v15520_v22, %v10791_v17 }
 0xf23   :  { %v10625_v37 = vpop.f32.mrf.mxu0  ;;  %v10666_v55 = vpop.f32.mrf.mxu1 }
 0xf24   :  { %v10755_v38 = vadd.f32 %v10625_v37, %v15485_v33  ;;  %v10757_v1 = vadd.f32 %v10666_v55, %v15488_v43  ;;  %v10788_v37 = vrot.slane %v15520_v22, %v10787_v7  ;;  %v13801_v22 = vld [vmem:[#allocation8 + $0x100] sm:$0xff]  }
 0xf25   :  { %v10627_v11 = vpop.f32.mrf.mxu0  ;;  %v10668_v52 = vpop.f32.mrf.mxu1 }
 0xf26   :  { %v10805_v54 = vadd.f32 %v10768_v40, %v10755_v38  ;;  %v10807_v35 = vadd.f32 %v10776_v19, %v10757_v1  ;;  %v10756_v21 = vadd.f32 %v10627_v11, %v15491_v18  ;;  %v10758_v58 = vadd.f32 %v10668_v52, %v15494_v32  ;;  %v13776_v18 = vld [vmem:[#allocation8 + $0x1f0] sm:$0xff]   ;;  %v13797_v1 = vld [vmem:[#allocation8 + $0x108] sm:$0xff]   ;;  %v13799_v52 = vld [vmem:[#allocation8 + $0x140] sm:$0xff]  }
 0xf27   :  { %v10629_v31 = vpop.f32.mrf.mxu0  ;;  %v10670_v23 = vpop.f32.mrf.mxu1  ;;  %v13777_v32 = vld [vmem:[#allocation8 + $0x130] sm:$0xff]  }
 0xf28   :  { %v10806_v29 = vadd.f32 %v10772_v26, %v10756_v21  ;;  %v10808_v45 = vadd.f32 %v10780_v28, %v10758_v58  ;;  %v10813_v2 = vmax.f32 %v10805_v54, 0.0  ;;  %v10815_v33 = vmax.f32 %v10807_v35, 0.0  ;;  %v13798_v26 = vld [vmem:[#allocation8 + $0x188] sm:$0xff]   ;;  %v13800_v54 = vld [vmem:[#allocation8 + $0x1c0] sm:$0xff]  }
 0xf29   :  { %v10630_v14 = vpop.f32.mrf.mxu0  ;;  %v10671_v43 = vpop.f32.mrf.mxu1 }
 0xf2a   :  { %v10814_v63 = vmax.f32 %v10806_v29, 0.0  ;;  %v10816_v25 = vmax.f32 %v10808_v45, 0.0  ;;  %v10821_v8 = vpack.c.bf16 %v10813_v2, %v10813_v2  ;;  %v10823_v42 = vpack.c.bf16 %v10815_v33, %v10815_v33  ;;  %v13802_v45 = vld [vmem:[#allocation8 + $0x180] sm:$0xff]  }
 0xf2c   :  { %v10822_v59 = vpack.c.bf16 %v10814_v63, %v10814_v63  ;;  %v10824_v6 = vpack.c.bf16 %v10816_v25, %v10816_v25 }
 0xf2e   :  { %11380 = vmatprep.mubr.bf16.mxu0 %v10822_v59  ;;  %11420 = vmatprep.mubr.bf16.mxu1 %v10824_v6 }
 0xf2f   :  { %11381 = vmatmul.mubr.bf16.vlgmr.msra.gmra.mxu0 %v10821_v8  ;;  %11421 = vmatmul.mubr.bf16.vlgmr.msra.gmra.mxu1 %v10823_v42 }
 0xf30   :  { %13587 = vmatpush3.bf16.msra.mxu0 %v13773_v36  ;;  %13609 = vmatpush3.bf16.msra.mxu1 %v13774_v53 }
 0xf31   :  { %13588 = vmatprep.subr.bf16.mxu0 %v13775_v47  ;;  %13610 = vmatprep.subr.bf16.mxu1 %v13776_v18 }
 0xf34   :  { %13589 = vmatpush3.bf16.msra.mxu0 %v13777_v32  ;;  %13611 = vmatpush3.bf16.msra.mxu1 %v13778_v61 }
 0xf35   :  { %13590 = vmatprep.subr.bf16.mxu0 %v13779_v62  ;;  %13612 = vmatprep.subr.bf16.mxu1 %v13780_v50  ;;  %v12806_v50 = vld [vmem:[#allocation10] ss:$0 sm:$0xff] }
 0xf38   :  { %13591 = vmatpush3.bf16.msra.mxu0 %v13781_v39  ;;  %13613 = vmatpush3.bf16.msra.mxu1 %v13782_v5 }
 0xf39   :  { %13592 = vmatprep.subr.bf16.mxu0 %v13783_v41  ;;  %13614 = vmatprep.subr.bf16.mxu1 %v13784_v46 }
 0xf3c   :  { %13593 = vmatpush3.bf16.msra.mxu0 %v13785_v51  ;;  %13615 = vmatpush3.bf16.msra.mxu1 %v13786_v49 }
 0xf3d   :  { %13594 = vmatprep.subr.bf16.mxu0 %v13787_v12  ;;  %13616 = vmatprep.subr.bf16.mxu1 %v13788_v24 }
 0xf40   :  { %13595 = vmatpush3.bf16.msra.mxu0 %v13789_v4  ;;  %13617 = vmatpush3.bf16.msra.mxu1 %v13790_v9 }
 0xf41   :  { %13596 = vmatprep.subr.bf16.mxu0 %v13791_v16  ;;  %13618 = vmatprep.subr.bf16.mxu1 %v13792_v0 }
 0xf43   :  { %v10707_v40 = vpop.f32.mrf.mxu0  ;;  %v10748_v19 = vpop.f32.mrf.mxu1 }
 0xf44   :  { %v10759_v55 = vadd.f32 %v10707_v40, %v15497_v27  ;;  %v10761_v38 = vadd.f32 %v10748_v19, %v15500_v34  ;;  %13597 = vmatpush3.bf16.msra.mxu0 %v13793_v20  ;;  %13619 = vmatpush3.bf16.msra.mxu1 %v13794_v48 }
 0xf45   :  { %v10709_v28 = vpop.f32.mrf.mxu0  ;;  %v10750_v11 = vpop.f32.mrf.mxu1  ;;  %13598 = vmatprep.subr.bf16.mxu0 %v13795_v13  ;;  %13620 = vmatprep.subr.bf16.mxu1 %v13796_v60 }
 0xf46   :  { %v10809_v35 = vadd.f32 %v10784_v44, %v10759_v55  ;;  %v10811_v21 = vadd.f32 %v10792_v15, %v10761_v38  ;;  %v10760_v58 = vadd.f32 %v10709_v28, %v15503_v30  ;;  %v10762_v27 = vadd.f32 %v10750_v11, %v15506_v56 }
 0xf47   :  { %v10711_v31 = vpop.f32.mrf.mxu0  ;;  %v10752_v34 = vpop.f32.mrf.mxu1 }
 0xf48   :  { %v10810_v23 = vadd.f32 %v10788_v37, %v10760_v58  ;;  %v10812_v29 = vadd.f32 %v10796_v10, %v10762_v27  ;;  %13599 = vmatpush3.bf16.msra.mxu0 %v13797_v1  ;;  %13621 = vmatpush3.bf16.msra.mxu1 %v13798_v26  ;;  %v10817_v2 = vmax.f32 %v10809_v35, 0.0  ;;  %v10819_v33 = vmax.f32 %v10811_v21, 0.0 }
 0xf49   :  { %v10712_v14 = vpop.f32.mrf.mxu0  ;;  %v10753_v43 = vpop.f32.mrf.mxu1  ;;  %13600 = vmatprep.subr.bf16.mxu0 %v13799_v52  ;;  %13622 = vmatprep.subr.bf16.mxu1 %v13800_v54 }
 0xf4a   :  { %v10818_v63 = vmax.f32 %v10810_v23, 0.0  ;;  %v10820_v25 = vmax.f32 %v10812_v29, 0.0  ;;  %v10825_v56 = vpack.c.bf16 %v10817_v2, %v10817_v2  ;;  %v10827_v6 = vpack.c.bf16 %v10819_v33, %v10819_v33 }
 0xf4c   :  { %v10826_v59 = vpack.c.bf16 %v10818_v63, %v10818_v63  ;;  %v10828_v30 = vpack.c.bf16 %v10820_v25, %v10820_v25  ;;  %13601 = vmatpush3.bf16.msra.mxu0 %v13801_v22  ;;  %13623 = vmatpush3.bf16.msra.mxu1 %v13802_v45 }
 0xf4e   :  { %11460 = vmatprep.mubr.bf16.mxu0 %v10826_v59  ;;  %11500 = vmatprep.mubr.bf16.mxu1 %v10828_v30 }
 0xf4f   :  { %11461 = vmatmul.mubr.bf16.vlgmr.msra.gmra.mxu0 %v10825_v56  ;;  %11501 = vmatmul.mubr.bf16.vlgmr.msra.gmra.mxu1 %v10827_v6 }
 0xfef   :  { %v13558_v36 = vpop.f32.mrf.mxu0  ;;  %v13580_v53 = vpop.f32.mrf.mxu1 }
 0xff1   :  { %v13559_v8 = vpop.f32.mrf.mxu0  ;;  %v13581_v42 = vpop.f32.mrf.mxu1 }
 0xff2   :  { %v13560_v62 = vadd.f32 %v13559_v8, %v13558_v36  ;;  %v13582_v46 = vadd.f32 %v13581_v42, %v13580_v53 }
 0xff3   :  { %v13561_v47 = vpop.f32.mrf.mxu0  ;;  %v13583_v18 = vpop.f32.mrf.mxu1 }
 0xff4   :  { %v11383_v39 = vadd.f32 %v13560_v62, %v12806_v50 }
 0xff5   :  { %v13562_v32 = vpop.f32.mrf.mxu0  ;;  %v13584_v61 = vpop.f32.mrf.mxu1 }
 0xff6   :  { %v11423_v12 = vadd.f32 %v13582_v46, %v11383_v39 }
0x100f   :  { %v13602_v5 = vpop.f32.mrf.mxu0  ;;  %v13624_v41 = vpop.f32.mrf.mxu1 }
0x1011   :  { %v13603_v51 = vpop.f32.mrf.mxu0  ;;  %v13625_v49 = vpop.f32.mrf.mxu1 }
0x1012   :  { %v13604_v24 = vadd.f32 %v13603_v51, %v13602_v5  ;;  %v13626_v0 = vadd.f32 %v13625_v49, %v13624_v41 }
0x1013   :  { %v13605_v4 = vpop.f32.mrf.mxu0  ;;  %v13627_v9 = vpop.f32.mrf.mxu1 }
0x1014   :  { %v11463_v16 = vadd.f32 %v13604_v24, %v11423_v12 }
0x1015   :  { %v13606_v3 = vpop.f32.mrf.mxu0  ;;  %v13628_v17 = vpop.f32.mrf.mxu1 }
0x1016   :  { %v11503_v7 = vadd.f32 %v13626_v0, %v11463_v16 }
0x1018   :  { %11508 = vst [vmem:[#allocation11] sm:$0xff] %v11503_v7 }
0x1019   :  { %13914 = shalt.err (!%p13911_p1)
}
0x101a   :  { %11518 = dma.vmem_to_hbm [thread:$0]  %s11516_s20, 128, %s15553_s6, [#allocation4]  }
0x101b   :  { %13929 = dma.done.wait [#allocation4], 128  }
0x101c   :  { %13930 = vsyncadd [#allocation4], 4294967168 }
0x101d   :  { %11522 = vsyncpa [#allocation3], 1 }
0x101e   :  { %11523 = vsyncpa [#allocation6], 1 }
0x101f   :  { %11524 = vsyncpa [#allocation9], 1 }
0x1020   :  { %11525 = vsyncpa [#allocation4], 1 }

</bundles_post_ra>
